<compile_context>
chip_gen: v5e
topology: v5e:2x2
jax: 0.10.0
libtpu: 0.0.40
codegen_flags: <defaults>
</compile_context>

<pallas_src>
import functools

import jax
import jax.numpy as jnp
from jax.experimental import pallas as pl
from jax.experimental.pallas import tpu as pltpu

# Module hyper-parameters (p.*) chosen so the hard-coded View(-1, 256*5*1) is valid:
# after five stride-2 (k=5, pad=2) convs, WIDTH 160 -> 5 and HEIGHT 16 -> 1.
CHANNEL, WIDTH, HEIGHT = 1, 160, 16
NUM_PIXELS = CHANNEL * WIDTH * HEIGHT          # x_dim = 2560
NUM_LABELS = 10                                # y_dim
EPS = 1e-9                                     # p.EPS for ClippedSoftmax
BN_EPS = 1e-5                                  # PyTorch BatchNorm default eps

KSIZE, STRIDE, PAD = 5, 2, 2
VMEM_LIMIT_BYTES = 32 * 1024 * 1024            # safe on v5e/v6e (128 MiB) and v7x (64 MiB)


def _round_up(x, m):
    return ((x + m - 1) // m) * m


# ----------------------------- Pallas kernels ------------------------------ #

def _conv_bn_swish_kernel(x_ref, w_ref, shift_ref, o_ref, *, Ho, Hh, K):
    """One batch element of Conv2d(k=5, s=2, p=2) + folded-BN + Swish.

    x_ref:     (1, 4*Hh, Wh*Cin) bf16 -- the 4 stride-2 phases of the zero-padded image,
               stacked phase-major along rows; W and Cin merged into a contiguous lane dim.
    w_ref:     (K*2*Wh*Cin, Wo*Cout) bf16 -- "lowered" weights (tap/phase structure
               scattered into a sparse matrix), BN scale already folded in.
    shift_ref: (1, Wo*Cout) f32 -- folded-BN shift, tiled over Wo.
    o_ref:     (1, Ho, Wo*Cout) bf16 -- lane-dense output (Wo*Cout = 128 or 256 here).

    The im2col happens entirely in VMEM: K*2 row-offset slices of the resident phase
    block are concatenated along lanes and fed to a single MXU matmul, so no expanded
    patch tensor ever touches HBM.
    """
    taps = []
    for kh in range(K):
        ph_r, dh = kh % 2, kh // 2
        for ph_w in range(2):
            p = ph_r * 2 + ph_w                               # phase index
            taps.append(x_ref[0, pl.ds(p * Hh + dh, Ho), :])  # (Ho, Wh*Cin), static offsets
    pat = jnp.concatenate(taps, axis=-1)                      # (Ho, K*2*Wh*Cin) bf16
    y = jnp.dot(pat, w_ref[...], preferred_element_type=jnp.float32)
    y = y + shift_ref[...]                                    # folded-BN shift (f32)
    sig = 0.5 * (jnp.tanh(0.5 * y) + 1.0)                     # stable sigmoid (EUP tanh)
    o_ref[0] = (y * sig).astype(o_ref.dtype)                  # Swish


def _fc_bn_softmax_kernel(x_ref, w_ref, shift_ref, o_ref):
    """Final Linear (BN scale folded into W) + shift + ClippedSoftmax over dim=1."""
    logits = jnp.dot(x_ref[...], w_ref[...], preferred_element_type=jnp.float32)
    y = logits + shift_ref[...]
    m = jnp.max(y, axis=-1, keepdims=True)
    e = jnp.exp(y - m)
    p = e * pl.reciprocal(jnp.sum(e, axis=-1, keepdims=True), approx=True)  # EUP vrcp
    # TODO(synk): ClippedSoftmax source not provided; clamp-after-softmax, no renorm.
    o_ref[...] = jnp.maximum(p, EPS)


# ------------------------------- JAX glue ---------------------------------- #

def _fold_bn(bias, gamma, beta, mean, var):
    scale = gamma / jnp.sqrt(var + BN_EPS)
    shift = beta + (bias - mean) * scale
    return scale, shift                                        # both (C,)


def _make_phases(x, pad):
    """NHWC (N,H,W,C) -> (N, 4*Hh, Wh*C) stride-2 phase tensor (same bytes as input).

    Phase p = ph_h*2 + ph_w holds xpad[2*rh+ph_h, 2*cw+ph_w, c]; rows are phase-major
    (row index = p*Hh + rh), W and C are merged into lanes (lane = cw*C + c).
    """
    N, H, W, C = x.shape
    xp = jnp.pad(x, ((0, 0), (pad, pad), (pad, pad), (0, 0)))
    Hp, Wp = H + 2 * pad, W + 2 * pad
    Hh, Wh = (Hp + 1) // 2, (Wp + 1) // 2
    phases = []
    for ph_h in range(2):
        for ph_w in range(2):
            p = xp[:, ph_h::2, ph_w::2, :]
            p = jnp.pad(p, ((0, 0), (0, Hh - p.shape[1]), (0, Wh - p.shape[2]), (0, 0)))
            phases.append(p)
    ph = jnp.stack(phases, axis=1)                             # (N, 4, Hh, Wh, C)
    return ph.reshape(N, 4 * Hh, Wh * C), Hh, Wh


def _lower_conv_weights(w, scale, Wo, Wh):
    """w: PyTorch (Cout, Cin, K, K) -> (K*2*Wh*Cin, Wo*Cout) lowered matrix.

    Row index = (kh, ph_w, cw, cin); col index = (wo, cout).  Entry is
    scale[cout] * w[cout, cin, kh, kw] with kw = 2*(cw-wo)+ph_w when 0 <= kw <= K-1,
    else 0.  This bakes the stride-2 taps + lane-dense (Wo*Cout) output layout into
    the weights so the kernel needs only row-offset slices and ONE matmul.
    """
    Cout, Cin, K, _ = w.shape
    w_t = jnp.transpose(w, (2, 3, 1, 0)) * scale               # (K, K, Cin, Cout), BN folded
    WL = jnp.zeros((K, 2, Wh, Cin, Wo, Cout), w_t.dtype)
    for kw in range(K):
        ph_w, half = kw % 2, kw // 2
        for wo in range(Wo):
            WL = WL.at[:, ph_w, wo + half, :, wo, :].set(w_t[:, kw, :, :])
    return WL.reshape(K * 2 * Wh * Cin, Wo * Cout)


def conv_bn_swish(x, w, b, gamma, beta, mean, var):
    """x: (N, H, W, Cin) NHWC; w: PyTorch layout (Cout, Cin, 5, 5)."""
    N, H, W, Cin = x.shape
    Cout = w.shape[0]
    Ho = (H + 2 * PAD - KSIZE) // STRIDE + 1
    Wo = (W + 2 * PAD - KSIZE) // STRIDE + 1

    xph, Hh, Wh = _make_phases(x, PAD)
    scale, shift = _fold_bn(b, gamma, beta, mean, var)
    WL = _lower_conv_weights(w, scale, Wo, Wh).astype(jnp.bfloat16)
    shift_row = jnp.tile(shift, Wo).reshape(1, Wo * Cout).astype(jnp.float32)

    kern = functools.partial(_conv_bn_swish_kernel, Ho=Ho, Hh=Hh, K=KSIZE)
    out = pl.pallas_call(
        kern,
        out_shape=jax.ShapeDtypeStruct((N, Ho, Wo * Cout), jnp.bfloat16),
        grid=(N,),                                  # pipelined over batch; per-step VMEM
        in_specs=[                                  # is a few KB..~2 MB (fits all chips).
            pl.BlockSpec((1, 4 * Hh, Wh * Cin), lambda n: (n, 0, 0)),
            pl.BlockSpec((KSIZE * 2 * Wh * Cin, Wo * Cout), lambda n: (0, 0)),
            pl.BlockSpec((1, Wo * Cout), lambda n: (0, 0)),
        ],
        out_specs=pl.BlockSpec((1, Ho, Wo * Cout), lambda n: (n, 0, 0)),
        compiler_params=pltpu.CompilerParams(
            dimension_semantics=("parallel",),      # megacore sharding on v7x
            vmem_limit_bytes=VMEM_LIMIT_BYTES),
    )(xph.astype(jnp.bfloat16), WL, shift_row)
    return out.reshape(N, Ho, Wo, Cout)


def fc_bn_clipped_softmax(x, wf, bf, gf, btf, mf, vf):
    """x: (M, 1280) -> (M, NUM_LABELS) clipped-softmax probabilities."""
    M, Kdim = x.shape
    C = wf.shape[0]
    scale, shift = _fold_bn(bf, gf, btf, mf, vf)
    w_mat = (wf.T * scale).astype(jnp.bfloat16)                 # (Kdim, C), BN scale folded
    shift_row = shift.reshape(1, C).astype(jnp.float32)

    TM = 128 if M >= 128 else _round_up(M, 8)                   # sublane-aligned M tiles
    Mp = _round_up(M, TM)
    xb = x.astype(jnp.bfloat16)
    if Mp != M:
        xb = jnp.pad(xb, ((0, Mp - M), (0, 0)))

    out = pl.pallas_call(
        _fc_bn_softmax_kernel,
        out_shape=jax.ShapeDtypeStruct((Mp, C), jnp.float32),
        grid=(Mp // TM,),
        in_specs=[
            pl.BlockSpec((TM, Kdim), lambda i: (i, 0)),
            pl.BlockSpec((Kdim, C), lambda i: (0, 0)),
            pl.BlockSpec((1, C), lambda i: (0, 0)),
        ],
        out_specs=pl.BlockSpec((TM, C), lambda i: (i, 0)),      # lane dim = y_dim (10);
        compiler_params=pltpu.CompilerParams(                   # tiny final layer, waste OK
            dimension_semantics=("parallel",),
            vmem_limit_bytes=VMEM_LIMIT_BYTES),
    )(xb, w_mat, shift_row)
    return out[:M]


def conv_encoder_y(xs, conv_params, fc_params):
    """xs: (N, NUM_PIXELS) float32 -> (N, NUM_LABELS) clipped-softmax probs."""
    N = xs.shape[0]
    x = xs.reshape(N, CHANNEL, WIDTH, HEIGHT)              # View(-1, C, W, H)  (NCHW)
    x = jnp.transpose(x, (0, 2, 3, 1))                     # -> NHWC for the kernels
    for (w, b, g, bt, m, v) in conv_params:
        x = conv_bn_swish(x, w, b, g, bt, m, v)
    # View(-1, 256*5*1): flatten in NCHW order (C, W_out, H_out)
    x = jnp.transpose(x, (0, 3, 1, 2)).reshape(N, 256 * 5 * 1)
    return fc_bn_clipped_softmax(x, *fc_params)


# -------------------- pure-JAX reference (same bf16 casts) ------------------ #

def reference_forward(xs, conv_params, fc_params):
    N = xs.shape[0]
    x = jnp.transpose(xs.reshape(N, CHANNEL, WIDTH, HEIGHT), (0, 2, 3, 1))
    for (w, b, g, bt, m, v) in conv_params:
        scale, shift = _fold_bn(b, g, bt, m, v)
        wk = (jnp.transpose(w, (2, 3, 1, 0)) * scale).astype(jnp.bfloat16)   # HWIO
        y = jax.lax.conv_general_dilated(
            x.astype(jnp.bfloat16), wk, window_strides=(STRIDE, STRIDE),
            padding=((PAD, PAD), (PAD, PAD)),
            dimension_numbers=("NHWC", "HWIO", "NHWC"),
            preferred_element_type=jnp.float32)
        y = y + shift
        x = (y * (0.5 * (jnp.tanh(0.5 * y) + 1.0))).astype(jnp.bfloat16)
    x = jnp.transpose(x, (0, 3, 1, 2)).reshape(N, 256 * 5 * 1)
    wf, bf, gf, btf, mf, vf = fc_params
    scale, shift = _fold_bn(bf, gf, btf, mf, vf)
    logits = jnp.dot(x, (wf.T * scale).astype(jnp.bfloat16),
                     preferred_element_type=jnp.float32) + shift
    return jnp.maximum(jax.nn.softmax(logits, axis=1), EPS)


# --------------------------- deterministic params --------------------------- #

def init_params(key):
    channels = [CHANNEL, 16, 32, 64, 128, 256]
    conv_params = []
    for idx in range(5):
        cin, cout = channels[idx], channels[idx + 1]
        key, k1, k2, k3, k4, k5, k6 = jax.random.split(key, 7)
        fan_in = cin * 25
        w = jax.random.normal(k1, (cout, cin, 5, 5), jnp.float32) / jnp.sqrt(fan_in)
        b = 0.01 * jax.random.normal(k2, (cout,), jnp.float32)
        gamma = 1.0 + 0.1 * jax.random.normal(k3, (cout,), jnp.float32)
        beta = 0.1 * jax.random.normal(k4, (cout,), jnp.float32)
        mean = 0.1 * jax.random.normal(k5, (cout,), jnp.float32)
        var = 1.0 + 0.1 * jax.random.uniform(k6, (cout,), jnp.float32)
        conv_params.append((w, b, gamma, beta, mean, var))

    key, k1, k2, k3, k4, k5, k6 = jax.random.split(key, 7)
    fc_in = 256 * 5 * 1
    wf = jax.random.normal(k1, (NUM_LABELS, fc_in), jnp.float32) / jnp.sqrt(fc_in)
    bf = 0.01 * jax.random.normal(k2, (NUM_LABELS,), jnp.float32)
    gf = 1.0 + 0.1 * jax.random.normal(k3, (NUM_LABELS,), jnp.float32)
    btf = 0.1 * jax.random.normal(k4, (NUM_LABELS,), jnp.float32)
    mf = 0.1 * jax.random.normal(k5, (NUM_LABELS,), jnp.float32)
    vf = 1.0 + 0.1 * jax.random.uniform(k6, (NUM_LABELS,), jnp.float32)
    return conv_params, (wf, bf, gf, btf, mf, vf)


if __name__ == "__main__":
    key = jax.random.PRNGKey(0)
    kx, kp = jax.random.split(key)
    conv_params, fc_params = init_params(kp)
    xs = jax.random.normal(kx, (2, NUM_PIXELS), jnp.float32)   # batch=2

    ys = jax.jit(conv_encoder_y)(xs, conv_params, fc_params)
    ys = jax.block_until_ready(ys)

    ys_ref = jax.jit(reference_forward)(xs, conv_params, fc_params)
    ys_ref = jax.block_until_ready(ys_ref)

    assert ys.shape == (2, NUM_LABELS)
    assert bool(jnp.all(jnp.isfinite(ys)))
    assert bool(jnp.all(ys >= EPS))
    # rows sum to ~1 (approx reciprocal + tiny eps clamp)
    assert bool(jnp.all(jnp.abs(jnp.sum(ys, axis=1) - 1.0) < 2e-3))
    # structural check vs a bf16-matched XLA reference (loose tol for accum-order noise)
    assert bool(jnp.max(jnp.abs(ys - ys_ref)) < 3e-2)
    print("KERNEL_OK")
</pallas_src>

<mosaic_0001>
module attributes {stable_mosaic.version = 11 : i64} {
  func.func @_conv_bn_swish_kernel(%arg0: i32, %arg1: memref<1x328x10xbf16, #tpu.memory_space<vmem>>, %arg2: memref<100x128xbf16, #tpu.memory_space<vmem>>, %arg3: memref<1x128xf32, #tpu.memory_space<vmem>>, %arg4: memref<1x80x128xbf16, #tpu.memory_space<vmem>>) attributes {dimension_semantics = [#tpu.dimension_semantics<parallel>], iteration_bounds = array<i64: 2>, scalar_prefetch = 0 : i64, scratch_operands = 0 : i64, tpu.core_type = #tpu.core_type<tc>, window_params = [{transform_indices = @transform_0, window_bounds = array<i64: 1, 328, 10>}, {pipeline_mode = #tpu.pipeline_mode<synchronous>, transform_indices = @transform_1, window_bounds = array<i64: 100, 128>}, {pipeline_mode = #tpu.pipeline_mode<synchronous>, transform_indices = @transform_2, window_bounds = array<i64: 1, 128>}, {transform_indices = @transform_3, window_bounds = array<i64: 1, 80, 128>}]} {
    %c0 = arith.constant 0 : index
    %c0_0 = arith.constant 0 : index
    %c0_1 = arith.constant 0 : index
    %0 = vector.load %arg1[%c0, %c0_0, %c0_1] : memref<1x328x10xbf16, #tpu.memory_space<vmem>>, vector<1x80x10xbf16>
    %1 = vector.shape_cast %0 : vector<1x80x10xbf16> to vector<80x10xbf16>
    %c0_2 = arith.constant 0 : index
    %c82 = arith.constant 82 : index
    %c0_3 = arith.constant 0 : index
    %2 = vector.load %arg1[%c0_2, %c82, %c0_3] : memref<1x328x10xbf16, #tpu.memory_space<vmem>>, vector<1x80x10xbf16>
    %3 = vector.shape_cast %2 : vector<1x80x10xbf16> to vector<80x10xbf16>
    %c0_4 = arith.constant 0 : index
    %c164 = arith.constant 164 : index
    %c0_5 = arith.constant 0 : index
    %4 = vector.load %arg1[%c0_4, %c164, %c0_5] : memref<1x328x10xbf16, #tpu.memory_space<vmem>>, vector<1x80x10xbf16>
    %5 = vector.shape_cast %4 : vector<1x80x10xbf16> to vector<80x10xbf16>
    %c0_6 = arith.constant 0 : index
    %c246 = arith.constant 246 : index
    %c0_7 = arith.constant 0 : index
    %6 = vector.load %arg1[%c0_6, %c246, %c0_7] : memref<1x328x10xbf16, #tpu.memory_space<vmem>>, vector<1x80x10xbf16>
    %7 = vector.shape_cast %6 : vector<1x80x10xbf16> to vector<80x10xbf16>
    %c0_8 = arith.constant 0 : index
    %c1 = arith.constant 1 : index
    %c0_9 = arith.constant 0 : index
    %8 = vector.load %arg1[%c0_8, %c1, %c0_9] : memref<1x328x10xbf16, #tpu.memory_space<vmem>>, vector<1x80x10xbf16>
    %9 = vector.shape_cast %8 : vector<1x80x10xbf16> to vector<80x10xbf16>
    %c0_10 = arith.constant 0 : index
    %c83 = arith.constant 83 : index
    %c0_11 = arith.constant 0 : index
    %10 = vector.load %arg1[%c0_10, %c83, %c0_11] : memref<1x328x10xbf16, #tpu.memory_space<vmem>>, vector<1x80x10xbf16>
    %11 = vector.shape_cast %10 : vector<1x80x10xbf16> to vector<80x10xbf16>
    %c0_12 = arith.constant 0 : index
    %c165 = arith.constant 165 : index
    %c0_13 = arith.constant 0 : index
    %12 = vector.load %arg1[%c0_12, %c165, %c0_13] : memref<1x328x10xbf16, #tpu.memory_space<vmem>>, vector<1x80x10xbf16>
    %13 = vector.shape_cast %12 : vector<1x80x10xbf16> to vector<80x10xbf16>
    %c0_14 = arith.constant 0 : index
    %c247 = arith.constant 247 : index
    %c0_15 = arith.constant 0 : index
    %14 = vector.load %arg1[%c0_14, %c247, %c0_15] : memref<1x328x10xbf16, #tpu.memory_space<vmem>>, vector<1x80x10xbf16>
    %15 = vector.shape_cast %14 : vector<1x80x10xbf16> to vector<80x10xbf16>
    %c0_16 = arith.constant 0 : index
    %c2 = arith.constant 2 : index
    %c0_17 = arith.constant 0 : index
    %16 = vector.load %arg1[%c0_16, %c2, %c0_17] : memref<1x328x10xbf16, #tpu.memory_space<vmem>>, vector<1x80x10xbf16>
    %17 = vector.shape_cast %16 : vector<1x80x10xbf16> to vector<80x10xbf16>
    %c0_18 = arith.constant 0 : index
    %c84 = arith.constant 84 : index
    %c0_19 = arith.constant 0 : index
    %18 = vector.load %arg1[%c0_18, %c84, %c0_19] : memref<1x328x10xbf16, #tpu.memory_space<vmem>>, vector<1x80x10xbf16>
    %19 = vector.shape_cast %18 : vector<1x80x10xbf16> to vector<80x10xbf16>
    %20 = tpu.concatenate %1, %3, %5, %7, %9, %11, %13, %15, %17, %19 in 1 : vector<80x10xbf16>, vector<80x10xbf16>, vector<80x10xbf16>, vector<80x10xbf16>, vector<80x10xbf16>, vector<80x10xbf16>, vector<80x10xbf16>, vector<80x10xbf16>, vector<80x10xbf16>, vector<80x10xbf16> -> vector<80x100xbf16>
    %c0_20 = arith.constant 0 : index
    %c0_21 = arith.constant 0 : index
    %21 = vector.load %arg2[%c0_20, %c0_21] : memref<100x128xbf16, #tpu.memory_space<vmem>>, vector<100x128xbf16>
    %cst = arith.constant dense<0.000000e+00> : vector<80x128xf32>
    %22 = tpu.matmul %20, %21, %cst {dimension_numbers = #tpu.dot_dimension_numbers<[1], [0], [0], [1], [0, 0, 1, 1], [], []>} : vector<80x100xbf16>, vector<100x128xbf16>, vector<80x128xf32> -> vector<80x128xf32>
    %c0_22 = arith.constant 0 : index
    %c0_23 = arith.constant 0 : index
    %23 = vector.load %arg3[%c0_22, %c0_23] : memref<1x128xf32, #tpu.memory_space<vmem>>, vector<1x128xf32>
    %24 = vector.broadcast %23 : vector<1x128xf32> to vector<80x128xf32>
    %25 = arith.addf %22, %24 : vector<80x128xf32>
    %cst_24 = arith.constant 5.000000e-01 : f32
    %26 = vector.broadcast %cst_24 : f32 to vector<80x128xf32>
    %27 = arith.mulf %26, %25 : vector<80x128xf32>
    %28 = math.tanh %27 : vector<80x128xf32>
    %cst_25 = arith.constant 1.000000e+00 : f32
    %29 = vector.broadcast %cst_25 : f32 to vector<80x128xf32>
    %30 = arith.addf %28, %29 : vector<80x128xf32>
    %cst_26 = arith.constant 5.000000e-01 : f32
    %31 = vector.broadcast %cst_26 : f32 to vector<80x128xf32>
    %32 = arith.mulf %31, %30 : vector<80x128xf32>
    %33 = arith.mulf %25, %32 : vector<80x128xf32>
    %34 = arith.truncf %33 : vector<80x128xf32> to vector<80x128xbf16>
    %c0_27 = arith.constant 0 : index
    %c0_28 = arith.constant 0 : index
    %c0_29 = arith.constant 0 : index
    %35 = vector.load %arg4[%c0_27, %c0_28, %c0_29] : memref<1x80x128xbf16, #tpu.memory_space<vmem>>, vector<1x80x128xbf16>
    %36 = vector.shape_cast %35 : vector<1x80x128xbf16> to vector<80x128xbf16>
    %37 = vector.shape_cast %34 : vector<80x128xbf16> to vector<1x80x128xbf16>
    tpu.vector_store %arg4[%c0_27, %c0_28, %c0_29], %37 {strides = array<i32>} : memref<1x80x128xbf16, #tpu.memory_space<vmem>>, vector<1x80x128xbf16>,
    return
  }
  func.func @transform_0(%arg0: i32) -> (i32, i32, i32) {
    %c0_i32 = arith.constant 0 : i32
    %c0_i32_0 = arith.constant 0 : i32
    %c0_i32_1 = arith.constant 0 : i32
    return %arg0, %c0_i32, %c0_i32_0 : i32, i32, i32
  }
  func.func @transform_1(%arg0: i32) -> (i32, i32) {
    %c0_i32 = arith.constant 0 : i32
    %c0_i32_0 = arith.constant 0 : i32
    %c0_i32_1 = arith.constant 0 : i32
    return %c0_i32, %c0_i32_0 : i32, i32
  }
  func.func @transform_2(%arg0: i32) -> (i32, i32) {
    %c0_i32 = arith.constant 0 : i32
    %c0_i32_0 = arith.constant 0 : i32
    %c0_i32_1 = arith.constant 0 : i32
    return %c0_i32, %c0_i32_0 : i32, i32
  }
  func.func @transform_3(%arg0: i32) -> (i32, i32, i32) {
    %c0_i32 = arith.constant 0 : i32
    %c0_i32_0 = arith.constant 0 : i32
    %c0_i32_1 = arith.constant 0 : i32
    return %arg0, %c0_i32, %c0_i32_0 : i32, i32, i32
  }
}

module attributes {stable_mosaic.version = 11 : i64} {
  func.func @_conv_bn_swish_kernel(%arg0: i32, %arg1: memref<1x168x96xbf16, #tpu.memory_space<vmem>>, %arg2: memref<960x128xbf16, #tpu.memory_space<vmem>>, %arg3: memref<1x128xf32, #tpu.memory_space<vmem>>, %arg4: memref<1x40x128xbf16, #tpu.memory_space<vmem>>) attributes {dimension_semantics = [#tpu.dimension_semantics<parallel>], iteration_bounds = array<i64: 2>, scalar_prefetch = 0 : i64, scratch_operands = 0 : i64, tpu.core_type = #tpu.core_type<tc>, window_params = [{transform_indices = @transform_0, window_bounds = array<i64: 1, 168, 96>}, {pipeline_mode = #tpu.pipeline_mode<synchronous>, transform_indices = @transform_1, window_bounds = array<i64: 960, 128>}, {pipeline_mode = #tpu.pipeline_mode<synchronous>, transform_indices = @transform_2, window_bounds = array<i64: 1, 128>}, {transform_indices = @transform_3, window_bounds = array<i64: 1, 40, 128>}]} {
    %c0 = arith.constant 0 : index
    %c0_0 = arith.constant 0 : index
    %c0_1 = arith.constant 0 : index
    %0 = vector.load %arg1[%c0, %c0_0, %c0_1] : memref<1x168x96xbf16, #tpu.memory_space<vmem>>, vector<1x40x96xbf16>
    %1 = vector.shape_cast %0 : vector<1x40x96xbf16> to vector<40x96xbf16>
    %c0_2 = arith.constant 0 : index
    %c42 = arith.constant 42 : index
    %c0_3 = arith.constant 0 : index
    %2 = vector.load %arg1[%c0_2, %c42, %c0_3] : memref<1x168x96xbf16, #tpu.memory_space<vmem>>, vector<1x40x96xbf16>
    %3 = vector.shape_cast %2 : vector<1x40x96xbf16> to vector<40x96xbf16>
    %c0_4 = arith.constant 0 : index
    %c84 = arith.constant 84 : index
    %c0_5 = arith.constant 0 : index
    %4 = vector.load %arg1[%c0_4, %c84, %c0_5] : memref<1x168x96xbf16, #tpu.memory_space<vmem>>, vector<1x40x96xbf16>
    %5 = vector.shape_cast %4 : vector<1x40x96xbf16> to vector<40x96xbf16>
    %c0_6 = arith.constant 0 : index
    %c126 = arith.constant 126 : index
    %c0_7 = arith.constant 0 : index
    %6 = vector.load %arg1[%c0_6, %c126, %c0_7] : memref<1x168x96xbf16, #tpu.memory_space<vmem>>, vector<1x40x96xbf16>
    %7 = vector.shape_cast %6 : vector<1x40x96xbf16> to vector<40x96xbf16>
    %c0_8 = arith.constant 0 : index
    %c1 = arith.constant 1 : index
    %c0_9 = arith.constant 0 : index
    %8 = vector.load %arg1[%c0_8, %c1, %c0_9] : memref<1x168x96xbf16, #tpu.memory_space<vmem>>, vector<1x40x96xbf16>
    %9 = vector.shape_cast %8 : vector<1x40x96xbf16> to vector<40x96xbf16>
    %c0_10 = arith.constant 0 : index
    %c43 = arith.constant 43 : index
    %c0_11 = arith.constant 0 : index
    %10 = vector.load %arg1[%c0_10, %c43, %c0_11] : memref<1x168x96xbf16, #tpu.memory_space<vmem>>, vector<1x40x96xbf16>
    %11 = vector.shape_cast %10 : vector<1x40x96xbf16> to vector<40x96xbf16>
    %c0_12 = arith.constant 0 : index
    %c85 = arith.constant 85 : index
    %c0_13 = arith.constant 0 : index
    %12 = vector.load %arg1[%c0_12, %c85, %c0_13] : memref<1x168x96xbf16, #tpu.memory_space<vmem>>, vector<1x40x96xbf16>
    %13 = vector.shape_cast %12 : vector<1x40x96xbf16> to vector<40x96xbf16>
    %c0_14 = arith.constant 0 : index
    %c127 = arith.constant 127 : index
    %c0_15 = arith.constant 0 : index
    %14 = vector.load %arg1[%c0_14, %c127, %c0_15] : memref<1x168x96xbf16, #tpu.memory_space<vmem>>, vector<1x40x96xbf16>
    %15 = vector.shape_cast %14 : vector<1x40x96xbf16> to vector<40x96xbf16>
    %c0_16 = arith.constant 0 : index
    %c2 = arith.constant 2 : index
    %c0_17 = arith.constant 0 : index
    %16 = vector.load %arg1[%c0_16, %c2, %c0_17] : memref<1x168x96xbf16, #tpu.memory_space<vmem>>, vector<1x40x96xbf16>
    %17 = vector.shape_cast %16 : vector<1x40x96xbf16> to vector<40x96xbf16>
    %c0_18 = arith.constant 0 : index
    %c44 = arith.constant 44 : index
    %c0_19 = arith.constant 0 : index
    %18 = vector.load %arg1[%c0_18, %c44, %c0_19] : memref<1x168x96xbf16, #tpu.memory_space<vmem>>, vector<1x40x96xbf16>
    %19 = vector.shape_cast %18 : vector<1x40x96xbf16> to vector<40x96xbf16>
    %20 = tpu.concatenate %1, %3, %5, %7, %9, %11, %13, %15, %17, %19 in 1 : vector<40x96xbf16>, vector<40x96xbf16>, vector<40x96xbf16>, vector<40x96xbf16>, vector<40x96xbf16>, vector<40x96xbf16>, vector<40x96xbf16>, vector<40x96xbf16>, vector<40x96xbf16>, vector<40x96xbf16> -> vector<40x960xbf16>
    %c0_20 = arith.constant 0 : index
    %c0_21 = arith.constant 0 : index
    %21 = vector.load %arg2[%c0_20, %c0_21] : memref<960x128xbf16, #tpu.memory_space<vmem>>, vector<960x128xbf16>
    %cst = arith.constant dense<0.000000e+00> : vector<40x128xf32>
    %22 = tpu.matmul %20, %21, %cst {dimension_numbers = #tpu.dot_dimension_numbers<[1], [0], [0], [1], [0, 0, 1, 1], [], []>} : vector<40x960xbf16>, vector<960x128xbf16>, vector<40x128xf32> -> vector<40x128xf32>
    %c0_22 = arith.constant 0 : index
    %c0_23 = arith.constant 0 : index
    %23 = vector.load %arg3[%c0_22, %c0_23] : memref<1x128xf32, #tpu.memory_space<vmem>>, vector<1x128xf32>
    %24 = vector.broadcast %23 : vector<1x128xf32> to vector<40x128xf32>
    %25 = arith.addf %22, %24 : vector<40x128xf32>
    %cst_24 = arith.constant 5.000000e-01 : f32
    %26 = vector.broadcast %cst_24 : f32 to vector<40x128xf32>
    %27 = arith.mulf %26, %25 : vector<40x128xf32>
    %28 = math.tanh %27 : vector<40x128xf32>
    %cst_25 = arith.constant 1.000000e+00 : f32
    %29 = vector.broadcast %cst_25 : f32 to vector<40x128xf32>
    %30 = arith.addf %28, %29 : vector<40x128xf32>
    %cst_26 = arith.constant 5.000000e-01 : f32
    %31 = vector.broadcast %cst_26 : f32 to vector<40x128xf32>
    %32 = arith.mulf %31, %30 : vector<40x128xf32>
    %33 = arith.mulf %25, %32 : vector<40x128xf32>
    %34 = arith.truncf %33 : vector<40x128xf32> to vector<40x128xbf16>
    %c0_27 = arith.constant 0 : index
    %c0_28 = arith.constant 0 : index
    %c0_29 = arith.constant 0 : index
    %35 = vector.load %arg4[%c0_27, %c0_28, %c0_29] : memref<1x40x128xbf16, #tpu.memory_space<vmem>>, vector<1x40x128xbf16>
    %36 = vector.shape_cast %35 : vector<1x40x128xbf16> to vector<40x128xbf16>
    %37 = vector.shape_cast %34 : vector<40x128xbf16> to vector<1x40x128xbf16>
    tpu.vector_store %arg4[%c0_27, %c0_28, %c0_29], %37 {strides = array<i32>} : memref<1x40x128xbf16, #tpu.memory_space<vmem>>, vector<1x40x128xbf16>,
    return
  }
  func.func @transform_0(%arg0: i32) -> (i32, i32, i32) {
    %c0_i32 = arith.constant 0 : i32
    %c0_i32_0 = arith.constant 0 : i32
    %c0_i32_1 = arith.constant 0 : i32
    return %arg0, %c0_i32, %c0_i32_0 : i32, i32, i32
  }
  func.func @transform_1(%arg0: i32) -> (i32, i32) {
    %c0_i32 = arith.constant 0 : i32
    %c0_i32_0 = arith.constant 0 : i32
    %c0_i32_1 = arith.constant 0 : i32
    return %c0_i32, %c0_i32_0 : i32, i32
  }
  func.func @transform_2(%arg0: i32) -> (i32, i32) {
    %c0_i32 = arith.constant 0 : i32
    %c0_i32_0 = arith.constant 0 : i32
    %c0_i32_1 = arith.constant 0 : i32
    return %c0_i32, %c0_i32_0 : i32, i32
  }
  func.func @transform_3(%arg0: i32) -> (i32, i32, i32) {
    %c0_i32 = arith.constant 0 : i32
    %c0_i32_0 = arith.constant 0 : i32
    %c0_i32_1 = arith.constant 0 : i32
    return %arg0, %c0_i32, %c0_i32_0 : i32, i32, i32
  }
}

module attributes {stable_mosaic.version = 11 : i64} {
  func.func @_conv_bn_swish_kernel(%arg0: i32, %arg1: memref<1x88x128xbf16, #tpu.memory_space<vmem>>, %arg2: memref<1280x128xbf16, #tpu.memory_space<vmem>>, %arg3: memref<1x128xf32, #tpu.memory_space<vmem>>, %arg4: memref<1x20x128xbf16, #tpu.memory_space<vmem>>) attributes {dimension_semantics = [#tpu.dimension_semantics<parallel>], iteration_bounds = array<i64: 2>, scalar_prefetch = 0 : i64, scratch_operands = 0 : i64, tpu.core_type = #tpu.core_type<tc>, window_params = [{transform_indices = @transform_0, window_bounds = array<i64: 1, 88, 128>}, {pipeline_mode = #tpu.pipeline_mode<synchronous>, transform_indices = @transform_1, window_bounds = array<i64: 1280, 128>}, {pipeline_mode = #tpu.pipeline_mode<synchronous>, transform_indices = @transform_2, window_bounds = array<i64: 1, 128>}, {transform_indices = @transform_3, window_bounds = array<i64: 1, 20, 128>}]} {
    %c0 = arith.constant 0 : index
    %c0_0 = arith.constant 0 : index
    %c0_1 = arith.constant 0 : index
    %0 = vector.load %arg1[%c0, %c0_0, %c0_1] : memref<1x88x128xbf16, #tpu.memory_space<vmem>>, vector<1x20x128xbf16>
    %1 = vector.shape_cast %0 : vector<1x20x128xbf16> to vector<20x128xbf16>
    %c0_2 = arith.constant 0 : index
    %c22 = arith.constant 22 : index
    %c0_3 = arith.constant 0 : index
    %2 = vector.load %arg1[%c0_2, %c22, %c0_3] : memref<1x88x128xbf16, #tpu.memory_space<vmem>>, vector<1x20x128xbf16>
    %3 = vector.shape_cast %2 : vector<1x20x128xbf16> to vector<20x128xbf16>
    %c0_4 = arith.constant 0 : index
    %c44 = arith.constant 44 : index
    %c0_5 = arith.constant 0 : index
    %4 = vector.load %arg1[%c0_4, %c44, %c0_5] : memref<1x88x128xbf16, #tpu.memory_space<vmem>>, vector<1x20x128xbf16>
    %5 = vector.shape_cast %4 : vector<1x20x128xbf16> to vector<20x128xbf16>
    %c0_6 = arith.constant 0 : index
    %c66 = arith.constant 66 : index
    %c0_7 = arith.constant 0 : index
    %6 = vector.load %arg1[%c0_6, %c66, %c0_7] : memref<1x88x128xbf16, #tpu.memory_space<vmem>>, vector<1x20x128xbf16>
    %7 = vector.shape_cast %6 : vector<1x20x128xbf16> to vector<20x128xbf16>
    %c0_8 = arith.constant 0 : index
    %c1 = arith.constant 1 : index
    %c0_9 = arith.constant 0 : index
    %8 = vector.load %arg1[%c0_8, %c1, %c0_9] : memref<1x88x128xbf16, #tpu.memory_space<vmem>>, vector<1x20x128xbf16>
    %9 = vector.shape_cast %8 : vector<1x20x128xbf16> to vector<20x128xbf16>
    %c0_10 = arith.constant 0 : index
    %c23 = arith.constant 23 : index
    %c0_11 = arith.constant 0 : index
    %10 = vector.load %arg1[%c0_10, %c23, %c0_11] : memref<1x88x128xbf16, #tpu.memory_space<vmem>>, vector<1x20x128xbf16>
    %11 = vector.shape_cast %10 : vector<1x20x128xbf16> to vector<20x128xbf16>
    %c0_12 = arith.constant 0 : index
    %c45 = arith.constant 45 : index
    %c0_13 = arith.constant 0 : index
    %12 = vector.load %arg1[%c0_12, %c45, %c0_13] : memref<1x88x128xbf16, #tpu.memory_space<vmem>>, vector<1x20x128xbf16>
    %13 = vector.shape_cast %12 : vector<1x20x128xbf16> to vector<20x128xbf16>
    %c0_14 = arith.constant 0 : index
    %c67 = arith.constant 67 : index
    %c0_15 = arith.constant 0 : index
    %14 = vector.load %arg1[%c0_14, %c67, %c0_15] : memref<1x88x128xbf16, #tpu.memory_space<vmem>>, vector<1x20x128xbf16>
    %15 = vector.shape_cast %14 : vector<1x20x128xbf16> to vector<20x128xbf16>
    %c0_16 = arith.constant 0 : index
    %c2 = arith.constant 2 : index
    %c0_17 = arith.constant 0 : index
    %16 = vector.load %arg1[%c0_16, %c2, %c0_17] : memref<1x88x128xbf16, #tpu.memory_space<vmem>>, vector<1x20x128xbf16>
    %17 = vector.shape_cast %16 : vector<1x20x128xbf16> to vector<20x128xbf16>
    %c0_18 = arith.constant 0 : index
    %c24 = arith.constant 24 : index
    %c0_19 = arith.constant 0 : index
    %18 = vector.load %arg1[%c0_18, %c24, %c0_19] : memref<1x88x128xbf16, #tpu.memory_space<vmem>>, vector<1x20x128xbf16>
    %19 = vector.shape_cast %18 : vector<1x20x128xbf16> to vector<20x128xbf16>
    %20 = tpu.concatenate %1, %3, %5, %7, %9, %11, %13, %15, %17, %19 in 1 : vector<20x128xbf16>, vector<20x128xbf16>, vector<20x128xbf16>, vector<20x128xbf16>, vector<20x128xbf16>, vector<20x128xbf16>, vector<20x128xbf16>, vector<20x128xbf16>, vector<20x128xbf16>, vector<20x128xbf16> -> vector<20x1280xbf16>
    %c0_20 = arith.constant 0 : index
    %c0_21 = arith.constant 0 : index
    %21 = vector.load %arg2[%c0_20, %c0_21] : memref<1280x128xbf16, #tpu.memory_space<vmem>>, vector<1280x128xbf16>
    %cst = arith.constant dense<0.000000e+00> : vector<20x128xf32>
    %22 = tpu.matmul %20, %21, %cst {dimension_numbers = #tpu.dot_dimension_numbers<[1], [0], [0], [1], [0, 0, 1, 1], [], []>} : vector<20x1280xbf16>, vector<1280x128xbf16>, vector<20x128xf32> -> vector<20x128xf32>
    %c0_22 = arith.constant 0 : index
    %c0_23 = arith.constant 0 : index
    %23 = vector.load %arg3[%c0_22, %c0_23] : memref<1x128xf32, #tpu.memory_space<vmem>>, vector<1x128xf32>
    %24 = vector.broadcast %23 : vector<1x128xf32> to vector<20x128xf32>
    %25 = arith.addf %22, %24 : vector<20x128xf32>
    %cst_24 = arith.constant 5.000000e-01 : f32
    %26 = vector.broadcast %cst_24 : f32 to vector<20x128xf32>
    %27 = arith.mulf %26, %25 : vector<20x128xf32>
    %28 = math.tanh %27 : vector<20x128xf32>
    %cst_25 = arith.constant 1.000000e+00 : f32
    %29 = vector.broadcast %cst_25 : f32 to vector<20x128xf32>
    %30 = arith.addf %28, %29 : vector<20x128xf32>
    %cst_26 = arith.constant 5.000000e-01 : f32
    %31 = vector.broadcast %cst_26 : f32 to vector<20x128xf32>
    %32 = arith.mulf %31, %30 : vector<20x128xf32>
    %33 = arith.mulf %25, %32 : vector<20x128xf32>
    %34 = arith.truncf %33 : vector<20x128xf32> to vector<20x128xbf16>
    %c0_27 = arith.constant 0 : index
    %c0_28 = arith.constant 0 : index
    %c0_29 = arith.constant 0 : index
    %35 = vector.load %arg4[%c0_27, %c0_28, %c0_29] : memref<1x20x128xbf16, #tpu.memory_space<vmem>>, vector<1x20x128xbf16>
    %36 = vector.shape_cast %35 : vector<1x20x128xbf16> to vector<20x128xbf16>
    %37 = vector.shape_cast %34 : vector<20x128xbf16> to vector<1x20x128xbf16>
    tpu.vector_store %arg4[%c0_27, %c0_28, %c0_29], %37 {strides = array<i32>} : memref<1x20x128xbf16, #tpu.memory_space<vmem>>, vector<1x20x128xbf16>,
    return
  }
  func.func @transform_0(%arg0: i32) -> (i32, i32, i32) {
    %c0_i32 = arith.constant 0 : i32
    %c0_i32_0 = arith.constant 0 : i32
    %c0_i32_1 = arith.constant 0 : i32
    return %arg0, %c0_i32, %c0_i32_0 : i32, i32, i32
  }
  func.func @transform_1(%arg0: i32) -> (i32, i32) {
    %c0_i32 = arith.constant 0 : i32
    %c0_i32_0 = arith.constant 0 : i32
    %c0_i32_1 = arith.constant 0 : i32
    return %c0_i32, %c0_i32_0 : i32, i32
  }
  func.func @transform_2(%arg0: i32) -> (i32, i32) {
    %c0_i32 = arith.constant 0 : i32
    %c0_i32_0 = arith.constant 0 : i32
    %c0_i32_1 = arith.constant 0 : i32
    return %c0_i32, %c0_i32_0 : i32, i32
  }
  func.func @transform_3(%arg0: i32) -> (i32, i32, i32) {
    %c0_i32 = arith.constant 0 : i32
    %c0_i32_0 = arith.constant 0 : i32
    %c0_i32_1 = arith.constant 0 : i32
    return %arg0, %c0_i32, %c0_i32_0 : i32, i32, i32
  }
}

module attributes {stable_mosaic.version = 11 : i64} {
  func.func @_conv_bn_swish_kernel(%arg0: i32, %arg1: memref<1x48x192xbf16, #tpu.memory_space<vmem>>, %arg2: memref<1920x128xbf16, #tpu.memory_space<vmem>>, %arg3: memref<1x128xf32, #tpu.memory_space<vmem>>, %arg4: memref<1x10x128xbf16, #tpu.memory_space<vmem>>) attributes {dimension_semantics = [#tpu.dimension_semantics<parallel>], iteration_bounds = array<i64: 2>, scalar_prefetch = 0 : i64, scratch_operands = 0 : i64, tpu.core_type = #tpu.core_type<tc>, window_params = [{transform_indices = @transform_0, window_bounds = array<i64: 1, 48, 192>}, {pipeline_mode = #tpu.pipeline_mode<synchronous>, transform_indices = @transform_1, window_bounds = array<i64: 1920, 128>}, {pipeline_mode = #tpu.pipeline_mode<synchronous>, transform_indices = @transform_2, window_bounds = array<i64: 1, 128>}, {transform_indices = @transform_3, window_bounds = array<i64: 1, 10, 128>}]} {
    %c0 = arith.constant 0 : index
    %c0_0 = arith.constant 0 : index
    %c0_1 = arith.constant 0 : index
    %0 = vector.load %arg1[%c0, %c0_0, %c0_1] : memref<1x48x192xbf16, #tpu.memory_space<vmem>>, vector<1x10x192xbf16>
    %1 = vector.shape_cast %0 : vector<1x10x192xbf16> to vector<10x192xbf16>
    %c0_2 = arith.constant 0 : index
    %c12 = arith.constant 12 : index
    %c0_3 = arith.constant 0 : index
    %2 = vector.load %arg1[%c0_2, %c12, %c0_3] : memref<1x48x192xbf16, #tpu.memory_space<vmem>>, vector<1x10x192xbf16>
    %3 = vector.shape_cast %2 : vector<1x10x192xbf16> to vector<10x192xbf16>
    %c0_4 = arith.constant 0 : index
    %c24 = arith.constant 24 : index
    %c0_5 = arith.constant 0 : index
    %4 = vector.load %arg1[%c0_4, %c24, %c0_5] : memref<1x48x192xbf16, #tpu.memory_space<vmem>>, vector<1x10x192xbf16>
    %5 = vector.shape_cast %4 : vector<1x10x192xbf16> to vector<10x192xbf16>
    %c0_6 = arith.constant 0 : index
    %c36 = arith.constant 36 : index
    %c0_7 = arith.constant 0 : index
    %6 = vector.load %arg1[%c0_6, %c36, %c0_7] : memref<1x48x192xbf16, #tpu.memory_space<vmem>>, vector<1x10x192xbf16>
    %7 = vector.shape_cast %6 : vector<1x10x192xbf16> to vector<10x192xbf16>
    %c0_8 = arith.constant 0 : index
    %c1 = arith.constant 1 : index
    %c0_9 = arith.constant 0 : index
    %8 = vector.load %arg1[%c0_8, %c1, %c0_9] : memref<1x48x192xbf16, #tpu.memory_space<vmem>>, vector<1x10x192xbf16>
    %9 = vector.shape_cast %8 : vector<1x10x192xbf16> to vector<10x192xbf16>
    %c0_10 = arith.constant 0 : index
    %c13 = arith.constant 13 : index
    %c0_11 = arith.constant 0 : index
    %10 = vector.load %arg1[%c0_10, %c13, %c0_11] : memref<1x48x192xbf16, #tpu.memory_space<vmem>>, vector<1x10x192xbf16>
    %11 = vector.shape_cast %10 : vector<1x10x192xbf16> to vector<10x192xbf16>
    %c0_12 = arith.constant 0 : index
    %c25 = arith.constant 25 : index
    %c0_13 = arith.constant 0 : index
    %12 = vector.load %arg1[%c0_12, %c25, %c0_13] : memref<1x48x192xbf16, #tpu.memory_space<vmem>>, vector<1x10x192xbf16>
    %13 = vector.shape_cast %12 : vector<1x10x192xbf16> to vector<10x192xbf16>
    %c0_14 = arith.constant 0 : index
    %c37 = arith.constant 37 : index
    %c0_15 = arith.constant 0 : index
    %14 = vector.load %arg1[%c0_14, %c37, %c0_15] : memref<1x48x192xbf16, #tpu.memory_space<vmem>>, vector<1x10x192xbf16>
    %15 = vector.shape_cast %14 : vector<1x10x192xbf16> to vector<10x192xbf16>
    %c0_16 = arith.constant 0 : index
    %c2 = arith.constant 2 : index
    %c0_17 = arith.constant 0 : index
    %16 = vector.load %arg1[%c0_16, %c2, %c0_17] : memref<1x48x192xbf16, #tpu.memory_space<vmem>>, vector<1x10x192xbf16>
    %17 = vector.shape_cast %16 : vector<1x10x192xbf16> to vector<10x192xbf16>
    %c0_18 = arith.constant 0 : index
    %c14 = arith.constant 14 : index
    %c0_19 = arith.constant 0 : index
    %18 = vector.load %arg1[%c0_18, %c14, %c0_19] : memref<1x48x192xbf16, #tpu.memory_space<vmem>>, vector<1x10x192xbf16>
    %19 = vector.shape_cast %18 : vector<1x10x192xbf16> to vector<10x192xbf16>
    %20 = tpu.concatenate %1, %3, %5, %7, %9, %11, %13, %15, %17, %19 in 1 : vector<10x192xbf16>, vector<10x192xbf16>, vector<10x192xbf16>, vector<10x192xbf16>, vector<10x192xbf16>, vector<10x192xbf16>, vector<10x192xbf16>, vector<10x192xbf16>, vector<10x192xbf16>, vector<10x192xbf16> -> vector<10x1920xbf16>
    %c0_20 = arith.constant 0 : index
    %c0_21 = arith.constant 0 : index
    %21 = vector.load %arg2[%c0_20, %c0_21] : memref<1920x128xbf16, #tpu.memory_space<vmem>>, vector<1920x128xbf16>
    %cst = arith.constant dense<0.000000e+00> : vector<10x128xf32>
    %22 = tpu.matmul %20, %21, %cst {dimension_numbers = #tpu.dot_dimension_numbers<[1], [0], [0], [1], [0, 0, 1, 1], [], []>} : vector<10x1920xbf16>, vector<1920x128xbf16>, vector<10x128xf32> -> vector<10x128xf32>
    %c0_22 = arith.constant 0 : index
    %c0_23 = arith.constant 0 : index
    %23 = vector.load %arg3[%c0_22, %c0_23] : memref<1x128xf32, #tpu.memory_space<vmem>>, vector<1x128xf32>
    %24 = vector.broadcast %23 : vector<1x128xf32> to vector<10x128xf32>
    %25 = arith.addf %22, %24 : vector<10x128xf32>
    %cst_24 = arith.constant 5.000000e-01 : f32
    %26 = vector.broadcast %cst_24 : f32 to vector<10x128xf32>
    %27 = arith.mulf %26, %25 : vector<10x128xf32>
    %28 = math.tanh %27 : vector<10x128xf32>
    %cst_25 = arith.constant 1.000000e+00 : f32
    %29 = vector.broadcast %cst_25 : f32 to vector<10x128xf32>
    %30 = arith.addf %28, %29 : vector<10x128xf32>
    %cst_26 = arith.constant 5.000000e-01 : f32
    %31 = vector.broadcast %cst_26 : f32 to vector<10x128xf32>
    %32 = arith.mulf %31, %30 : vector<10x128xf32>
    %33 = arith.mulf %25, %32 : vector<10x128xf32>
    %34 = arith.truncf %33 : vector<10x128xf32> to vector<10x128xbf16>
    %c0_27 = arith.constant 0 : index
    %c0_28 = arith.constant 0 : index
    %c0_29 = arith.constant 0 : index
    %35 = vector.load %arg4[%c0_27, %c0_28, %c0_29] : memref<1x10x128xbf16, #tpu.memory_space<vmem>>, vector<1x10x128xbf16>
    %36 = vector.shape_cast %35 : vector<1x10x128xbf16> to vector<10x128xbf16>
    %37 = vector.shape_cast %34 : vector<10x128xbf16> to vector<1x10x128xbf16>
    tpu.vector_store %arg4[%c0_27, %c0_28, %c0_29], %37 {strides = array<i32>} : memref<1x10x128xbf16, #tpu.memory_space<vmem>>, vector<1x10x128xbf16>,
    return
  }
  func.func @transform_0(%arg0: i32) -> (i32, i32, i32) {
    %c0_i32 = arith.constant 0 : i32
    %c0_i32_0 = arith.constant 0 : i32
    %c0_i32_1 = arith.constant 0 : i32
    return %arg0, %c0_i32, %c0_i32_0 : i32, i32, i32
  }
  func.func @transform_1(%arg0: i32) -> (i32, i32) {
    %c0_i32 = arith.constant 0 : i32
    %c0_i32_0 = arith.constant 0 : i32
    %c0_i32_1 = arith.constant 0 : i32
    return %c0_i32, %c0_i32_0 : i32, i32
  }
  func.func @transform_2(%arg0: i32) -> (i32, i32) {
    %c0_i32 = arith.constant 0 : i32
    %c0_i32_0 = arith.constant 0 : i32
    %c0_i32_1 = arith.constant 0 : i32
    return %c0_i32, %c0_i32_0 : i32, i32
  }
  func.func @transform_3(%arg0: i32) -> (i32, i32, i32) {
    %c0_i32 = arith.constant 0 : i32
    %c0_i32_0 = arith.constant 0 : i32
    %c0_i32_1 = arith.constant 0 : i32
    return %arg0, %c0_i32, %c0_i32_0 : i32, i32, i32
  }
}

module attributes {stable_mosaic.version = 11 : i64} {
  func.func @_conv_bn_swish_kernel(%arg0: i32, %arg1: memref<1x28x384xbf16, #tpu.memory_space<vmem>>, %arg2: memref<3840x256xbf16, #tpu.memory_space<vmem>>, %arg3: memref<1x256xf32, #tpu.memory_space<vmem>>, %arg4: memref<1x5x256xbf16, #tpu.memory_space<vmem>>) attributes {dimension_semantics = [#tpu.dimension_semantics<parallel>], iteration_bounds = array<i64: 2>, scalar_prefetch = 0 : i64, scratch_operands = 0 : i64, tpu.core_type = #tpu.core_type<tc>, window_params = [{transform_indices = @transform_0, window_bounds = array<i64: 1, 28, 384>}, {pipeline_mode = #tpu.pipeline_mode<synchronous>, transform_indices = @transform_1, window_bounds = array<i64: 3840, 256>}, {pipeline_mode = #tpu.pipeline_mode<synchronous>, transform_indices = @transform_2, window_bounds = array<i64: 1, 256>}, {transform_indices = @transform_3, window_bounds = array<i64: 1, 5, 256>}]} {
    %c0 = arith.constant 0 : index
    %c0_0 = arith.constant 0 : index
    %c0_1 = arith.constant 0 : index
    %0 = vector.load %arg1[%c0, %c0_0, %c0_1] : memref<1x28x384xbf16, #tpu.memory_space<vmem>>, vector<1x5x384xbf16>
    %1 = vector.shape_cast %0 : vector<1x5x384xbf16> to vector<5x384xbf16>
    %c0_2 = arith.constant 0 : index
    %c7 = arith.constant 7 : index
    %c0_3 = arith.constant 0 : index
    %2 = vector.load %arg1[%c0_2, %c7, %c0_3] : memref<1x28x384xbf16, #tpu.memory_space<vmem>>, vector<1x5x384xbf16>
    %3 = vector.shape_cast %2 : vector<1x5x384xbf16> to vector<5x384xbf16>
    %c0_4 = arith.constant 0 : index
    %c14 = arith.constant 14 : index
    %c0_5 = arith.constant 0 : index
    %4 = vector.load %arg1[%c0_4, %c14, %c0_5] : memref<1x28x384xbf16, #tpu.memory_space<vmem>>, vector<1x5x384xbf16>
    %5 = vector.shape_cast %4 : vector<1x5x384xbf16> to vector<5x384xbf16>
    %c0_6 = arith.constant 0 : index
    %c21 = arith.constant 21 : index
    %c0_7 = arith.constant 0 : index
    %6 = vector.load %arg1[%c0_6, %c21, %c0_7] : memref<1x28x384xbf16, #tpu.memory_space<vmem>>, vector<1x5x384xbf16>
    %7 = vector.shape_cast %6 : vector<1x5x384xbf16> to vector<5x384xbf16>
    %c0_8 = arith.constant 0 : index
    %c1 = arith.constant 1 : index
    %c0_9 = arith.constant 0 : index
    %8 = vector.load %arg1[%c0_8, %c1, %c0_9] : memref<1x28x384xbf16, #tpu.memory_space<vmem>>, vector<1x5x384xbf16>
    %9 = vector.shape_cast %8 : vector<1x5x384xbf16> to vector<5x384xbf16>
    %c0_10 = arith.constant 0 : index
    %c8 = arith.constant 8 : index
    %c0_11 = arith.constant 0 : index
    %10 = vector.load %arg1[%c0_10, %c8, %c0_11] : memref<1x28x384xbf16, #tpu.memory_space<vmem>>, vector<1x5x384xbf16>
    %11 = vector.shape_cast %10 : vector<1x5x384xbf16> to vector<5x384xbf16>
    %c0_12 = arith.constant 0 : index
    %c15 = arith.constant 15 : index
    %c0_13 = arith.constant 0 : index
    %12 = vector.load %arg1[%c0_12, %c15, %c0_13] : memref<1x28x384xbf16, #tpu.memory_space<vmem>>, vector<1x5x384xbf16>
    %13 = vector.shape_cast %12 : vector<1x5x384xbf16> to vector<5x384xbf16>
    %c0_14 = arith.constant 0 : index
    %c22 = arith.constant 22 : index
    %c0_15 = arith.constant 0 : index
    %14 = vector.load %arg1[%c0_14, %c22, %c0_15] : memref<1x28x384xbf16, #tpu.memory_space<vmem>>, vector<1x5x384xbf16>
    %15 = vector.shape_cast %14 : vector<1x5x384xbf16> to vector<5x384xbf16>
    %c0_16 = arith.constant 0 : index
    %c2 = arith.constant 2 : index
    %c0_17 = arith.constant 0 : index
    %16 = vector.load %arg1[%c0_16, %c2, %c0_17] : memref<1x28x384xbf16, #tpu.memory_space<vmem>>, vector<1x5x384xbf16>
    %17 = vector.shape_cast %16 : vector<1x5x384xbf16> to vector<5x384xbf16>
    %c0_18 = arith.constant 0 : index
    %c9 = arith.constant 9 : index
    %c0_19 = arith.constant 0 : index
    %18 = vector.load %arg1[%c0_18, %c9, %c0_19] : memref<1x28x384xbf16, #tpu.memory_space<vmem>>, vector<1x5x384xbf16>
    %19 = vector.shape_cast %18 : vector<1x5x384xbf16> to vector<5x384xbf16>
    %20 = tpu.concatenate %1, %3, %5, %7, %9, %11, %13, %15, %17, %19 in 1 : vector<5x384xbf16>, vector<5x384xbf16>, vector<5x384xbf16>, vector<5x384xbf16>, vector<5x384xbf16>, vector<5x384xbf16>, vector<5x384xbf16>, vector<5x384xbf16>, vector<5x384xbf16>, vector<5x384xbf16> -> vector<5x3840xbf16>
    %c0_20 = arith.constant 0 : index
    %c0_21 = arith.constant 0 : index
    %21 = vector.load %arg2[%c0_20, %c0_21] : memref<3840x256xbf16, #tpu.memory_space<vmem>>, vector<3840x256xbf16>
    %cst = arith.constant dense<0.000000e+00> : vector<5x256xf32>
    %22 = tpu.matmul %20, %21, %cst {dimension_numbers = #tpu.dot_dimension_numbers<[1], [0], [0], [1], [0, 0, 1, 1], [], []>} : vector<5x3840xbf16>, vector<3840x256xbf16>, vector<5x256xf32> -> vector<5x256xf32>
    %c0_22 = arith.constant 0 : index
    %c0_23 = arith.constant 0 : index
    %23 = vector.load %arg3[%c0_22, %c0_23] : memref<1x256xf32, #tpu.memory_space<vmem>>, vector<1x256xf32>
    %24 = vector.broadcast %23 : vector<1x256xf32> to vector<5x256xf32>
    %25 = arith.addf %22, %24 : vector<5x256xf32>
    %cst_24 = arith.constant 5.000000e-01 : f32
    %26 = vector.broadcast %cst_24 : f32 to vector<5x256xf32>
    %27 = arith.mulf %26, %25 : vector<5x256xf32>
    %28 = math.tanh %27 : vector<5x256xf32>
    %cst_25 = arith.constant 1.000000e+00 : f32
    %29 = vector.broadcast %cst_25 : f32 to vector<5x256xf32>
    %30 = arith.addf %28, %29 : vector<5x256xf32>
    %cst_26 = arith.constant 5.000000e-01 : f32
    %31 = vector.broadcast %cst_26 : f32 to vector<5x256xf32>
    %32 = arith.mulf %31, %30 : vector<5x256xf32>
    %33 = arith.mulf %25, %32 : vector<5x256xf32>
    %34 = arith.truncf %33 : vector<5x256xf32> to vector<5x256xbf16>
    %c0_27 = arith.constant 0 : index
    %c0_28 = arith.constant 0 : index
    %c0_29 = arith.constant 0 : index
    %35 = vector.load %arg4[%c0_27, %c0_28, %c0_29] : memref<1x5x256xbf16, #tpu.memory_space<vmem>>, vector<1x5x256xbf16>
    %36 = vector.shape_cast %35 : vector<1x5x256xbf16> to vector<5x256xbf16>
    %37 = vector.shape_cast %34 : vector<5x256xbf16> to vector<1x5x256xbf16>
    tpu.vector_store %arg4[%c0_27, %c0_28, %c0_29], %37 {strides = array<i32>} : memref<1x5x256xbf16, #tpu.memory_space<vmem>>, vector<1x5x256xbf16>,
    return
  }
  func.func @transform_0(%arg0: i32) -> (i32, i32, i32) {
    %c0_i32 = arith.constant 0 : i32
    %c0_i32_0 = arith.constant 0 : i32
    %c0_i32_1 = arith.constant 0 : i32
    return %arg0, %c0_i32, %c0_i32_0 : i32, i32, i32
  }
  func.func @transform_1(%arg0: i32) -> (i32, i32) {
    %c0_i32 = arith.constant 0 : i32
    %c0_i32_0 = arith.constant 0 : i32
    %c0_i32_1 = arith.constant 0 : i32
    return %c0_i32, %c0_i32_0 : i32, i32
  }
  func.func @transform_2(%arg0: i32) -> (i32, i32) {
    %c0_i32 = arith.constant 0 : i32
    %c0_i32_0 = arith.constant 0 : i32
    %c0_i32_1 = arith.constant 0 : i32
    return %c0_i32, %c0_i32_0 : i32, i32
  }
  func.func @transform_3(%arg0: i32) -> (i32, i32, i32) {
    %c0_i32 = arith.constant 0 : i32
    %c0_i32_0 = arith.constant 0 : i32
    %c0_i32_1 = arith.constant 0 : i32
    return %arg0, %c0_i32, %c0_i32_0 : i32, i32, i32
  }
}

module attributes {stable_mosaic.version = 11 : i64} {
  func.func @_fc_bn_softmax_kernel(%arg0: i32, %arg1: memref<8x1280xbf16, #tpu.memory_space<vmem>>, %arg2: memref<1280x10xbf16, #tpu.memory_space<vmem>>, %arg3: memref<1x10xf32, #tpu.memory_space<vmem>>, %arg4: memref<8x10xf32, #tpu.memory_space<vmem>>) attributes {dimension_semantics = [#tpu.dimension_semantics<parallel>], iteration_bounds = array<i64: 1>, scalar_prefetch = 0 : i64, scratch_operands = 0 : i64, tpu.core_type = #tpu.core_type<tc>, window_params = [{transform_indices = @transform_0, window_bounds = array<i64: 8, 1280>}, {pipeline_mode = #tpu.pipeline_mode<synchronous>, transform_indices = @transform_1, window_bounds = array<i64: 1280, 10>}, {pipeline_mode = #tpu.pipeline_mode<synchronous>, transform_indices = @transform_2, window_bounds = array<i64: 1, 10>}, {transform_indices = @transform_3, window_bounds = array<i64: 8, 10>}]} {
    %c0 = arith.constant 0 : index
    %c0_0 = arith.constant 0 : index
    %0 = vector.load %arg1[%c0, %c0_0] : memref<8x1280xbf16, #tpu.memory_space<vmem>>, vector<8x1280xbf16>
    %c0_1 = arith.constant 0 : index
    %c0_2 = arith.constant 0 : index
    %1 = vector.load %arg2[%c0_1, %c0_2] : memref<1280x10xbf16, #tpu.memory_space<vmem>>, vector<1280x10xbf16>
    %cst = arith.constant dense<0.000000e+00> : vector<8x10xf32>
    %2 = tpu.matmul %0, %1, %cst {dimension_numbers = #tpu.dot_dimension_numbers<[1], [0], [0], [1], [0, 0, 1, 1], [], []>} : vector<8x1280xbf16>, vector<1280x10xbf16>, vector<8x10xf32> -> vector<8x10xf32>
    %c0_3 = arith.constant 0 : index
    %c0_4 = arith.constant 0 : index
    %3 = vector.load %arg3[%c0_3, %c0_4] : memref<1x10xf32, #tpu.memory_space<vmem>>, vector<1x10xf32>
    %4 = vector.broadcast %3 : vector<1x10xf32> to vector<8x10xf32>
    %5 = arith.addf %2, %4 : vector<8x10xf32>
    %cst_5 = arith.constant dense<0xFF800000> : vector<8xf32>
    %6 = vector.multi_reduction <maximumf>, %5, %cst_5 [1] : vector<8x10xf32> to vector<8xf32>
    %7 = vector.shape_cast %6 : vector<8xf32> to vector<8x1xf32>
    %8 = vector.broadcast %7 : vector<8x1xf32> to vector<8x10xf32>
    %9 = arith.subf %5, %8 : vector<8x10xf32>
    %10 = math.exp %9 : vector<8x10xf32>
    %cst_6 = arith.constant dense<0.000000e+00> : vector<8xf32>
    %11 = vector.multi_reduction <add>, %10, %cst_6 [1] : vector<8x10xf32> to vector<8xf32>
    %12 = vector.shape_cast %11 : vector<8xf32> to vector<8x1xf32>
    %13 = tpu.reciprocal %12 {approx = true} : vector<8x1xf32> -> vector<8x1xf32>
    %14 = vector.broadcast %13 : vector<8x1xf32> to vector<8x10xf32>
    %15 = arith.mulf %10, %14 : vector<8x10xf32>
    %cst_7 = arith.constant 9.99999971E-10 : f32
    %16 = vector.broadcast %cst_7 : f32 to vector<8x10xf32>
    %17 = arith.maximumf %15, %16 : vector<8x10xf32>
    %c0_8 = arith.constant 0 : index
    %c0_9 = arith.constant 0 : index
    %18 = vector.load %arg4[%c0_8, %c0_9] : memref<8x10xf32, #tpu.memory_space<vmem>>, vector<8x10xf32>
    tpu.vector_store %arg4[%c0_8, %c0_9], %17 {strides = array<i32>} : memref<8x10xf32, #tpu.memory_space<vmem>>, vector<8x10xf32>,
    return
  }
  func.func @transform_0(%arg0: i32) -> (i32, i32) {
    %c0_i32 = arith.constant 0 : i32
    %c0_i32_0 = arith.constant 0 : i32
    return %arg0, %c0_i32 : i32, i32
  }
  func.func @transform_1(%arg0: i32) -> (i32, i32) {
    %c0_i32 = arith.constant 0 : i32
    %c0_i32_0 = arith.constant 0 : i32
    %c0_i32_1 = arith.constant 0 : i32
    return %c0_i32, %c0_i32_0 : i32, i32
  }
  func.func @transform_2(%arg0: i32) -> (i32, i32) {
    %c0_i32 = arith.constant 0 : i32
    %c0_i32_0 = arith.constant 0 : i32
    %c0_i32_1 = arith.constant 0 : i32
    return %c0_i32, %c0_i32_0 : i32, i32
  }
  func.func @transform_3(%arg0: i32) -> (i32, i32) {
    %c0_i32 = arith.constant 0 : i32
    %c0_i32_0 = arith.constant 0 : i32
    return %arg0, %c0_i32 : i32, i32
  }
}

</mosaic_0001>

<bundles_post_ra>
// kernel: tile.20
= control target key start
LH: loop header
LB: loop body
LE: loop exit
PB: predicated region body
PF: predicated region fallthrough
CT: control target
= control target key end

     0   :  { %s22_s0 = inlined_call_operand.vmem [shape: f32[16], index: 0, kind: input, shape index: {}]   ;;  %s23_s1 = inlined_call_operand.vmem [shape: f32[8,16], index: 1, kind: output, shape index: {}]  }
   0x1   :  { %v4_v0 = vld [vmem:[%s22_s0] ss:$0 sm:$0xff] }
   0x2   :  { %5 = vst [vmem:[%s23_s1] sm:$0xff] %v4_v0 }

// kernel: tile.21
= control target key start
LH: loop header
LB: loop body
LE: loop exit
PB: predicated region body
PF: predicated region fallthrough
CT: control target
= control target key end

     0   :  { %s67_s10 = smov 112   ;;  %s68_s11 = smov 80   ;;  %vm3_vm0 = vcmask 130048   ;;  %vm9_vm1 = vcmask 1048448   ;;  %vm15_vm2 = vcmask 917248   ;;  %vm21_vm3 = vcmask 786048   ;;  %s111_s0 = inlined_call_operand.vmem [shape: f32[8,16], index: 0, kind: input, shape index: {}]   ;;  %s112_s1 = inlined_call_operand.vmem [shape: f32[1,128], index: 1, kind: output, shape index: {}]  }
   0x1   :  { %v53_v0 = vld [vmem:[%s111_s0 + $0x7] sm:$0x1]   ;;  %v55_v1 = vld [vmem:[%s111_s0 + $0x5] sm:$0x1]   ;;  %v57_v2 = vld [vmem:[%s111_s0 + $0x3] sm:$0x1]  }
   0x2   :  { %7 = vrot.lane.b32.xlu0 %v53_v0, %s67_s10  ;;  %19 = vrot.lane.b32.xlu1 %v55_v1, %s68_s11  ;;  %s69_s14 = smov 48   ;;  %v54_v3 = vld [vmem:[%s111_s0 + $0x6] sm:$0x1]   ;;  %v56_v4 = vld [vmem:[%s111_s0 + $0x4] sm:$0x1]   ;;  %s70_s21 = smov 96  }
   0x3   :  { %31 = vrot.lane.b32.xlu2 %v57_v2, %s69_s14  ;;  %v58_v5 = vld [vmem:[%s111_s0 + $0x2] sm:$0x1]   ;;  %s71_s22 = smov 64   ;;  %s72_s23 = smov 32   ;;  %v59_v6 = vld [vmem:[%s111_s0 + $0x1] sm:$0x1]  }
   0x4   :  { %s73_s26 = smov 16   ;;  %v2_v7 = vld [vmem:[%s111_s0] sm:$0x1]   ;;  %vm27_vm4 = vcmask 654848   ;;  %vm33_vm5 = vcmask 523648   ;;  %vm39_vm6 = vcmask 392448  }
   0x5   :  { %4 = vst.msk [vmem:[#allocation0] sm:$0x1] %vm3_vm0, %v2_v7   ;;  %vm45_vm7 = vcmask 261248  }
   0xa   :  { %13 = vrot.lane.b32.xlu0 %v54_v3, %s70_s21  ;;  %25 = vrot.lane.b32.xlu1 %v56_v4, %s71_s22 }
   0xb   :  { %37 = vrot.lane.b32.xlu2 %v58_v5, %s72_s23 }
  0x12   :  { %43 = vrot.lane.b32.xlu0 %v59_v6, %s73_s26 }
  0x5d   :  { %v32_v8 = vpop.permute.xlu2 %31  }
  0x65   :  { %v38_v9 = vpop.permute.xlu2 %37  }
  0x74   :  { %v8_v10 = vpop.permute.xlu0 %7   ;;  %v20_v11 = vpop.permute.xlu1 %19  }
  0x75   :  { %10 = vst.msk [vmem:[#allocation0] sm:$0x1] %vm9_vm1, %v8_v10  }
  0x7c   :  { %v14_v12 = vpop.permute.xlu0 %13   ;;  %v26_v13 = vpop.permute.xlu1 %25  }
  0x7d   :  { %16 = vst.msk [vmem:[#allocation0] sm:$0x1] %vm15_vm2, %v14_v12  }
  0x7e   :  { %22 = vst.msk [vmem:[#allocation0] sm:$0x1] %vm21_vm3, %v20_v11  }
  0x7f   :  { %28 = vst.msk [vmem:[#allocation0] sm:$0x1] %vm27_vm4, %v26_v13  }
  0x80   :  { %34 = vst.msk [vmem:[#allocation0] sm:$0x1] %vm33_vm5, %v32_v8  }
  0x81   :  { %40 = vst.msk [vmem:[#allocation0] sm:$0x1] %vm39_vm6, %v38_v9  }
  0x84   :  { %v44_v14 = vpop.permute.xlu0 %43  }
  0x85   :  { %46 = vst.msk [vmem:[#allocation0] sm:$0x1] %vm45_vm7, %v44_v14  }
  0x8c   :  { %v49_v15 = vld [vmem:[#allocation0] sm:$0x1] }
  0x8d   :  { %52 = vst [vmem:[%s112_s1] sm:$0x1] %v49_v15 }

// kernel: conv_encoder_y.6
= control target key start
LH: loop header
LB: loop body
LE: loop exit
PB: predicated region body
PF: predicated region fallthrough
CT: control target
= control target key end

     0   :  { %s1300_s12 = smov 0   ;;  %s1774_s0 = inlined_call_operand.vmem [shape: bf16[2,328,10], index: 0, kind: input, shape index: {}]   ;;  %s1775_s1 = inlined_call_operand.vmem [shape: bf16[100,128], index: 1, kind: input, shape index: {}]   ;;  %s1776_s2 = inlined_call_operand.vmem [shape: f32[1,128], index: 2, kind: input, shape index: {}]   ;;  %s1777_s3 = inlined_call_operand.vmem [shape: bf16[2,80,128], index: 3, kind: output, shape index: {}]  }
   0x1 LB: > { %s1032_s13 = sadd.s32 4294967295, %s1269_s12   ;;  %p1036_p0 = scmp.ge.s32.totalorder %s1269_s12, 1  ;;  %s1269_s12 = sphi %s1300_s12, %s13_s12  }
   0x2   : > { %p137_p1 = scmp.lt.s32.totalorder %s1269_s12, 3 }
   0x4   : > { %p138_p2 = pnand %p1036_p0, %p137_p1 }
   0x5   : > { %p161_p3 = scmp.lt.s32.totalorder (!%p138_p2), %s1032_s13, 1  ;;  %s1271_s18 = smov (!%p138_p2), 30  }
   0x6   : > { %141 = sbr.rel (%p138_p2) target bundleno = 403 (0x193), region = 32  ;;  %s1272_s19 = smov (!%p138_p2), 10  }
   0x7   : > { %s1273_s20 = smov (!%p138_p2), 90   ;;  %s1274_s21 = smov (!%p138_p2), 80  }
   0x8   : > { %s1275_s22 = smov (!%p138_p2), 20   ;;  %s1276_s23 = smov (!%p138_p2), 50  }
   0x9   : > { %s1277_s24 = smov (!%p138_p2), 40   ;;  %s1278_s25 = smov (!%p138_p2), 70  }
   0xa   : > { %s1279_s26 = smov (!%p138_p2), 60  }
   0xb   : > { %s1779_s13 = smov (!%p161_p3, %s1032_s13), 1  ;;  %vm374_vm0 = vcmask 1044480   ;;  %vm274_vm1 = vcmask 1046528   ;;  %vm324_vm2 = vcmask 1045504   ;;  %vm399_vm3 = vsmask.f32 7424 }
   0xc   : > { %s1223_s14 = smul.u32 164, %s1779_s13  ;;  %vm457_vm4 = vsmask.f32 6400  ;;  %vm591_vm5 = vsmask.f32 4352  ;;  %vm869_vm7 = vcmask 1041408  }
   0xd   : > { %vm524_vm6 = vsmask.f32 5376  ;;  %vm703_vm8 = vcmask 80896   ;;  %vm714_vm9 = vcmask 162816   ;;  %vm725_vm10 = vcmask 244736  }
   0xe   : > { %s1314_s17 = scalar_lea.vmem %s1774_s0, %s1223_s14  ;;  %vm736_vm11 = vcmask 326656   ;;  %vm747_vm12 = vcmask 408576   ;;  %vm758_vm13 = vcmask 490496   ;;  %vm769_vm14 = vcmask 572416  }
   0xf   : > { %v1317_v0 = vld [vmem:[%s1314_s17 + $0x90] sm:$0xff]  ;;  %v1320_v1 = vld [vmem:[%s1314_s17 + $0x98] sm:$0xff]  ;;  %v1323_v2 = vld [vmem:[%s1314_s17 + $0x40] sm:$0xff]  ;;  %vm780_vm15 = vcmask 654336  }
  0x10   : > { %v1326_v3 = vld [vmem:[%s1314_s17 + $0x48] sm:$0xff]  ;;  %v1332_v5 = vld [vmem:[%s1314_s17 + $0x70] sm:$0xff]  ;;  %v380_v6 = vrot.slane %v1317_v0, 3  ;;  %v382_v7 = vrot.slane %v1320_v1, 3  ;;  %v280_v8 = vrot.slane %v1323_v2, 1  ;;  %v1338_v9 = vld [vmem:[%s1314_s17 + $0x18] sm:$0xff] }
  0x11   : > { %v1329_v4 = vld [vmem:[%s1314_s17 + $0x68] sm:$0xff]  ;;  %v1341_v10 = vld [vmem:[%s1314_s17 + $0x20] sm:$0xff]  ;;  %v282_v11 = vrot.slane %v1326_v3, 1  ;;  %v619_v12 = vshrl.u32 %v1317_v0, 16  ;;  %v332_v15 = vrot.slane %v1332_v5, 2  ;;  %v622_v16 = vshll.u32 %v1317_v0, 16 }
  0x12   : > { %v383_v13 = vsel %vm374_vm0, %v380_v6, %v382_v7  ;;  %v330_v14 = vrot.slane %v1329_v4, 2  ;;  %v663_v18 = vrot.slane %v1338_v9, 1  ;;  %v665_v19 = vrot.slane %v1341_v10, 1  ;;  %v192_v36 = vld [vmem:[%s1314_s17 + $0x50] sm:$0x1]  ;;  %v1418_v63 = vld [vmem:[%s1314_s17 + $0x38] sm:$0xff] }
  0x13   : > { %392 = vrot.lane.b32.xlu1 %v383_v13, %s1271_s18  ;;  %v283_v17 = vsel %vm274_vm1, %v280_v8, %v282_v11  ;;  %v628_v20 = vshrl.u32 %v1320_v1, 16  ;;  %v424_v21 = vshll.u32 %v1338_v9, 16  ;;  %v631_v22 = vshll.u32 %v1320_v1, 16 }
  0x14   : > { %292 = vrot.lane.b32.xlu0 %v283_v17, %s1272_s19  ;;  %v687_v23 = vrot.slane %v1323_v2, 2  ;;  %v333_v24 = vsel %vm324_vm2, %v330_v14, %v332_v15  ;;  %v621_v25 = vrot.slane %v619_v12, 3  ;;  %v624_v26 = vrot.slane %v622_v16, 4  ;;  %v203_v12 = vld [vmem:[%s1314_s17 + $0x78] sm:$0x3] }
  0x15   : > { %v689_v27 = vrot.slane %v1326_v3, 2  ;;  %v666_v28 = vsel %vm274_vm1, %v663_v18, %v665_v19  ;;  %v432_v29 = vshll.u32 %v1341_v10, 16  ;;  %v485_v30 = vshrl.u32 %v1323_v2, 16 }
  0x16   : > { %v488_v31 = vshll.u32 %v1323_v2, 16  ;;  %v630_v32 = vrot.slane %v628_v20, 3  ;;  %v1380_v33 = vrot.slane %v424_v21, 1  ;;  %v428_v34 = vshrl.u32 %v1338_v9, 16 }
  0x17   : > { %v690_v35 = vsel %vm324_vm2, %v687_v23, %v689_v27  ;;  %v633_v37 = vrot.slane %v631_v22, 4  ;;  %v487_v38 = vrot.slane %v485_v30, 1  ;;  %v494_v40 = vshrl.u32 %v1326_v3, 16  ;;  %v215_v22 = vld [vmem:[%s1314_s17 + $0x28] sm:$0x1] }
  0x18   : > { %699 = vrot.lane.b32.xlu2 %v690_v35, %s1273_s20  ;;  %v490_v39 = vrot.slane %v488_v31, 2  ;;  %v497_v41 = vshll.u32 %v1326_v3, 16  ;;  %v1393_v42 = vrot.slane %v432_v29, 1  ;;  %v267_v43 = vunpack.c.l.b16 %v192_v36  ;;  %v1441_v29 = vld [vmem:[%s1314_s17 + $0x88] sm:$0xff]  ;;  %v216_v36 = vld [vmem:[%s1314_s17 + $0x50] sm:$0x3] }
  0x19   : > { %v496_v44 = vrot.slane %v494_v40, 1  ;;  %v430_v45 = vor.u32 %v428_v34, %v1380_v33  ;;  %v552_v48 = vshrl.u32 %v1329_v4, 16  ;;  %v1400_v49 = vor.u32 %v624_v26, %v621_v25  ;;  %v1434_v25 = vld [vmem:[%s1314_s17 + $0x60] sm:$0xff]  ;;  %v1450_v34 = vld [vmem:[%s1314_s17 + $0x10] sm:$0xff] }
  0x1a   : > { %v1397_v46 = vor.u32 %v490_v39, %v487_v38  ;;  %v499_v47 = vrot.slane %v497_v41, 2  ;;  %v1402_v50 = vor.u32 %v633_v37, %v630_v32  ;;  %v555_v51 = vshll.u32 %v1329_v4, 16  ;;  %v214_v26 = vld [vmem:[%s1314_s17 + $0xa0] sm:$0x7] }
  0x1b   : > { %675 = vrot.lane.b32.xlu1 %v666_v28, %s1274_s21  ;;  %v561_v52 = vshrl.u32 %v1332_v5, 16  ;;  %v554_v54 = vrot.slane %v552_v48, 2  ;;  %v564_v55 = vshll.u32 %v1332_v5, 16  ;;  %v435_v58 = vsel %vm399_vm3, %v430_v45, %v1393_v42 }
  0x1c   : > { %342 = vrot.lane.b32.xlu0 %v333_v24, %s1275_s22  ;;  %v1406_v53 = vor.u32 %v499_v47, %v496_v44  ;;  %v557_v56 = vrot.slane %v555_v51, 3  ;;  %v273_v59 = vpack.c.b16 %v267_v43, %v267_v43  ;;  %v635_v62 = vsel %vm591_vm5, %v1400_v49, %v1402_v50  ;;  %v217_v44 = vld [vmem:[%s1314_s17 + $0x78] sm:$0x7] }
  0x1d   : > { %v563_v57 = vrot.slane %v561_v52, 2  ;;  %v566_v61 = vrot.slane %v564_v55, 3  ;;  %v278_v20 = vrot.slane %v1418_v63, 1  ;;  %v317_v21 = vunpack.c.l.b16 %v203_v12 }
  0x1e   : > { %v501_v60 = vsel %vm457_vm4, %v1397_v46, %v1406_v53  ;;  %v1422_v13 = vor.u32 %v557_v56, %v554_v54  ;;  %v284_v17 = vrot.slane %v273_v59, 1  ;;  %v397_v30 = vunpack.c.l.b16 %v215_v22 }
  0x1f   : > { %v1424_v16 = vor.u32 %v566_v61, %v563_v57  ;;  %v281_v31 = vsel %vm274_vm1, %v278_v20, %v280_v8  ;;  %v323_v32 = vpack.c.b16 %v317_v21, %v317_v21  ;;  %v328_v35 = vrot.slane %v1434_v25, 2 }
  0x20   : > { %517 = vrot.lane.b32.xlu2 %v501_v60, %s1276_s23  ;;  %v285_v28 = vsel %vm274_vm1, %v282_v11, %v284_v17  ;;  %v367_v11 = vunpack.c.l.b16 %v214_v26  ;;  %v378_v37 = vrot.slane %v1441_v29, 3  ;;  %v1457_v38 = vpack.c.b16 %v397_v30, %v397_v30  ;;  %v182_v30 = vld [vmem:[%s1314_s17 + $0x28] sm:$0xe] }
  0x21   : > { %v568_v24 = vsel %vm524_vm6, %v1422_v13, %v1424_v16  ;;  %v334_v8 = vrot.slane %v323_v32, 2  ;;  %v416_v39 = vshll.u32 %v1450_v34, 16  ;;  %v455_v40 = vunpack.c.l.b16 %v216_v36 }
  0x22   : > { %v331_v41 = vsel %vm324_vm2, %v328_v35, %v330_v14  ;;  %v373_v43 = vpack.c.b16 %v367_v11, %v367_v11  ;;  %v381_v45 = vsel %vm374_vm0, %v378_v37, %v380_v6  ;;  %v436_v47 = vshrl.u32 %v1341_v10, 16 }
  0x23   : > { %450 = vrot.lane.b32.xlu1 %v435_v58, %s1277_s24  ;;  %v440_v48 = vshll.u32 %v1457_v38, 16  ;;  %v335_v4 = vsel %vm324_vm2, %v332_v15, %v334_v8  ;;  %v1476_v51 = vrot.slane %v416_v39, 1  ;;  %v420_v14 = vshrl.u32 %v1450_v34, 16 }
  0x24   : > { %651 = vrot.lane.b32.xlu0 %v635_v62, %s1278_s25  ;;  %v1480_v52 = vpack.c.b16 %v455_v40, %v455_v40  ;;  %v384_v0 = vrot.slane %v373_v43, 3  ;;  %v476_v54 = vshrl.u32 %v1418_v63, 16  ;;  %v479_v6 = vshll.u32 %v1418_v63, 16 }
  0x25   : > { %v522_v55 = vunpack.c.l.b16 %v217_v44  ;;  %v438_v5 = vor.u32 %v436_v47, %v1393_v42  ;;  %v442_v15 = vrot.slane %v440_v48, 1  ;;  %v543_v56 = vshrl.u32 %v1434_v25, 16  ;;  %v1518_v47 = vld [vmem:[%s1314_s17 + $0x30] sm:$0xff] }
  0x26   : > { %v546_v57 = vshll.u32 %v1434_v25, 16  ;;  %v422_v58 = vor.u32 %v420_v14, %v1476_v51  ;;  %v503_v59 = vshrl.u32 %v1480_v52, 16  ;;  %v506_v60 = vshll.u32 %v1480_v52, 16  ;;  %v1587_v25 = vld [vmem:[%s1314_s17] sm:$0xff]  }
  0x27   : > { %v385_v61 = vsel %vm374_vm0, %v382_v7, %v384_v0  ;;  %v478_v62 = vrot.slane %v476_v54, 1  ;;  %v481_v42 = vrot.slane %v479_v6, 2  ;;  %v523_v12 = vpack.c.b16 %v522_v55, %v522_v55  ;;  %v218_v7 = vld [vmem:[%s1314_s17 + $0xa0] sm:$0xf]  ;;  %v1073_v55 = vld [vmem:[%s1314_s17 + $0x50] sm:$0xc] }
  0x28   : > { %584 = vrot.lane.b32.xlu2 %v568_v24, %s1279_s26  ;;  %v443_v17 = vsel %vm399_vm3, %v438_v5, %v442_v15  ;;  %v545_v21 = vrot.slane %v543_v56, 2  ;;  %v548_v22 = vrot.slane %v546_v57, 3  ;;  %v427_v24 = vsel %vm399_vm3, %v422_v58, %v1380_v33  ;;  %v1150_v5 = vld [vmem:[%s1314_s17 + $0x50] sm:$0xf0] }
  0x29   : > { %v505_v26 = vrot.slane %v503_v59, 1  ;;  %v1503_v1 = vor.u32 %v481_v42, %v478_v62  ;;  %v570_v32 = vshrl.u32 %v523_v12, 16  ;;  %v573_v36 = vshll.u32 %v523_v12, 16 }
  0x2a   : > { %v1508_v11 = vor.u32 %v548_v22, %v545_v21  ;;  %v257_v33 = vunpack.c.l.b16 %v182_v30  ;;  %v589_v40 = vunpack.c.l.b16 %v218_v7  ;;  %v610_v0 = vshrl.u32 %v1441_v29, 16  ;;  %v1155_v30 = vld [vmem:[%s1314_s17 + $0x78] sm:$0xf0] }
  0x2b   : > { %294 = vrot.lane.b32.xlu1 %v285_v28, %s1272_s19  ;;  %v508_v28 = vrot.slane %v506_v60, 2  ;;  %v572_v43 = vrot.slane %v570_v32, 2  ;;  %v575_v44 = vrot.slane %v573_v36, 3  ;;  %v613_v54 = vshll.u32 %v1441_v29, 16  ;;  %v1541_v60 = vld [vmem:[%s1314_s17 + $0x58] sm:$0xff] }
  0x2c   : > { %290 = vrot.lane.b32.xlu0 %v281_v31, %s1272_s19  ;;  %v1501_v31 = vld [vmem:[%s1314_s17 + $0x2c] sm:$0xf]  ;;  %v612_v57 = vrot.slane %v610_v0, 3  ;;  %v667_v7 = vrot.slane %v1457_v38, 1  ;;  %v661_v32 = vrot.slane %v1450_v34, 1 }
  0x2d   : > { %v258_v8 = vunpack.c.l.b16 %v1501_v31  ;;  %v509_v39 = vor.u32 %v508_v28, %v505_v26  ;;  %v576_v14 = vor.u32 %v575_v44, %v572_v43  ;;  %v615_v58 = vrot.slane %v613_v54, 4  ;;  %v1093_v28 = vld [vmem:[%s1314_s17 + $0x78] sm:$0x8] }
  0x2e   : > { %v1569_v36 = vor.u32 %v1155_v30, %v1093_v28  ;;  %v664_v38 = vsel %vm274_vm1, %v661_v32, %v663_v18  ;;  %v814_v18 = vld [vmem:[%s1775_s1 + $0x30] sm:$0x3]  ;;  %v403_v43 = vshll.u32 %v1587_v25, 16 }
  0x2f   : > { %v1522_v48 = vpack.c.b16 %v258_v8, %v257_v33  ;;  %v577_v56 = vsel %vm524_vm6, %v1424_v16, %v576_v14  ;;  %v1572_v33 = vld [vmem:[%s1314_s17 + $0x8] sm:$0xff]  ;;  %v844_v44 = vunpack.c.l.b16 %v814_v18 }
  0x30   : > { %340 = vrot.lane.b32.xlu2 %v331_v41, %s1275_s22  ;;  %v492_v41 = vsel %vm457_vm4, %v1503_v1, %v1397_v46  ;;  %v590_v46 = vpack.c.b16 %v589_v40, %v589_v40  ;;  %v408_v40 = vshll.u32 %v1572_v33, 16 }
  0x31   : > { %v275_v6 = vrot.slane %v1522_v48, 1  ;;  %v851_v14 = vpack.c.b16 %v844_v44, %v844_v44  ;;  %v462_v2 = vshll.u32 %v1522_v48, 16 }
  0x32   : > { %v640_v15 = vshll.u32 %v590_v46, 16 }
  0x33   : > { %390 = vrot.lane.b32.xlu1 %v381_v45, %s1271_s18  ;;  %v559_v45 = vsel %vm524_vm6, %v1508_v11, %v1422_v13  ;;  %v276_v13 = vrot.slane %v1518_v47, 1 }
  0x34   : > { %344 = vrot.lane.b32.xlu0 %v335_v4, %s1275_s22  ;;  %v510_v4 = vsel %vm457_vm4, %v1406_v53, %v509_v39  ;;  %v637_v53 = vshrl.u32 %v590_v46, 16  ;;  %v642_v12 = vrot.slane %v640_v15, 4  ;;  %v1578_v39 = vld [vmem:[%s1314_s17 + $0x80] sm:$0xff]  ;;  %v412_v46 = vshrl.u32 %v1572_v33, 16 }
  0x35   : > { %v279_v59 = vsel %vm274_vm1, %v276_v13, %v278_v20  ;;  %v277_v62 = vsel %vm274_vm1, %v275_v6, %v276_v13  ;;  %v326_v20 = vrot.slane %v1541_v60, 2  ;;  %v401_v13 = vshrl.u32 %v1587_v25, 16 }
  0x36   : > { %v639_v42 = vrot.slane %v637_v53, 3  ;;  %v405_v6 = vrot.slane %v403_v43, 1  ;;  %v459_v53 = vshrl.u32 %v1522_v48, 16  ;;  %v534_v15 = vshrl.u32 %v1541_v60, 16  ;;  %v1165_v48 = vld [vmem:[%s1775_s1 + $0x28] sm:$0xff] }
  0x38   : > { %394 = vrot.lane.b32.xlu2 %v385_v61, %s1271_s18  ;;  %v1543_v61 = vor.u32 %v1150_v5, %v1073_v55  ;;  %v643_v21 = vor.u32 %v642_v12, %v639_v42  ;;  %v871_v55 = vsel %vm869_vm7, %v851_v14, 0  ;;  %v691_v5 = vrot.slane %v1480_v52, 2  ;;  %v1195_v14 = vld [vmem:[%s1314_s17] sm:$0xf0] }
  0x39   : > { %1204 = vmatpush.bf16.msra.mxu3 %v871_v55  ;;  %1203 = vmatpush.bf16.msra.mxu2 %v871_v55  ;;  %v537_v52 = vshll.u32 %v1541_v60, 16 }
  0x3a   : > { %v325_v16 = vrot.slane %v1543_v61, 2  ;;  %v644_v26 = vsel %vm591_vm5, %v1402_v50, %v643_v21  ;;  %v668_v50 = vsel %vm274_vm1, %v665_v19, %v667_v7  ;;  %v685_v19 = vrot.slane %v1418_v63, 2  ;;  %874 = vmatpush.bf16.msra.mxu0 %v871_v55  ;;  %1202 = vmatpush.bf16.msra.mxu1 %v871_v55 }
  0x3b   : > { %452 = vrot.lane.b32.xlu1 %v443_v17, %s1277_s24  ;;  %v1547_v17 = vor.u32 %v615_v58, %v612_v57  ;;  %v526_v29 = vshrl.u32 %v1543_v61, 16  ;;  %v470_v57 = vshll.u32 %v1518_v47, 16  ;;  %v406_v58 = vor.u32 %v405_v6, %v401_v13 }
  0x3c   : > { %448 = vrot.lane.b32.xlu0 %v427_v24, %s1277_s24  ;;  %v327_v24 = vsel %vm324_vm2, %v325_v16, %v326_v20  ;;  %v688_v0 = vsel %vm324_vm2, %v685_v19, %v687_v23  ;;  %v1164_v16 = vld [vmem:[%s1775_s1 + $0x20] sm:$0xff]  ;;  %v539_v21 = vrot.slane %v537_v52, 3  ;;  %v601_v7 = vshrl.u32 %v1578_v39, 16 }
  0x3d   : > { %v626_v22 = vsel %vm591_vm5, %v1547_v17, %v1400_v49  ;;  %v329_v49 = vsel %vm324_vm2, %v326_v20, %v328_v35  ;;  %v375_v35 = vrot.slane %v1569_v36, 3  ;;  %1207 = vmatpush.bf16.msra.mxu3 %v1165_v48  ;;  %1206 = vmatpush.bf16.msra.mxu2 %v1165_v48  ;;  %v528_v42 = vrot.slane %v526_v29, 2 }
  0x3e   : > { %875 = vmatpush.bf16.msra.mxu0 %v1165_v48  ;;  %v536_v20 = vrot.slane %v534_v15, 2  ;;  %v472_v3 = vrot.slane %v470_v57, 2  ;;  %1205 = vmatpush.bf16.msra.mxu1 %v1165_v48 }
  0x40   : > { %515 = vrot.lane.b32.xlu2 %v492_v41, %s1276_s23  ;;  %v376_v41 = vrot.slane %v1578_v39, 3  ;;  %v540_v28 = vor.u32 %v539_v21, %v536_v20 }
  0x41   : > { %1210 = vmatpush.bf16.msra.mxu3 %v1164_v16  ;;  %1209 = vmatpush.bf16.msra.mxu2 %v1164_v16 }
  0x42   : > { %v379_v54 = vsel %vm374_vm0, %v376_v41, %v378_v37  ;;  %v529_v37 = vshll.u32 %v1543_v61, 16  ;;  %v461_v61 = vrot.slane %v459_v53, 1  ;;  %876 = vmatpush.bf16.msra.mxu0 %v1164_v16  ;;  %1208 = vmatpush.bf16.msra.mxu1 %v1164_v16  ;;  %v550_v6 = vsel %vm524_vm6, %v540_v28, %v1508_v11 }
  0x43   : > { %582 = vrot.lane.b32.xlu1 %v559_v45, %s1279_s26  ;;  %v377_v45 = vsel %vm374_vm0, %v375_v35, %v376_v41  ;;  %vm791_vm0 = vcmask 736256  }
  0x44   : > { %519 = vrot.lane.b32.xlu0 %v510_v4, %s1276_s23  ;;  %v410_v4 = vrot.slane %v408_v40, 1  ;;  %v531_v12 = vrot.slane %v529_v37, 3  ;;  %v1162_v40 = vld [vmem:[%s1775_s1 + $0x10] sm:$0xff] }
  0x46   : > { %v414_v23 = vor.u32 %v412_v46, %v410_v4 }
  0x48   : > { %586 = vrot.lane.b32.xlu2 %v577_v56, %s1279_s26  ;;  %v467_v56 = vshrl.u32 %v1518_v47, 16  ;;  %v419_v60 = vsel %vm399_vm3, %v414_v23, %v1476_v51  ;;  %v1163_v51 = vld [vmem:[%s1775_s1 + $0x18] sm:$0xff] }
  0x49   : > { %1213 = vmatpush.bf16.msra.mxu3 %v1163_v51  ;;  %1212 = vmatpush.bf16.msra.mxu2 %v1163_v51 }
  0x4a   : > { %877 = vmatpush.bf16.msra.mxu0 %v1163_v51  ;;  %1211 = vmatpush.bf16.msra.mxu1 %v1163_v51 }
  0x4b   : > { %288 = vrot.lane.b32.xlu1 %v279_v59, %s1272_s19  ;;  %v692_v59 = vsel %vm324_vm2, %v689_v27, %v691_v5  ;;  %v411_v27 = vsel %vm399_vm3, %v406_v58, %v410_v4  ;;  %v1161_v4 = vld [vmem:[%s1775_s1 + $0x8] sm:$0xff] }
  0x4c   : > { %286 = vrot.lane.b32.xlu0 %v277_v62, %s1272_s19  ;;  %v464_v62 = vrot.slane %v462_v2, 2  ;;  %v1160_v2 = vld [vmem:[%s1775_s1] sm:$0xff] }
  0x4d   : > { %1216 = vmatpush.bf16.msra.mxu3 %v1162_v40  ;;  %1215 = vmatpush.bf16.msra.mxu2 %v1162_v40 }
  0x4e   : > { %878 = vmatpush.bf16.msra.mxu0 %v1162_v40  ;;  %1214 = vmatpush.bf16.msra.mxu1 %v1162_v40 }
  0x50   : > { %649 = vrot.lane.b32.xlu2 %v626_v22, %s1278_s25  ;;  %v469_v22 = vrot.slane %v467_v56, 1 }
  0x51   : > { %1219 = vmatpush.bf16.msra.mxu3 %v1161_v4  ;;  %1218 = vmatpush.bf16.msra.mxu2 %v1161_v4 }
  0x52   : > { %v473_v30 = vor.u32 %v472_v3, %v469_v22  ;;  %879 = vmatpush.bf16.msra.mxu0 %v1161_v4  ;;  %1217 = vmatpush.bf16.msra.mxu1 %v1161_v4 }
  0x53   : > { %336 = vrot.lane.b32.xlu1 %v327_v24, %s1275_s22  ;;  %v465_v24 = vor.u32 %v464_v62, %v461_v61 }
  0x54   : > { %653 = vrot.lane.b32.xlu0 %v644_v26, %s1278_s25  ;;  %v532_v26 = vor.u32 %v531_v12, %v528_v42  ;;  %v483_v43 = vsel %vm457_vm4, %v473_v30, %v1503_v1 }
  0x55   : > { %v474_v35 = vsel %vm457_vm4, %v465_v24, %v473_v30  ;;  %1222 = vmatpush.bf16.msra.mxu3 %v1160_v2  ;;  %1221 = vmatpush.bf16.msra.mxu2 %v1160_v2 }
  0x56   : > { %v541_v41 = vsel %vm524_vm6, %v532_v26, %v540_v28  ;;  %880 = vmatpush.bf16.msra.mxu0 %v1160_v2  ;;  %1220 = vmatpush.bf16.msra.mxu1 %v1160_v2 }
  0x58   : > { %338 = vrot.lane.b32.xlu2 %v329_v49, %s1275_s22  ;;  %v604_v49 = vshll.u32 %v1578_v39, 16  ;;  %v603_v39 = vrot.slane %v601_v7, 3 }
  0x5a   : > { %v606_v18 = vrot.slane %v604_v49, 4 }
  0x5b   : > { %677 = vrot.lane.b32.xlu1 %v668_v50, %s1274_s21  ;;  %v593_v50 = vshrl.u32 %v1569_v36, 16 }
  0x5c   : > { %673 = vrot.lane.b32.xlu0 %v664_v38, %s1274_s21  ;;  %v596_v38 = vshll.u32 %v1569_v36, 16  ;;  %v607_v1 = vor.u32 %v606_v18, %v603_v39 }
  0x5d   : > { %v595_v36 = vrot.slane %v593_v50, 3 }
  0x5e   : > { %v598_v44 = vrot.slane %v596_v38, 4  ;;  %v617_v5 = vsel %vm591_vm5, %v607_v1, %v1547_v17  ;;  %v659_v17 = vrot.slane %v1572_v33, 1 }
  0x60   : > { %386 = vrot.lane.b32.xlu2 %v377_v45, %s1271_s18  ;;  %v220_v45 = vld [vmem:[%s1314_s17 + $0x28] sm:$0xc]  ;;  %v599_v13 = vor.u32 %v598_v44, %v595_v36  ;;  %v662_v52 = vsel %vm274_vm1, %v659_v17, %v661_v32 }
  0x62   : > { %v608_v23 = vsel %vm591_vm5, %v599_v13, %v607_v1 }
  0x63   : > { %697 = vrot.lane.b32.xlu1 %v688_v0, %s1273_s20  ;;  %v1196_v0 = vld [vmem:[%s1314_s17] sm:$0xe] }
  0x64   : > { %388 = vrot.lane.b32.xlu0 %v379_v54, %s1271_s18  ;;  %v680_v54 = vunpack.c.l.b16 %v220_v45  ;;  %v1197_v55 = vor.u32 %v1196_v0, %v1195_v14  ;;  %s1224_s18 = smul.u32 40, %s1779_s13 }
  0x66   : > { %v681_v53 = vpack.c.b16 %v258_v8, %v680_v54  ;;  %v658_v11 = vrot.slane %v1197_v55, 1  ;;  %v683_v8 = vrot.slane %v1518_v47, 2 }
  0x68   : > { %701 = vrot.lane.b32.xlu2 %v692_v59, %s1273_s20  ;;  %v682_v31 = vrot.slane %v681_v53, 2  ;;  %v660_v37 = vsel %vm274_vm1, %v658_v11, %v659_v17  ;;  %v686_v48 = vsel %vm324_vm2, %v683_v8, %v685_v19  ;;  %vm858_vm1 = vcmask 818176  }
  0x6a   : > { %v684_v15 = vsel %vm324_vm2, %v682_v31, %v683_v8 }
  0x6b   : > { %446 = vrot.lane.b32.xlu1 %v419_v60, %s1277_s24 }
  0x6c   : > { %444 = vrot.lane.b32.xlu0 %v411_v27, %s1277_s24 }
  0x70   : > { %511 = vrot.lane.b32.xlu2 %v474_v35, %s1276_s23 }
  0x72   : > { %v1657_v46 = vpop.permute.xlu2 %699 }
  0x73   : > { %578 = vrot.lane.b32.xlu1 %v541_v41, %s1279_s26 }
  0x74   : > { %513 = vrot.lane.b32.xlu0 %v483_v43, %s1276_s23 }
  0x78   : > { %580 = vrot.lane.b32.xlu2 %v550_v6, %s1279_s26 }
  0x7a   : > { %v518_v29 = vpop.permute.xlu2 %517 }
  0x7b   : > { %647 = vrot.lane.b32.xlu1 %v617_v5, %s1278_s25 }
  0x7c   : > { %645 = vrot.lane.b32.xlu0 %v608_v23, %s1278_s25 }
  0x80   : > { %669 = vrot.lane.b32.xlu2 %v660_v37, %s1274_s21 }
  0x82   : > { %v585_v56 = vpop.permute.xlu2 %584 }
  0x83   : > { %693 = vrot.lane.b32.xlu1 %v684_v15, %s1273_s20 }
  0x84   : > { %671 = vrot.lane.b32.xlu0 %v662_v52, %s1274_s21  ;;  %s1756_s21 = scalar_lea.vmem %s1777_s3, %s1224_s18 }
  0x85   : > { %v393_v57 = vpop.permute.xlu1 %392 }
  0x86   : > { %v293_v47 = vpop.permute.xlu0 %292 }
  0x87   : > { %v711_v32 = vsel %vm703_vm8, %v1338_v9, %v293_v47 }
  0x88   : > { %695 = vrot.lane.b32.xlu2 %v686_v48, %s1273_s20 }
  0x8a   : > { %v341_v58 = vpop.permute.xlu2 %340 }
  0x8d   : > { %v676_v59 = vpop.permute.xlu1 %675 }
  0x8e   : > { %v343_v61 = vpop.permute.xlu0 %342 }
  0x8f   : > { %v722_v62 = vsel %vm714_vm9, %v711_v32, %v343_v61 }
  0x90   : > { %v733_v63 = vsel %vm725_vm10, %v722_v62, %v393_v57 }
  0x92   : > { %v395_v60 = vpop.permute.xlu2 %394 }
  0x95   : > { %v451_v19 = vpop.permute.xlu1 %450 }
  0x96   : > { %v652_v42 = vpop.permute.xlu0 %651  ;;  %v744_v12 = vsel %vm736_vm11, %v733_v63, %v451_v19 }
  0x97   : > { %v755_v16 = vsel %vm747_vm12, %v744_v12, %v518_v29 }
  0x98   : > { %v766_v20 = vsel %vm758_vm13, %v755_v16, %v585_v56 }
  0x99   : > { %v777_v9 = vsel %vm769_vm14, %v766_v20, %v652_v42 }
  0x9a   : > { %v788_v21 = vsel %vm780_vm15, %v777_v9, %v676_v59  ;;  %v516_v3 = vpop.permute.xlu2 %515 }
  0x9b   : > { %v799_v22 = vsel %vm791_vm0, %v788_v21, %v1657_v46 }
  0x9c   : > { %1138 = vmatmul.msk.bf16.vlgmr.msra.gmra.mxu3 %vm858_vm1, %v799_v22 }
  0x9d   : > { %v295_v27 = vpop.permute.xlu1 %294 }
  0x9e   : > { %v291_v24 = vpop.permute.xlu0 %290  ;;  %v713_v36 = vsel %vm703_vm8, %v1341_v10, %v295_v27 }
  0xa2   : > { %v587_v51 = vpop.permute.xlu2 %586 }
  0xa5   : > { %v391_v26 = vpop.permute.xlu1 %390 }
  0xa6   : > { %v345_v28 = vpop.permute.xlu0 %344 }
  0xa7   : > { %v724_v44 = vsel %vm714_vm9, %v713_v36, %v345_v28 }
  0xa8   : > { %v735_v0 = vsel %vm725_vm10, %v724_v44, %v395_v60 }
  0xaa   : > { %v650_v49 = vpop.permute.xlu2 %649 }
  0xad   : > { %v453_v30 = vpop.permute.xlu1 %452 }
  0xae   : > { %v449_v7 = vpop.permute.xlu0 %448  ;;  %v746_v1 = vsel %vm736_vm11, %v735_v0, %v453_v30  ;;  %v1748_v30 = vld [vmem:[%s1776_s2] ss:$0 sm:$0xff] }
  0xb2   : > { %v339_v35 = vpop.permute.xlu2 %338 }
  0xb5   : > { %v583_v50 = vpop.permute.xlu1 %582 }
  0xb6   : > { %v520_v38 = vpop.permute.xlu0 %519 }
  0xb7   : > { %v757_v54 = vsel %vm747_vm12, %v746_v1, %v520_v38 }
  0xb8   : > { %v768_v6 = vsel %vm758_vm13, %v757_v54, %v587_v51 }
  0xba   : > { %v387_v43 = vpop.permute.xlu2 %386 }
  0xbd   : > { %v289_v40 = vpop.permute.xlu1 %288 }
  0xbe   : > { %v707_v41 = vsel %vm703_vm8, %v1572_v33, %v289_v40  ;;  %v287_v39 = vpop.permute.xlu0 %286  ;;  %v709_v33 = vsel %vm703_vm8, %v1450_v34, %v291_v24 }
  0xbf   : > { %v718_v18 = vsel %vm714_vm9, %v707_v41, %v339_v35  ;;  %v705_v45 = vsel %vm703_vm8, %v1587_v25, %v287_v39  ;;  %v720_v10 = vsel %vm714_vm9, %v709_v33, %v341_v58 }
  0xc0   : > { %v731_v13 = vsel %vm725_vm10, %v720_v10, %v391_v26 }
  0xc1   : > { %v742_v55 = vsel %vm736_vm11, %v731_v13, %v449_v7 }
  0xc2   : > { %v702_v25 = vpop.permute.xlu2 %701  ;;  %v753_v11 = vsel %vm747_vm12, %v742_v55, %v516_v3 }
  0xc3   : > { %v764_v29 = vsel %vm758_vm13, %v753_v11, %v583_v50 }
  0xc4   : > { %v775_v31 = vsel %vm769_vm14, %v764_v29, %v650_v49 }
  0xc5   : > { %v337_v4 = vpop.permute.xlu1 %336 }
  0xc6   : > { %v716_v46 = vsel %vm714_vm9, %v705_v45, %v337_v4  ;;  %v654_v14 = vpop.permute.xlu0 %653 }
  0xc7   : > { %v779_v5 = vsel %vm769_vm14, %v768_v6, %v654_v14  ;;  %v727_v61 = vsel %vm725_vm10, %v716_v46, %v387_v43 }
  0xca   : > { %v512_v52 = vpop.permute.xlu2 %511 }
  0xcd   : > { %v678_v53 = vpop.permute.xlu1 %677 }
  0xce   : > { %v790_v2 = vsel %vm780_vm15, %v779_v5, %v678_v53  ;;  %v674_v23 = vpop.permute.xlu0 %673 }
  0xcf   : > { %v801_v34 = vsel %vm791_vm0, %v790_v2, %v702_v25  ;;  %v786_v8 = vsel %vm780_vm15, %v775_v31, %v674_v23 }
  0xd0   : > { %1139 = vmatmul.msk.bf16.gmra.mxu3 %vm858_vm1, %v801_v34 }
  0xd2   : > { %v581_v47 = vpop.permute.xlu2 %580 }
  0xd5   : > { %v698_v17 = vpop.permute.xlu1 %697 }
  0xd6   : > { %v389_v37 = vpop.permute.xlu0 %388  ;;  %v797_v15 = vsel %vm791_vm0, %v786_v8, %v698_v17 }
  0xd7   : > { %1137 = vmatmul.msk.bf16.vlgmr.msra.gmra.mxu2 %vm858_vm1, %v797_v15  ;;  %v729_v63 = vsel %vm725_vm10, %v718_v18, %v389_v37 }
  0xda   : > { %v670_v59 = vpop.permute.xlu2 %669 }
  0xdd   : > { %v447_v56 = vpop.permute.xlu1 %446 }
  0xde   : > { %v445_v57 = vpop.permute.xlu0 %444  ;;  %v740_v42 = vsel %vm736_vm11, %v729_v63, %v447_v56 }
  0xdf   : > { %v738_v32 = vsel %vm736_vm11, %v727_v61, %v445_v57 }
  0xe0   : > { %v749_v19 = vsel %vm747_vm12, %v738_v32, %v512_v52 }
  0xe2   : > { %v696_v3 = vpop.permute.xlu2 %695 }
  0xe5   : > { %v579_v48 = vpop.permute.xlu1 %578 }
  0xe6   : > { %v514_v58 = vpop.permute.xlu0 %513  ;;  %v760_v12 = vsel %vm758_vm13, %v749_v19, %v579_v48 }
  0xe7   : > { %v751_v16 = vsel %vm747_vm12, %v740_v42, %v514_v58 }
  0xe8   : > { %v762_v9 = vsel %vm758_vm13, %v751_v16, %v581_v47 }
  0xed   : > { %v648_v62 = vpop.permute.xlu1 %647 }
  0xee   : > { %v646_v60 = vpop.permute.xlu0 %645  ;;  %v773_v27 = vsel %vm769_vm14, %v762_v9, %v648_v62 }
  0xef   : > { %v771_v20 = vsel %vm769_vm14, %v760_v12, %v646_v60 }
  0xf0   : > { %v782_v21 = vsel %vm780_vm15, %v771_v20, %v670_v59 }
  0xf5   : > { %v694_v22 = vpop.permute.xlu1 %693 }
  0xf6   : > { %v672_v24 = vpop.permute.xlu0 %671  ;;  %v793_v51 = vsel %vm791_vm0, %v782_v21, %v694_v22 }
  0xf7   : > { %v784_v26 = vsel %vm780_vm15, %v773_v27, %v672_v24  ;;  %1135 = vmatmul.msk.bf16.vlgmr.msra.gmra.mxu0 %vm858_vm1, %v793_v51 }
  0xf8   : > { %v795_v28 = vsel %vm791_vm0, %v784_v26, %v696_v3 }
  0xf9   : > { %1136 = vmatmul.msk.bf16.vlgmr.msra.gmra.mxu1 %vm858_vm1, %v795_v28 }
 0x11f   : > { %v897_v7 = vpop.f32.mrf.mxu3 }
 0x120   : > { %v898_v49 = vadd.f32 %v1748_v30, %v897_v7 }
 0x122   : > { %v913_v50 = vmul.f32 0.5, %v898_v49 }
 0x124   : > { %1243 = vtanh.f32 %v913_v50 }
 0x127   : > { %v899_v38 = vpop.f32.mrf.mxu3 }
 0x128   : > { %v900_v35 = vadd.f32 %v1748_v30, %v899_v38 }
 0x12a   : > { %v914_v40 = vmul.f32 0.5, %v900_v35  ;;  %v1244_v41 = vpop.eup %1243 }
 0x12b   : > { %v933_v39 = vadd.f32 1.0, %v1244_v41 }
 0x12c   : > { %1245 = vtanh.f32 %v914_v40 }
 0x12d   : > { %v943_v43 = vmul.f32 0.5, %v933_v39 }
 0x12f   : > { %v953_v45 = vmul.f32 %v943_v43, %v898_v49 }
 0x132   : > { %v1246_v18 = vpop.eup %1245 }
 0x133   : > { %v934_v36 = vadd.f32 1.0, %v1246_v18 }
 0x135   : > { %v944_v44 = vmul.f32 0.5, %v934_v36 }
 0x137   : > { %v954_v4 = vmul.f32 %v944_v44, %v900_v35 }
 0x139   : > { %v1188_v46 = vpack.c.bf16 %v954_v4, %v953_v45 }
 0x13b   : > { %1200 = vst [vmem:[%s1756_s21 + $0x18] sm:$0xff] %v1188_v46  }
 0x153   : > { %v902_v14 = vpop.f32.mrf.mxu3 }
 0x154   : > { %v903_v0 = vadd.f32 %v1748_v30, %v902_v14 }
 0x156   : > { %v915_v33 = vmul.f32 0.5, %v903_v0 }
 0x158   : > { %1247 = vtanh.f32 %v915_v33 }
 0x15a   : > { %v892_v1 = vpop.f32.mrf.mxu2 }
 0x15b   : > { %v893_v54 = vadd.f32 %v1748_v30, %v892_v1  ;;  %v904_v10 = vpop.f32.mrf.mxu3 }
 0x15c   : > { %v905_v13 = vadd.f32 %v1748_v30, %v904_v10 }
 0x15d   : > { %v911_v6 = vmul.f32 0.5, %v893_v54 }
 0x15e   : > { %v916_v25 = vmul.f32 0.5, %v905_v13  ;;  %v1248_v55 = vpop.eup %1247 }
 0x15f   : > { %v935_v53 = vadd.f32 1.0, %v1248_v55 }
 0x160   : > { %1249 = vtanh.f32 %v916_v25 }
 0x161   : > { %1251 = vtanh.f32 %v911_v6  ;;  %v945_v29 = vmul.f32 0.5, %v935_v53 }
 0x162   : > { %v894_v5 = vpop.f32.mrf.mxu2 }
 0x163   : > { %v895_v2 = vadd.f32 %v1748_v30, %v894_v5  ;;  %v955_v37 = vmul.f32 %v945_v29, %v903_v0 }
 0x165   : > { %v912_v23 = vmul.f32 0.5, %v895_v2 }
 0x166   : > { %v1250_v34 = vpop.eup %1249 }
 0x167   : > { %v1252_v11 = vpop.eup %1251  ;;  %v936_v31 = vadd.f32 1.0, %v1250_v34  ;;  %1253 = vtanh.f32 %v912_v23 }
 0x168   : > { %v931_v17 = vadd.f32 1.0, %v1252_v11 }
 0x169   : > { %v946_v8 = vmul.f32 0.5, %v936_v31 }
 0x16a   : > { %v941_v57 = vmul.f32 0.5, %v931_v17 }
 0x16b   : > { %v956_v15 = vmul.f32 %v946_v8, %v905_v13 }
 0x16c   : > { %v951_v58 = vmul.f32 %v941_v57, %v893_v54 }
 0x16d   : > { %v1254_v52 = vpop.eup %1253  ;;  %v1193_v56 = vpack.c.bf16 %v956_v15, %v955_v37 }
 0x16e   : > { %v932_v47 = vadd.f32 1.0, %v1254_v52 }
 0x16f   : > { %1201 = vst [vmem:[%s1756_s21 + $0x20] sm:$0xff] %v1193_v56  }
 0x170   : > { %v942_v48 = vmul.f32 0.5, %v932_v47 }
 0x172   : > { %v952_v59 = vmul.f32 %v942_v48, %v895_v2 }
 0x174   : > { %v1183_v61 = vpack.c.bf16 %v952_v59, %v951_v58  ;;  %v882_v32 = vpop.f32.mrf.mxu0 }
 0x175   : > { %v883_v62 = vadd.f32 %v1748_v30, %v882_v32 }
 0x176   : > { %1199 = vst [vmem:[%s1756_s21 + $0x10] sm:$0xff] %v1183_v61   ;;  %v887_v60 = vpop.f32.mrf.mxu1 }
 0x177   : > { %v907_v63 = vmul.f32 0.5, %v883_v62  ;;  %v888_v19 = vadd.f32 %v1748_v30, %v887_v60 }
 0x179   : > { %v909_v42 = vmul.f32 0.5, %v888_v19  ;;  %1255 = vtanh.f32 %v907_v63 }
 0x17b   : > { %1257 = vtanh.f32 %v909_v42 }
 0x17c   : > { %v884_v12 = vpop.f32.mrf.mxu0 }
 0x17d   : > { %v885_v16 = vadd.f32 %v1748_v30, %v884_v12 }
 0x17e   : > { %v889_v20 = vpop.f32.mrf.mxu1 }
 0x17f   : > { %v908_v9 = vmul.f32 0.5, %v885_v16  ;;  %v890_v21 = vadd.f32 %v1748_v30, %v889_v20  ;;  %v1256_v22 = vpop.eup %1255 }
 0x180   : > { %v927_v24 = vadd.f32 1.0, %v1256_v22 }
 0x181   : > { %1259 = vtanh.f32 %v908_v9  ;;  %v910_v3 = vmul.f32 0.5, %v890_v21  ;;  %v1258_v27 = vpop.eup %1257 }
 0x182   : > { %v929_v51 = vadd.f32 1.0, %v1258_v27  ;;  %v937_v28 = vmul.f32 0.5, %v927_v24 }
 0x183   : > { %1261 = vtanh.f32 %v910_v3 }
 0x184   : > { %v939_v50 = vmul.f32 0.5, %v929_v51  ;;  %v947_v40 = vmul.f32 %v937_v28, %v883_v62 }
 0x186   : > { %v949_v30 = vmul.f32 %v939_v50, %v888_v19 }
 0x187   : > { %v1260_v26 = vpop.eup %1259 }
 0x188   : > { %v928_v7 = vadd.f32 1.0, %v1260_v26 }
 0x189   : > { %v1262_v49 = vpop.eup %1261 }
 0x18a   : > { %v938_v38 = vmul.f32 0.5, %v928_v7  ;;  %v930_v35 = vadd.f32 1.0, %v1262_v49 }
 0x18c   : > { %v948_v41 = vmul.f32 %v938_v38, %v885_v16  ;;  %v940_v39 = vmul.f32 0.5, %v930_v35 }
 0x18e   : > { %v1173_v18 = vpack.c.bf16 %v948_v41, %v947_v40  ;;  %v950_v43 = vmul.f32 %v940_v39, %v890_v21 }
 0x190   : > { %1174 = vst [vmem:[%s1756_s21] sm:$0xff] %v1173_v18   ;;  %v1178_v36 = vpack.c.bf16 %v950_v43, %v949_v30 }
 0x192   : > { %1198 = vst [vmem:[%s1756_s21 + $0x8] sm:$0xff] %v1178_v36  }
 0x193 PF: > { %s13_s12 = sadd.s32 1, %s1269_s12  }
 0x194   : > { %p10_p4 = scmp.ge.s32.totalorder %s13_s12, 4  }
 0x196   :  { %12 = sbr.rel (!%p10_p4) target bundleno = 1 (0x1), region = 62 }

// kernel: tile.25
= control target key start
LH: loop header
LB: loop body
LE: loop exit
PB: predicated region body
PF: predicated region fallthrough
CT: control target
= control target key end

     0   :  { %s22_s0 = inlined_call_operand.vmem [shape: f32[32], index: 0, kind: input, shape index: {}]   ;;  %s23_s1 = inlined_call_operand.vmem [shape: f32[4,32], index: 1, kind: output, shape index: {}]  }
   0x1   :  { %v4_v0 = vld [vmem:[%s22_s0] ss:$0 sm:$0xff] }
   0x2   :  { %5 = vst [vmem:[%s23_s1] sm:$0xf] %v4_v0 }

// kernel: tile.26
= control target key start
LH: loop header
LB: loop body
LE: loop exit
PB: predicated region body
PF: predicated region fallthrough
CT: control target
= control target key end

     0   :  { %s37_s8 = smov 32   ;;  %s38_s9 = smov 64   ;;  %vm7_vm0 = vcmask 261120   ;;  %vm13_vm1 = vcmask 1048320   ;;  %vm19_vm2 = vcmask 785920   ;;  %vm25_vm3 = vcmask 523520   ;;  %s55_s0 = inlined_call_operand.vmem [shape: f32[4,32], index: 0, kind: input, shape index: {}]   ;;  %s56_s1 = inlined_call_operand.vmem [shape: f32[1,128], index: 1, kind: output, shape index: {}]  }
   0x1   :  { %v4_v0 = vld [vmem:[%s55_s0] sm:$0xf]  ;;  %s36_s0 = smov 96  }
   0x2   :  { %5 = vst [vmem:[#allocation1] sm:$0xf] %v4_v0 }
   0x9   :  { %v10_v1 = vld [vmem:[#allocation1 + $0x3] sm:$0x1]   ;;  %v22_v2 = vld [vmem:[#allocation1 + $0x1] sm:$0x1]   ;;  %v16_v3 = vld [vmem:[#allocation1 + $0x2] sm:$0x1]  }
   0xa   :  { %11 = vrot.lane.b32.xlu0 %v10_v1, %s36_s0  ;;  %23 = vrot.lane.b32.xlu1 %v22_v2, %s37_s8  ;;  %v6_v4 = vld [vmem:[#allocation1] sm:$0x1]  }
   0xb   :  { %8 = vst.msk [vmem:[#allocation0] sm:$0x1] %vm7_vm0, %v6_v4  }
  0x12   :  { %17 = vrot.lane.b32.xlu0 %v16_v3, %s38_s9 }
  0x7c   :  { %v12_v5 = vpop.permute.xlu0 %11   ;;  %v24_v6 = vpop.permute.xlu1 %23  }
  0x7d   :  { %14 = vst.msk [vmem:[#allocation0] sm:$0x1] %vm13_vm1, %v12_v5  }
  0x84   :  { %v18_v7 = vpop.permute.xlu0 %17  }
  0x85   :  { %20 = vst.msk [vmem:[#allocation0] sm:$0x1] %vm19_vm2, %v18_v7  }
  0x86   :  { %26 = vst.msk [vmem:[#allocation0] sm:$0x1] %vm25_vm3, %v24_v6  }
  0x8d   :  { %v29_v8 = vld [vmem:[#allocation0] sm:$0x1] }
  0x8e   :  { %32 = vst [vmem:[%s56_s1] sm:$0x1] %v29_v8 }

// kernel: conv_encoder_y.7
= control target key start
LH: loop header
LB: loop body
LE: loop exit
PB: predicated region body
PF: predicated region fallthrough
CT: control target
= control target key end

     0   :  { %s1709_s12 = smov 0   ;;  %s2068_s0 = inlined_call_operand.vmem [shape: bf16[2,168,96], index: 0, kind: input, shape index: {}]   ;;  %s2069_s1 = inlined_call_operand.vmem [shape: bf16[960,128], index: 1, kind: input, shape index: {}]   ;;  %s2070_s2 = inlined_call_operand.vmem [shape: f32[1,128], index: 2, kind: input, shape index: {}]   ;;  %s2071_s3 = inlined_call_operand.vmem [shape: bf16[2,40,128], index: 3, kind: output, shape index: {}]  }
   0x1 LB: > { %s1289_s13 = sadd.s32 4294967295, %s1684_s12   ;;  %p1293_p0 = scmp.ge.s32.totalorder %s1684_s12, 1  ;;  %s1684_s12 = sphi %s1709_s12, %s13_s12  }
   0x2   : > { %p137_p1 = scmp.lt.s32.totalorder %s1684_s12, 3 }
   0x4   : > { %p138_p2 = pnand %p1293_p0, %p137_p1 }
   0x5   : > { %p161_p3 = scmp.lt.s32.totalorder (!%p138_p2), %s1289_s13, 1  ;;  %s1686_s18 = smov (!%p138_p2), 64  }
   0x6   : > { %141 = sbr.rel (%p138_p2) target bundleno = 380 (0x17c), region = 32  ;;  %s1687_s19 = smov (!%p138_p2), 96  }
   0x7   : > { %s1688_s20 = smov (!%p138_p2), 32  }
   0xb   : > { %s2073_s13 = smov (!%p161_p3, %s1289_s13), 1  ;;  %vm256_vm0 = vcmask 1045504   ;;  %vm229_vm1 = vcmask 1046528   ;;  %vm283_vm2 = vcmask 1044480   ;;  %vm325_vm3 = vsmask.f32 6400 }
   0xc   : > { %s1649_s14 = smul.u32 84, %s2073_s13  ;;  %vm361_vm4 = vsmask.f32 5376  ;;  %vm397_vm5 = vsmask.f32 4352  ;;  %vm452_vm6 = vcmask 785408  }
   0xd   : > { %vm463_vm7 = vcmask 523264   ;;  %vm473_vm8 = vcmask 261120   ;;  %vm298_vm9 = vsmask.f32 7424  ;;  %s1650_s28 = smul.u32 20, %s2073_s13 }
   0xe   : > { %s1723_s17 = scalar_lea.vmem %s2068_s0, %s1649_s14 }
   0xf   : > { %v1306_v0 = vld [vmem:[%s1723_s17 + $0x28] sm:$0xc]  ;;  %v1567_v1 = vld [vmem:[%s1723_s17 + $0x28] sm:$0xf0]  ;;  %v1728_v2 = vld [vmem:[%s1723_s17 + $0x30] sm:$0xff]  ;;  %s2060_s4 = scalar_lea.vmem %s2071_s3, %s1650_s28 }
  0x10   : > { %v1730_v3 = vor.u32 %v1567_v1, %v1306_v0  ;;  %v177_v4 = vld [vmem:[%s1723_s17 + $0x14] sm:$0xe]  ;;  %v1734_v5 = vld [vmem:[%s1723_s17 + $0x18] sm:$0xf]  ;;  %v1737_v6 = vld [vmem:[%s1723_s17 + $0x1c] sm:$0xff]  ;;  %v258_v7 = vrot.slane %v1728_v2, 2 }
  0x11   : > { %v220_v8 = vunpack.c.l.b16 %v177_v4  ;;  %v221_v9 = vunpack.c.l.b16 %v1734_v5  ;;  %v1314_v10 = vld [vmem:[%s1723_s17 + $0x3c] sm:$0x8]  ;;  %v1569_v11 = vld [vmem:[%s1723_s17 + $0x3c] sm:$0xf0]  ;;  %v1744_v12 = vld [vmem:[%s1723_s17 + $0x44] sm:$0xff]  ;;  %v231_v14 = vrot.slane %v1737_v6, 1 }
  0x12   : > { %v257_v13 = vrot.slane %v1730_v3, 2  ;;  %v1748_v15 = vor.u32 %v1569_v11, %v1314_v10  ;;  %v335_v16 = vshrl.u32 %v1737_v6, 16  ;;  %v181_v17 = vld [vmem:[%s1723_s17 + $0x24] sm:$0xf]  ;;  %v285_v19 = vrot.slane %v1744_v12, 3  ;;  %v1767_v36 = vld [vmem:[%s1723_s17 + $0x4c] sm:$0xff]  }
  0x13   : > { %v226_v18 = vpack.c.b16 %v221_v9, %v220_v8  ;;  %v338_v20 = vshll.u32 %v1737_v6, 16  ;;  %v182_v21 = vld [vmem:[%s1723_s17 + $0x28] sm:$0x1]  ;;  %v224_v23 = vunpack.c.l.b16 %v181_v17  ;;  %v1761_v28 = vld [vmem:[%s1723_s17 + $0x38] sm:$0xf]  ;;  %v363_v8 = vshrl.u32 %v1730_v3, 16 }
  0x14   : > { %v196_v22 = vld [vmem:[%s1723_s17 + $0x28] sm:$0x3]  ;;  %v259_v24 = vsel %vm256_vm0, %v257_v13, %v258_v7  ;;  %v284_v25 = vrot.slane %v1748_v15, 3  ;;  %v337_v26 = vrot.slane %v335_v16, 1  ;;  %v225_v27 = vunpack.c.l.b16 %v182_v21  ;;  %v188_v33 = vld [vmem:[%s1723_s17 + $0x3c] sm:$0x3] }
  0x15   : > { %262 = vrot.lane.b32.xlu0 %v259_v24, %s1686_s18  ;;  %v230_v29 = vrot.slane %v226_v18, 1  ;;  %v327_v30 = vshrl.u32 %v226_v18, 16  ;;  %v330_v31 = vshll.u32 %v226_v18, 16  ;;  %v340_v32 = vrot.slane %v338_v20, 2  ;;  %v1679_v37 = vld [vmem:[%s1723_s17 + $0x4c] sm:$0xf]  }
  0x16   : > { %v323_v34 = vunpack.c.l.b16 %v196_v22  ;;  %v251_v35 = vunpack.c.l.b16 %v1761_v28  ;;  %v1681_v41 = vld [vmem:[%s1723_s17 + $0x4c] sm:$0x70]  ;;  %v286_v42 = vsel %vm283_vm2, %v284_v25, %v285_v19  ;;  %v252_v44 = vunpack.c.l.b16 %v188_v33  ;;  %v197_v63 = vld [vmem:[%s1723_s17 + $0x3c] sm:$0x7]  ;;  %v200_v0 = vld [vmem:[%s1723_s17 + $0x14] sm:$0xc] }
  0x17   : > { %v232_v38 = vsel %vm229_vm1, %v230_v29, %v231_v14  ;;  %v329_v39 = vrot.slane %v327_v30, 1  ;;  %v332_v40 = vrot.slane %v330_v31, 2  ;;  %v341_v46 = vor.u32 %v340_v32, %v337_v26  ;;  %v1577_v17 = vld [vmem:[%s2069_s1 + $0x30] sm:$0xff]  ;;  %v1602_v18 = vld [vmem:[%s2069_s1 + $0xf8] sm:$0xff]  ;;  %v1576_v26 = vld [vmem:[%s2069_s1 + $0x28] sm:$0xff] }
  0x18   : > { %235 = vrot.lane.b32.xlu1 %v232_v38, %s1687_s19  ;;  %v1774_v43 = vpack.c.b16 %v323_v34, %v224_v23  ;;  %v228_v47 = vpack.c.b16 %v225_v27, %v224_v23  ;;  %v255_v50 = vpack.c.b16 %v252_v44, %v251_v35  ;;  %v1680_v57 = vor.u32 %v1681_v41, %v1679_v37  ;;  %v1601_v23 = vld [vmem:[%s2069_s1 + $0xf0] sm:$0xff]  ;;  %v1584_v27 = vld [vmem:[%s2069_s1 + $0x68] sm:$0xff]  ;;  %v1583_v38 = vld [vmem:[%s2069_s1 + $0x60] sm:$0xff] }
  0x19   : > { %v333_v45 = vor.u32 %v332_v40, %v329_v39  ;;  %v439_v1 = vunpack.c.l.b16 %v200_v0  ;;  %v359_v4 = vunpack.c.l.b16 %v197_v63  ;;  %v366_v10 = vshll.u32 %v1730_v3, 16  ;;  %v1594_v3 = vld [vmem:[%s2069_s1 + $0xb8] sm:$0xff]  ;;  %1084 = vmatpush.bf16.msra.mxu3 %v1602_v18  ;;  %v1592_v31 = vld [vmem:[%s2069_s1 + $0xa8] sm:$0xff]  ;;  %v1591_v44 = vld [vmem:[%s2069_s1 + $0xa0] sm:$0xff] }
  0x1a   : > { %v344_v48 = vshrl.u32 %v1774_v43, 16  ;;  %v347_v49 = vshll.u32 %v1774_v43, 16  ;;  %v260_v51 = vrot.slane %v255_v50, 2  ;;  %v233_v55 = vrot.slane %v228_v47, 1  ;;  %1061 = vmatpush.bf16.msra.mxu2 %v1594_v3  ;;  %v1600_v37 = vld [vmem:[%s2069_s1 + $0xe8] sm:$0xff]  ;;  %v1574_v50 = vld [vmem:[%s2069_s1 + $0x18] sm:$0xff] }
  0x1b   : > { %v342_v52 = vsel %vm325_vm3, %v333_v45, %v341_v46  ;;  %v287_v60 = vrot.slane %v1680_v57, 3  ;;  %v371_v11 = vshrl.u32 %v1728_v2, 16  ;;  %v374_v13 = vshll.u32 %v1728_v2, 16  ;;  %v1585_v2 = vld [vmem:[%s2069_s1 + $0x70] sm:$0xff]  ;;  %v1598_v57 = vld [vmem:[%s2069_s1 + $0xd8] sm:$0xff]  ;;  %v1595_v3 = vld [vmem:[%s2069_s1 + $0xc0] sm:$0xff] }
  0x1c   : > { %v346_v53 = vrot.slane %v344_v48, 1  ;;  %v349_v54 = vrot.slane %v347_v49, 2  ;;  %v261_v56 = vsel %vm256_vm0, %v258_v7, %v260_v51  ;;  %v234_v59 = vsel %vm229_vm1, %v231_v14, %v233_v55  ;;  %v1578_v7 = vld [vmem:[%s2069_s1 + $0x38] sm:$0xff]  ;;  %v1599_v48 = vld [vmem:[%s2069_s1 + $0xe0] sm:$0xff]  ;;  %v1589_v63 = vld [vmem:[%s2069_s1 + $0x90] sm:$0xff] }
  0x1d   : > { %289 = vrot.lane.b32.xlu0 %v286_v42, %s1688_s20  ;;  %264 = vrot.lane.b32.xlu2 %v261_v56, %s1686_s18  ;;  %v288_v61 = vsel %vm283_vm2, %v285_v19, %v287_v60  ;;  %v1586_v14 = vld [vmem:[%s2069_s1 + $0x78] sm:$0xff]  ;;  %v440_v16 = vpack.c.b16 %v221_v9, %v439_v1  ;;  %v360_v5 = vpack.c.b16 %v359_v4, %v251_v35  ;;  %v1593_v9 = vld [vmem:[%s2069_s1 + $0xb0] sm:$0xff]  ;;  %v365_v19 = vrot.slane %v363_v8, 2 }
  0x1e   : > { %v1783_v58 = vor.u32 %v349_v54, %v346_v53  ;;  %1015 = vmatpush.bf16.msra.mxu0 %v1578_v7  ;;  %1038 = vmatpush.bf16.msra.mxu1 %v1586_v14  ;;  %v368_v20 = vrot.slane %v366_v10, 3  ;;  %v373_v21 = vrot.slane %v371_v11, 2  ;;  %v376_v22 = vrot.slane %v374_v13, 3  ;;  %v1572_v1 = vld [vmem:[%s2069_s1 + $0x8] sm:$0xff]  ;;  %v1571_v10 = vld [vmem:[%s2069_s1] sm:$0xff]  ;;  %v1597_v13 = vld [vmem:[%s2069_s1 + $0xd0] sm:$0xff] }
  0x1f   : > { %v441_v24 = vrot.slane %v440_v16, 2  ;;  %v442_v25 = vrot.slane %v1737_v6, 2  ;;  %v399_v28 = vshrl.u32 %v1748_v15, 16  ;;  %v402_v29 = vshll.u32 %v1748_v15, 16  ;;  %1062 = vmatpush.bf16.msra.mxu2 %v1593_v9  ;;  %1085 = vmatpush.bf16.msra.mxu3 %v1601_v23  ;;  %v1580_v4 = vld [vmem:[%s2069_s1 + $0x48] sm:$0xff]  ;;  %v1579_v11 = vld [vmem:[%s2069_s1 + $0x40] sm:$0xff] }
  0x20   : > { %352 = vrot.lane.b32.xlu1 %v342_v52, %s1687_s19  ;;  %v351_v62 = vsel %vm325_vm3, %v341_v46, %v1783_v58  ;;  %v407_v6 = vshrl.u32 %v1744_v12, 16  ;;  %v410_v30 = vshll.u32 %v1744_v12, 16  ;;  %v369_v32 = vor.u32 %v368_v20, %v365_v19  ;;  %v1575_v12 = vld [vmem:[%s2069_s1 + $0x20] sm:$0xff]  ;;  %v1588_v14 = vld [vmem:[%s2069_s1 + $0x88] sm:$0xff]  ;;  %v1610_v18 = vld [vmem:[%s2069_s1 + $0x138] sm:$0xff] }
  0x21   : > { %v377_v33 = vor.u32 %v376_v22, %v373_v21  ;;  %v380_v34 = vshrl.u32 %v360_v5, 16  ;;  %v383_v35 = vshll.u32 %v360_v5, 16  ;;  %v443_v15 = vsel %vm256_vm0, %v441_v24, %v442_v25  ;;  %v1596_v16 = vld [vmem:[%s2069_s1 + $0xc8] sm:$0xff]  ;;  %v1630_v5 = vld [vmem:[%s2069_s1 + $0x1d8] sm:$0xff]  ;;  %v1625_v19 = vld [vmem:[%s2069_s1 + $0x1b0] sm:$0xff] }
  0x22   : > { %1016 = vmatpush.bf16.msra.mxu0 %v1577_v17  ;;  %1039 = vmatpush.bf16.msra.mxu1 %v1585_v2  ;;  %v401_v39 = vrot.slane %v399_v28, 3  ;;  %v404_v40 = vrot.slane %v402_v29, 4  ;;  %v409_v41 = vrot.slane %v407_v6, 3  ;;  %v412_v42 = vrot.slane %v410_v30, 4  ;;  %v1587_v17 = vld [vmem:[%s2069_s1 + $0x80] sm:$0xff]  ;;  %v1626_v2 = vld [vmem:[%s2069_s1 + $0x1b8] sm:$0xff] }
  0x23   : > { %1063 = vmatpush.bf16.msra.mxu2 %v1592_v31  ;;  %v378_v45 = vsel %vm361_vm4, %v369_v32, %v377_v33  ;;  %v382_v46 = vrot.slane %v380_v34, 2  ;;  %v385_v47 = vrot.slane %v383_v35, 3  ;;  %1086 = vmatpush.bf16.msra.mxu3 %v1600_v37  ;;  %v444_v49 = vrot.slane %v1774_v43, 2  ;;  %v1618_v9 = vld [vmem:[%s2069_s1 + $0x178] sm:$0xff]  ;;  %v1609_v20 = vld [vmem:[%s2069_s1 + $0x130] sm:$0xff]  ;;  %v1624_v22 = vld [vmem:[%s2069_s1 + $0x1a8] sm:$0xff] }
  0x24   : > { %v405_v52 = vor.u32 %v404_v40, %v401_v39  ;;  %v413_v53 = vor.u32 %v412_v42, %v409_v41  ;;  %v416_v54 = vshrl.u32 %v1767_v36, 16  ;;  %v419_v43 = vshll.u32 %v1767_v36, 16  ;;  %v1581_v36 = vld [vmem:[%s2069_s1 + $0x50] sm:$0xff]  ;;  %v1608_v23 = vld [vmem:[%s2069_s1 + $0x128] sm:$0xff]  ;;  %v1623_v29 = vld [vmem:[%s2069_s1 + $0x1a0] sm:$0xff] }
  0x25   : > { %237 = vrot.lane.b32.xlu0 %v234_v59, %s1687_s19  ;;  %291 = vrot.lane.b32.xlu2 %v288_v61, %s1688_s20  ;;  %v386_v56 = vor.u32 %v385_v47, %v382_v46  ;;  %v1573_v59 = vld [vmem:[%s2069_s1 + $0x10] sm:$0xff]  ;;  %v1607_v6 = vld [vmem:[%s2069_s1 + $0x120] sm:$0xff] }
  0x26   : > { %1017 = vmatpush.bf16.msra.mxu0 %v1576_v26  ;;  %1040 = vmatpush.bf16.msra.mxu1 %v1584_v27  ;;  %v418_v61 = vrot.slane %v416_v54, 3  ;;  %v1617_v21 = vld [vmem:[%s2069_s1 + $0x170] sm:$0xff]  ;;  %v1616_v26 = vld [vmem:[%s2069_s1 + $0x168] sm:$0xff]  ;;  %v1615_v30 = vld [vmem:[%s2069_s1 + $0x160] sm:$0xff] }
  0x27   : > { %1064 = vmatpush.bf16.msra.mxu2 %v1591_v44  ;;  %1087 = vmatpush.bf16.msra.mxu3 %v1599_v48  ;;  %v387_v0 = vsel %vm361_vm4, %v377_v33, %v386_v56  ;;  %v1629_v24 = vld [vmem:[%s2069_s1 + $0x1d0] sm:$0xff]  ;;  %v1959_v27 = vld [vmem:[%s1723_s17 + $0x8] sm:$0xff]  ;;  %v1622_v31 = vld [vmem:[%s2069_s1 + $0x198] sm:$0xff] }
  0x28   : > { %354 = vrot.lane.b32.xlu1 %v351_v62, %s1687_s19  ;;  %v421_v62 = vrot.slane %v419_v43, 4  ;;  %v307_v35 = vshll.u32 %v1959_v27, 16  ;;  %v195_v39 = vld [vmem:[%s1723_s17 + $0x14] sm:$0x1]  ;;  %v1606_v40 = vld [vmem:[%s2069_s1 + $0x118] sm:$0xff] }
  0x29   : > { %v1614_v41 = vld [vmem:[%s2069_s1 + $0x158] sm:$0xff]  ;;  %v1621_v46 = vld [vmem:[%s2069_s1 + $0x190] sm:$0xff] }
  0x2a   : > { %1018 = vmatpush.bf16.msra.mxu0 %v1575_v12  ;;  %1041 = vmatpush.bf16.msra.mxu1 %v1583_v38  ;;  %v422_v7 = vor.u32 %v421_v62, %v418_v61  ;;  %v309_v44 = vrot.slane %v307_v35, 1  ;;  %v1605_v47 = vld [vmem:[%s2069_s1 + $0x110] sm:$0xff]  ;;  %v311_v61 = vshrl.u32 %v1959_v27, 16 }
  0x2b   : > { %1088 = vmatpush.bf16.msra.mxu3 %v1598_v57  ;;  %v1604_v57 = vld [vmem:[%s2069_s1 + $0x108] sm:$0xff] }
  0x2c   : > { %v423_v8 = vsel %vm397_vm5, %v413_v53, %v422_v7 }
  0x2d   : > { %293 = vrot.lane.b32.xlu0 %v287_v60, %s1688_s20  ;;  %266 = vrot.lane.b32.xlu2 %v260_v51, %s1686_s18  ;;  %v1582_v51 = vld [vmem:[%s2069_s1 + $0x58] sm:$0xff]  ;;  %v414_v60 = vsel %vm397_vm5, %v405_v52, %v413_v53 }
  0x2e   : > { %1019 = vmatpush.bf16.msra.mxu0 %v1574_v50  ;;  %1042 = vmatpush.bf16.msra.mxu1 %v1582_v51  ;;  %v1613_v50 = vld [vmem:[%s2069_s1 + $0x150] sm:$0xff] }
  0x2f   : > { %1089 = vmatpush.bf16.msra.mxu3 %v1597_v13 }
  0x30   : > { %239 = vrot.lane.b32.xlu1 %v233_v55, %s1687_s19  ;;  %v1590_v55 = vld [vmem:[%s2069_s1 + $0x98] sm:$0xff] }
  0x31   : > { %1065 = vmatpush.bf16.msra.mxu2 %v1590_v55 }
  0x32   : > { %1020 = vmatpush.bf16.msra.mxu0 %v1573_v59  ;;  %1043 = vmatpush.bf16.msra.mxu1 %v1581_v36  ;;  %v1620_v59 = vld [vmem:[%s2069_s1 + $0x188] sm:$0xff]  ;;  %v1627_v36 = vld [vmem:[%s2069_s1 + $0x1c0] sm:$0xff] }
  0x33   : > { %1090 = vmatpush.bf16.msra.mxu3 %v1596_v16 }
  0x35   : > { %446 = vrot.lane.b32.xlu0 %v443_v15, %s1687_s19  ;;  %356 = vrot.lane.b32.xlu2 %v1783_v58, %s1687_s19  ;;  %v445_v58 = vsel %vm256_vm0, %v442_v25, %v444_v49  ;;  %v1632_v25 = vld [vmem:[%s1723_s17] sm:$0xff]   ;;  %v176_v15 = vld [vmem:[%s1723_s17 + $0x10] sm:$0xf] }
  0x36   : > { %1066 = vmatpush.bf16.msra.mxu2 %v1589_v63  ;;  %1021 = vmatpush.bf16.msra.mxu0 %v1572_v1  ;;  %v302_v28 = vshll.u32 %v1632_v25, 16  ;;  %v300_v33 = vshrl.u32 %v1632_v25, 16  ;;  %v210_v48 = vunpack.c.l.b16 %v176_v15  ;;  %v1611_v63 = vld [vmem:[%s2069_s1 + $0x140] sm:$0xff] }
  0x37   : > { %1044 = vmatpush.bf16.msra.mxu1 %v1580_v4  ;;  %1091 = vmatpush.bf16.msra.mxu3 %v1595_v3 }
  0x38   : > { %388 = vrot.lane.b32.xlu1 %v378_v45, %s1686_s18  ;;  %v304_v34 = vrot.slane %v302_v28, 1  ;;  %v1628_v45 = vld [vmem:[%s2069_s1 + $0x1c8] sm:$0xff] }
  0x3a   : > { %1022 = vmatpush.bf16.msra.mxu0 %v1571_v10  ;;  %1067 = vmatpush.bf16.msra.mxu2 %v1588_v14  ;;  %v305_v42 = vor.u32 %v304_v34, %v300_v33 }
  0x3b   : > { %1045 = vmatpush.bf16.msra.mxu1 %v1579_v11  ;;  %1180 = vmatpush.bf16.msrb.mxu3 %v1630_v5  ;;  %v1619_v11 = vld [vmem:[%s2069_s1 + $0x180] sm:$0xff] }
  0x3c   : > { %v310_v54 = vsel %vm298_vm9, %v305_v42, %v309_v44 }
  0x3d   : > { %448 = vrot.lane.b32.xlu0 %v445_v58, %s1687_s19  ;;  %424 = vrot.lane.b32.xlu2 %v414_v60, %s1688_s20  ;;  %v1612_v58 = vld [vmem:[%s2069_s1 + $0x148] sm:$0xff]  ;;  %v1603_v60 = vld [vmem:[%s2069_s1 + $0x100] sm:$0xff] }
  0x3e   : > { %1068 = vmatpush.bf16.msra.mxu2 %v1587_v17  ;;  %1107 = vmatpush.bf16.msrb.mxu0 %v1610_v18 }
  0x3f   : > { %1130 = vmatpush.bf16.msrb.mxu1 %v1618_v9  ;;  %1181 = vmatpush.bf16.msrb.mxu3 %v1629_v24  ;;  %v1645_v24 = vld [vmem:[%s1723_s17] sm:$0xf0] }
  0x40   : > { %390 = vrot.lane.b32.xlu1 %v387_v0, %s1686_s18 }
  0x42   : > { %1153 = vmatpush.bf16.msrb.mxu2 %v1626_v2  ;;  %1108 = vmatpush.bf16.msrb.mxu0 %v1609_v20  ;;  %v213_v2 = vpack.c.b16 %v210_v48, %v210_v48 }
  0x43   : > { %1131 = vmatpush.bf16.msrb.mxu1 %v1617_v21  ;;  %1182 = vmatpush.bf16.msrb.mxu3 %v1628_v45 }
  0x45   : > { %450 = vrot.lane.b32.xlu0 %v444_v49, %s1687_s19  ;;  %426 = vrot.lane.b32.xlu2 %v423_v8, %s1688_s20  ;;  %v296_v49 = vunpack.c.l.b16 %v195_v39 }
  0x46   : > { %1154 = vmatpush.bf16.msrb.mxu2 %v1625_v19  ;;  %1109 = vmatpush.bf16.msrb.mxu0 %v1608_v23 }
  0x47   : > { %1132 = vmatpush.bf16.msrb.mxu1 %v1616_v26  ;;  %v1998_v55 = vpack.c.b16 %v296_v49, %v210_v48  ;;  %1183 = vmatpush.bf16.msrb.mxu3 %v1627_v36 }
  0x48   : > { %392 = vrot.lane.b32.xlu1 %v386_v56, %s1686_s18 }
  0x49   : > { %v315_v62 = vshll.u32 %v1998_v55, 16  ;;  %v319_v19 = vshrl.u32 %v1998_v55, 16 }
  0x4a   : > { %1155 = vmatpush.bf16.msrb.mxu2 %v1624_v22  ;;  %1110 = vmatpush.bf16.msrb.mxu0 %v1607_v6 }
  0x4b   : > { %1133 = vmatpush.bf16.msrb.mxu1 %v1615_v30  ;;  %v317_v8 = vrot.slane %v315_v62, 1  ;;  %v434_v30 = vrot.slane %v1959_v27, 1 }
  0x4d   : > { %428 = vrot.lane.b32.xlu2 %v422_v7, %s1688_s20  ;;  %v313_v7 = vor.u32 %v311_v61, %v309_v44  ;;  %v321_v22 = vor.u32 %v319_v19, %v317_v8 }
  0x4e   : > { %1156 = vmatpush.bf16.msrb.mxu2 %v1623_v29  ;;  %1111 = vmatpush.bf16.msrb.mxu0 %v1606_v40 }
  0x4f   : > { %1134 = vmatpush.bf16.msrb.mxu1 %v1614_v41  ;;  %v318_v14 = vsel %vm298_vm9, %v313_v7, %v317_v8 }
  0x52   : > { %1157 = vmatpush.bf16.msrb.mxu2 %v1622_v31  ;;  %1112 = vmatpush.bf16.msrb.mxu0 %v1605_v47 }
  0x53   : > { %1135 = vmatpush.bf16.msrb.mxu1 %v1613_v50 }
  0x56   : > { %1158 = vmatpush.bf16.msrb.mxu2 %v1621_v46  ;;  %1113 = vmatpush.bf16.msrb.mxu0 %v1604_v57 }
  0x57   : > { %1136 = vmatpush.bf16.msrb.mxu1 %v1612_v58 }
  0x5a   : > { %1159 = vmatpush.bf16.msrb.mxu2 %v1620_v59  ;;  %1114 = vmatpush.bf16.msrb.mxu0 %v1603_v60 }
  0x5b   : > { %1137 = vmatpush.bf16.msrb.mxu1 %v1611_v63 }
  0x5e   : > { %1160 = vmatpush.bf16.msrb.mxu2 %v1619_v11 }
  0x77   : > { %v265_v52 = vpop.permute.xlu2 %264 }
  0x7f   : > { %v292_v4 = vpop.permute.xlu2 %291 }
  0x80   : > { %v478_v16 = vsel %vm473_vm8, %v265_v52, %v292_v4 }
  0x87   : > { %v263_v32 = vpop.permute.xlu0 %262  ;;  %v267_v3 = vpop.permute.xlu2 %266 }
  0x8a   : > { %v236_v37 = vpop.permute.xlu1 %235 }
  0x8b   : > { %v454_v12 = vsel %vm452_vm6, %v1632_v25, %v236_v37  ;;  %v465_v38 = vsel %vm463_vm7, %v236_v37, %v263_v32  ;;  %v1646_v25 = vld [vmem:[%s1723_s17] sm:$0xe] }
  0x8c   : > { %1023 = vmatmul.bf16.vlgmr.msra.gmra.mxu0 %v454_v12  ;;  %1046 = vmatmul.bf16.vlgmr.msra.gmra.mxu1 %v465_v38  ;;  %v1647_v28 = vor.u32 %v1646_v25, %v1645_v24  ;;  %v436_v12 = vrot.slane %v1998_v55, 1 }
  0x8e   : > { %v433_v6 = vrot.slane %v1647_v28, 1  ;;  %v437_v41 = vsel %vm229_vm1, %v434_v30, %v436_v12 }
  0x8f   : > { %v290_v51 = vpop.permute.xlu0 %289  ;;  %v357_v20 = vpop.permute.xlu2 %356 }
  0x90   : > { %v475_v53 = vsel %vm473_vm8, %v263_v32, %v290_v51  ;;  %v493_v26 = vsel %vm452_vm6, %v321_v22, %v357_v20  ;;  %v435_v35 = vsel %vm229_vm1, %v433_v6, %v434_v30 }
  0x91   : > { %1069 = vmatmul.bf16.vlgmr.msra.gmra.mxu2 %v475_v53 }
  0x92   : > { %v353_v43 = vpop.permute.xlu1 %352 }
  0x93   : > { %v485_v56 = vsel %vm452_vm6, %v310_v54, %v353_v43 }
  0x94   : > { %1092 = vmatmul.bf16.vlgmr.msra.gmra.mxu3 %v485_v56 }
  0x97   : > { %v238_v0 = vpop.permute.xlu0 %237  ;;  %v425_v29 = vpop.permute.xlu2 %424 }
  0x98   : > { %v457_v1 = vsel %vm452_vm6, %v1959_v27, %v238_v0  ;;  %v468_v10 = vsel %vm463_vm7, %v238_v0, %v265_v52 }
  0x9a   : > { %v355_v13 = vpop.permute.xlu1 %354 }
  0x9b   : > { %v489_v17 = vsel %vm452_vm6, %v318_v14, %v355_v13 }
  0x9c   : > { %1028 = vmatmul.bf16.gmra.mxu0 %v457_v1  ;;  %1051 = vmatmul.bf16.gmra.mxu1 %v468_v10  ;;  %v1662_v1 = vld [vmem:[%s2070_s2] ss:$0 sm:$0xff] }
  0x9f   : > { %v294_v21 = vpop.permute.xlu0 %293  ;;  %v427_v15 = vpop.permute.xlu2 %426 }
  0xa0   : > { %v481_v23 = vsel %vm473_vm8, %v267_v3, %v294_v21 }
  0xa1   : > { %1074 = vmatmul.bf16.gmra.mxu2 %v478_v16 }
  0xa2   : > { %v240_v18 = vpop.permute.xlu1 %239 }
  0xa3   : > { %v461_v5 = vsel %vm452_vm6, %v213_v2, %v240_v18  ;;  %v471_v9 = vsel %vm463_vm7, %v240_v18, %v267_v3 }
  0xa4   : > { %1097 = vmatmul.bf16.gmra.mxu3 %v489_v17 }
  0xa7   : > { %v447_v34 = vpop.permute.xlu0 %446  ;;  %v429_v44 = vpop.permute.xlu2 %428 }
  0xa8   : > { %v515_v37 = vsel %vm452_vm6, %v435_v35, %v447_v34 }
  0xaa   : > { %v389_v31 = vpop.permute.xlu1 %388 }
  0xab   : > { %v505_v32 = vsel %vm473_vm8, %v389_v31, %v425_v29  ;;  %v496_v33 = vsel %vm463_vm7, %v353_v43, %v389_v31 }
  0xac   : > { %1033 = vmatmul.bf16.gmra.mxu0 %v461_v5  ;;  %1056 = vmatmul.bf16.gmra.mxu1 %v471_v9 }
  0xaf   : > { %v449_v40 = vpop.permute.xlu0 %448 }
  0xb0   : > { %v519_v42 = vsel %vm452_vm6, %v437_v41, %v449_v40 }
  0xb1   : > { %1079 = vmatmul.bf16.gmra.mxu2 %v481_v23 }
  0xb2   : > { %v391_v38 = vpop.permute.xlu1 %390 }
  0xb3   : > { %v508_v27 = vsel %vm473_vm8, %v391_v38, %v427_v15  ;;  %v499_v39 = vsel %vm463_vm7, %v355_v13, %v391_v38 }
  0xb4   : > { %1102 = vmatmul.bf16.gmra.mxu3 %v493_v26 }
  0xb7   : > { %v451_v48 = vpop.permute.xlu0 %450 }
  0xb8   : > { %v523_v49 = vsel %vm452_vm6, %v436_v12, %v451_v48 }
  0xba   : > { %v393_v45 = vpop.permute.xlu1 %392 }
  0xbb   : > { %v511_v46 = vsel %vm473_vm8, %v393_v45, %v429_v44  ;;  %v502_v47 = vsel %vm463_vm7, %v357_v20, %v393_v45 }
  0xbc   : > { %1115 = vmatmul.bf16.vlgmr.msrb.gmra.mxu0 %v496_v33  ;;  %1138 = vmatmul.bf16.vlgmr.msrb.gmra.mxu1 %v505_v32 }
  0xc1   : > { %1161 = vmatmul.bf16.vlgmr.msrb.gmra.mxu2 %v515_v37 }
  0xc4   : > { %1560 = vmatmul.msk.bf16.vlgmr.msrb.gmra.mxu3 %vm463_vm7, %v447_v34 }
  0xcc   : > { %1120 = vmatmul.bf16.gmra.mxu0 %v499_v39  ;;  %1143 = vmatmul.bf16.gmra.mxu1 %v508_v27 }
  0xd1   : > { %1166 = vmatmul.bf16.gmra.mxu2 %v519_v42 }
  0xd4   : > { %1561 = vmatmul.msk.bf16.gmra.mxu3 %vm463_vm7, %v449_v40 }
  0xdc   : > { %1125 = vmatmul.bf16.gmra.mxu0 %v502_v47  ;;  %1148 = vmatmul.bf16.gmra.mxu1 %v511_v46 }
  0xe1   : > { %1171 = vmatmul.bf16.gmra.mxu2 %v523_v49 }
  0xe4   : > { %1562 = vmatmul.msk.bf16.gmra.mxu3 %vm463_vm7, %v451_v48 }
 0x109   : > { %v1024_v50 = vpop.f32.mrf.mxu0  ;;  %v1047_v51 = vpop.f32.mrf.mxu1 }
 0x10a   : > { %v1025_v10 = vadd.f32 %v1662_v1, %v1024_v50 }
 0x10c   : > { %v1048_v13 = vadd.f32 %v1047_v51, %v1025_v10 }
 0x111   : > { %v1026_v52 = vpop.f32.mrf.mxu0  ;;  %v1049_v53 = vpop.f32.mrf.mxu1 }
 0x112   : > { %v1027_v2 = vadd.f32 %v1662_v1, %v1026_v52 }
 0x114   : > { %v1070_v54 = vpop.f32.mrf.mxu2  ;;  %v1050_v9 = vadd.f32 %v1049_v53, %v1027_v2 }
 0x115   : > { %v1071_v16 = vadd.f32 %v1070_v54, %v1048_v13 }
 0x117   : > { %v1093_v43 = vpop.f32.mrf.mxu3 }
 0x118   : > { %v1094_v5 = vadd.f32 %v1093_v43, %v1071_v16 }
 0x119   : > { %v1029_v55 = vpop.f32.mrf.mxu0  ;;  %v1052_v56 = vpop.f32.mrf.mxu1 }
 0x11a   : > { %v1030_v24 = vadd.f32 %v1662_v1, %v1029_v55 }
 0x11c   : > { %v1072_v57 = vpop.f32.mrf.mxu2  ;;  %v1053_v6 = vadd.f32 %v1052_v56, %v1030_v24 }
 0x11d   : > { %v1073_v21 = vadd.f32 %v1072_v57, %v1050_v9 }
 0x11f   : > { %v1095_v58 = vpop.f32.mrf.mxu3 }
 0x120   : > { %v1096_v28 = vadd.f32 %v1095_v58, %v1073_v21 }
 0x121   : > { %v1031_v59 = vpop.f32.mrf.mxu0  ;;  %v1054_v36 = vpop.f32.mrf.mxu1 }
 0x122   : > { %v1032_v15 = vadd.f32 %v1662_v1, %v1031_v59 }
 0x124   : > { %v1075_v60 = vpop.f32.mrf.mxu2  ;;  %v1055_v40 = vadd.f32 %v1054_v36, %v1032_v15 }
 0x125   : > { %v1076_v33 = vadd.f32 %v1075_v60, %v1053_v6 }
 0x127   : > { %v1098_v61 = vpop.f32.mrf.mxu3 }
 0x128   : > { %v1099_v27 = vadd.f32 %v1098_v61, %v1076_v33 }
 0x129   : > { %v1034_v62 = vpop.f32.mrf.mxu0  ;;  %v1057_v63 = vpop.f32.mrf.mxu1 }
 0x12a   : > { %v1035_v49 = vadd.f32 %v1662_v1, %v1034_v62 }
 0x12c   : > { %v1077_v0 = vpop.f32.mrf.mxu2  ;;  %v1058_v43 = vadd.f32 %v1057_v63, %v1035_v49 }
 0x12d   : > { %v1078_v45 = vadd.f32 %v1077_v0, %v1055_v40 }
 0x12f   : > { %v1100_v4 = vpop.f32.mrf.mxu3 }
 0x130   : > { %v1101_v53 = vadd.f32 %v1100_v4, %v1078_v45 }
 0x131   : > { %v1036_v7 = vpop.f32.mrf.mxu0  ;;  %v1059_v8 = vpop.f32.mrf.mxu1 }
 0x134   : > { %v1080_v11 = vpop.f32.mrf.mxu2 }
 0x135   : > { %v1081_v59 = vadd.f32 %v1080_v11, %v1058_v43 }
 0x137   : > { %v1103_v14 = vpop.f32.mrf.mxu3 }
 0x138   : > { %v1104_v10 = vadd.f32 %v1103_v14, %v1081_v59 }
 0x139   : > { %v1116_v17 = vpop.f32.mrf.mxu0  ;;  %v1139_v3 = vpop.f32.mrf.mxu1 }
 0x13a   : > { %v1117_v19 = vadd.f32 %v1116_v17, %v1094_v5 }
 0x13c   : > { %v1082_v18 = vpop.f32.mrf.mxu2  ;;  %v1140_v25 = vadd.f32 %v1139_v3, %v1117_v19 }
 0x13f   : > { %v1105_v20 = vpop.f32.mrf.mxu3 }
 0x141   : > { %v1118_v22 = vpop.f32.mrf.mxu0  ;;  %v1141_v23 = vpop.f32.mrf.mxu1 }
 0x142   : > { %v1119_v30 = vadd.f32 %v1118_v22, %v1096_v28 }
 0x144   : > { %v1162_v26 = vpop.f32.mrf.mxu2  ;;  %v1142_v12 = vadd.f32 %v1141_v23, %v1119_v30 }
 0x145   : > { %v1163_v29 = vadd.f32 %v1162_v26, %v1140_v25 }
 0x147   : > { %v1185_v31 = vpop.f32.mrf.mxu3 }
 0x148   : > { %v1186_v32 = vadd.f32 %v1185_v31, %v1163_v29 }
 0x149   : > { %v1121_v34 = vpop.f32.mrf.mxu0  ;;  %v1144_v35 = vpop.f32.mrf.mxu1 }
 0x14a   : > { %v1199_v37 = vmul.f32 0.5, %v1186_v32  ;;  %v1122_v41 = vadd.f32 %v1121_v34, %v1099_v27 }
 0x14c   : > { %v1164_v38 = vpop.f32.mrf.mxu2  ;;  %1663 = vtanh.f32 %v1199_v37  ;;  %v1145_v50 = vadd.f32 %v1144_v35, %v1122_v41 }
 0x14d   : > { %v1165_v39 = vadd.f32 %v1164_v38, %v1142_v12 }
 0x14f   : > { %v1187_v42 = vpop.f32.mrf.mxu3 }
 0x150   : > { %v1188_v44 = vadd.f32 %v1187_v42, %v1165_v39 }
 0x151   : > { %v1123_v46 = vpop.f32.mrf.mxu0  ;;  %v1146_v47 = vpop.f32.mrf.mxu1 }
 0x152   : > { %v1200_v48 = vmul.f32 0.5, %v1188_v44  ;;  %v1664_v51 = vpop.eup %1663  ;;  %v1124_v56 = vadd.f32 %v1123_v46, %v1101_v53 }
 0x153   : > { %v1209_v55 = vadd.f32 1.0, %v1664_v51 }
 0x154   : > { %1665 = vtanh.f32 %v1200_v48  ;;  %v1167_v52 = vpop.f32.mrf.mxu2  ;;  %v1147_v62 = vadd.f32 %v1146_v47, %v1124_v56 }
 0x155   : > { %v1168_v54 = vadd.f32 %v1167_v52, %v1145_v50  ;;  %v1214_v7 = vmul.f32 0.5, %v1209_v55 }
 0x157   : > { %v1190_v57 = vpop.f32.mrf.mxu3  ;;  %v1219_v4 = vmul.f32 %v1214_v7, %v1186_v32 }
 0x158   : > { %v1191_v58 = vadd.f32 %v1190_v57, %v1168_v54 }
 0x159   : > { %v1126_v36 = vpop.f32.mrf.mxu0  ;;  %v1149_v60 = vpop.f32.mrf.mxu1 }
 0x15a   : > { %v1666_v61 = vpop.eup %1665  ;;  %v1201_v0 = vmul.f32 0.5, %v1191_v58  ;;  %v1127_v17 = vadd.f32 %v1126_v36, %v1104_v10 }
 0x15b   : > { %v1210_v8 = vadd.f32 1.0, %v1666_v61 }
 0x15c   : > { %v1169_v1 = vpop.f32.mrf.mxu2  ;;  %1667 = vtanh.f32 %v1201_v0  ;;  %v1150_v14 = vadd.f32 %v1149_v60, %v1127_v17 }
 0x15d   : > { %v1215_v13 = vmul.f32 0.5, %v1210_v8  ;;  %v1170_v16 = vadd.f32 %v1169_v1, %v1147_v62 }
 0x15f   : > { %v1220_v63 = vmul.f32 %v1215_v13, %v1188_v44  ;;  %v1192_v3 = vpop.f32.mrf.mxu3 }
 0x160   : > { %v1193_v11 = vadd.f32 %v1192_v3, %v1170_v16 }
 0x161   : > { %v1638_v2 = vpack.c.bf16 %v1220_v63, %v1219_v4  ;;  %v1128_v18 = vpop.f32.mrf.mxu0  ;;  %v1151_v5 = vpop.f32.mrf.mxu1 }
 0x162   : > { %v1202_v9 = vmul.f32 0.5, %v1193_v11  ;;  %v1668_v19 = vpop.eup %1667 }
 0x163   : > { %1639 = vst [vmem:[%s2060_s4] sm:$0xff] %v1638_v2   ;;  %v1211_v22 = vadd.f32 1.0, %v1668_v19 }
 0x164   : > { %1669 = vtanh.f32 %v1202_v9  ;;  %v1172_v20 = vpop.f32.mrf.mxu2 }
 0x165   : > { %v1173_v21 = vadd.f32 %v1172_v20, %v1150_v14  ;;  %v1216_v28 = vmul.f32 0.5, %v1211_v22 }
 0x167   : > { %v1195_v23 = vpop.f32.mrf.mxu3  ;;  %v1221_v31 = vmul.f32 %v1216_v28, %v1191_v58 }
 0x168   : > { %v1196_v24 = vadd.f32 %v1195_v23, %v1173_v21 }
 0x16a   : > { %v1670_v25 = vpop.eup %1669  ;;  %v1203_v26 = vmul.f32 0.5, %v1196_v24 }
 0x16b   : > { %v1212_v29 = vadd.f32 1.0, %v1670_v25 }
 0x16c   : > { %1671 = vtanh.f32 %v1203_v26  ;;  %v1174_v6 = vpop.f32.mrf.mxu2 }
 0x16d   : > { %v1217_v30 = vmul.f32 0.5, %v1212_v29 }
 0x16f   : > { %v1222_v32 = vmul.f32 %v1217_v30, %v1193_v11  ;;  %v1197_v33 = vpop.f32.mrf.mxu3 }
 0x171   : > { %v1643_v34 = vpack.c.bf16 %v1222_v32, %v1221_v31 }
 0x172   : > { %v1672_v35 = vpop.eup %1671 }
 0x173   : > { %1648 = vst [vmem:[%s2060_s4 + $0x8] sm:$0xff] %v1643_v34   ;;  %v1213_v37 = vadd.f32 1.0, %v1672_v35 }
 0x175   : > { %v1218_v15 = vmul.f32 0.5, %v1213_v37 }
 0x177   : > { %v1223_v12 = vmul.f32 %v1218_v15, %v1196_v24 }
 0x179   : > { %v1228_v38 = vpack.c.bf16 %v1223_v12, %v1223_v12 }
 0x17b   : > { %1233 = vst [vmem:[%s2060_s4 + $0x10] sm:$0xf] %v1228_v38 }
 0x17c PF: > { %s13_s12 = sadd.s32 1, %s1684_s12  }
 0x17d   : > { %p10_p4 = scmp.ge.s32.totalorder %s13_s12, 4  }
 0x17f   :  { %12 = sbr.rel (!%p10_p4) target bundleno = 1 (0x1), region = 62 }

// kernel: tile.30
= control target key start
LH: loop header
LB: loop body
LE: loop exit
PB: predicated region body
PF: predicated region fallthrough
CT: control target
= control target key end

     0   :  { %s22_s0 = inlined_call_operand.vmem [shape: f32[64], index: 0, kind: input, shape index: {}]   ;;  %s23_s1 = inlined_call_operand.vmem [shape: f32[2,64], index: 1, kind: output, shape index: {}]  }
   0x1   :  { %v4_v0 = vld [vmem:[%s22_s0] ss:$0 sm:$0xff] }
   0x2   :  { %5 = vst [vmem:[%s23_s1] sm:$0x3] %v4_v0 }

// kernel: tile.31
= control target key start
LH: loop header
LB: loop body
LE: loop exit
PB: predicated region body
PF: predicated region fallthrough
CT: control target
= control target key end

     0   :  { %vm7_vm0 = vcmask 523264   ;;  %vm13_vm1 = vcmask 1048064   ;;  %s39_s0 = inlined_call_operand.vmem [shape: f32[2,64], index: 0, kind: input, shape index: {}]   ;;  %s40_s1 = inlined_call_operand.vmem [shape: f32[1,128], index: 1, kind: output, shape index: {}]  }
   0x1   :  { %v4_v0 = vld [vmem:[%s39_s0] sm:$0x3]  ;;  %s22_s0 = smov 64  }
   0x2   :  { %5 = vst [vmem:[#allocation1] sm:$0x3] %v4_v0 }
   0x9   :  { %v10_v1 = vld [vmem:[#allocation1 + $0x1] sm:$0x1]   ;;  %v6_v2 = vld [vmem:[#allocation1] sm:$0x1]  }
   0xa   :  { %11 = vrot.lane.b32.xlu0 %v10_v1, %s22_s0  ;;  %8 = vst.msk [vmem:[#allocation0] sm:$0x1] %vm7_vm0, %v6_v2  }
  0x7c   :  { %v12_v3 = vpop.permute.xlu0 %11  }
  0x7d   :  { %14 = vst.msk [vmem:[#allocation0] sm:$0x1] %vm13_vm1, %v12_v3  }
  0x84   :  { %v17_v4 = vld [vmem:[#allocation0] sm:$0x1] }
  0x85   :  { %20 = vst [vmem:[%s40_s1] sm:$0x1] %v17_v4 }

// kernel: conv_encoder_y.8
= control target key start
LH: loop header
LB: loop body
LE: loop exit
PB: predicated region body
PF: predicated region fallthrough
CT: control target
= control target key end

     0   :  { %s1742_s12 = smov 0   ;;  %s2091_s0 = inlined_call_operand.vmem [shape: bf16[2,88,128], index: 0, kind: input, shape index: {}]   ;;  %s2092_s1 = inlined_call_operand.vmem [shape: bf16[1280,128], index: 1, kind: input, shape index: {}]   ;;  %s2093_s2 = inlined_call_operand.vmem [shape: f32[1,128], index: 2, kind: input, shape index: {}]   ;;  %s2094_s3 = inlined_call_operand.vmem [shape: bf16[2,20,128], index: 3, kind: output, shape index: {}]  }
   0x1 LB: > { %s1245_s13 = sadd.s32 4294967295, %s1720_s12   ;;  %p1249_p0 = scmp.ge.s32.totalorder %s1720_s12, 1  ;;  %s1720_s12 = sphi %s1742_s12, %s13_s12  }
   0x2   : > { %p137_p1 = scmp.lt.s32.totalorder %s1720_s12, 3 }
   0x4   : > { %p138_p2 = pnand %p1249_p0, %p137_p1 }
   0x5   : > { %p161_p3 = scmp.lt.s32.totalorder (!%p138_p2), %s1245_s13, 1 }
   0x6   : > { %141 = sbr.rel (%p138_p2) target bundleno = 264 (0x108), region = 32 }
   0xb   : > { %v1591_v0 = vld [vmem:[%s2092_s1 + $0x38] sm:$0xff]  ;;  %v1590_v4 = vld [vmem:[%s2092_s1 + $0x30] sm:$0xff]  ;;  %s2096_s13 = smov (!%p161_p3, %s1245_s13), 1  ;;  %v1589_v8 = vld [vmem:[%s2092_s1 + $0x28] sm:$0xff]  ;;  %vm209_vm0 = vcmask 1044480   ;;  %vm223_vm1 = vcmask 1045504  }
   0xc   : > { %v1599_v1 = vld [vmem:[%s2092_s1 + $0x78] sm:$0xff]  ;;  %989 = vmatpush.bf16.msra.mxu0 %v1591_v0  ;;  %v1598_v5 = vld [vmem:[%s2092_s1 + $0x70] sm:$0xff]  ;;  %v1597_v9 = vld [vmem:[%s2092_s1 + $0x68] sm:$0xff]  ;;  %s1692_s11 = smul.u32 44, %s2096_s13  ;;  %vm237_vm2 = vcmask 1046528  }
   0xd   : > { %v1607_v2 = vld [vmem:[%s2092_s1 + $0xb8] sm:$0xff]  ;;  %1007 = vmatpush.bf16.msra.mxu1 %v1599_v1  ;;  %v1606_v6 = vld [vmem:[%s2092_s1 + $0xb0] sm:$0xff]  ;;  %v1605_v10 = vld [vmem:[%s2092_s1 + $0xa8] sm:$0xff]  ;;  %vm246_vm3 = vsmask.f32 7424  ;;  %s1693_s7 = smul.u32 12, %s2096_s13 }
   0xe   : > { %v1615_v3 = vld [vmem:[%s2092_s1 + $0xf8] sm:$0xff]  ;;  %1025 = vmatpush.bf16.msra.mxu2 %v1607_v2  ;;  %v1614_v7 = vld [vmem:[%s2092_s1 + $0xf0] sm:$0xff]  ;;  %v1613_v11 = vld [vmem:[%s2092_s1 + $0xe8] sm:$0xff]  ;;  %s1804_s24 = scalar_lea.vmem %s2091_s0, %s1692_s11  ;;  %vm267_vm4 = vsmask.f32 4352 }
   0xf   : > { %1043 = vmatpush.bf16.msra.mxu3 %v1615_v3  ;;  %v1588_v12 = vld [vmem:[%s2092_s1 + $0x20] sm:$0xff]  ;;  %v1587_v16 = vld [vmem:[%s2092_s1 + $0x18] sm:$0xff]  ;;  %v1715_v20 = vld [vmem:[%s1804_s24 + $0x8] sm:$0x8]  ;;  %vm290_vm5 = vsmask.f32 5376  ;;  %s170_s10 = scalar_lea.vmem %s2094_s3, %s1693_s7 }
  0x10   : > { %990 = vmatpush.bf16.msra.mxu0 %v1590_v4  ;;  %v1596_v13 = vld [vmem:[%s2092_s1 + $0x60] sm:$0xff]  ;;  %v1595_v17 = vld [vmem:[%s2092_s1 + $0x58] sm:$0xff]  ;;  %v1820_v21 = vld [vmem:[%s1804_s24 + $0xc] sm:$0xff]   ;;  %vm313_vm6 = vsmask.f32 6400 }
  0x11   : > { %1008 = vmatpush.bf16.msra.mxu1 %v1598_v5  ;;  %v1604_v14 = vld [vmem:[%s2092_s1 + $0xa0] sm:$0xff]  ;;  %v1603_v18 = vld [vmem:[%s2092_s1 + $0x98] sm:$0xff]  ;;  %v1717_v22 = vld [vmem:[%s1804_s24 + $0x8] sm:$0xf0]   ;;  %v205_v29 = vunpack.c.h.b16 %v1820_v21 }
  0x12   : > { %1026 = vmatpush.bf16.msra.mxu2 %v1606_v6  ;;  %v1612_v15 = vld [vmem:[%s2092_s1 + $0xe0] sm:$0xff]  ;;  %v1611_v19 = vld [vmem:[%s2092_s1 + $0xd8] sm:$0xff]  ;;  %v177_v23 = vld [vmem:[%s1804_s24 + $0x14] sm:$0x1]  ;;  %v1851_v40 = vor.u32 %v1717_v22, %v1715_v20 }
  0x13   : > { %1044 = vmatpush.bf16.msra.mxu3 %v1614_v7  ;;  %v180_v24 = vld [vmem:[%s1804_s24 + $0x1c] sm:$0xf]  ;;  %v183_v25 = vld [vmem:[%s1804_s24 + $0x28] sm:$0x7]  ;;  %v1586_v26 = vld [vmem:[%s2092_s1 + $0x10] sm:$0xff]  ;;  %v206_v30 = vunpack.c.l.b16 %v177_v23 }
  0x14   : > { %991 = vmatpush.bf16.msra.mxu0 %v1589_v8  ;;  %v1594_v27 = vld [vmem:[%s2092_s1 + $0x50] sm:$0xff]  ;;  %v1582_v33 = vld [vmem:[%s1804_s24 + $0x14] sm:$0xf0]  ;;  %v1841_v34 = vunpack.c.l.b16 %v180_v24  ;;  %v234_v35 = vunpack.c.l.b16 %v183_v25  ;;  %v1258_v36 = vld [vmem:[%s1804_s24 + $0x20] sm:$0xe]  ;;  %v210_v50 = vrot.slane %v1851_v40, 3 }
  0x15   : > { %1009 = vmatpush.bf16.msra.mxu1 %v1597_v9  ;;  %v1602_v28 = vld [vmem:[%s2092_s1 + $0x90] sm:$0xff]  ;;  %v1583_v37 = vld [vmem:[%s1804_s24 + $0x20] sm:$0xf0]  ;;  %v1585_v38 = vld [vmem:[%s2092_s1 + $0x8] sm:$0xff]  ;;  %v1855_v41 = vpack.c.b16 %v206_v30, %v205_v29 }
  0x16   : > { %1027 = vmatpush.bf16.msra.mxu2 %v1605_v10  ;;  %v1610_v31 = vld [vmem:[%s2092_s1 + $0xd0] sm:$0xff]  ;;  %v1593_v39 = vld [vmem:[%s2092_s1 + $0x48] sm:$0xff]  ;;  %v222_v45 = vpack.c.b16 %v1841_v34, %v1841_v34  ;;  %v1867_v46 = vor.u32 %v1583_v37, %v1258_v36  ;;  %v1869_v47 = vpack.c.b16 %v234_v35, %v234_v35  ;;  %v1584_v48 = vld [vmem:[%s2092_s1] sm:$0xff]  ;;  %v269_v37 = vshrl.u32 %v1851_v40, 16 }
  0x17   : > { %1045 = vmatpush.bf16.msra.mxu3 %v1613_v11  ;;  %v1254_v32 = vld [vmem:[%s1804_s24 + $0x14] sm:$0xc]  ;;  %v1601_v43 = vld [vmem:[%s2092_s1 + $0x88] sm:$0xff]  ;;  %v1592_v49 = vld [vmem:[%s2092_s1 + $0x40] sm:$0xff]  ;;  %v211_v51 = vrot.slane %v1855_v41, 3 }
  0x18   : > { %992 = vmatpush.bf16.msra.mxu0 %v1588_v12  ;;  %v1857_v42 = vor.u32 %v1582_v33, %v1254_v32  ;;  %v1609_v44 = vld [vmem:[%s2092_s1 + $0xc8] sm:$0xff]  ;;  %v1600_v52 = vld [vmem:[%s2092_s1 + $0x80] sm:$0xff]  ;;  %v1886_v55 = vrot.slane %v222_v45, 2  ;;  %v238_v56 = vrot.slane %v1867_v46, 1  ;;  %v239_v57 = vrot.slane %v1869_v47, 1  ;;  %v1623_v58 = vld [vmem:[%s2092_s1 + $0x138] sm:$0xff] }
  0x19   : > { %1010 = vmatpush.bf16.msra.mxu1 %v1596_v13  ;;  %v1608_v53 = vld [vmem:[%s2092_s1 + $0xc0] sm:$0xff]  ;;  %v1631_v59 = vld [vmem:[%s2092_s1 + $0x178] sm:$0xff]  ;;  %v212_v61 = vsel %vm209_vm0, %v210_v50, %v211_v51  ;;  %v1622_v2 = vld [vmem:[%s2092_s1 + $0x130] sm:$0xff]  ;;  %v315_v50 = vshrl.u32 %v1867_v46, 16  ;;  %v318_v47 = vshll.u32 %v1867_v46, 16 }
  0x1a   : > { %1028 = vmatpush.bf16.msra.mxu2 %v1604_v14  ;;  %v224_v54 = vrot.slane %v1857_v42, 2  ;;  %v1897_v60 = vld [vmem:[%s1804_s24] sm:$0xff]   ;;  %v240_v63 = vsel %vm237_vm2, %v238_v56, %v239_v57  ;;  %v1639_v0 = vld [vmem:[%s2092_s1 + $0x1b8] sm:$0xff]  ;;  %v1630_v3 = vld [vmem:[%s2092_s1 + $0x170] sm:$0xff]  ;;  %v295_v45 = vshll.u32 %v1857_v42, 16 }
  0x1b   : > { %1046 = vmatpush.bf16.msra.mxu3 %v1612_v15  ;;  %v1647_v1 = vld [vmem:[%s2092_s1 + $0x1f8] sm:$0xff]  ;;  %v1638_v4 = vld [vmem:[%s2092_s1 + $0x1b0] sm:$0xff]  ;;  %v1621_v6 = vld [vmem:[%s2092_s1 + $0x128] sm:$0xff]  ;;  %v250_v35 = vshll.u32 %v1897_v60, 16 }
  0x1c   : > { %993 = vmatpush.bf16.msra.mxu0 %v1587_v16  ;;  %v226_v62 = vsel %vm223_vm1, %v224_v54, %v1886_v55  ;;  %v1646_v5 = vld [vmem:[%s2092_s1 + $0x1f0] sm:$0xff]  ;;  %v1629_v7 = vld [vmem:[%s2092_s1 + $0x168] sm:$0xff]  ;;  %v186_v10 = vld [vmem:[%s1804_s24 + $0x20] sm:$0x1] }
  0x1d   : > { %1011 = vmatpush.bf16.msra.mxu1 %v1595_v17  ;;  %v173_v8 = vld [vmem:[%s1804_s24 + $0x8] sm:$0x3]  ;;  %v185_v9 = vld [vmem:[%s1804_s24 + $0x14] sm:$0x3]  ;;  %v1620_v13 = vld [vmem:[%s2092_s1 + $0x120] sm:$0xff] }
  0x1e   : > { %1029 = vmatpush.bf16.msra.mxu2 %v1603_v18  ;;  %v1637_v11 = vld [vmem:[%s2092_s1 + $0x1a8] sm:$0xff]  ;;  %v1628_v14 = vld [vmem:[%s2092_s1 + $0x160] sm:$0xff]  ;;  %v194_v16 = vunpack.c.l.b16 %v173_v8  ;;  %v1948_v18 = vunpack.c.l.b16 %v185_v9  ;;  %v1619_v24 = vld [vmem:[%s2092_s1 + $0x118] sm:$0xff] }
  0x1f   : > { %1047 = vmatpush.bf16.msra.mxu3 %v1611_v19  ;;  %v1645_v12 = vld [vmem:[%s2092_s1 + $0x1e8] sm:$0xff]  ;;  %v288_v19 = vunpack.c.l.b16 %v186_v10  ;;  %v1636_v20 = vld [vmem:[%s2092_s1 + $0x1a0] sm:$0xff]  ;;  %v1627_v25 = vld [vmem:[%s2092_s1 + $0x158] sm:$0xff] }
  0x20   : > { %994 = vmatpush.bf16.msra.mxu0 %v1586_v26  ;;  %v187_v15 = vld [vmem:[%s1804_s24 + $0x28] sm:$0xf]  ;;  %v1644_v22 = vld [vmem:[%s2092_s1 + $0x1e0] sm:$0xff]  ;;  %v1643_v32 = vld [vmem:[%s2092_s1 + $0x1d8] sm:$0xff] }
  0x21   : > { %1012 = vmatpush.bf16.msra.mxu1 %v1594_v27  ;;  %v184_v17 = vld [vmem:[%s1804_s24 + $0x8] sm:$0x7]  ;;  %v311_v23 = vunpack.c.l.b16 %v187_v15  ;;  %v196_v27 = vpack.c.b16 %v194_v16, %v194_v16  ;;  %v289_v30 = vpack.c.b16 %v288_v19, %v1841_v34  ;;  %v1626_v34 = vld [vmem:[%s2092_s1 + $0x150] sm:$0xff]  ;;  %v1655_v9 = vld [vmem:[%s2092_s1 + $0x238] sm:$0xff] }
  0x22   : > { %1030 = vmatpush.bf16.msra.mxu2 %v1602_v28  ;;  %v244_v26 = vunpack.c.l.b16 %v184_v17  ;;  %v266_v28 = vpack.c.b16 %v1948_v18, %v205_v29  ;;  %v1618_v29 = vld [vmem:[%s2092_s1 + $0x110] sm:$0xff]  ;;  %v1617_v54 = vld [vmem:[%s2092_s1 + $0x108] sm:$0xff]  ;;  %v1663_v10 = vld [vmem:[%s2092_s1 + $0x278] sm:$0xff] }
  0x23   : > { %1048 = vmatpush.bf16.msra.mxu3 %v1610_v31  ;;  %v1635_v31 = vld [vmem:[%s2092_s1 + $0x198] sm:$0xff]  ;;  %v312_v33 = vpack.c.b16 %v311_v23, %v311_v23  ;;  %v1634_v41 = vld [vmem:[%s2092_s1 + $0x190] sm:$0xff]  ;;  %v1632_v15 = vld [vmem:[%s2092_s1 + $0x180] sm:$0xff] }
  0x24   : > { %995 = vmatpush.bf16.msra.mxu0 %v1585_v38  ;;  %v1979_v36 = vpack.c.b16 %v244_v26, %v244_v26  ;;  %v272_v38 = vshll.u32 %v1851_v40, 16  ;;  %v1642_v40 = vld [vmem:[%s2092_s1 + $0x1d0] sm:$0xff]  ;;  %v1640_v16 = vld [vmem:[%s2092_s1 + $0x1c0] sm:$0xff] }
  0x25   : > { %1013 = vmatpush.bf16.msra.mxu1 %v1593_v39  ;;  %v277_v39 = vshrl.u32 %v266_v28, 16  ;;  %v1654_v26 = vld [vmem:[%s2092_s1 + $0x230] sm:$0xff] }
  0x26   : > { %1031 = vmatpush.bf16.msra.mxu2 %v1601_v43  ;;  %v280_v43 = vshll.u32 %v266_v28, 16  ;;  %v255_v56 = vshll.u32 %v1979_v36, 16  ;;  %v1653_v28 = vld [vmem:[%s2092_s1 + $0x228] sm:$0xff] }
  0x27   : > { %1049 = vmatpush.bf16.msra.mxu3 %v1609_v44  ;;  %v292_v44 = vshrl.u32 %v1857_v42, 16  ;;  %v248_v42 = vshrl.u32 %v1897_v60, 16  ;;  %v279_v46 = vrot.slane %v277_v39, 3  ;;  %v1649_v39 = vld [vmem:[%s2092_s1 + $0x208] sm:$0xff] }
  0x28   : > { %996 = vmatpush.bf16.msra.mxu0 %v1584_v48  ;;  %v300_v48 = vshrl.u32 %v289_v30, 16 }
  0x29   : > { %1014 = vmatpush.bf16.msra.mxu1 %v1592_v49  ;;  %v303_v49 = vshll.u32 %v289_v30, 16  ;;  %v1661_v30 = vld [vmem:[%s2092_s1 + $0x268] sm:$0xff] }
  0x2a   : > { %1032 = vmatpush.bf16.msra.mxu2 %v1600_v52  ;;  %v326_v52 = vshll.u32 %v312_v33, 16 }
  0x2b   : > { %1050 = vmatpush.bf16.msra.mxu3 %v1608_v53  ;;  %997 = vmatmul.bf16.vlgmr.msra.gmra.mxu0 %v1897_v60  ;;  %v252_v53 = vrot.slane %v250_v35, 1  ;;  %v302_v60 = vrot.slane %v300_v48, 2  ;;  %v1651_v35 = vld [vmem:[%s2092_s1 + $0x218] sm:$0xff] }
  0x2c   : > { %1061 = vmatpush.bf16.msrb.mxu0 %v1623_v58  ;;  %1015 = vmatmul.bf16.vlgmr.msra.gmra.mxu1 %v212_v61  ;;  %v274_v58 = vrot.slane %v272_v38, 4  ;;  %v294_v61 = vrot.slane %v292_v44, 2  ;;  %v1658_v38 = vld [vmem:[%s2092_s1 + $0x250] sm:$0xff]  ;;  %v1673_v44 = vld [vmem:[%s1804_s24] sm:$0xf0] }
  0x2d   : > { %1079 = vmatpush.bf16.msrb.mxu1 %v1631_v59  ;;  %1033 = vmatmul.bf16.vlgmr.msra.gmra.mxu2 %v226_v62  ;;  %v282_v59 = vrot.slane %v280_v43, 4  ;;  %v297_v62 = vrot.slane %v295_v45, 3  ;;  %v253_v8 = vor.u32 %v252_v53, %v248_v42  ;;  %v1657_v43 = vld [vmem:[%s2092_s1 + $0x248] sm:$0xff]  ;;  %v1674_v45 = vld [vmem:[%s1804_s24] sm:$0xe] }
  0x2e   : > { %1051 = vmatmul.bf16.vlgmr.msra.gmra.mxu3 %v240_v63  ;;  %1097 = vmatpush.bf16.msrb.mxu2 %v1639_v0  ;;  %v305_v63 = vrot.slane %v303_v49, 3  ;;  %v1633_v0 = vld [vmem:[%s2092_s1 + $0x188] sm:$0xff]  ;;  %v1675_v48 = vor.u32 %v1674_v45, %v1673_v44  ;;  %v1648_v49 = vld [vmem:[%s2092_s1 + $0x200] sm:$0xff] }
  0x2f   : > { %1115 = vmatpush.bf16.msrb.mxu3 %v1647_v1  ;;  %v1641_v1 = vld [vmem:[%s2092_s1 + $0x1c8] sm:$0xff] }
  0x30   : > { %1062 = vmatpush.bf16.msrb.mxu0 %v1622_v2  ;;  %v317_v2 = vrot.slane %v315_v50, 1  ;;  %v306_v17 = vor.u32 %v305_v63, %v302_v60  ;;  %v337_v50 = vrot.slane %v1979_v36, 1 }
  0x31   : > { %1080 = vmatpush.bf16.msrb.mxu1 %v1630_v3  ;;  %v320_v3 = vrot.slane %v318_v47, 2 }
  0x32   : > { %1098 = vmatpush.bf16.msrb.mxu2 %v1638_v4 }
  0x33   : > { %1116 = vmatpush.bf16.msrb.mxu3 %v1646_v5  ;;  %v328_v5 = vrot.slane %v326_v52, 2  ;;  %v321_v19 = vor.u32 %v320_v3, %v317_v2 }
  0x34   : > { %1063 = vmatpush.bf16.msrb.mxu0 %v1621_v6  ;;  %v1616_v6 = vld [vmem:[%s2092_s1 + $0x100] sm:$0xff] }
  0x35   : > { %1081 = vmatpush.bf16.msrb.mxu1 %v1629_v7  ;;  %v1624_v7 = vld [vmem:[%s2092_s1 + $0x140] sm:$0xff] }
  0x36   : > { %1099 = vmatpush.bf16.msrb.mxu2 %v1637_v11  ;;  %v257_v11 = vrot.slane %v255_v56, 1 }
  0x37   : > { %1117 = vmatpush.bf16.msrb.mxu3 %v1645_v12 }
  0x38   : > { %1064 = vmatpush.bf16.msrb.mxu0 %v1620_v13  ;;  %v283_v13 = vor.u32 %v282_v59, %v279_v46 }
  0x39   : > { %1082 = vmatpush.bf16.msrb.mxu1 %v1628_v14  ;;  %v298_v14 = vor.u32 %v297_v62, %v294_v61 }
  0x3a   : > { %1100 = vmatpush.bf16.msrb.mxu2 %v1636_v20 }
  0x3b   : > { %1118 = vmatpush.bf16.msrb.mxu3 %v1644_v22  ;;  %1002 = vmatmul.bf16.gmra.mxu0 %v196_v27  ;;  %v258_v22 = vsel %vm246_vm3, %v253_v8, %v257_v11  ;;  %v1662_v27 = vld [vmem:[%s2092_s1 + $0x270] sm:$0xff] }
  0x3c   : > { %1065 = vmatpush.bf16.msrb.mxu0 %v1619_v24  ;;  %1020 = vmatmul.bf16.gmra.mxu1 %v211_v51  ;;  %v323_v51 = vshrl.u32 %v312_v33, 16  ;;  %v307_v24 = vsel %vm290_vm5, %v298_v14, %v306_v17  ;;  %v259_v33 = vshrl.u32 %v1979_v36, 16 }
  0x3d   : > { %1083 = vmatpush.bf16.msrb.mxu1 %v1627_v25  ;;  %1038 = vmatmul.bf16.gmra.mxu2 %v1886_v55  ;;  %v1625_v55 = vld [vmem:[%s2092_s1 + $0x148] sm:$0xff] }
  0x3e   : > { %1056 = vmatmul.bf16.gmra.mxu3 %v239_v57  ;;  %1101 = vmatpush.bf16.msrb.mxu2 %v1635_v31  ;;  %v271_v57 = vrot.slane %v269_v37, 3  ;;  %v325_v4 = vrot.slane %v323_v51, 1  ;;  %v1652_v31 = vld [vmem:[%s2092_s1 + $0x220] sm:$0xff]  ;;  %v1650_v37 = vld [vmem:[%s2092_s1 + $0x210] sm:$0xff]  ;;  %v342_v51 = vpack.c.b16 %v1948_v18, %v1948_v18 }
  0x3f   : > { %1119 = vmatpush.bf16.msrb.mxu3 %v1643_v32  ;;  %v1660_v32 = vld [vmem:[%s2092_s1 + $0x260] sm:$0xff] }
  0x40   : > { %1066 = vmatpush.bf16.msrb.mxu0 %v1618_v29  ;;  %v275_v12 = vor.u32 %v274_v58, %v271_v57  ;;  %v329_v20 = vor.u32 %v328_v5, %v325_v4  ;;  %v1659_v29 = vld [vmem:[%s2092_s1 + $0x258] sm:$0xff] }
  0x41   : > { %1084 = vmatpush.bf16.msrb.mxu1 %v1626_v34  ;;  %v261_v34 = vor.u32 %v259_v33, %v257_v11 }
  0x42   : > { %1102 = vmatpush.bf16.msrb.mxu2 %v1634_v41  ;;  %v284_v23 = vsel %vm267_vm4, %v275_v12, %v283_v13  ;;  %v330_v25 = vsel %vm313_vm6, %v321_v19, %v329_v20  ;;  %v1656_v41 = vld [vmem:[%s2092_s1 + $0x240] sm:$0xff] }
  0x43   : > { %1120 = vmatpush.bf16.msrb.mxu3 %v1642_v40  ;;  %v336_v40 = vrot.slane %v1675_v48, 1 }
  0x44   : > { %1067 = vmatpush.bf16.msrb.mxu0 %v1617_v54 }
  0x45   : > { %1085 = vmatpush.bf16.msrb.mxu1 %v1625_v55  ;;  %v338_v47 = vsel %vm237_vm2, %v336_v40, %v337_v50 }
  0x46   : > { %1103 = vmatpush.bf16.msrb.mxu2 %v1633_v0 }
  0x47   : > { %1121 = vmatpush.bf16.msrb.mxu3 %v1641_v1  ;;  %v1702_v1 = vld [vmem:[%s2093_s2] ss:$0 sm:$0xff] }
  0x48   : > { %1068 = vmatpush.bf16.msrb.mxu0 %v1616_v6 }
  0x49   : > { %1086 = vmatpush.bf16.msrb.mxu1 %v1624_v7 }
  0x4a   : > { %1104 = vmatpush.bf16.msrb.mxu2 %v1632_v15 }
  0x4b   : > { %1122 = vmatpush.bf16.msrb.mxu3 %v1640_v16  ;;  %1069 = vmatmul.bf16.vlgmr.msrb.gmra.mxu0 %v258_v22 }
  0x4c   : > { %1133 = vmatpush.bf16.msra.mxu0 %v1655_v9  ;;  %1087 = vmatmul.bf16.vlgmr.msrb.gmra.mxu1 %v284_v23 }
  0x4d   : > { %1151 = vmatpush.bf16.msra.mxu1 %v1663_v10  ;;  %1105 = vmatmul.bf16.vlgmr.msrb.gmra.mxu2 %v307_v24 }
  0x4e   : > { %1676 = vmatpush.bf16.msra.mxu2 %v1655_v9  ;;  %1123 = vmatmul.bf16.vlgmr.msrb.gmra.mxu3 %v330_v25 }
  0x4f   : > { %1684 = vmatpush.bf16.msra.mxu3 %v1663_v10 }
  0x50   : > { %1134 = vmatpush.bf16.msra.mxu0 %v1654_v26 }
  0x51   : > { %1152 = vmatpush.bf16.msra.mxu1 %v1662_v27 }
  0x52   : > { %1677 = vmatpush.bf16.msra.mxu2 %v1654_v26 }
  0x53   : > { %1685 = vmatpush.bf16.msra.mxu3 %v1662_v27 }
  0x54   : > { %1135 = vmatpush.bf16.msra.mxu0 %v1653_v28 }
  0x55   : > { %1153 = vmatpush.bf16.msra.mxu1 %v1661_v30 }
  0x56   : > { %1678 = vmatpush.bf16.msra.mxu2 %v1653_v28 }
  0x57   : > { %1686 = vmatpush.bf16.msra.mxu3 %v1661_v30 }
  0x58   : > { %1136 = vmatpush.bf16.msra.mxu0 %v1652_v31 }
  0x59   : > { %1154 = vmatpush.bf16.msra.mxu1 %v1660_v32 }
  0x5a   : > { %1679 = vmatpush.bf16.msra.mxu2 %v1652_v31 }
  0x5b   : > { %1687 = vmatpush.bf16.msra.mxu3 %v1660_v32  ;;  %1074 = vmatmul.bf16.gmra.mxu0 %v261_v34 }
  0x5c   : > { %1137 = vmatpush.bf16.msra.mxu0 %v1651_v35  ;;  %1092 = vmatmul.bf16.gmra.mxu1 %v283_v13 }
  0x5d   : > { %1155 = vmatpush.bf16.msra.mxu1 %v1659_v29  ;;  %1110 = vmatmul.bf16.gmra.mxu2 %v306_v17 }
  0x5e   : > { %1680 = vmatpush.bf16.msra.mxu2 %v1651_v35  ;;  %1128 = vmatmul.bf16.gmra.mxu3 %v329_v20 }
  0x5f   : > { %1688 = vmatpush.bf16.msra.mxu3 %v1659_v29 }
  0x60   : > { %1138 = vmatpush.bf16.msra.mxu0 %v1650_v37 }
  0x61   : > { %1156 = vmatpush.bf16.msra.mxu1 %v1658_v38 }
  0x62   : > { %1681 = vmatpush.bf16.msra.mxu2 %v1650_v37 }
  0x63   : > { %1689 = vmatpush.bf16.msra.mxu3 %v1658_v38 }
  0x64   : > { %1139 = vmatpush.bf16.msra.mxu0 %v1649_v39 }
  0x65   : > { %1157 = vmatpush.bf16.msra.mxu1 %v1657_v43 }
  0x66   : > { %1682 = vmatpush.bf16.msra.mxu2 %v1649_v39 }
  0x67   : > { %1690 = vmatpush.bf16.msra.mxu3 %v1657_v43 }
  0x68   : > { %1140 = vmatpush.bf16.msra.mxu0 %v1648_v49 }
  0x69   : > { %1158 = vmatpush.bf16.msra.mxu1 %v1656_v41 }
  0x6a   : > { %1683 = vmatpush.bf16.msra.mxu2 %v1648_v49 }
  0x6b   : > { %1691 = vmatpush.bf16.msra.mxu3 %v1656_v41  ;;  %1141 = vmatmul.bf16.vlgmr.msra.gmra.mxu0 %v338_v47 }
  0x6c   : > { %1159 = vmatmul.bf16.vlgmr.msra.gmra.mxu1 %v1820_v21 }
  0x6d   : > { %1146 = vmatmul.bf16.vlgmr.msra.gmra.mxu2 %v337_v50 }
  0x6e   : > { %1164 = vmatmul.bf16.vlgmr.msra.gmra.mxu3 %v342_v51 }
  0xa8   : > { %v998_v52 = vpop.f32.mrf.mxu0 }
  0xa9   : > { %v1016_v42 = vpop.f32.mrf.mxu1  ;;  %v999_v6 = vadd.f32 %v1702_v1, %v998_v52 }
  0xab   : > { %v1017_v7 = vadd.f32 %v1016_v42, %v999_v6 }
  0xb0   : > { %v1034_v53 = vpop.f32.mrf.mxu2  ;;  %v1000_v55 = vpop.f32.mrf.mxu0 }
  0xb1   : > { %v1052_v54 = vpop.f32.mrf.mxu3  ;;  %v1018_v36 = vpop.f32.mrf.mxu1  ;;  %v1035_v8 = vadd.f32 %v1034_v53, %v1017_v7  ;;  %v1001_v14 = vadd.f32 %v1702_v1, %v1000_v55 }
  0xb3   : > { %v1053_v15 = vadd.f32 %v1052_v54, %v1035_v8  ;;  %v1019_v17 = vadd.f32 %v1018_v36, %v1001_v14 }
  0xb8   : > { %v1036_v56 = vpop.f32.mrf.mxu2  ;;  %v1003_v58 = vpop.f32.mrf.mxu0 }
  0xb9   : > { %v1054_v57 = vpop.f32.mrf.mxu3  ;;  %v1021_v46 = vpop.f32.mrf.mxu1  ;;  %v1004_v11 = vadd.f32 %v1702_v1, %v1003_v58  ;;  %v1037_v22 = vadd.f32 %v1036_v56, %v1019_v17 }
  0xbb   : > { %v1022_v16 = vadd.f32 %v1021_v46, %v1004_v11  ;;  %v1055_v30 = vadd.f32 %v1054_v57, %v1037_v22 }
  0xc0   : > { %v1039_v59 = vpop.f32.mrf.mxu2  ;;  %v1005_v62 = vpop.f32.mrf.mxu0 }
  0xc1   : > { %v1057_v61 = vpop.f32.mrf.mxu3  ;;  %v1023_v60 = vpop.f32.mrf.mxu1  ;;  %v1040_v20 = vadd.f32 %v1039_v59, %v1022_v16 }
  0xc3   : > { %v1058_v28 = vadd.f32 %v1057_v61, %v1040_v20 }
  0xc8   : > { %v1041_v18 = vpop.f32.mrf.mxu2  ;;  %v1070_v0 = vpop.f32.mrf.mxu0 }
  0xc9   : > { %v1059_v63 = vpop.f32.mrf.mxu3  ;;  %v1088_v21 = vpop.f32.mrf.mxu1  ;;  %v1071_v19 = vadd.f32 %v1070_v0, %v1053_v15 }
  0xcb   : > { %v1089_v27 = vadd.f32 %v1088_v21, %v1071_v19 }
  0xd0   : > { %v1106_v2 = vpop.f32.mrf.mxu2  ;;  %v1072_v4 = vpop.f32.mrf.mxu0 }
  0xd1   : > { %v1124_v3 = vpop.f32.mrf.mxu3  ;;  %v1090_v5 = vpop.f32.mrf.mxu1  ;;  %v1107_v31 = vadd.f32 %v1106_v2, %v1089_v27  ;;  %v1073_v33 = vadd.f32 %v1072_v4, %v1055_v30 }
  0xd3   : > { %v1125_v35 = vadd.f32 %v1124_v3, %v1107_v31  ;;  %v1091_v43 = vadd.f32 %v1090_v5, %v1073_v33 }
  0xd8   : > { %v1108_v9 = vpop.f32.mrf.mxu2  ;;  %v1075_v12 = vpop.f32.mrf.mxu0 }
  0xd9   : > { %v1126_v10 = vpop.f32.mrf.mxu3  ;;  %v1093_v13 = vpop.f32.mrf.mxu1  ;;  %v1076_v32 = vadd.f32 %v1075_v12, %v1058_v28  ;;  %v1109_v48 = vadd.f32 %v1108_v9, %v1091_v43 }
  0xdb   : > { %v1094_v37 = vadd.f32 %v1093_v13, %v1076_v32  ;;  %v1127_v50 = vadd.f32 %v1126_v10, %v1109_v48 }
  0xe0   : > { %v1111_v23 = vpop.f32.mrf.mxu2  ;;  %v1077_v25 = vpop.f32.mrf.mxu0 }
  0xe1   : > { %v1129_v24 = vpop.f32.mrf.mxu3  ;;  %v1095_v26 = vpop.f32.mrf.mxu1  ;;  %v1112_v45 = vadd.f32 %v1111_v23, %v1094_v37 }
  0xe3   : > { %v1130_v40 = vadd.f32 %v1129_v24, %v1112_v45 }
  0xe8   : > { %v1113_v29 = vpop.f32.mrf.mxu2  ;;  %v1142_v38 = vpop.f32.mrf.mxu0 }
  0xe9   : > { %v1131_v34 = vpop.f32.mrf.mxu3  ;;  %v1160_v39 = vpop.f32.mrf.mxu1  ;;  %v1143_v44 = vadd.f32 %v1142_v38, %v1125_v35 }
  0xeb   : > { %v1161_v49 = vadd.f32 %v1160_v39, %v1143_v44 }
  0xed   : > { %v1169_v41 = vmul.f32 0.5, %v1161_v49 }
  0xef   : > { %1703 = vtanh.f32 %v1169_v41 }
  0xf0   : > { %v1147_v47 = vpop.f32.mrf.mxu2  ;;  %v1144_v42 = vpop.f32.mrf.mxu0 }
  0xf1   : > { %v1165_v51 = vpop.f32.mrf.mxu3  ;;  %v1148_v52 = vadd.f32 %v1147_v47, %v1130_v40  ;;  %v1145_v53 = vadd.f32 %v1144_v42, %v1127_v50  ;;  %v1162_v55 = vpop.f32.mrf.mxu1 }
  0xf3   : > { %v1166_v54 = vadd.f32 %v1165_v51, %v1148_v52  ;;  %v1163_v36 = vadd.f32 %v1162_v55, %v1145_v53 }
  0xf5   : > { %v1171_v56 = vmul.f32 0.5, %v1166_v54  ;;  %v1170_v57 = vmul.f32 0.5, %v1163_v36  ;;  %v1704_v58 = vpop.eup %1703 }
  0xf6   : > { %v1175_v61 = vadd.f32 1.0, %v1704_v58 }
  0xf7   : > { %1705 = vtanh.f32 %v1171_v56 }
  0xf8   : > { %1707 = vtanh.f32 %v1170_v57  ;;  %v1149_v46 = vpop.f32.mrf.mxu2  ;;  %v1178_v63 = vmul.f32 0.5, %v1175_v61 }
  0xf9   : > { %v1167_v59 = vpop.f32.mrf.mxu3 }
  0xfa   : > { %v1181_v3 = vmul.f32 %v1178_v63, %v1161_v49 }
  0xfd   : > { %v1706_v62 = vpop.eup %1705 }
  0xfe   : > { %v1708_v60 = vpop.eup %1707  ;;  %v1177_v18 = vadd.f32 1.0, %v1706_v62 }
  0xff   : > { %v1176_v0 = vadd.f32 1.0, %v1708_v60 }
 0x100   : > { %v1180_v21 = vmul.f32 0.5, %v1177_v18 }
 0x101   : > { %v1179_v1 = vmul.f32 0.5, %v1176_v0 }
 0x102   : > { %v1183_v2 = vmul.f32 %v1180_v21, %v1166_v54 }
 0x103   : > { %v1182_v4 = vmul.f32 %v1179_v1, %v1163_v36 }
 0x104   : > { %v1186_v5 = vpack.c.bf16 %v1183_v2, %v1183_v2 }
 0x105   : > { %v1671_v6 = vpack.c.bf16 %v1182_v4, %v1181_v3 }
 0x106   : > { %1189 = vst [vmem:[%s170_s10 + $0x8] sm:$0x3] %v1186_v5 }
 0x107   : > { %1672 = vst [vmem:[%s170_s10] sm:$0xff] %v1671_v6  }
 0x108 PF: > { %s13_s12 = sadd.s32 1, %s1720_s12  }
 0x109   : > { %p10_p4 = scmp.ge.s32.totalorder %s13_s12, 4  }
 0x10b   :  { %12 = sbr.rel (!%p10_p4) target bundleno = 1 (0x1), region = 62 }

// kernel: conv_encoder_y.9
= control target key start
LH: loop header
LB: loop body
LE: loop exit
PB: predicated region body
PF: predicated region fallthrough
CT: control target
= control target key end

     0   :  { %s2270_s12 = smov 0   ;;  %s2738_s0 = inlined_call_operand.vmem [shape: bf16[2,48,192], index: 0, kind: input, shape index: {}]   ;;  %s2739_s1 = inlined_call_operand.vmem [shape: bf16[1920,128], index: 1, kind: input, shape index: {}]   ;;  %s2740_s2 = inlined_call_operand.vmem [shape: f32[1,128], index: 2, kind: input, shape index: {}]   ;;  %s2741_s3 = inlined_call_operand.vmem [shape: bf16[2,10,128], index: 3, kind: output, shape index: {}]  }
   0x1 LB: > { %s1615_s13 = sadd.s32 4294967295, %s2247_s12   ;;  %p1619_p0 = scmp.ge.s32.totalorder %s2247_s12, 1  ;;  %s2247_s12 = sphi %s2270_s12, %s13_s12  }
   0x2   : > { %p137_p1 = scmp.lt.s32.totalorder %s2247_s12, 3 }
   0x4   : > { %p138_p2 = pnand %p1619_p0, %p137_p1 }
   0x5   : > { %p161_p3 = scmp.lt.s32.totalorder (!%p138_p2), %s1615_s13, 1  ;;  %s2249_s23 = smov (!%p138_p2), 64  }
   0x6   : > { %141 = sbr.rel (%p138_p2) target bundleno = 370 (0x172), region = 32 }
   0xb   : > { %v2113_v0 = vld [vmem:[%s2739_s1 + $0x38] sm:$0xff]  ;;  %s2743_s13 = smov (!%p161_p3, %s1615_s13), 1  ;;  %v2112_v2 = vld [vmem:[%s2739_s1 + $0x30] sm:$0xff]  ;;  %v2111_v5 = vld [vmem:[%s2739_s1 + $0x28] sm:$0xff]  ;;  %vm208_vm0 = vcmask 523264  }
   0xc   : > { %v2121_v1 = vld [vmem:[%s2739_s1 + $0x78] sm:$0xff]  ;;  %1336 = vmatpush.bf16.msra.mxu0 %v2113_v0  ;;  %v2120_v4 = vld [vmem:[%s2739_s1 + $0x70] sm:$0xff]  ;;  %s2226_s24 = smul.u32 48, %s2743_s13  ;;  %v2119_v6 = vld [vmem:[%s2739_s1 + $0x68] sm:$0xff]  ;;  %s2105_s19 = sshll.u32 %s2743_s13, 3 }
   0xd   : > { %v2129_v3 = vld [vmem:[%s2739_s1 + $0xb8] sm:$0xff]  ;;  %1350 = vmatpush.bf16.msra.mxu1 %v2121_v1  ;;  %v2128_v8 = vld [vmem:[%s2739_s1 + $0xb0] sm:$0xff]  ;;  %v2110_v26 = vld [vmem:[%s2739_s1 + $0x20] sm:$0xff]  ;;  %s170_s22 = scalar_lea.vmem %s2741_s3, %s2105_s19 }
   0xe   : > { %1364 = vmatpush.bf16.msra.mxu2 %v2129_v3  ;;  %s2302_s29 = scalar_lea.vmem %s2738_s0, %s2226_s24  ;;  %v2137_v7 = vld [vmem:[%s2739_s1 + $0xf8] sm:$0xff]  ;;  %v2136_v22 = vld [vmem:[%s2739_s1 + $0xf0] sm:$0xff]  ;;  %v2127_v27 = vld [vmem:[%s2739_s1 + $0xa8] sm:$0xff] }
   0xf   : > { %v173_v9 = vld [vmem:[%s2302_s29 + $0x8] sm:$0xcc]  ;;  %v174_v10 = vld [vmem:[%s2302_s29 + $0x10] sm:$0x77]  ;;  %v177_v15 = vld [vmem:[%s2302_s29 + $0x20] sm:$0xcc]  ;;  %1378 = vmatpush.bf16.msra.mxu3 %v2137_v7 }
  0x10   : > { %1337 = vmatpush.bf16.msra.mxu0 %v2112_v2  ;;  %v2316_v11 = vld [vmem:[%s2302_s29 + $0x10] sm:$0xff]  ;;  %v196_v12 = vunpack.c.l.b16 %v173_v9  ;;  %v197_v13 = vunpack.c.h.b16 %v173_v9  ;;  %v198_v14 = vunpack.c.l.b16 %v174_v10  ;;  %v178_v16 = vld [vmem:[%s2302_s29 + $0x28] sm:$0x77]  ;;  %v199_v18 = vunpack.c.h.b16 %v174_v10  ;;  %v2118_v32 = vld [vmem:[%s2739_s1 + $0x60] sm:$0xff] }
  0x11   : > { %1351 = vmatpush.bf16.msra.mxu1 %v2120_v4  ;;  %v182_v17 = vld [vmem:[%s2302_s29 + $0x28] sm:$0xff]  ;;  %v258_v19 = vunpack.c.h.b16 %v2316_v11  ;;  %v222_v20 = vunpack.c.l.b16 %v177_v15  ;;  %v224_v21 = vunpack.c.l.b16 %v178_v16  ;;  %v223_v24 = vunpack.c.h.b16 %v177_v15  ;;  %v2126_v35 = vld [vmem:[%s2739_s1 + $0xa0] sm:$0xff]  ;;  %v2109_v41 = vld [vmem:[%s2739_s1 + $0x18] sm:$0xff] }
  0x12   : > { %1365 = vmatpush.bf16.msra.mxu2 %v2128_v8  ;;  %v200_v23 = vpack.c.b16 %v198_v14, %v196_v12  ;;  %v304_v25 = vunpack.c.l.b16 %v182_v17  ;;  %v225_v28 = vunpack.c.h.b16 %v178_v16  ;;  %v305_v30 = vunpack.c.h.b16 %v182_v17  ;;  %v2135_v34 = vld [vmem:[%s2739_s1 + $0xe8] sm:$0xff]  ;;  %v2117_v44 = vld [vmem:[%s2739_s1 + $0x58] sm:$0xff]  ;;  %v2134_v47 = vld [vmem:[%s2739_s1 + $0xe0] sm:$0xff] }
  0x13   : > { %v226_v29 = vpack.c.b16 %v224_v21, %v222_v20  ;;  %v257_v31 = vunpack.c.l.b16 %v2316_v11  ;;  %1379 = vmatpush.bf16.msra.mxu3 %v2136_v22  ;;  %v260_v36 = vpack.c.b16 %v258_v19, %v197_v13  ;;  %v201_v37 = vpack.c.b16 %v199_v18, %v197_v13  ;;  %v2125_v48 = vld [vmem:[%s2739_s1 + $0x98] sm:$0xff]  ;;  %v2108_v59 = vld [vmem:[%s2739_s1 + $0x10] sm:$0xff]  ;;  %v2107_v7 = vld [vmem:[%s2739_s1 + $0x8] sm:$0xff] }
  0x14   : > { %1338 = vmatpush.bf16.msra.mxu0 %v2111_v5  ;;  %v202_v33 = vrot.slane %v200_v23, 2  ;;  %v306_v39 = vpack.c.b16 %v304_v25, %v222_v20  ;;  %v307_v42 = vpack.c.b16 %v305_v30, %v223_v24  ;;  %v227_v43 = vpack.c.b16 %v225_v28, %v223_v24  ;;  %v2116_v61 = vld [vmem:[%s2739_s1 + $0x50] sm:$0xff]  ;;  %v2133_v62 = vld [vmem:[%s2739_s1 + $0xd8] sm:$0xff]  ;;  %v2115_v8 = vld [vmem:[%s2739_s1 + $0x48] sm:$0xff] }
  0x15   : > { %1352 = vmatpush.bf16.msra.mxu1 %v2119_v6  ;;  %v228_v38 = vrot.slane %v226_v29, 2  ;;  %v259_v40 = vpack.c.b16 %v257_v31, %v196_v12  ;;  %v203_v49 = vrot.slane %v201_v37, 2  ;;  %v270_v50 = vshrl.u32 %v260_v36, 16  ;;  %v2124_v63 = vld [vmem:[%s2739_s1 + $0x90] sm:$0xff]  ;;  %v184_v6 = vld [vmem:[%s2302_s29 + $0x8] sm:$0x88] }
  0x16   : > { %1366 = vmatpush.bf16.msra.mxu2 %v2127_v27  ;;  %204 = vrot.lane.b32.xlu0 %v202_v33, %s2249_s23  ;;  %v273_v51 = vshll.u32 %v260_v36, 16  ;;  %v309_v54 = vshrl.u32 %v306_v39, 16  ;;  %v312_v55 = vshll.u32 %v306_v39, 16  ;;  %v229_v56 = vrot.slane %v227_v43, 2  ;;  %v2132_v9 = vld [vmem:[%s2739_s1 + $0xd0] sm:$0xff]  ;;  %v2123_v10 = vld [vmem:[%s2739_s1 + $0x88] sm:$0xff] }
  0x17   : > { %230 = vrot.lane.b32.xlu1 %v228_v38, %s2249_s23  ;;  %v262_v45 = vshrl.u32 %v259_v40, 16  ;;  %v265_v46 = vshll.u32 %v259_v40, 16  ;;  %1380 = vmatpush.bf16.msra.mxu3 %v2135_v34  ;;  %v317_v57 = vshrl.u32 %v307_v42, 16  ;;  %v320_v58 = vshll.u32 %v307_v42, 16  ;;  %v2106_v17 = vld [vmem:[%s2739_s1] sm:$0xff]  ;;  %v2145_v18 = vld [vmem:[%s2739_s1 + $0x138] sm:$0xff] }
  0x18   : > { %1339 = vmatpush.bf16.msra.mxu0 %v2110_v26  ;;  %v272_v0 = vrot.slane %v270_v50, 2  ;;  %v275_v1 = vrot.slane %v273_v51, 3  ;;  %v311_v2 = vrot.slane %v309_v54, 2  ;;  %v314_v3 = vrot.slane %v312_v55, 3  ;;  %v2114_v20 = vld [vmem:[%s2739_s1 + $0x40] sm:$0xff]  ;;  %v2153_v23 = vld [vmem:[%s2739_s1 + $0x178] sm:$0xff] }
  0x19   : > { %1353 = vmatpush.bf16.msra.mxu1 %v2118_v32  ;;  %v264_v52 = vrot.slane %v262_v45, 2  ;;  %v267_v53 = vrot.slane %v265_v46, 3  ;;  %v319_v4 = vrot.slane %v317_v57, 2  ;;  %v322_v5 = vrot.slane %v320_v58, 3  ;;  %v2397_v21 = vld [vmem:[%s2302_s29] sm:$0xff]  ;;  %v2131_v24 = vld [vmem:[%s2739_s1 + $0xc8] sm:$0xff] }
  0x1a   : > { %1367 = vmatpush.bf16.msra.mxu2 %v2126_v35  ;;  %v276_v12 = vor.u32 %v275_v1, %v272_v0  ;;  %v315_v13 = vor.u32 %v314_v3, %v311_v2  ;;  %v340_v14 = vunpack.c.h.b16 %v184_v6  ;;  %v339_v15 = vunpack.c.l.b16 %v184_v6  ;;  %v2400_v22 = vld [vmem:[%s2302_s29 + $0x8] sm:$0x11]  ;;  %v2122_v29 = vld [vmem:[%s2739_s1 + $0x80] sm:$0xff]  ;;  %v2161_v30 = vld [vmem:[%s2739_s1 + $0x1b8] sm:$0xff] }
  0x1b   : > { %v268_v60 = vor.u32 %v267_v53, %v264_v52  ;;  %1381 = vmatpush.bf16.msra.mxu3 %v2134_v47  ;;  %v323_v16 = vor.u32 %v322_v5, %v319_v4  ;;  %v187_v25 = vunpack.c.l.b16 %v2397_v21  ;;  %v189_v26 = vunpack.c.l.b16 %v2400_v22  ;;  %v2144_v11 = vld [vmem:[%s2739_s1 + $0x130] sm:$0xff]  ;;  %v2169_v35 = vld [vmem:[%s2739_s1 + $0x1f8] sm:$0xff]  ;;  %v2143_v37 = vld [vmem:[%s2739_s1 + $0x128] sm:$0xff] }
  0x1c   : > { %1340 = vmatpush.bf16.msra.mxu0 %v2109_v41  ;;  %v342_v27 = vpack.c.b16 %v258_v19, %v340_v14  ;;  %v341_v28 = vpack.c.b16 %v257_v31, %v339_v15  ;;  %v2152_v19 = vld [vmem:[%s2739_s1 + $0x170] sm:$0xff]  ;;  %v2130_v31 = vld [vmem:[%s2739_s1 + $0xc0] sm:$0xff]  ;;  %v2151_v38 = vld [vmem:[%s2739_s1 + $0x168] sm:$0xff]  ;;  %v188_v57 = vunpack.c.h.b16 %v2397_v21  ;;  %v190_v58 = vunpack.c.h.b16 %v2400_v22 }
  0x1d   : > { %1354 = vmatpush.bf16.msra.mxu1 %v2117_v44  ;;  %277 = vrot.lane.b32.xlu2 %v268_v60, %s2249_s23  ;;  %v191_v32 = vpack.c.b16 %v189_v26, %v187_v25  ;;  %v2160_v36 = vld [vmem:[%s2739_s1 + $0x1b0] sm:$0xff]  ;;  %v2159_v40 = vld [vmem:[%s2739_s1 + $0x1a8] sm:$0xff]  ;;  %v2142_v41 = vld [vmem:[%s2739_s1 + $0x120] sm:$0xff] }
  0x1e   : > { %1368 = vmatpush.bf16.msra.mxu2 %v2125_v48  ;;  %206 = vrot.lane.b32.xlu0 %v203_v49, %s2249_s23  ;;  %v344_v33 = vrot.slane %v342_v27, 3  ;;  %v343_v34 = vrot.slane %v341_v28, 3  ;;  %v2168_v39 = vld [vmem:[%s2739_s1 + $0x1f0] sm:$0xff]  ;;  %v2150_v42 = vld [vmem:[%s2739_s1 + $0x160] sm:$0xff]  ;;  %v2167_v43 = vld [vmem:[%s2739_s1 + $0x1e8] sm:$0xff] }
  0x1f   : > { %232 = vrot.lane.b32.xlu1 %v229_v56, %s2249_s23  ;;  %1382 = vmatpush.bf16.msra.mxu3 %v2133_v62  ;;  %v2158_v44 = vld [vmem:[%s2739_s1 + $0x1a0] sm:$0xff]  ;;  %v2141_v45 = vld [vmem:[%s2739_s1 + $0x118] sm:$0xff]  ;;  %v2140_v49 = vld [vmem:[%s2739_s1 + $0x110] sm:$0xff]  ;;  %v192_v62 = vpack.c.b16 %v190_v58, %v188_v57 }
  0x20   : > { %1341 = vmatpush.bf16.msra.mxu0 %v2108_v59  ;;  %v2149_v46 = vld [vmem:[%s2739_s1 + $0x158] sm:$0xff]  ;;  %v2166_v47 = vld [vmem:[%s2739_s1 + $0x1e0] sm:$0xff]  ;;  %v2148_v50 = vld [vmem:[%s2739_s1 + $0x150] sm:$0xff] }
  0x21   : > { %1355 = vmatpush.bf16.msra.mxu1 %v2116_v61  ;;  %v2157_v48 = vld [vmem:[%s2739_s1 + $0x198] sm:$0xff]  ;;  %v2139_v52 = vld [vmem:[%s2739_s1 + $0x108] sm:$0xff]  ;;  %v2138_v54 = vld [vmem:[%s2739_s1 + $0x100] sm:$0xff] }
  0x22   : > { %1369 = vmatpush.bf16.msra.mxu2 %v2124_v63  ;;  %v2165_v51 = vld [vmem:[%s2739_s1 + $0x1d8] sm:$0xff]  ;;  %v2147_v53 = vld [vmem:[%s2739_s1 + $0x148] sm:$0xff]  ;;  %v2176_v56 = vld [vmem:[%s2739_s1 + $0x230] sm:$0xff] }
  0x23   : > { %1383 = vmatpush.bf16.msra.mxu3 %v2132_v9  ;;  %v2177_v55 = vld [vmem:[%s2739_s1 + $0x238] sm:$0xff]  ;;  %v2175_v59 = vld [vmem:[%s2739_s1 + $0x228] sm:$0xff]  ;;  %v2146_v60 = vld [vmem:[%s2739_s1 + $0x140] sm:$0xff] }
  0x24   : > { %1342 = vmatpush.bf16.msra.mxu0 %v2107_v7  ;;  %v2156_v61 = vld [vmem:[%s2739_s1 + $0x190] sm:$0xff]  ;;  %v2174_v0 = vld [vmem:[%s2739_s1 + $0x220] sm:$0xff]  ;;  %v2155_v1 = vld [vmem:[%s2739_s1 + $0x188] sm:$0xff] }
  0x25   : > { %1356 = vmatpush.bf16.msra.mxu1 %v2115_v8  ;;  %324 = vrot.lane.b32.xlu2 %v315_v13, %s2249_s23  ;;  %v2164_v63 = vld [vmem:[%s2739_s1 + $0x1d0] sm:$0xff]  ;;  %v2163_v2 = vld [vmem:[%s2739_s1 + $0x1c8] sm:$0xff]  ;;  %v2173_v3 = vld [vmem:[%s2739_s1 + $0x218] sm:$0xff] }
  0x26   : > { %1370 = vmatpush.bf16.msra.mxu2 %v2123_v10  ;;  %279 = vrot.lane.b32.xlu0 %v276_v12, %s2249_s23  ;;  %v2154_v4 = vld [vmem:[%s2739_s1 + $0x180] sm:$0xff]  ;;  %v2532_v5 = vld [vmem:[%s2302_s29 + $0x18] sm:$0xff]  ;;  %v2537_v9 = vld [vmem:[%s2302_s29 + $0x8] sm:$0x33] }
  0x27   : > { %326 = vrot.lane.b32.xlu1 %v323_v16, %s2249_s23  ;;  %1384 = vmatpush.bf16.msra.mxu3 %v2131_v24  ;;  %v176_v6 = vld [vmem:[%s2302_s29 + $0x20] sm:$0x11]  ;;  %v213_v7 = vunpack.c.l.b16 %v2532_v5  ;;  %v2172_v13 = vld [vmem:[%s2739_s1 + $0x210] sm:$0xff]  ;;  %v2201_v14 = vld [vmem:[%s2739_s1 + $0x2f8] sm:$0xff]  ;;  %v238_v15 = vunpack.c.h.b16 %v2537_v9 }
  0x28   : > { %1343 = vmatpush.bf16.msra.mxu0 %v2106_v17  ;;  %v215_v8 = vunpack.c.l.b16 %v176_v6  ;;  %v2162_v10 = vld [vmem:[%s2739_s1 + $0x1c0] sm:$0xff]  ;;  %v2171_v16 = vld [vmem:[%s2739_s1 + $0x208] sm:$0xff]  ;;  %v2200_v17 = vld [vmem:[%s2739_s1 + $0x2f0] sm:$0xff] }
  0x29   : > { %1357 = vmatpush.bf16.msra.mxu1 %v2114_v20  ;;  %v2170_v20 = vld [vmem:[%s2739_s1 + $0x200] sm:$0xff]  ;;  %v2199_v22 = vld [vmem:[%s2739_s1 + $0x2e8] sm:$0xff] }
  0x2a   : > { %1371 = vmatpush.bf16.msra.mxu2 %v2122_v29  ;;  %v217_v12 = vpack.c.b16 %v215_v8, %v213_v7  ;;  %v2198_v24 = vld [vmem:[%s2739_s1 + $0x2e0] sm:$0xff]  ;;  %v214_v29 = vunpack.c.h.b16 %v2532_v5 }
  0x2b   : > { %1344 = vmatmul.bf16.vlgmr.msra.gmra.mxu0 %v191_v32  ;;  %1385 = vmatpush.bf16.msra.mxu3 %v2130_v31  ;;  %v2206_v21 = vld [vmem:[%s2739_s1 + $0x320] sm:$0xff] }
  0x2c   : > { %1392 = vmatpush.bf16.msrb.mxu0 %v2145_v18  ;;  %v240_v18 = vpack.c.b16 %v238_v15, %v188_v57  ;;  %v2191_v57 = vld [vmem:[%s2739_s1 + $0x2a8] sm:$0xff]  ;;  %v2190_v8 = vld [vmem:[%s2739_s1 + $0x2a0] sm:$0xff] }
  0x2d   : > { %1406 = vmatpush.bf16.msrb.mxu1 %v2153_v23  ;;  %345 = vrot.lane.b32.xlu2 %v343_v34, %s2249_s23  ;;  %v2178_v5 = vld [vmem:[%s2739_s1 + $0x240] sm:$0xff] }
  0x2e   : > { %1420 = vmatpush.bf16.msrb.mxu2 %v2161_v30  ;;  %347 = vrot.lane.b32.xlu0 %v344_v33, %s2249_s23  ;;  %v251_v23 = vshll.u32 %v240_v18, 16  ;;  %v249_v26 = vshrl.u32 %v240_v18, 16  ;;  %v216_v30 = vunpack.c.h.b16 %v176_v6  ;;  %v2185_v33 = vld [vmem:[%s2739_s1 + $0x278] sm:$0xff]  ;;  %v2180_v6 = vld [vmem:[%s2739_s1 + $0x250] sm:$0xff] }
  0x2f   : > { %1434 = vmatpush.bf16.msrb.mxu3 %v2169_v35  ;;  %v2209_v35 = vld [vmem:[%s2739_s1 + $0x338] sm:$0xff] }
  0x30   : > { %1393 = vmatpush.bf16.msrb.mxu0 %v2144_v11  ;;  %1386 = vmatmul.bf16.vlgmr.msra.gmra.mxu3 %v217_v12  ;;  %v253_v27 = vrot.slane %v251_v23, 1  ;;  %v2197_v11 = vld [vmem:[%s2739_s1 + $0x2d8] sm:$0xff]  ;;  %v218_v31 = vpack.c.b16 %v216_v30, %v214_v29 }
  0x31   : > { %1407 = vmatpush.bf16.msrb.mxu1 %v2152_v19 }
  0x32   : > { %1421 = vmatpush.bf16.msrb.mxu2 %v2160_v36  ;;  %v254_v32 = vor.u32 %v253_v27, %v249_v26  ;;  %v2196_v36 = vld [vmem:[%s2739_s1 + $0x2d0] sm:$0xff]  ;;  %v2217_v27 = vld [vmem:[%s2739_s1 + $0x378] sm:$0xff] }
  0x33   : > { %1435 = vmatpush.bf16.msrb.mxu3 %v2168_v39 }
  0x34   : > { %1394 = vmatpush.bf16.msrb.mxu0 %v2143_v37 }
  0x35   : > { %1408 = vmatpush.bf16.msrb.mxu1 %v2151_v38 }
  0x36   : > { %1422 = vmatpush.bf16.msrb.mxu2 %v2159_v40  ;;  %v2184_v40 = vld [vmem:[%s2739_s1 + $0x270] sm:$0xff] }
  0x37   : > { %1436 = vmatpush.bf16.msrb.mxu3 %v2167_v43  ;;  %v237_v43 = vunpack.c.l.b16 %v2537_v9  ;;  %v2219_v9 = vld [vmem:[%s2739_s1 + $0x388] sm:$0xff] }
  0x38   : > { %1395 = vmatpush.bf16.msrb.mxu0 %v2142_v41  ;;  %v2208_v41 = vld [vmem:[%s2739_s1 + $0x330] sm:$0xff] }
  0x39   : > { %1409 = vmatpush.bf16.msrb.mxu1 %v2150_v42  ;;  %v2195_v42 = vld [vmem:[%s2739_s1 + $0x2c8] sm:$0xff] }
  0x3a   : > { %1423 = vmatpush.bf16.msrb.mxu2 %v2158_v44  ;;  %v2183_v44 = vld [vmem:[%s2739_s1 + $0x268] sm:$0xff] }
  0x3b   : > { %1437 = vmatpush.bf16.msrb.mxu3 %v2166_v47  ;;  %v2207_v47 = vld [vmem:[%s2739_s1 + $0x328] sm:$0xff] }
  0x3c   : > { %1396 = vmatpush.bf16.msrb.mxu0 %v2141_v45  ;;  %v2193_v45 = vld [vmem:[%s2739_s1 + $0x2b8] sm:$0xff] }
  0x3d   : > { %1410 = vmatpush.bf16.msrb.mxu1 %v2149_v46 }
  0x3e   : > { %1424 = vmatpush.bf16.msrb.mxu2 %v2157_v48  ;;  %v2194_v48 = vld [vmem:[%s2739_s1 + $0x2c0] sm:$0xff] }
  0x3f   : > { %1438 = vmatpush.bf16.msrb.mxu3 %v2165_v51  ;;  %v239_v51 = vpack.c.b16 %v237_v43, %v187_v25 }
  0x40   : > { %1397 = vmatpush.bf16.msrb.mxu0 %v2140_v49 }
  0x41   : > { %1411 = vmatpush.bf16.msrb.mxu1 %v2148_v50  ;;  %v244_v25 = vshll.u32 %v239_v51, 16 }
  0x42   : > { %1425 = vmatpush.bf16.msrb.mxu2 %v2156_v61  ;;  %v2205_v61 = vld [vmem:[%s2739_s1 + $0x318] sm:$0xff] }
  0x43   : > { %1439 = vmatpush.bf16.msrb.mxu3 %v2164_v63 }
  0x44   : > { %1398 = vmatpush.bf16.msrb.mxu0 %v2139_v52  ;;  %v181_v52 = vld [vmem:[%s2302_s29 + $0x20] sm:$0x33] }
  0x45   : > { %1412 = vmatpush.bf16.msrb.mxu1 %v2147_v53  ;;  %v2182_v53 = vld [vmem:[%s2739_s1 + $0x260] sm:$0xff] }
  0x46   : > { %1426 = vmatpush.bf16.msrb.mxu2 %v2155_v1  ;;  %v242_v1 = vshrl.u32 %v239_v51, 16 }
  0x47   : > { %1440 = vmatpush.bf16.msrb.mxu3 %v2163_v2  ;;  %v246_v2 = vrot.slane %v244_v25, 1 }
  0x48   : > { %1399 = vmatpush.bf16.msrb.mxu0 %v2138_v54  ;;  %v2192_v54 = vld [vmem:[%s2739_s1 + $0x2b0] sm:$0xff] }
  0x49   : > { %1413 = vmatpush.bf16.msrb.mxu1 %v2146_v60 }
  0x4a   : > { %1427 = vmatpush.bf16.msrb.mxu2 %v2154_v4  ;;  %v285_v4 = vunpack.c.h.b16 %v181_v52 }
  0x4b   : > { %1441 = vmatpush.bf16.msrb.mxu3 %v2162_v10  ;;  %v183_v10 = vld [vmem:[%s2302_s29] sm:$0xee] }
  0x4c   : > { %1448 = vmatpush.bf16.msra.mxu0 %v2177_v55  ;;  %v284_v55 = vunpack.c.l.b16 %v181_v52  ;;  %v331_v18 = vunpack.c.l.b16 %v183_v10 }
  0x4f   : > { %1490 = vmatpush.bf16.msra.mxu3 %v2201_v14  ;;  %v287_v14 = vpack.c.b16 %v285_v4, %v214_v29  ;;  %v2202_v29 = vld [vmem:[%s2739_s1 + $0x300] sm:$0xff] }
  0x50   : > { %1449 = vmatpush.bf16.msra.mxu0 %v2176_v56  ;;  %v2181_v56 = vld [vmem:[%s2739_s1 + $0x258] sm:$0xff] }
  0x51   : > { %v298_v26 = vshll.u32 %v287_v14, 16 }
  0x53   : > { %1491 = vmatpush.bf16.msra.mxu3 %v2200_v17  ;;  %v2189_v17 = vld [vmem:[%s2739_s1 + $0x298] sm:$0xff] }
  0x54   : > { %1450 = vmatpush.bf16.msra.mxu0 %v2175_v59 }
  0x57   : > { %1492 = vmatpush.bf16.msra.mxu3 %v2199_v22 }
  0x58   : > { %1451 = vmatpush.bf16.msra.mxu0 %v2174_v0  ;;  %v286_v0 = vpack.c.b16 %v284_v55, %v213_v7  ;;  %v2204_v7 = vld [vmem:[%s2739_s1 + $0x310] sm:$0xff] }
  0x5a   : > { %v291_v12 = vshll.u32 %v286_v0, 16  ;;  %v289_v22 = vshrl.u32 %v286_v0, 16 }
  0x5b   : > { %1493 = vmatpush.bf16.msra.mxu3 %v2198_v24  ;;  %v2188_v24 = vld [vmem:[%s2739_s1 + $0x290] sm:$0xff] }
  0x5c   : > { %1452 = vmatpush.bf16.msra.mxu0 %v2173_v3  ;;  %v293_v23 = vrot.slane %v291_v12, 1 }
  0x5e   : > { %v294_v30 = vor.u32 %v293_v23, %v289_v22 }
  0x5f   : > { %1494 = vmatpush.bf16.msra.mxu3 %v2197_v11  ;;  %v296_v11 = vshrl.u32 %v287_v14, 16 }
  0x60   : > { %1453 = vmatpush.bf16.msra.mxu0 %v2172_v13  ;;  %v247_v13 = vor.u32 %v246_v2, %v242_v1 }
  0x63   : > { %1495 = vmatpush.bf16.msra.mxu3 %v2196_v36  ;;  %v2215_v36 = vld [vmem:[%s2739_s1 + $0x368] sm:$0xff] }
  0x64   : > { %1454 = vmatpush.bf16.msra.mxu0 %v2171_v16  ;;  %v2179_v16 = vld [vmem:[%s2739_s1 + $0x248] sm:$0xff] }
  0x67   : > { %1496 = vmatpush.bf16.msra.mxu3 %v2195_v42  ;;  %v2223_v42 = vld [vmem:[%s2739_s1 + $0x3a8] sm:$0xff] }
  0x68   : > { %1455 = vmatpush.bf16.msra.mxu0 %v2170_v20  ;;  %v2203_v20 = vld [vmem:[%s2739_s1 + $0x308] sm:$0xff] }
  0x6b   : > { %1497 = vmatpush.bf16.msra.mxu3 %v2194_v48 }
  0x77   : > { %v278_v28 = vpop.permute.xlu2 %277 }
  0x78   : > { %v362_v19 = vsel %vm208_vm0, %v254_v32, %v278_v28  ;;  %v2187_v32 = vld [vmem:[%s2739_s1 + $0x288] sm:$0xff] }
  0x79   : > { %1442 = vmatmul.bf16.vlgmr.msrb.gmra.mxu3 %v362_v19  ;;  %v300_v19 = vrot.slane %v298_v26, 1 }
  0x88   : > { %v205_v34 = vpop.permute.xlu0 %204 }
  0x89   : > { %v354_v37 = vsel %vm208_vm0, %v192_v62, %v205_v34  ;;  %v231_v38 = vpop.permute.xlu1 %230  ;;  %v325_v62 = vpop.permute.xlu2 %324 }
  0x8a   : > { %1358 = vmatmul.bf16.vlgmr.msra.gmra.mxu1 %v354_v37  ;;  %v358_v39 = vsel %vm208_vm0, %v218_v31, %v231_v38  ;;  %v2216_v31 = vld [vmem:[%s2739_s1 + $0x370] sm:$0xff]  ;;  %v2225_v37 = vld [vmem:[%s2739_s1 + $0x3b8] sm:$0xff] }
  0x8b   : > { %1462 = vmatpush.bf16.msra.mxu1 %v2185_v33  ;;  %1400 = vmatmul.bf16.vlgmr.msrb.gmra.mxu0 %v358_v39  ;;  %v2214_v39 = vld [vmem:[%s2739_s1 + $0x360] sm:$0xff] }
  0x8c   : > { %1504 = vmatpush.bf16.msrb.mxu0 %v2209_v35  ;;  %v301_v35 = vor.u32 %v300_v19, %v296_v11 }
  0x8f   : > { %1463 = vmatpush.bf16.msra.mxu1 %v2184_v40  ;;  %v2224_v40 = vld [vmem:[%s2739_s1 + $0x3b0] sm:$0xff] }
  0x90   : > { %v207_v46 = vpop.permute.xlu0 %206  ;;  %1505 = vmatpush.bf16.msrb.mxu0 %v2208_v41  ;;  %v2213_v41 = vld [vmem:[%s2739_s1 + $0x358] sm:$0xff] }
  0x91   : > { %v209_v49 = vsel %vm208_vm0, %v205_v34, %v207_v46  ;;  %v233_v50 = vpop.permute.xlu1 %232  ;;  %v2186_v34 = vld [vmem:[%s2739_s1 + $0x280] sm:$0xff]  ;;  %v2211_v46 = vld [vmem:[%s2739_s1 + $0x348] sm:$0xff]  ;;  %v346_v52 = vpop.permute.xlu2 %345 }
  0x92   : > { %1372 = vmatmul.bf16.vlgmr.msra.gmra.mxu2 %v209_v49  ;;  %v234_v58 = vsel %vm208_vm0, %v231_v38, %v233_v50  ;;  %v366_v38 = vsel %vm208_vm0, %v301_v35, %v325_v62  ;;  %v2210_v49 = vld [vmem:[%s2739_s1 + $0x340] sm:$0xff]  ;;  %v2220_v50 = vld [vmem:[%s2739_s1 + $0x390] sm:$0xff] }
  0x93   : > { %1464 = vmatpush.bf16.msra.mxu1 %v2183_v44  ;;  %1476 = vmatpush.bf16.msra.mxu2 %v2193_v45  ;;  %v2222_v44 = vld [vmem:[%s2739_s1 + $0x3a0] sm:$0xff]  ;;  %v332_v45 = vunpack.c.h.b16 %v183_v10 }
  0x94   : > { %1506 = vmatpush.bf16.msrb.mxu0 %v2207_v47  ;;  %v2221_v47 = vld [vmem:[%s2739_s1 + $0x398] sm:$0xff] }
  0x95   : > { %v334_v48 = vpack.c.b16 %v238_v15, %v332_v45  ;;  %v2218_v15 = vld [vmem:[%s2739_s1 + $0x380] sm:$0xff] }
  0x97   : > { %1465 = vmatpush.bf16.msra.mxu1 %v2182_v53  ;;  %1477 = vmatpush.bf16.msra.mxu2 %v2192_v54  ;;  %v336_v51 = vrot.slane %v334_v48, 1 }
  0x98   : > { %1507 = vmatpush.bf16.msrb.mxu0 %v2206_v21  ;;  %v280_v59 = vpop.permute.xlu0 %279 }
  0x99   : > { %v281_v60 = vsel %vm208_vm0, %v278_v28, %v280_v59  ;;  %v327_v63 = vpop.permute.xlu1 %326  ;;  %v333_v28 = vpack.c.b16 %v237_v43, %v331_v18  ;;  %v2212_v43 = vld [vmem:[%s2739_s1 + $0x350] sm:$0xff]  ;;  %v370_v53 = vsel %vm208_vm0, %v336_v51, %v346_v52 }
  0x9a   : > { %1414 = vmatmul.bf16.vlgmr.msrb.gmra.mxu1 %v234_v58  ;;  %v328_v3 = vsel %vm208_vm0, %v325_v62, %v327_v63 }
  0x9b   : > { %1466 = vmatpush.bf16.msra.mxu1 %v2181_v56  ;;  %1478 = vmatpush.bf16.msra.mxu2 %v2191_v57  ;;  %v335_v33 = vrot.slane %v333_v28, 1 }
  0x9c   : > { %1456 = vmatmul.bf16.vlgmr.msra.gmra.mxu0 %v281_v60  ;;  %1498 = vmatmul.bf16.vlgmr.msra.gmra.mxu3 %v328_v3  ;;  %v2236_v60 = vld [vmem:[%s2740_s2] ss:$0 sm:$0xff] }
  0x9d   : > { %1508 = vmatpush.bf16.msrb.mxu0 %v2205_v61 }
  0x9f   : > { %1467 = vmatpush.bf16.msra.mxu1 %v2180_v6  ;;  %1479 = vmatpush.bf16.msra.mxu2 %v2190_v8 }
  0xa0   : > { %v348_v54 = vpop.permute.xlu0 %347 }
  0xa1   : > { %1509 = vmatpush.bf16.msrb.mxu0 %v2204_v7  ;;  %v349_v21 = vsel %vm208_vm0, %v346_v52, %v348_v54 }
  0xa2   : > { %1428 = vmatmul.bf16.vlgmr.msrb.gmra.mxu2 %v247_v13 }
  0xa3   : > { %1468 = vmatpush.bf16.msra.mxu1 %v2179_v16  ;;  %1480 = vmatpush.bf16.msra.mxu2 %v2189_v17 }
  0xa5   : > { %1510 = vmatpush.bf16.msrb.mxu0 %v2203_v20 }
  0xa7   : > { %1469 = vmatpush.bf16.msra.mxu1 %v2178_v5  ;;  %1481 = vmatpush.bf16.msra.mxu2 %v2188_v24 }
  0xa8   : > { %v1345_v55 = vpop.f32.mrf.mxu0 }
  0xa9   : > { %1511 = vmatpush.bf16.msrb.mxu0 %v2202_v29  ;;  %v1346_v63 = vadd.f32 %v2236_v60, %v1345_v55 }
  0xaa   : > { %1470 = vmatmul.bf16.vlgmr.msra.gmra.mxu1 %v294_v30 }
  0xab   : > { %1518 = vmatpush.bf16.msrb.mxu1 %v2217_v27  ;;  %1482 = vmatpush.bf16.msra.mxu2 %v2187_v32 }
  0xac   : > { %1512 = vmatmul.bf16.vlgmr.msrb.gmra.mxu0 %v335_v33 }
  0xaf   : > { %1519 = vmatpush.bf16.msrb.mxu1 %v2216_v31  ;;  %1483 = vmatpush.bf16.msra.mxu2 %v2186_v34 }
  0xb0   : > { %v1347_v57 = vpop.f32.mrf.mxu0 }
  0xb1   : > { %v1348_v8 = vadd.f32 %v2236_v60, %v1347_v57 }
  0xb2   : > { %1484 = vmatmul.bf16.vlgmr.msra.gmra.mxu2 %v366_v38 }
  0xb3   : > { %1520 = vmatpush.bf16.msrb.mxu1 %v2215_v36  ;;  %1532 = vmatpush.bf16.msrb.mxu2 %v2225_v37  ;;  %v1387_v59 = vpop.f32.mrf.mxu3 }
  0xb7   : > { %1521 = vmatpush.bf16.msrb.mxu1 %v2214_v39  ;;  %1533 = vmatpush.bf16.msrb.mxu2 %v2224_v40 }
  0xbb   : > { %1522 = vmatpush.bf16.msrb.mxu1 %v2213_v41  ;;  %1534 = vmatpush.bf16.msrb.mxu2 %v2223_v42  ;;  %v1389_v1 = vpop.f32.mrf.mxu3 }
  0xbf   : > { %1523 = vmatpush.bf16.msrb.mxu1 %v2212_v43  ;;  %1535 = vmatpush.bf16.msrb.mxu2 %v2222_v44 }
  0xc3   : > { %1524 = vmatpush.bf16.msrb.mxu1 %v2211_v46  ;;  %1536 = vmatpush.bf16.msrb.mxu2 %v2221_v47 }
  0xc7   : > { %1525 = vmatpush.bf16.msrb.mxu1 %v2210_v49  ;;  %1537 = vmatpush.bf16.msrb.mxu2 %v2220_v50 }
  0xca   : > { %1526 = vmatmul.bf16.vlgmr.msrb.gmra.mxu1 %v370_v53 }
  0xcb   : > { %1538 = vmatpush.bf16.msrb.mxu2 %v2219_v9 }
  0xcf   : > { %1539 = vmatpush.bf16.msrb.mxu2 %v2218_v15 }
  0xd2   : > { %1540 = vmatmul.bf16.vlgmr.msrb.gmra.mxu2 %v349_v21 }
  0xfc   : > { %v1443_v13 = vpop.f32.mrf.mxu3 }
 0x104   : > { %v1445_v26 = vpop.f32.mrf.mxu3 }
 0x107   : > { %v1359_v25 = vpop.f32.mrf.mxu1 }
 0x108   : > { %v1401_v61 = vpop.f32.mrf.mxu0  ;;  %v1360_v2 = vadd.f32 %v1359_v25, %v1346_v63 }
 0x10f   : > { %v1361_v58 = vpop.f32.mrf.mxu1 }
 0x110   : > { %v1403_v4 = vpop.f32.mrf.mxu0  ;;  %v1362_v12 = vadd.f32 %v1361_v58, %v1348_v8 }
 0x115   : > { %v1373_v56 = vpop.f32.mrf.mxu2 }
 0x116   : > { %v1374_v3 = vadd.f32 %v1373_v56, %v1360_v2 }
 0x117   : > { %v1415_v0 = vpop.f32.mrf.mxu1 }
 0x118   : > { %v1388_v7 = vadd.f32 %v1387_v59, %v1374_v3 }
 0x119   : > { %v1457_v17 = vpop.f32.mrf.mxu0 }
 0x11a   : > { %v1402_v14 = vadd.f32 %v1401_v61, %v1388_v7 }
 0x11c   : > { %v1416_v20 = vadd.f32 %v1415_v0, %v1402_v14 }
 0x11d   : > { %v1375_v62 = vpop.f32.mrf.mxu2 }
 0x11e   : > { %v1376_v16 = vadd.f32 %v1375_v62, %v1362_v12 }
 0x11f   : > { %v1417_v10 = vpop.f32.mrf.mxu1  ;;  %v1499_v34 = vpop.f32.mrf.mxu3 }
 0x120   : > { %v1390_v22 = vadd.f32 %v1389_v1, %v1376_v16 }
 0x121   : > { %v1459_v29 = vpop.f32.mrf.mxu0 }
 0x122   : > { %v1404_v24 = vadd.f32 %v1403_v4, %v1390_v22 }
 0x124   : > { %v1418_v28 = vadd.f32 %v1417_v10, %v1404_v24 }
 0x125   : > { %v1429_v6 = vpop.f32.mrf.mxu2 }
 0x126   : > { %v1430_v23 = vadd.f32 %v1429_v6, %v1416_v20 }
 0x127   : > { %v1471_v5 = vpop.f32.mrf.mxu1  ;;  %v1501_v44 = vpop.f32.mrf.mxu3 }
 0x128   : > { %v1444_v27 = vadd.f32 %v1443_v13, %v1430_v23 }
 0x129   : > { %v1513_v37 = vpop.f32.mrf.mxu0 }
 0x12a   : > { %v1458_v32 = vadd.f32 %v1457_v17, %v1444_v27 }
 0x12c   : > { %v1472_v31 = vadd.f32 %v1471_v5, %v1458_v32 }
 0x12d   : > { %v1431_v18 = vpop.f32.mrf.mxu2 }
 0x12e   : > { %v1432_v11 = vadd.f32 %v1431_v18, %v1418_v28 }
 0x12f   : > { %v1473_v19 = vpop.f32.mrf.mxu1 }
 0x130   : > { %v1446_v33 = vadd.f32 %v1445_v26, %v1432_v11 }
 0x131   : > { %v1515_v49 = vpop.f32.mrf.mxu0 }
 0x132   : > { %v1460_v36 = vadd.f32 %v1459_v29, %v1446_v33 }
 0x134   : > { %v1474_v41 = vadd.f32 %v1473_v19, %v1460_v36 }
 0x135   : > { %v1485_v30 = vpop.f32.mrf.mxu2 }
 0x136   : > { %v1486_v35 = vadd.f32 %v1485_v30, %v1472_v31 }
 0x138   : > { %v1500_v39 = vadd.f32 %v1499_v34, %v1486_v35 }
 0x13a   : > { %v1514_v42 = vadd.f32 %v1513_v37, %v1500_v39 }
 0x13d   : > { %v1487_v38 = vpop.f32.mrf.mxu2 }
 0x13e   : > { %v1488_v43 = vadd.f32 %v1487_v38, %v1474_v41 }
 0x140   : > { %v1502_v47 = vadd.f32 %v1501_v44, %v1488_v43 }
 0x142   : > { %v1516_v52 = vadd.f32 %v1515_v49, %v1502_v47 }
 0x147   : > { %v1527_v40 = vpop.f32.mrf.mxu1 }
 0x148   : > { %v1528_v45 = vadd.f32 %v1527_v40, %v1514_v42 }
 0x14f   : > { %v1529_v51 = vpop.f32.mrf.mxu1 }
 0x150   : > { %v1530_v53 = vadd.f32 %v1529_v51, %v1516_v52 }
 0x155   : > { %v1541_v46 = vpop.f32.mrf.mxu2 }
 0x156   : > { %v1542_v48 = vadd.f32 %v1541_v46, %v1528_v45 }
 0x158   : > { %v1546_v50 = vmul.f32 0.5, %v1542_v48 }
 0x15a   : > { %2237 = vtanh.f32 %v1546_v50 }
 0x15d   : > { %v1543_v9 = vpop.f32.mrf.mxu2 }
 0x15e   : > { %v1544_v15 = vadd.f32 %v1543_v9, %v1530_v53 }
 0x160   : > { %v2238_v54 = vpop.eup %2237  ;;  %v1547_v21 = vmul.f32 0.5, %v1544_v15 }
 0x161   : > { %v1550_v55 = vadd.f32 1.0, %v2238_v54 }
 0x162   : > { %2239 = vtanh.f32 %v1547_v21 }
 0x163   : > { %v1552_v25 = vmul.f32 0.5, %v1550_v55 }
 0x165   : > { %v1554_v56 = vmul.f32 %v1552_v25, %v1542_v48 }
 0x167   : > { %v1556_v57 = vpack.c.bf16 %v1554_v56, %v1554_v56 }
 0x168   : > { %v2240_v58 = vpop.eup %2239 }
 0x169   : > { %1558 = vst [vmem:[%s170_s22] sm:$0xf] %v1556_v57  ;;  %v1551_v59 = vadd.f32 1.0, %v2240_v58 }
 0x16b   : > { %v1553_v60 = vmul.f32 0.5, %v1551_v59 }
 0x16d   : > { %v1555_v61 = vmul.f32 %v1553_v60, %v1544_v15 }
 0x16f   : > { %v1557_v62 = vpack.c.bf16 %v1555_v61, %v1555_v61 }
 0x171   : > { %1559 = vst [vmem:[%s170_s22 + $0x4] sm:$0x1] %v1557_v62 }
 0x172 PF: > { %s13_s12 = sadd.s32 1, %s2247_s12  }
 0x173   : > { %p10_p4 = scmp.ge.s32.totalorder %s13_s12, 4  }
 0x175   :  { %12 = sbr.rel (!%p10_p4) target bundleno = 1 (0x1), region = 62 }

// kernel: conv_encoder_y.11
= control target key start
LH: loop header
LB: loop body
LE: loop exit
PB: predicated region body
PF: predicated region fallthrough
CT: control target
= control target key end

     0   :  { %vm828_vm0 = vcmask 80896   ;;  %s1535_s1 = inlined_call_operand.vmem [shape: bf16[1280,10], index: 1, kind: input, shape index: {}]   ;;  %s1536_s2 = inlined_call_operand.vmem [shape: f32[1,10], index: 2, kind: input, shape index: {}]   ;;  %s1537_s0 = inlined_call_operand.vmem [shape: bf16[8,1280], index: 0, kind: input, shape index: {}]   ;;  %s1538_s3 = inlined_call_operand.vmem [shape: f32[8,10], index: 3, kind: output, shape index: {}]  }
   0x1   :  { %v1173_v0 = vld [vmem:[%s1535_s1 + $0x38] sm:$0xff]  ;;  %v1172_v4 = vld [vmem:[%s1535_s1 + $0x30] sm:$0xff]  ;;  %v1171_v8 = vld [vmem:[%s1535_s1 + $0x28] sm:$0xff] }
   0x2   :  { %v1181_v1 = vld [vmem:[%s1535_s1 + $0x78] sm:$0xff]  ;;  %698 = vmatpush.bf16.msra.mxu0 %v1173_v0  ;;  %v1180_v5 = vld [vmem:[%s1535_s1 + $0x70] sm:$0xff]  ;;  %v1179_v9 = vld [vmem:[%s1535_s1 + $0x68] sm:$0xff] }
   0x3   :  { %v1189_v2 = vld [vmem:[%s1535_s1 + $0xb8] sm:$0xff]  ;;  %711 = vmatpush.bf16.msra.mxu1 %v1181_v1  ;;  %v1188_v6 = vld [vmem:[%s1535_s1 + $0xb0] sm:$0xff]  ;;  %v1187_v10 = vld [vmem:[%s1535_s1 + $0xa8] sm:$0xff] }
   0x4   :  { %v1197_v3 = vld [vmem:[%s1535_s1 + $0xf8] sm:$0xff]  ;;  %724 = vmatpush.bf16.msra.mxu2 %v1189_v2  ;;  %v1196_v7 = vld [vmem:[%s1535_s1 + $0xf0] sm:$0xff]  ;;  %v1195_v11 = vld [vmem:[%s1535_s1 + $0xe8] sm:$0xff] }
   0x5   :  { %737 = vmatpush.bf16.msra.mxu3 %v1197_v3  ;;  %v1170_v12 = vld [vmem:[%s1535_s1 + $0x20] sm:$0xff]  ;;  %v1169_v16 = vld [vmem:[%s1535_s1 + $0x18] sm:$0xff]  ;;  %v1168_v20 = vld [vmem:[%s1535_s1 + $0x10] sm:$0xff] }
   0x6   :  { %699 = vmatpush.bf16.msra.mxu0 %v1172_v4  ;;  %v1178_v13 = vld [vmem:[%s1535_s1 + $0x60] sm:$0xff]  ;;  %v1177_v17 = vld [vmem:[%s1535_s1 + $0x58] sm:$0xff]  ;;  %v1176_v21 = vld [vmem:[%s1535_s1 + $0x50] sm:$0xff] }
   0x7   :  { %712 = vmatpush.bf16.msra.mxu1 %v1180_v5  ;;  %v1186_v14 = vld [vmem:[%s1535_s1 + $0xa0] sm:$0xff]  ;;  %v1185_v18 = vld [vmem:[%s1535_s1 + $0x98] sm:$0xff]  ;;  %v1184_v22 = vld [vmem:[%s1535_s1 + $0x90] sm:$0xff] }
   0x8   :  { %725 = vmatpush.bf16.msra.mxu2 %v1188_v6  ;;  %v1194_v15 = vld [vmem:[%s1535_s1 + $0xe0] sm:$0xff]  ;;  %v1193_v19 = vld [vmem:[%s1535_s1 + $0xd8] sm:$0xff]  ;;  %v1192_v23 = vld [vmem:[%s1535_s1 + $0xd0] sm:$0xff] }
   0x9   :  { %738 = vmatpush.bf16.msra.mxu3 %v1196_v7  ;;  %v1167_v24 = vld [vmem:[%s1535_s1 + $0x8] sm:$0xff]  ;;  %v14_v28 = vld [vmem:[%s1537_s0] sm:$0xff]  ;;  %v1205_v34 = vld [vmem:[%s1535_s1 + $0x138] sm:$0xff] }
   0xa   :  { %700 = vmatpush.bf16.msra.mxu0 %v1171_v8  ;;  %v1175_v25 = vld [vmem:[%s1535_s1 + $0x48] sm:$0xff]  ;;  %v1166_v30 = vld [vmem:[%s1535_s1] sm:$0xff]  ;;  %v188_v32 = vunpack.c.l.b16 %v14_v28  ;;  %v189_v33 = vunpack.c.h.b16 %v14_v28  ;;  %v1213_v35 = vld [vmem:[%s1535_s1 + $0x178] sm:$0xff] }
   0xb   :  { %713 = vmatpush.bf16.msra.mxu1 %v1179_v9  ;;  %v1183_v26 = vld [vmem:[%s1535_s1 + $0x88] sm:$0xff]  ;;  %v1174_v31 = vld [vmem:[%s1535_s1 + $0x40] sm:$0xff]  ;;  %v1221_v40 = vld [vmem:[%s1535_s1 + $0x1b8] sm:$0xff] }
   0xc   :  { %726 = vmatpush.bf16.msra.mxu2 %v1187_v10  ;;  %v1191_v27 = vld [vmem:[%s1535_s1 + $0xc8] sm:$0xff]  ;;  %v1182_v36 = vld [vmem:[%s1535_s1 + $0x80] sm:$0xff]  ;;  %v1229_v41 = vld [vmem:[%s1535_s1 + $0x1f8] sm:$0xff]  ;;  %v198_v42 = vpack.c.b16 %v188_v32, %v188_v32  ;;  %v199_v43 = vpack.c.b16 %v189_v33, %v189_v33 }
   0xd   :  { %739 = vmatpush.bf16.msra.mxu3 %v1195_v11  ;;  %v15_v29 = vld [vmem:[%s1537_s0 + $0x8] sm:$0xff]  ;;  %v1190_v37 = vld [vmem:[%s1535_s1 + $0xc0] sm:$0xff]  ;;  %v1204_v44 = vld [vmem:[%s1535_s1 + $0x130] sm:$0xff] }
   0xe   :  { %701 = vmatpush.bf16.msra.mxu0 %v1170_v12  ;;  %v190_v38 = vunpack.c.l.b16 %v15_v29  ;;  %v191_v39 = vunpack.c.h.b16 %v15_v29  ;;  %v1212_v45 = vld [vmem:[%s1535_s1 + $0x170] sm:$0xff]  ;;  %v1203_v50 = vld [vmem:[%s1535_s1 + $0x128] sm:$0xff]  ;;  %v1202_v54 = vld [vmem:[%s1535_s1 + $0x120] sm:$0xff] }
   0xf   :  { %714 = vmatpush.bf16.msra.mxu1 %v1178_v13  ;;  %v1220_v48 = vld [vmem:[%s1535_s1 + $0x1b0] sm:$0xff]  ;;  %v1211_v51 = vld [vmem:[%s1535_s1 + $0x168] sm:$0xff]  ;;  %v1210_v55 = vld [vmem:[%s1535_s1 + $0x160] sm:$0xff] }
  0x10   :  { %727 = vmatpush.bf16.msra.mxu2 %v1186_v14  ;;  %v200_v46 = vpack.c.b16 %v190_v38, %v190_v38  ;;  %v201_v47 = vpack.c.b16 %v191_v39, %v191_v39  ;;  %v1228_v49 = vld [vmem:[%s1535_s1 + $0x1f0] sm:$0xff]  ;;  %v1219_v52 = vld [vmem:[%s1535_s1 + $0x1a8] sm:$0xff]  ;;  %v1218_v56 = vld [vmem:[%s1535_s1 + $0x1a0] sm:$0xff] }
  0x11   :  { %740 = vmatpush.bf16.msra.mxu3 %v1194_v15  ;;  %v1227_v53 = vld [vmem:[%s1535_s1 + $0x1e8] sm:$0xff]  ;;  %v1226_v57 = vld [vmem:[%s1535_s1 + $0x1e0] sm:$0xff]  ;;  %v1201_v58 = vld [vmem:[%s1535_s1 + $0x118] sm:$0xff] }
  0x12   :  { %702 = vmatpush.bf16.msra.mxu0 %v1169_v16  ;;  %v1209_v59 = vld [vmem:[%s1535_s1 + $0x158] sm:$0xff]  ;;  %v1200_v62 = vld [vmem:[%s1535_s1 + $0x110] sm:$0xff]  ;;  %v1199_v2 = vld [vmem:[%s1535_s1 + $0x108] sm:$0xff] }
  0x13   :  { %715 = vmatpush.bf16.msra.mxu1 %v1177_v17  ;;  %v1217_v60 = vld [vmem:[%s1535_s1 + $0x198] sm:$0xff]  ;;  %v1208_v63 = vld [vmem:[%s1535_s1 + $0x150] sm:$0xff]  ;;  %v1207_v3 = vld [vmem:[%s1535_s1 + $0x148] sm:$0xff] }
  0x14   :  { %728 = vmatpush.bf16.msra.mxu2 %v1185_v18  ;;  %v1225_v61 = vld [vmem:[%s1535_s1 + $0x1d8] sm:$0xff]  ;;  %v1216_v0 = vld [vmem:[%s1535_s1 + $0x190] sm:$0xff]  ;;  %v1215_v5 = vld [vmem:[%s1535_s1 + $0x188] sm:$0xff] }
  0x15   :  { %741 = vmatpush.bf16.msra.mxu3 %v1193_v19  ;;  %v1224_v1 = vld [vmem:[%s1535_s1 + $0x1d0] sm:$0xff]  ;;  %v1223_v6 = vld [vmem:[%s1535_s1 + $0x1c8] sm:$0xff]  ;;  %v17_v7 = vld [vmem:[%s1537_s0 + $0x18] sm:$0xff] }
  0x16   :  { %703 = vmatpush.bf16.msra.mxu0 %v1168_v20  ;;  %v16_v4 = vld [vmem:[%s1537_s0 + $0x10] sm:$0xff]  ;;  %v1198_v10 = vld [vmem:[%s1535_s1 + $0x100] sm:$0xff]  ;;  %v1237_v12 = vld [vmem:[%s1535_s1 + $0x238] sm:$0xff]  ;;  %v194_v16 = vunpack.c.l.b16 %v17_v7  ;;  %v195_v17 = vunpack.c.h.b16 %v17_v7 }
  0x17   :  { %716 = vmatpush.bf16.msra.mxu1 %v1176_v21  ;;  %v192_v8 = vunpack.c.l.b16 %v16_v4  ;;  %v193_v9 = vunpack.c.h.b16 %v16_v4  ;;  %v1206_v11 = vld [vmem:[%s1535_s1 + $0x140] sm:$0xff]  ;;  %v1245_v13 = vld [vmem:[%s1535_s1 + $0x278] sm:$0xff]  ;;  %v1236_v20 = vld [vmem:[%s1535_s1 + $0x230] sm:$0xff] }
  0x18   :  { %729 = vmatpush.bf16.msra.mxu2 %v1184_v22  ;;  %v1214_v14 = vld [vmem:[%s1535_s1 + $0x180] sm:$0xff]  ;;  %v1244_v21 = vld [vmem:[%s1535_s1 + $0x270] sm:$0xff]  ;;  %v204_v22 = vpack.c.b16 %v194_v16, %v194_v16  ;;  %v1233_v28 = vld [vmem:[%s1535_s1 + $0x218] sm:$0xff] }
  0x19   :  { %742 = vmatpush.bf16.msra.mxu3 %v1192_v23  ;;  %v1222_v15 = vld [vmem:[%s1535_s1 + $0x1c0] sm:$0xff]  ;;  %v202_v18 = vpack.c.b16 %v192_v8, %v192_v8  ;;  %v203_v19 = vpack.c.b16 %v193_v9, %v193_v9  ;;  %v205_v23 = vpack.c.b16 %v195_v17, %v195_v17  ;;  %v1241_v29 = vld [vmem:[%s1535_s1 + $0x258] sm:$0xff]  ;;  %v1231_v32 = vld [vmem:[%s1535_s1 + $0x208] sm:$0xff] }
  0x1a   :  { %704 = vmatpush.bf16.msra.mxu0 %v1167_v24  ;;  %v1235_v24 = vld [vmem:[%s1535_s1 + $0x228] sm:$0xff]  ;;  %v1238_v38 = vld [vmem:[%s1535_s1 + $0x240] sm:$0xff] }
  0x1b   :  { %717 = vmatpush.bf16.msra.mxu1 %v1175_v25  ;;  %v1243_v25 = vld [vmem:[%s1535_s1 + $0x268] sm:$0xff] }
  0x1c   :  { %730 = vmatpush.bf16.msra.mxu2 %v1183_v26  ;;  %v1234_v26 = vld [vmem:[%s1535_s1 + $0x220] sm:$0xff]  ;;  %v1239_v33 = vld [vmem:[%s1535_s1 + $0x248] sm:$0xff] }
  0x1d   :  { %743 = vmatpush.bf16.msra.mxu3 %v1191_v27  ;;  %v1242_v27 = vld [vmem:[%s1535_s1 + $0x260] sm:$0xff] }
  0x1e   :  { %705 = vmatpush.bf16.msra.mxu0 %v1166_v30  ;;  %v1232_v30 = vld [vmem:[%s1535_s1 + $0x210] sm:$0xff] }
  0x1f   :  { %718 = vmatpush.bf16.msra.mxu1 %v1174_v31  ;;  %v1240_v31 = vld [vmem:[%s1535_s1 + $0x250] sm:$0xff] }
  0x20   :  { %731 = vmatpush.bf16.msra.mxu2 %v1182_v36 }
  0x21   :  { %744 = vmatpush.bf16.msra.mxu3 %v1190_v37  ;;  %706 = vmatmul.bf16.vlgmr.msra.gmra.mxu0 %v198_v42  ;;  %v1230_v37 = vld [vmem:[%s1535_s1 + $0x200] sm:$0xff] }
  0x22   :  { %750 = vmatpush.bf16.msrb.mxu0 %v1205_v34  ;;  %719 = vmatmul.bf16.vlgmr.msra.gmra.mxu1 %v199_v43  ;;  %v18_v34 = vld [vmem:[%s1537_s0 + $0x20] sm:$0xff] }
  0x23   :  { %763 = vmatpush.bf16.msrb.mxu1 %v1213_v35  ;;  %732 = vmatmul.bf16.vlgmr.msra.gmra.mxu2 %v200_v46  ;;  %v196_v35 = vunpack.c.l.b16 %v18_v34  ;;  %v197_v36 = vunpack.c.h.b16 %v18_v34 }
  0x24   :  { %776 = vmatpush.bf16.msrb.mxu2 %v1221_v40  ;;  %745 = vmatmul.bf16.vlgmr.msra.gmra.mxu3 %v201_v47 }
  0x25   :  { %789 = vmatpush.bf16.msrb.mxu3 %v1229_v41  ;;  %v206_v39 = vpack.c.b16 %v196_v35, %v196_v35  ;;  %v207_v40 = vpack.c.b16 %v197_v36, %v197_v36 }
  0x26   :  { %751 = vmatpush.bf16.msrb.mxu0 %v1204_v44 }
  0x27   :  { %764 = vmatpush.bf16.msrb.mxu1 %v1212_v45 }
  0x28   :  { %777 = vmatpush.bf16.msrb.mxu2 %v1220_v48 }
  0x29   :  { %790 = vmatpush.bf16.msrb.mxu3 %v1228_v49  ;;  %v1246_v49 = vld [vmem:[%s1536_s2] ss:$0 sm:$0xff] }
  0x2a   :  { %752 = vmatpush.bf16.msrb.mxu0 %v1203_v50 }
  0x2b   :  { %765 = vmatpush.bf16.msrb.mxu1 %v1211_v51 }
  0x2c   :  { %778 = vmatpush.bf16.msrb.mxu2 %v1219_v52 }
  0x2d   :  { %791 = vmatpush.bf16.msrb.mxu3 %v1227_v53 }
  0x2e   :  { %753 = vmatpush.bf16.msrb.mxu0 %v1202_v54 }
  0x2f   :  { %766 = vmatpush.bf16.msrb.mxu1 %v1210_v55 }
  0x30   :  { %779 = vmatpush.bf16.msrb.mxu2 %v1218_v56 }
  0x31   :  { %792 = vmatpush.bf16.msrb.mxu3 %v1226_v57 }
  0x32   :  { %754 = vmatpush.bf16.msrb.mxu0 %v1201_v58 }
  0x33   :  { %767 = vmatpush.bf16.msrb.mxu1 %v1209_v59 }
  0x34   :  { %780 = vmatpush.bf16.msrb.mxu2 %v1217_v60 }
  0x35   :  { %793 = vmatpush.bf16.msrb.mxu3 %v1225_v61 }
  0x36   :  { %755 = vmatpush.bf16.msrb.mxu0 %v1200_v62 }
  0x37   :  { %768 = vmatpush.bf16.msrb.mxu1 %v1208_v63 }
  0x38   :  { %781 = vmatpush.bf16.msrb.mxu2 %v1216_v0 }
  0x39   :  { %794 = vmatpush.bf16.msrb.mxu3 %v1224_v1 }
  0x3a   :  { %756 = vmatpush.bf16.msrb.mxu0 %v1199_v2 }
  0x3b   :  { %769 = vmatpush.bf16.msrb.mxu1 %v1207_v3 }
  0x3c   :  { %782 = vmatpush.bf16.msrb.mxu2 %v1215_v5 }
  0x3d   :  { %795 = vmatpush.bf16.msrb.mxu3 %v1223_v6 }
  0x3e   :  { %757 = vmatpush.bf16.msrb.mxu0 %v1198_v10 }
  0x3f   :  { %770 = vmatpush.bf16.msrb.mxu1 %v1206_v11 }
  0x40   :  { %783 = vmatpush.bf16.msrb.mxu2 %v1214_v14 }
  0x41   :  { %796 = vmatpush.bf16.msrb.mxu3 %v1222_v15  ;;  %758 = vmatmul.bf16.vlgmr.msrb.gmra.mxu0 %v202_v18 }
  0x42   :  { %802 = vmatpush.bf16.msra.mxu0 %v1237_v12  ;;  %771 = vmatmul.bf16.vlgmr.msrb.gmra.mxu1 %v203_v19 }
  0x43   :  { %815 = vmatpush.bf16.msra.mxu1 %v1245_v13  ;;  %784 = vmatmul.bf16.vlgmr.msrb.gmra.mxu2 %v204_v22 }
  0x44   :  { %797 = vmatmul.bf16.vlgmr.msrb.gmra.mxu3 %v205_v23 }
  0x46   :  { %803 = vmatpush.bf16.msra.mxu0 %v1236_v20 }
  0x47   :  { %816 = vmatpush.bf16.msra.mxu1 %v1244_v21 }
  0x4a   :  { %804 = vmatpush.bf16.msra.mxu0 %v1235_v24 }
  0x4b   :  { %817 = vmatpush.bf16.msra.mxu1 %v1243_v25 }
  0x4e   :  { %805 = vmatpush.bf16.msra.mxu0 %v1234_v26 }
  0x4f   :  { %818 = vmatpush.bf16.msra.mxu1 %v1242_v27 }
  0x52   :  { %806 = vmatpush.bf16.msra.mxu0 %v1233_v28 }
  0x53   :  { %819 = vmatpush.bf16.msra.mxu1 %v1241_v29 }
  0x56   :  { %807 = vmatpush.bf16.msra.mxu0 %v1232_v30 }
  0x57   :  { %820 = vmatpush.bf16.msra.mxu1 %v1240_v31 }
  0x5a   :  { %808 = vmatpush.bf16.msra.mxu0 %v1231_v32 }
  0x5b   :  { %821 = vmatpush.bf16.msra.mxu1 %v1239_v33 }
  0x5e   :  { %809 = vmatpush.bf16.msra.mxu0 %v1230_v37 }
  0x5f   :  { %822 = vmatpush.bf16.msra.mxu1 %v1238_v38 }
  0x61   :  { %810 = vmatmul.bf16.vlgmr.msra.gmra.mxu0 %v206_v39 }
  0x62   :  { %823 = vmatmul.bf16.vlgmr.msra.gmra.mxu1 %v207_v40 }
  0x9e   :  { %v707_v41 = vpop.f32.mrf.mxu0 }
  0x9f   :  { %v720_v42 = vpop.f32.mrf.mxu1  ;;  %v708_v50 = vadd.f32 %v1246_v49, %v707_v41 }
  0xa1   :  { %v721_v53 = vadd.f32 %v720_v42, %v708_v50 }
  0xa6   :  { %v733_v43 = vpop.f32.mrf.mxu2  ;;  %v709_v45 = vpop.f32.mrf.mxu0 }
  0xa7   :  { %v746_v44 = vpop.f32.mrf.mxu3  ;;  %v722_v46 = vpop.f32.mrf.mxu1  ;;  %v734_v54 = vadd.f32 %v733_v43, %v721_v53 }
  0xa9   :  { %v747_v59 = vadd.f32 %v746_v44, %v734_v54 }
  0xae   :  { %v735_v47 = vpop.f32.mrf.mxu2 }
  0xaf   :  { %v748_v48 = vpop.f32.mrf.mxu3 }
  0xbe   :  { %v759_v51 = vpop.f32.mrf.mxu0 }
  0xbf   :  { %v772_v52 = vpop.f32.mrf.mxu1  ;;  %v760_v60 = vadd.f32 %v759_v51, %v747_v59 }
  0xc1   :  { %v773_v63 = vadd.f32 %v772_v52, %v760_v60 }
  0xc6   :  { %v761_v55 = vpop.f32.mrf.mxu0  ;;  %v785_v57 = vpop.f32.mrf.mxu2 }
  0xc7   :  { %v774_v56 = vpop.f32.mrf.mxu1  ;;  %v798_v58 = vpop.f32.mrf.mxu3  ;;  %v786_v0 = vadd.f32 %v785_v57, %v773_v63 }
  0xc9   :  { %v799_v1 = vadd.f32 %v798_v58, %v786_v0 }
  0xce   :  { %v787_v61 = vpop.f32.mrf.mxu2 }
  0xcf   :  { %v800_v62 = vpop.f32.mrf.mxu3 }
  0xde   :  { %v811_v2 = vpop.f32.mrf.mxu0 }
  0xdf   :  { %v824_v3 = vpop.f32.mrf.mxu1  ;;  %v812_v4 = vadd.f32 %v811_v2, %v799_v1 }
  0xe1   :  { %v825_v5 = vadd.f32 %v824_v3, %v812_v4 }
  0xe3   :  { %v829_v6 = vsel %vm828_vm0, %v825_v5, -inf }
  0xe4   :  { %830 = vmax.xlane.f32.xlu0 %v829_v6 }
  0xe6   :  { %v813_v7 = vpop.f32.mrf.mxu0 }
  0xe7   :  { %v826_v8 = vpop.f32.mrf.mxu1 }
 0x157   :  { %v831_v9 = vpop.xlane.xlu0 %830 }
 0x158   :  { %v832_v10 = vsub.f32 %v825_v5, %v831_v9 }
 0x15a   :  { %v833_v11 = vmul.f32 1.442695, %v832_v10 }
 0x15c   :  { %1247 = vpow2.f32 %v833_v11 }
 0x162   :  { %v1248_v12 = vpop.eup %1247 }
 0x163   :  { %v835_v13 = vsel %vm828_vm0, %v1248_v12, 0.0 }
 0x164   :  { %836 = vadd.xlane.f32.xlu0 %v835_v13 }
 0x1d7   :  { %v837_v14 = vpop.xlane.xlu0 %836 }
 0x1d8   :  { %1249 = vrcp.f32 %v837_v14 }
 0x1de   :  { %v1250_v15 = vpop.eup %1249 }
 0x1df   :  { %v839_v16 = vmul.f32 %v1250_v15, %v1248_v12 }
 0x1e1   :  { %v840_v17 = vmax.f32 %v839_v16, 1e-09 }
 0x1e3   :  { %841 = vst.msk [vmem:[%s1538_s3] sm:$0xff] %vm828_vm0, %v840_v17 }

// kernel: conv_encoder_y.10
= control target key start
LH: loop header
LB: loop body
LE: loop exit
PB: predicated region body
PF: predicated region fallthrough
CT: control target
= control target key end

     0   :  { %s6677_s12 = smov 0   ;;  %s9808_s0 = inlined_call_operand.vmem [shape: bf16[2,28,384], index: 0, kind: input, shape index: {}]   ;;  %s9809_s1 = inlined_call_operand.vmem [shape: bf16[3840,256], index: 1, kind: input, shape index: {}]   ;;  %s9810_s2 = inlined_call_operand.vmem [shape: f32[1,256], index: 2, kind: input, shape index: {}]   ;;  %s9811_s3 = inlined_call_operand.vmem [shape: bf16[2,5,256], index: 3, kind: output, shape index: {}]  }
   0x1 LB: > { %s4164_s13 = sadd.s32 4294967295, %s6655_s12   ;;  %p4168_p0 = scmp.ge.s32.totalorder %s6655_s12, 1  ;;  %s6655_s12 = sphi %s6677_s12, %s13_s12  }
   0x2   : > { %p137_p1 = scmp.lt.s32.totalorder %s6655_s12, 3 }
   0x4   : > { %p138_p2 = pnand %p4168_p0, %p137_p1 }
   0x5   : > { %p161_p3 = scmp.lt.s32.totalorder (!%p138_p2), %s4164_s13, 1 }
   0x6   : > { %141 = sbr.rel (%p138_p2) target bundleno = 650 (0x28a), region = 32 }
   0xb   : > { %v4278_v0 = vld [vmem:[%s9809_s1 + $0x70] sm:$0xf]  ;;  %v6170_v1 = vld [vmem:[%s9809_s1 + $0x74] sm:$0xf0]  ;;  %v4270_v11 = vld [vmem:[%s9809_s1 + $0x60] sm:$0xf] }
   0xc   : > { %v4342_v2 = vld [vmem:[%s9809_s1 + $0xf0] sm:$0xf]  ;;  %v4279_v3 = vor.u32 %v6170_v1, %v4278_v0  ;;  %v6186_v4 = vld [vmem:[%s9809_s1 + $0xf4] sm:$0xf0]  ;;  %v6168_v13 = vld [vmem:[%s9809_s1 + $0x64] sm:$0xf0] }
   0xd   : > { %v4406_v5 = vld [vmem:[%s9809_s1 + $0x170] sm:$0xf]  ;;  %v6202_v6 = vld [vmem:[%s9809_s1 + $0x174] sm:$0xf0]  ;;  %v4343_v7 = vor.u32 %v6186_v4, %v4342_v2  ;;  %v4334_v14 = vld [vmem:[%s9809_s1 + $0xe0] sm:$0xf]  ;;  %v4271_v16 = vor.u32 %v6168_v13, %v4270_v11 }
   0xe   : > { %v4407_v8 = vor.u32 %v6202_v6, %v4406_v5  ;;  %v4470_v9 = vld [vmem:[%s9809_s1 + $0x1f0] sm:$0xf]  ;;  %v6218_v10 = vld [vmem:[%s9809_s1 + $0x1f4] sm:$0xf0]  ;;  %3308 = vmatpush.bf16.msra.mxu0 %v4279_v3  ;;  %v6184_v15 = vld [vmem:[%s9809_s1 + $0xe4] sm:$0xf0] }
   0xf   : > { %v4471_v12 = vor.u32 %v6218_v10, %v4470_v9  ;;  %3321 = vmatpush.bf16.msra.mxu1 %v4343_v7  ;;  %v4335_v17 = vor.u32 %v6184_v15, %v4334_v14  ;;  %v4398_v18 = vld [vmem:[%s9809_s1 + $0x160] sm:$0xf]  ;;  %v6200_v19 = vld [vmem:[%s9809_s1 + $0x164] sm:$0xf0]  ;;  %v4262_v23 = vld [vmem:[%s9809_s1 + $0x50] sm:$0xf] }
  0x10   : > { %3334 = vmatpush.bf16.msra.mxu2 %v4407_v8  ;;  %v4462_v20 = vld [vmem:[%s9809_s1 + $0x1e0] sm:$0xf]  ;;  %v4399_v21 = vor.u32 %v6200_v19, %v4398_v18  ;;  %v6216_v22 = vld [vmem:[%s9809_s1 + $0x1e4] sm:$0xf0]  ;;  %v6166_v24 = vld [vmem:[%s9809_s1 + $0x54] sm:$0xf0] }
  0x11   : > { %3347 = vmatpush.bf16.msra.mxu3 %v4471_v12  ;;  %v4463_v25 = vor.u32 %v6216_v22, %v4462_v20  ;;  %v4326_v26 = vld [vmem:[%s9809_s1 + $0xd0] sm:$0xf]  ;;  %v6182_v27 = vld [vmem:[%s9809_s1 + $0xd4] sm:$0xf0]  ;;  %v4263_v29 = vor.u32 %v6166_v24, %v4262_v23  ;;  %v4254_v35 = vld [vmem:[%s9809_s1 + $0x40] sm:$0xf] }
  0x12   : > { %v4390_v28 = vld [vmem:[%s9809_s1 + $0x150] sm:$0xf]  ;;  %3309 = vmatpush.bf16.msra.mxu0 %v4271_v16  ;;  %v6198_v30 = vld [vmem:[%s9809_s1 + $0x154] sm:$0xf0]  ;;  %v4327_v33 = vor.u32 %v6182_v27, %v4326_v26  ;;  %v6164_v36 = vld [vmem:[%s9809_s1 + $0x44] sm:$0xf0] }
  0x13   : > { %v4454_v31 = vld [vmem:[%s9809_s1 + $0x1d0] sm:$0xf]  ;;  %v6214_v32 = vld [vmem:[%s9809_s1 + $0x1d4] sm:$0xf0]  ;;  %3322 = vmatpush.bf16.msra.mxu1 %v4335_v17  ;;  %v4391_v34 = vor.u32 %v6198_v30, %v4390_v28  ;;  %v4318_v37 = vld [vmem:[%s9809_s1 + $0xc0] sm:$0xf]  ;;  %v4255_v44 = vor.u32 %v6164_v36, %v4254_v35 }
  0x14   : > { %3335 = vmatpush.bf16.msra.mxu2 %v4399_v21  ;;  %v4455_v38 = vor.u32 %v6214_v32, %v4454_v31  ;;  %v6180_v39 = vld [vmem:[%s9809_s1 + $0xc4] sm:$0xf0]  ;;  %v4382_v40 = vld [vmem:[%s9809_s1 + $0x140] sm:$0xf]  ;;  %v4246_v47 = vld [vmem:[%s9809_s1 + $0x30] sm:$0xf] }
  0x15   : > { %3348 = vmatpush.bf16.msra.mxu3 %v4463_v25  ;;  %v6196_v41 = vld [vmem:[%s9809_s1 + $0x144] sm:$0xf0]  ;;  %v4446_v42 = vld [vmem:[%s9809_s1 + $0x1c0] sm:$0xf]  ;;  %v4319_v45 = vor.u32 %v6180_v39, %v4318_v37  ;;  %v6162_v48 = vld [vmem:[%s9809_s1 + $0x34] sm:$0xf0] }
  0x16   : > { %v6212_v43 = vld [vmem:[%s9809_s1 + $0x1c4] sm:$0xf0]  ;;  %3310 = vmatpush.bf16.msra.mxu0 %v4263_v29  ;;  %v4383_v46 = vor.u32 %v6196_v41, %v4382_v40  ;;  %v4310_v49 = vld [vmem:[%s9809_s1 + $0xb0] sm:$0xf]  ;;  %v6178_v51 = vld [vmem:[%s9809_s1 + $0xb4] sm:$0xf0]  ;;  %v4247_v56 = vor.u32 %v6162_v48, %v4246_v47 }
  0x17   : > { %3323 = vmatpush.bf16.msra.mxu1 %v4327_v33  ;;  %v4447_v50 = vor.u32 %v6212_v43, %v4446_v42  ;;  %v4374_v52 = vld [vmem:[%s9809_s1 + $0x130] sm:$0xf]  ;;  %v6194_v53 = vld [vmem:[%s9809_s1 + $0x134] sm:$0xf0]  ;;  %v4311_v57 = vor.u32 %v6178_v51, %v4310_v49  ;;  %v4238_v59 = vld [vmem:[%s9809_s1 + $0x20] sm:$0xf] }
  0x18   : > { %3336 = vmatpush.bf16.msra.mxu2 %v4391_v34  ;;  %v4438_v54 = vld [vmem:[%s9809_s1 + $0x1b0] sm:$0xf]  ;;  %v6210_v55 = vld [vmem:[%s9809_s1 + $0x1b4] sm:$0xf0]  ;;  %v4375_v58 = vor.u32 %v6194_v53, %v4374_v52  ;;  %v6160_v60 = vld [vmem:[%s9809_s1 + $0x24] sm:$0xf0] }
  0x19   : > { %3349 = vmatpush.bf16.msra.mxu3 %v4455_v38  ;;  %v4302_v61 = vld [vmem:[%s9809_s1 + $0xa0] sm:$0xf]  ;;  %v4439_v62 = vor.u32 %v6210_v55, %v4438_v54  ;;  %v6176_v63 = vld [vmem:[%s9809_s1 + $0xa4] sm:$0xf0]  ;;  %v4239_v4 = vor.u32 %v6160_v60, %v4238_v59  ;;  %v4230_v7 = vld [vmem:[%s9809_s1 + $0x10] sm:$0xf] }
  0x1a   : > { %3311 = vmatpush.bf16.msra.mxu0 %v4255_v44  ;;  %v4366_v0 = vld [vmem:[%s9809_s1 + $0x120] sm:$0xf]  ;;  %v6192_v1 = vld [vmem:[%s9809_s1 + $0x124] sm:$0xf0]  ;;  %v4303_v5 = vor.u32 %v6176_v63, %v4302_v61  ;;  %v6158_v8 = vld [vmem:[%s9809_s1 + $0x14] sm:$0xf0] }
  0x1b   : > { %3324 = vmatpush.bf16.msra.mxu1 %v4319_v45  ;;  %v4430_v2 = vld [vmem:[%s9809_s1 + $0x1a0] sm:$0xf]  ;;  %v6208_v3 = vld [vmem:[%s9809_s1 + $0x1a4] sm:$0xf0]  ;;  %v4367_v6 = vor.u32 %v6192_v1, %v4366_v0  ;;  %v4294_v9 = vld [vmem:[%s9809_s1 + $0x90] sm:$0xf]  ;;  %v4231_v16 = vor.u32 %v6158_v8, %v4230_v7 }
  0x1c   : > { %3337 = vmatpush.bf16.msra.mxu2 %v4383_v46  ;;  %v4431_v10 = vor.u32 %v6208_v3, %v4430_v2  ;;  %v6174_v11 = vld [vmem:[%s9809_s1 + $0x94] sm:$0xf0]  ;;  %v4358_v12 = vld [vmem:[%s9809_s1 + $0x110] sm:$0xf]  ;;  %v4222_v17 = vld [vmem:[%s9809_s1] sm:$0xf] }
  0x1d   : > { %3350 = vmatpush.bf16.msra.mxu3 %v4447_v50  ;;  %v6190_v13 = vld [vmem:[%s9809_s1 + $0x114] sm:$0xf0]  ;;  %v4422_v14 = vld [vmem:[%s9809_s1 + $0x190] sm:$0xf]  ;;  %v6156_v18 = vld [vmem:[%s9809_s1 + $0x4] sm:$0xf0]  ;;  %v4295_v19 = vor.u32 %v6174_v11, %v4294_v9 }
  0x1e   : > { %3312 = vmatpush.bf16.msra.mxu0 %v4247_v56  ;;  %v6206_v15 = vld [vmem:[%s9809_s1 + $0x194] sm:$0xf0]  ;;  %v4359_v20 = vor.u32 %v6190_v13, %v4358_v12  ;;  %v4286_v21 = vld [vmem:[%s9809_s1 + $0x80] sm:$0xf]  ;;  %v6172_v22 = vld [vmem:[%s9809_s1 + $0x84] sm:$0xf0]  ;;  %v4223_v31 = vor.u32 %v6156_v18, %v4222_v17 }
  0x1f   : > { %3325 = vmatpush.bf16.msra.mxu1 %v4311_v57  ;;  %v4350_v23 = vld [vmem:[%s9809_s1 + $0x100] sm:$0xf]  ;;  %v4423_v24 = vor.u32 %v6206_v15, %v4422_v14  ;;  %v6188_v25 = vld [vmem:[%s9809_s1 + $0x104] sm:$0xf0]  ;;  %v4534_v28 = vld [vmem:[%s9809_s1 + $0x270] sm:$0xf]  ;;  %v4287_v35 = vor.u32 %v6172_v22, %v4286_v21 }
  0x20   : > { %3338 = vmatpush.bf16.msra.mxu2 %v4375_v58  ;;  %v4414_v26 = vld [vmem:[%s9809_s1 + $0x180] sm:$0xf]  ;;  %v6204_v27 = vld [vmem:[%s9809_s1 + $0x184] sm:$0xf0]  ;;  %v6234_v29 = vld [vmem:[%s9809_s1 + $0x274] sm:$0xf0]  ;;  %v4351_v36 = vor.u32 %v6188_v25, %v4350_v23 }
  0x21   : > { %3351 = vmatpush.bf16.msra.mxu3 %v4439_v62  ;;  %v4598_v30 = vld [vmem:[%s9809_s1 + $0x2f0] sm:$0xf]  ;;  %v6250_v32 = vld [vmem:[%s9809_s1 + $0x2f4] sm:$0xf0]  ;;  %v4415_v39 = vor.u32 %v6204_v27, %v4414_v26  ;;  %v4535_v40 = vor.u32 %v6234_v29, %v4534_v28  ;;  %v4526_v43 = vld [vmem:[%s9809_s1 + $0x260] sm:$0xf] }
  0x22   : > { %3313 = vmatpush.bf16.msra.mxu0 %v4239_v4  ;;  %v4662_v33 = vld [vmem:[%s9809_s1 + $0x370] sm:$0xf]  ;;  %v6266_v34 = vld [vmem:[%s9809_s1 + $0x374] sm:$0xf0]  ;;  %v4599_v41 = vor.u32 %v6250_v32, %v4598_v30  ;;  %v6232_v44 = vld [vmem:[%s9809_s1 + $0x264] sm:$0xf0] }
  0x23   : > { %3326 = vmatpush.bf16.msra.mxu1 %v4303_v5  ;;  %v4726_v37 = vld [vmem:[%s9809_s1 + $0x3f0] sm:$0xf]  ;;  %v6282_v38 = vld [vmem:[%s9809_s1 + $0x3f4] sm:$0xf0]  ;;  %v4663_v42 = vor.u32 %v6266_v34, %v4662_v33  ;;  %v4590_v45 = vld [vmem:[%s9809_s1 + $0x2e0] sm:$0xf]  ;;  %v4527_v52 = vor.u32 %v6232_v44, %v4526_v43 }
  0x24   : > { %3339 = vmatpush.bf16.msra.mxu2 %v4367_v6  ;;  %v4727_v46 = vor.u32 %v6282_v38, %v4726_v37  ;;  %v6248_v47 = vld [vmem:[%s9809_s1 + $0x2e4] sm:$0xf0]  ;;  %v4654_v48 = vld [vmem:[%s9809_s1 + $0x360] sm:$0xf]  ;;  %v4518_v55 = vld [vmem:[%s9809_s1 + $0x250] sm:$0xf] }
  0x25   : > { %3352 = vmatpush.bf16.msra.mxu3 %v4431_v10  ;;  %v6264_v49 = vld [vmem:[%s9809_s1 + $0x364] sm:$0xf0]  ;;  %v4718_v50 = vld [vmem:[%s9809_s1 + $0x3e0] sm:$0xf]  ;;  %v4591_v53 = vor.u32 %v6248_v47, %v4590_v45  ;;  %v6230_v56 = vld [vmem:[%s9809_s1 + $0x254] sm:$0xf0] }
  0x26   : > { %3314 = vmatpush.bf16.msra.mxu0 %v4231_v16  ;;  %v6280_v51 = vld [vmem:[%s9809_s1 + $0x3e4] sm:$0xf0]  ;;  %v4655_v54 = vor.u32 %v6264_v49, %v4654_v48  ;;  %v4582_v57 = vld [vmem:[%s9809_s1 + $0x2d0] sm:$0xf]  ;;  %v6246_v59 = vld [vmem:[%s9809_s1 + $0x2d4] sm:$0xf0]  ;;  %v4519_v0 = vor.u32 %v6230_v56, %v4518_v55 }
  0x27   : > { %3327 = vmatpush.bf16.msra.mxu1 %v4295_v19  ;;  %v4719_v58 = vor.u32 %v6280_v51, %v4718_v50  ;;  %v4646_v60 = vld [vmem:[%s9809_s1 + $0x350] sm:$0xf]  ;;  %v6262_v61 = vld [vmem:[%s9809_s1 + $0x354] sm:$0xf0]  ;;  %v4510_v1 = vld [vmem:[%s9809_s1 + $0x240] sm:$0xf]  ;;  %v4583_v2 = vor.u32 %v6246_v59, %v4582_v57 }
  0x28   : > { %3340 = vmatpush.bf16.msra.mxu2 %v4359_v20  ;;  %v4710_v62 = vld [vmem:[%s9809_s1 + $0x3d0] sm:$0xf]  ;;  %v6278_v63 = vld [vmem:[%s9809_s1 + $0x3d4] sm:$0xf0]  ;;  %v4647_v3 = vor.u32 %v6262_v61, %v4646_v60  ;;  %v6228_v4 = vld [vmem:[%s9809_s1 + $0x244] sm:$0xf0] }
  0x29   : > { %3353 = vmatpush.bf16.msra.mxu3 %v4423_v24  ;;  %v4574_v5 = vld [vmem:[%s9809_s1 + $0x2c0] sm:$0xf]  ;;  %v6244_v6 = vld [vmem:[%s9809_s1 + $0x2c4] sm:$0xf0]  ;;  %v4711_v7 = vor.u32 %v6278_v63, %v4710_v62  ;;  %s9813_s13 = smov (!%p161_p3, %s4164_s13), 1  ;;  %v4511_v12 = vor.u32 %v6228_v4, %v4510_v1  ;;  %vm4099_vm0 = vcmask 1042432  }
  0x2a   : > { %3315 = vmatpush.bf16.msra.mxu0 %v4223_v31  ;;  %v4638_v8 = vld [vmem:[%s9809_s1 + $0x340] sm:$0xf]  ;;  %v6260_v9 = vld [vmem:[%s9809_s1 + $0x344] sm:$0xf0]  ;;  %v4502_v13 = vld [vmem:[%s9809_s1 + $0x230] sm:$0xf]  ;;  %v4575_v15 = vor.u32 %v6244_v6, %v4574_v5 }
  0x2b   : > { %3328 = vmatpush.bf16.msra.mxu1 %v4287_v35  ;;  %v4702_v10 = vld [vmem:[%s9809_s1 + $0x3c0] sm:$0xf]  ;;  %v6276_v11 = vld [vmem:[%s9809_s1 + $0x3c4] sm:$0xf0]  ;;  %v6226_v14 = vld [vmem:[%s9809_s1 + $0x234] sm:$0xf0]  ;;  %v4639_v16 = vor.u32 %v6260_v9, %v4638_v8 }
  0x2c   : > { %3341 = vmatpush.bf16.msra.mxu2 %v4351_v36  ;;  %s6635_s8 = smul.u32 48, %s9813_s13  ;;  %v4566_v17 = vld [vmem:[%s9809_s1 + $0x2b0] sm:$0xf]  ;;  %v6242_v18 = vld [vmem:[%s9809_s1 + $0x2b4] sm:$0xf0]  ;;  %v4703_v20 = vor.u32 %v6276_v11, %v4702_v10  ;;  %v4503_v27 = vor.u32 %v6226_v14, %v4502_v13  ;;  %s6142_s19 = sshll.u32 %s9813_s13, 3 }
  0x2d   : > { %3354 = vmatpush.bf16.msra.mxu3 %v4415_v39  ;;  %v4630_v19 = vld [vmem:[%s9809_s1 + $0x330] sm:$0xf]  ;;  %v6258_v21 = vld [vmem:[%s9809_s1 + $0x334] sm:$0xf0]  ;;  %v4567_v32 = vor.u32 %v6242_v18, %v4566_v17  ;;  %v4494_v34 = vld [vmem:[%s9809_s1 + $0x220] sm:$0xf]  ;;  %s170_s22 = scalar_lea.vmem %s9811_s3, %s6142_s19 }
  0x2e   : > { %3360 = vmatpush.bf16.msrb.mxu0 %v4535_v40  ;;  %v4694_v22 = vld [vmem:[%s9809_s1 + $0x3b0] sm:$0xf]  ;;  %v6274_v23 = vld [vmem:[%s9809_s1 + $0x3b4] sm:$0xf0]  ;;  %s7007_s25 = scalar_lea.vmem %s9808_s0, %s6635_s8  ;;  %v4631_v33 = vor.u32 %v6258_v21, %v4630_v19  ;;  %v6224_v35 = vld [vmem:[%s9809_s1 + $0x224] sm:$0xf0] }
  0x2f   : > { %3373 = vmatpush.bf16.msrb.mxu1 %v4599_v41  ;;  %v172_v24 = vld [vmem:[%s7007_s25 + $0x8] sm:$0x7]  ;;  %v171_v25 = vld [vmem:[%s7007_s25] sm:$0x77]  ;;  %v4174_v26 = vld [vmem:[%s7007_s25] sm:$0x8]  ;;  %v4695_v38 = vor.u32 %v6274_v23, %v4694_v22  ;;  %v4495_v49 = vor.u32 %v6224_v35, %v4494_v34 }
  0x30   : > { %3386 = vmatpush.bf16.msrb.mxu2 %v4663_v42  ;;  %v197_v28 = vunpack.c.l.b16 %v172_v24  ;;  %v195_v29 = vunpack.c.l.b16 %v171_v25  ;;  %v6144_v30 = vld [vmem:[%s7007_s25 + $0x8] sm:$0x30]  ;;  %v196_v31 = vunpack.c.h.b16 %v171_v25  ;;  %v4558_v36 = vld [vmem:[%s9809_s1 + $0x2a0] sm:$0xf]  ;;  %v6240_v39 = vld [vmem:[%s9809_s1 + $0x2a4] sm:$0xf0] }
  0x31   : > { %3399 = vmatpush.bf16.msrb.mxu3 %v4727_v46  ;;  %v4175_v37 = vor.u32 %v6144_v30, %v4174_v26  ;;  %v4622_v40 = vld [vmem:[%s9809_s1 + $0x320] sm:$0xf]  ;;  %v6256_v41 = vld [vmem:[%s9809_s1 + $0x324] sm:$0xf0]  ;;  %v4486_v50 = vld [vmem:[%s9809_s1 + $0x210] sm:$0xf] }
  0x32   : > { %3361 = vmatpush.bf16.msrb.mxu0 %v4527_v52  ;;  %v7031_v42 = vpack.c.b16 %v197_v28, %v197_v28  ;;  %v7033_v43 = vpack.c.b16 %v195_v29, %v195_v29  ;;  %v4686_v44 = vld [vmem:[%s9809_s1 + $0x3a0] sm:$0xf]  ;;  %v6272_v45 = vld [vmem:[%s9809_s1 + $0x3a4] sm:$0xf0]  ;;  %v7041_v48 = vpack.c.b16 %v196_v31, %v196_v31  ;;  %v6222_v51 = vld [vmem:[%s9809_s1 + $0x214] sm:$0xf0]  ;;  %v4559_v52 = vor.u32 %v6240_v39, %v4558_v36 }
  0x33   : > { %3374 = vmatpush.bf16.msrb.mxu1 %v4591_v53  ;;  %v218_v46 = vshrl.u32 %v4175_v37, 16  ;;  %v221_v47 = vshll.u32 %v4175_v37, 16  ;;  %v4623_v53 = vor.u32 %v6256_v41, %v4622_v40  ;;  %v4550_v56 = vld [vmem:[%s9809_s1 + $0x290] sm:$0xf]  ;;  %v6238_v57 = vld [vmem:[%s9809_s1 + $0x294] sm:$0xf0] }
  0x34   : > { %3387 = vmatpush.bf16.msrb.mxu2 %v4655_v54  ;;  %3316 = vmatmul.bf16.vlgmr.msra.gmra.mxu0 %v7033_v43  ;;  %v4614_v59 = vld [vmem:[%s9809_s1 + $0x310] sm:$0xf]  ;;  %v6254_v60 = vld [vmem:[%s9809_s1 + $0x314] sm:$0xf0]  ;;  %v6220_v1 = vld [vmem:[%s9809_s1 + $0x204] sm:$0xf0] }
  0x35   : > { %3400 = vmatpush.bf16.msrb.mxu3 %v4719_v58  ;;  %3342 = vmatmul.bf16.vlgmr.msra.gmra.mxu2 %v7031_v42  ;;  %v220_v54 = vrot.slane %v218_v46, 3  ;;  %v223_v55 = vrot.slane %v221_v47, 4  ;;  %v4687_v58 = vor.u32 %v6272_v45, %v4686_v44  ;;  %v4678_v61 = vld [vmem:[%s9809_s1 + $0x390] sm:$0xf]  ;;  %v6270_v63 = vld [vmem:[%s9809_s1 + $0x394] sm:$0xf0]  ;;  %v4615_v8 = vor.u32 %v6254_v60, %v4614_v59 }
  0x36   : > { %3362 = vmatpush.bf16.msrb.mxu0 %v4519_v0  ;;  %3329 = vmatmul.bf16.vlgmr.msra.gmra.mxu1 %v7041_v48  ;;  %v4478_v0 = vld [vmem:[%s9809_s1 + $0x200] sm:$0xf]  ;;  %v6236_v4 = vld [vmem:[%s9809_s1 + $0x284] sm:$0xf0]  ;;  %v4186_v11 = vld [vmem:[%s7007_s25 + $0xc] sm:$0x8]  ;;  %v4679_v14 = vor.u32 %v6270_v63, %v4678_v61 }
  0x37   : > { %3375 = vmatpush.bf16.msrb.mxu1 %v4583_v2  ;;  %v7066_v62 = vor.u32 %v223_v55, %v220_v54  ;;  %v4487_v2 = vor.u32 %v6222_v51, %v4486_v50  ;;  %v4606_v5 = vld [vmem:[%s9809_s1 + $0x300] sm:$0xf]  ;;  %v6252_v6 = vld [vmem:[%s9809_s1 + $0x304] sm:$0xf0]  ;;  %v6143_v13 = vld [vmem:[%s7007_s25 + $0x4] sm:$0x8]  ;;  %v4479_v22 = vor.u32 %v6220_v1, %v4478_v0 }
  0x38   : > { %3388 = vmatpush.bf16.msrb.mxu2 %v4647_v3  ;;  %v4542_v3 = vld [vmem:[%s9809_s1 + $0x280] sm:$0xf]  ;;  %v6268_v10 = vld [vmem:[%s9809_s1 + $0x384] sm:$0xf0]  ;;  %v4176_v17 = vld [vmem:[%s7007_s25 + $0xc] sm:$0x30]  ;;  %v4607_v29 = vor.u32 %v6252_v6, %v4606_v5 }
  0x39   : > { %3401 = vmatpush.bf16.msrb.mxu3 %v4711_v7  ;;  %v4551_v7 = vor.u32 %v6238_v57, %v4550_v56  ;;  %v4670_v9 = vld [vmem:[%s9809_s1 + $0x380] sm:$0xf]  ;;  %v4854_v18 = vld [vmem:[%s9809_s1 + $0x4f0] sm:$0xf]  ;;  %v4179_v19 = vor.u32 %v6143_v13, %v4176_v17  ;;  %v6145_v21 = vld [vmem:[%s7007_s25 + $0x10] sm:$0x30]  ;;  %v4543_v28 = vor.u32 %v6236_v4, %v4542_v3 }
  0x3a   : > { %3363 = vmatpush.bf16.msrb.mxu0 %v4511_v12  ;;  %v6147_v12 = vld [vmem:[%s7007_s25 + $0x14] sm:$0x30]  ;;  %3355 = vmatmul.bf16.vlgmr.msra.gmra.mxu3 %v7066_v62  ;;  %v4918_v24 = vld [vmem:[%s9809_s1 + $0x570] sm:$0xf]  ;;  %v4671_v34 = vor.u32 %v6268_v10, %v4670_v9  ;;  %v4782_v36 = vld [vmem:[%s9809_s1 + $0x460] sm:$0xf] }
  0x3b   : > { %3376 = vmatpush.bf16.msrb.mxu1 %v4575_v15  ;;  %v4790_v15 = vld [vmem:[%s9809_s1 + $0x470] sm:$0xf]  ;;  %v6314_v23 = vld [vmem:[%s9809_s1 + $0x4f4] sm:$0xf0]  ;;  %v7121_v26 = vor.u32 %v6147_v12, %v4186_v11  ;;  %v6296_v37 = vld [vmem:[%s9809_s1 + $0x464] sm:$0xf0] }
  0x3c   : > { %3389 = vmatpush.bf16.msrb.mxu2 %v4639_v16  ;;  %v6298_v16 = vld [vmem:[%s9809_s1 + $0x474] sm:$0xf0]  ;;  %v4982_v30 = vld [vmem:[%s9809_s1 + $0x5f0] sm:$0xf]  ;;  %v4855_v40 = vor.u32 %v6314_v23, %v4854_v18  ;;  %v4846_v44 = vld [vmem:[%s9809_s1 + $0x4e0] sm:$0xf]  ;;  %v4783_v57 = vor.u32 %v6296_v37, %v4782_v36 }
  0x3d   : > { %3402 = vmatpush.bf16.msrb.mxu3 %v4703_v20  ;;  %v4182_v20 = vld [vmem:[%s7007_s25 + $0x8] sm:$0x8]  ;;  %v6330_v25 = vld [vmem:[%s9809_s1 + $0x574] sm:$0xf0]  ;;  %v4791_v35 = vor.u32 %v6298_v16, %v4790_v15  ;;  %v4910_v46 = vld [vmem:[%s9809_s1 + $0x560] sm:$0xf] }
  0x3e   : > { %3364 = vmatpush.bf16.msrb.mxu0 %v4503_v27  ;;  %v4183_v27 = vor.u32 %v6145_v21, %v4182_v20  ;;  %v6346_v31 = vld [vmem:[%s9809_s1 + $0x5f4] sm:$0xf0]  ;;  %v4919_v41 = vor.u32 %v6330_v25, %v4918_v24  ;;  %v6312_v45 = vld [vmem:[%s9809_s1 + $0x4e4] sm:$0xf0]  ;;  %v257_v50 = vrot.slane %v7121_v26, 3  ;;  %vm4102_vm2 = vcmask 1046532  }
  0x3f   : > { %3377 = vmatpush.bf16.msrb.mxu1 %v4567_v32  ;;  %v226_v32 = vshrl.u32 %v4179_v19, 16  ;;  %v4983_v47 = vor.u32 %v6346_v31, %v4982_v30  ;;  %v6344_v54 = vld [vmem:[%s9809_s1 + $0x5e4] sm:$0xf0]  ;;  %v4188_v59 = vld [vmem:[%s7007_s25 + $0x18] sm:$0x30]  ;;  %v4847_v60 = vor.u32 %v6312_v45, %v4846_v44 }
  0x40   : > { %3390 = vmatpush.bf16.msrb.mxu2 %v4631_v33  ;;  %v229_v33 = vshll.u32 %v4179_v19, 16  ;;  %v237_v39 = vshll.u32 %v4183_v27, 16  ;;  %v4774_v63 = vld [vmem:[%s9809_s1 + $0x450] sm:$0xf]  ;;  %v6294_v0 = vld [vmem:[%s9809_s1 + $0x454] sm:$0xf0] }
  0x41   : > { %3403 = vmatpush.bf16.msrb.mxu3 %v4695_v38  ;;  %v234_v38 = vshrl.u32 %v4183_v27, 16  ;;  %v228_v51 = vrot.slane %v226_v32, 3  ;;  %v4838_v1 = vld [vmem:[%s9809_s1 + $0x4d0] sm:$0xf]  ;;  %v6310_v3 = vld [vmem:[%s9809_s1 + $0x4d4] sm:$0xf0]  ;;  %v4775_v11 = vor.u32 %v6294_v0, %v4774_v63 }
  0x42   : > { %3365 = vmatpush.bf16.msrb.mxu0 %v4495_v49  ;;  %v6328_v49 = vld [vmem:[%s9809_s1 + $0x564] sm:$0xf0]  ;;  %v239_v56 = vrot.slane %v237_v39, 4  ;;  %v4902_v4 = vld [vmem:[%s9809_s1 + $0x550] sm:$0xf]  ;;  %v4839_v12 = vor.u32 %v6310_v3, %v4838_v1 }
  0x43   : > { %3378 = vmatpush.bf16.msrb.mxu1 %v4559_v52  ;;  %v231_v52 = vrot.slane %v229_v33, 4  ;;  %v236_v55 = vrot.slane %v234_v38, 3  ;;  %v4911_v61 = vor.u32 %v6328_v49, %v4910_v46  ;;  %v6326_v5 = vld [vmem:[%s9809_s1 + $0x554] sm:$0xf0]  ;;  %v6292_v15 = vld [vmem:[%s9809_s1 + $0x444] sm:$0xf0] }
  0x44   : > { %3391 = vmatpush.bf16.msrb.mxu2 %v4623_v53  ;;  %v4974_v53 = vld [vmem:[%s9809_s1 + $0x5e0] sm:$0xf]  ;;  %v4903_v13 = vor.u32 %v6326_v5, %v4902_v4  ;;  %v6308_v18 = vld [vmem:[%s9809_s1 + $0x4c4] sm:$0xf0]  ;;  %v4758_v25 = vld [vmem:[%s9809_s1 + $0x430] sm:$0xf] }
  0x45   : > { %3404 = vmatpush.bf16.msrb.mxu3 %v4687_v58  ;;  %v6146_v58 = vld [vmem:[%s7007_s25 + $0x10] sm:$0x8]  ;;  %v7176_v6 = vor.u32 %v231_v52, %v228_v51  ;;  %v7186_v10 = vor.u32 %v239_v56, %v236_v55  ;;  %v4830_v16 = vld [vmem:[%s9809_s1 + $0x4c0] sm:$0xf]  ;;  %v6324_v20 = vld [vmem:[%s9809_s1 + $0x544] sm:$0xf0] }
  0x46   : > { %3366 = vmatpush.bf16.msrb.mxu0 %v4487_v2  ;;  %v4975_v2 = vor.u32 %v6344_v54, %v4974_v53  ;;  %v7184_v9 = vor.u32 %v6146_v58, %v4188_v59  ;;  %v4894_v19 = vld [vmem:[%s9809_s1 + $0x540] sm:$0xf]  ;;  %v6340_v23 = vld [vmem:[%s9809_s1 + $0x5c4] sm:$0xf0]  ;;  %v4831_v27 = vor.u32 %v6308_v18, %v4830_v16  ;;  %v4822_v30 = vld [vmem:[%s9809_s1 + $0x4b0] sm:$0xf] }
  0x47   : > { %3379 = vmatpush.bf16.msrb.mxu1 %v4551_v7  ;;  %v4966_v7 = vld [vmem:[%s9809_s1 + $0x5d0] sm:$0xf]  ;;  %v6306_v31 = vld [vmem:[%s9809_s1 + $0x4b4] sm:$0xf0]  ;;  %v4750_v37 = vld [vmem:[%s9809_s1 + $0x420] sm:$0xf] }
  0x48   : > { %3392 = vmatpush.bf16.msrb.mxu2 %v4615_v8  ;;  %v6342_v8 = vld [vmem:[%s9809_s1 + $0x5d4] sm:$0xf0]  ;;  %v258_v21 = vrot.slane %v7184_v9, 3  ;;  %v4886_v33 = vld [vmem:[%s9809_s1 + $0x530] sm:$0xf]  ;;  %v4823_v45 = vor.u32 %v6306_v31, %v4822_v30 }
  0x49   : > { %3405 = vmatpush.bf16.msrb.mxu3 %v4679_v14  ;;  %v4766_v14 = vld [vmem:[%s9809_s1 + $0x440] sm:$0xf]  ;;  %v4967_v17 = vor.u32 %v6342_v8, %v4966_v7  ;;  %v6338_v36 = vld [vmem:[%s9809_s1 + $0x5b4] sm:$0xf0]  ;;  %v6288_v38 = vld [vmem:[%s9809_s1 + $0x424] sm:$0xf0] }
  0x4a   : > { %3367 = vmatpush.bf16.msrb.mxu0 %v4479_v22  ;;  %v4958_v22 = vld [vmem:[%s9809_s1 + $0x5c0] sm:$0xf]  ;;  %v4767_v24 = vor.u32 %v6292_v15, %v4766_v14  ;;  %v6149_v51 = vld [vmem:[%s7007_s25 + $0x1c] sm:$0xc]  ;;  %v4200_v53 = vld [vmem:[%s7007_s25 + $0x24] sm:$0x10]  ;;  %v4751_v59 = vor.u32 %v6288_v38, %v4750_v37 }
  0x4b   : > { %3380 = vmatpush.bf16.msrb.mxu1 %v4543_v28  ;;  %v4895_v28 = vor.u32 %v6324_v20, %v4894_v19  ;;  %v4959_v32 = vor.u32 %v6340_v23, %v4958_v22  ;;  %v4878_v44 = vld [vmem:[%s9809_s1 + $0x520] sm:$0xf]  ;;  %v4198_v54 = vld [vmem:[%s7007_s25 + $0x18] sm:$0xc]  ;;  %v6150_v55 = vld [vmem:[%s7007_s25 + $0x20] sm:$0x10]  ;;  %v4203_v5 = vor.u32 %v6149_v51, %v4200_v53 }
  0x4c   : > { %3393 = vmatpush.bf16.msrb.mxu2 %v4607_v29  ;;  %v6290_v29 = vld [vmem:[%s9809_s1 + $0x434] sm:$0xf0]  ;;  %v4942_v49 = vld [vmem:[%s9809_s1 + $0x5a0] sm:$0xf]  ;;  %v6336_v56 = vld [vmem:[%s9809_s1 + $0x5a4] sm:$0xf0]  ;;  %v4199_v7 = vor.u32 %v6150_v55, %v4198_v54 }
  0x4d   : > { %3406 = vmatpush.bf16.msrb.mxu3 %v4671_v34  ;;  %3368 = vmatmul.bf16.vlgmr.msrb.gmra.mxu0 %v7176_v6  ;;  %v6322_v34 = vld [vmem:[%s9809_s1 + $0x534] sm:$0xf0]  ;;  %v4759_v39 = vor.u32 %v6290_v29, %v4758_v25  ;;  %v6151_v58 = vld [vmem:[%s7007_s25 + $0x28] sm:$0x10]  ;;  %v4806_v0 = vld [vmem:[%s9809_s1 + $0x490] sm:$0xf]  ;;  %v4943_v8 = vor.u32 %v6336_v56, %v4942_v49 }
  0x4e   : > { %3412 = vmatpush.bf16.msra.mxu0 %v4791_v35  ;;  %3381 = vmatmul.bf16.vlgmr.msrb.gmra.mxu1 %v7186_v10  ;;  %v4950_v35 = vld [vmem:[%s9809_s1 + $0x5b0] sm:$0xf]  ;;  %v4887_v46 = vor.u32 %v6322_v34, %v4886_v33  ;;  %v6286_v63 = vld [vmem:[%s9809_s1 + $0x414] sm:$0xf0]  ;;  %v4734_v14 = vld [vmem:[%s9809_s1 + $0x400] sm:$0xf] }
  0x4f   : > { %3425 = vmatpush.bf16.msra.mxu1 %v4855_v40  ;;  %3394 = vmatmul.bf16.vlgmr.msrb.gmra.mxu2 %v257_v50  ;;  %v4814_v40 = vld [vmem:[%s9809_s1 + $0x4a0] sm:$0xf]  ;;  %v4951_v52 = vor.u32 %v6338_v36, %v4950_v35  ;;  %v4870_v3 = vld [vmem:[%s9809_s1 + $0x510] sm:$0xf]  ;;  %v6318_v4 = vld [vmem:[%s9809_s1 + $0x514] sm:$0xf0] }
  0x50   : > { %3438 = vmatpush.bf16.msra.mxu2 %v4919_v41  ;;  %3407 = vmatmul.bf16.vlgmr.msrb.gmra.mxu3 %v258_v21  ;;  %v6304_v41 = vld [vmem:[%s9809_s1 + $0x4a4] sm:$0xf0]  ;;  %v4798_v16 = vld [vmem:[%s9809_s1 + $0x480] sm:$0xf]  ;;  %v4194_v18 = vld [vmem:[%s7007_s25 + $0x14] sm:$0x8]  ;;  %v4871_v23 = vor.u32 %v6318_v4, %v4870_v3 }
  0x51   : > { %3451 = vmatpush.bf16.msra.mxu3 %v4983_v47  ;;  %v6320_v47 = vld [vmem:[%s9809_s1 + $0x524] sm:$0xf0]  ;;  %v6148_v19 = vld [vmem:[%s7007_s25 + $0x1c] sm:$0x30]  ;;  %v285_v29 = vshrl.u32 %v4203_v5, 16  ;;  %v288_v30 = vshll.u32 %v4203_v5, 16 }
  0x52   : > { %3413 = vmatpush.bf16.msra.mxu0 %v4783_v57  ;;  %v4206_v57 = vld [vmem:[%s7007_s25 + $0x20] sm:$0xc]  ;;  %v4879_v1 = vor.u32 %v6320_v47, %v4878_v44  ;;  %v6284_v15 = vld [vmem:[%s9809_s1 + $0x404] sm:$0xf0]  ;;  %v277_v31 = vshrl.u32 %v4199_v7, 16  ;;  %v7324_v35 = vor.u32 %v6148_v19, %v4194_v18 }
  0x53   : > { %3426 = vmatpush.bf16.msra.mxu1 %v4847_v60  ;;  %v4815_v60 = vor.u32 %v6304_v41, %v4814_v40  ;;  %v6316_v25 = vld [vmem:[%s9809_s1 + $0x504] sm:$0xf0]  ;;  %v5046_v34 = vld [vmem:[%s9809_s1 + $0x670] sm:$0xf]  ;;  %v6362_v38 = vld [vmem:[%s9809_s1 + $0x674] sm:$0xf0]  ;;  %v4735_v41 = vor.u32 %v6284_v15, %v4734_v14 }
  0x54   : > { %3439 = vmatpush.bf16.msra.mxu2 %v4911_v61  ;;  %v4742_v61 = vld [vmem:[%s9809_s1 + $0x410] sm:$0xf]  ;;  %v6378_v40 = vld [vmem:[%s9809_s1 + $0x6f4] sm:$0xf0]  ;;  %v287_v53 = vrot.slane %v285_v29, 2  ;;  %v290_v54 = vrot.slane %v288_v30, 3 }
  0x55   : > { %3452 = vmatpush.bf16.msra.mxu3 %v4975_v2  ;;  %v6302_v2 = vld [vmem:[%s9809_s1 + $0x494] sm:$0xf0]  ;;  %v4743_v20 = vor.u32 %v6286_v63, %v4742_v61  ;;  %v5174_v47 = vld [vmem:[%s9809_s1 + $0x770] sm:$0xf]  ;;  %v279_v55 = vrot.slane %v277_v31, 2 }
  0x56   : > { %3414 = vmatpush.bf16.msra.mxu0 %v4775_v11  ;;  %v4934_v11 = vld [vmem:[%s9809_s1 + $0x590] sm:$0xf]  ;;  %v4807_v22 = vor.u32 %v6302_v2, %v4806_v0  ;;  %v6394_v49 = vld [vmem:[%s9809_s1 + $0x774] sm:$0xf0]  ;;  %v5038_v0 = vld [vmem:[%s9809_s1 + $0x660] sm:$0xf] }
  0x57   : > { %3427 = vmatpush.bf16.msra.mxu1 %v4839_v12  ;;  %v6334_v12 = vld [vmem:[%s9809_s1 + $0x594] sm:$0xf0]  ;;  %v5238_v51 = vld [vmem:[%s9809_s1 + $0x7f0] sm:$0xf]  ;;  %v5175_v63 = vor.u32 %v6394_v49, %v5174_v47  ;;  %v5102_v2 = vld [vmem:[%s9809_s1 + $0x6e0] sm:$0xf] }
  0x58   : > { %3440 = vmatpush.bf16.msra.mxu2 %v4903_v13  ;;  %v4207_v13 = vor.u32 %v6151_v58, %v4206_v57  ;;  %v4935_v33 = vor.u32 %v6334_v12, %v4934_v11  ;;  %v5047_v57 = vor.u32 %v6362_v38, %v5046_v34  ;;  %v259_v58 = vrot.slane %v7324_v35, 3  ;;  %v6376_v4 = vld [vmem:[%s9809_s1 + $0x6e4] sm:$0xf0]  ;;  %v5166_v5 = vld [vmem:[%s9809_s1 + $0x760] sm:$0xf] }
  0x59   : > { %3453 = vmatpush.bf16.msra.mxu3 %v4967_v17  ;;  %v6300_v17 = vld [vmem:[%s9809_s1 + $0x484] sm:$0xf0]  ;;  %v5230_v12 = vld [vmem:[%s9809_s1 + $0x7e0] sm:$0xf]  ;;  %v5030_v18 = vld [vmem:[%s9809_s1 + $0x650] sm:$0xf] }
  0x5a   : > { %3415 = vmatpush.bf16.msra.mxu0 %v4767_v24  ;;  %v4862_v24 = vld [vmem:[%s9809_s1 + $0x500] sm:$0xf]  ;;  %v293_v36 = vshrl.u32 %v4207_v13, 16  ;;  %v296_v37 = vshll.u32 %v4207_v13, 16  ;;  %v4799_v44 = vor.u32 %v6300_v17, %v4798_v16  ;;  %v6408_v13 = vld [vmem:[%s9809_s1 + $0x7e4] sm:$0xf0]  ;;  %v5103_v16 = vor.u32 %v6376_v4, %v5102_v2 }
  0x5b   : > { %3428 = vmatpush.bf16.msra.mxu1 %v4831_v27  ;;  %v4926_v27 = vld [vmem:[%s9809_s1 + $0x580] sm:$0xf]  ;;  %v6358_v19 = vld [vmem:[%s9809_s1 + $0x654] sm:$0xf0]  ;;  %v5014_v47 = vld [vmem:[%s9809_s1 + $0x630] sm:$0xf] }
  0x5c   : > { %3441 = vmatpush.bf16.msra.mxu2 %v4895_v28  ;;  %v6332_v28 = vld [vmem:[%s9809_s1 + $0x584] sm:$0xf0]  ;;  %v5031_v29 = vor.u32 %v6358_v19, %v5030_v18  ;;  %v5086_v34 = vld [vmem:[%s9809_s1 + $0x6c0] sm:$0xf]  ;;  %v6354_v49 = vld [vmem:[%s9809_s1 + $0x634] sm:$0xf0] }
  0x5d   : > { %3454 = vmatpush.bf16.msra.mxu3 %v4959_v32  ;;  %v280_v32 = vshll.u32 %v4199_v7, 16  ;;  %v6392_v7 = vld [vmem:[%s9809_s1 + $0x764] sm:$0xf0]  ;;  %v5150_v38 = vld [vmem:[%s9809_s1 + $0x740] sm:$0xf] }
  0x5e   : > { %3416 = vmatpush.bf16.msra.mxu0 %v4759_v39  ;;  %v5110_v39 = vld [vmem:[%s9809_s1 + $0x6f0] sm:$0xf]  ;;  %v5167_v17 = vor.u32 %v6392_v7, %v5166_v5  ;;  %v5134_v4 = vld [vmem:[%s9809_s1 + $0x720] sm:$0xf]  ;;  %v6384_v5 = vld [vmem:[%s9809_s1 + $0x724] sm:$0xf0] }
  0x5f   : > { %3429 = vmatpush.bf16.msra.mxu1 %v4823_v45  ;;  %v4863_v45 = vor.u32 %v6316_v25, %v4862_v24  ;;  %v282_v56 = vrot.slane %v280_v32, 3  ;;  %v5111_v61 = vor.u32 %v6378_v40, %v5110_v39  ;;  %v5158_v24 = vld [vmem:[%s9809_s1 + $0x750] sm:$0xf]  ;;  %v6390_v25 = vld [vmem:[%s9809_s1 + $0x754] sm:$0xf0]  ;;  %v5135_v19 = vor.u32 %v6384_v5, %v5134_v4 }
  0x60   : > { %3442 = vmatpush.bf16.msra.mxu2 %v4887_v46  ;;  %v4927_v46 = vor.u32 %v6332_v28, %v4926_v27  ;;  %v5222_v27 = vld [vmem:[%s9809_s1 + $0x7d0] sm:$0xf]  ;;  %v6406_v28 = vld [vmem:[%s9809_s1 + $0x7d4] sm:$0xf0]  ;;  %v5159_v31 = vor.u32 %v6390_v25, %v5158_v24  ;;  %v5022_v32 = vld [vmem:[%s9809_s1 + $0x640] sm:$0xf] }
  0x61   : > { %3455 = vmatpush.bf16.msra.mxu3 %v4951_v52  ;;  %v6410_v52 = vld [vmem:[%s9809_s1 + $0x7f4] sm:$0xf0]  ;;  %v7368_v11 = vor.u32 %v282_v56, %v279_v55  ;;  %v6388_v39 = vld [vmem:[%s9809_s1 + $0x744] sm:$0xf0]  ;;  %v5214_v40 = vld [vmem:[%s9809_s1 + $0x7c0] sm:$0xf] }
  0x62   : > { %3417 = vmatpush.bf16.msra.mxu0 %v4751_v59  ;;  %v295_v59 = vrot.slane %v293_v36, 2  ;;  %v5239_v3 = vor.u32 %v6410_v52, %v5238_v51  ;;  %v5223_v36 = vor.u32 %v6406_v28, %v5222_v27  ;;  %v5078_v51 = vld [vmem:[%s9809_s1 + $0x6b0] sm:$0xf]  ;;  %v6386_v55 = vld [vmem:[%s9809_s1 + $0x734] sm:$0xf0] }
  0x63   : > { %3430 = vmatpush.bf16.msra.mxu1 %v4815_v60  ;;  %v298_v60 = vrot.slane %v296_v37, 3  ;;  %v6372_v37 = vld [vmem:[%s9809_s1 + $0x6c4] sm:$0xf0]  ;;  %v5206_v56 = vld [vmem:[%s9809_s1 + $0x7b0] sm:$0xf] }
  0x64   : > { %3443 = vmatpush.bf16.msra.mxu2 %v4879_v1  ;;  %v6360_v1 = vld [vmem:[%s9809_s1 + $0x664] sm:$0xf0]  ;;  %v5198_v7 = vld [vmem:[%s9809_s1 + $0x7a0] sm:$0xf]  ;;  %v5190_v25 = vld [vmem:[%s9809_s1 + $0x790] sm:$0xf] }
  0x65   : > { %3456 = vmatpush.bf16.msra.mxu3 %v4943_v8  ;;  %v7366_v8 = vor.u32 %v290_v54, %v287_v53  ;;  %v7376_v14 = vor.u32 %v298_v60, %v295_v59  ;;  %v5039_v15 = vor.u32 %v6360_v1, %v5038_v0  ;;  %v6370_v53 = vld [vmem:[%s9809_s1 + $0x6b4] sm:$0xf0]  ;;  %v5142_v54 = vld [vmem:[%s9809_s1 + $0x730] sm:$0xf]  ;;  %v5015_v59 = vor.u32 %v6354_v49, %v5014_v47  ;;  %v6352_v0 = vld [vmem:[%s9809_s1 + $0x624] sm:$0xf0] }
  0x66   : > { %3418 = vmatpush.bf16.msra.mxu0 %v4743_v20  ;;  %v5094_v20 = vld [vmem:[%s9809_s1 + $0x6d0] sm:$0xf]  ;;  %v5079_v60 = vor.u32 %v6370_v53, %v5078_v51  ;;  %v5070_v1 = vld [vmem:[%s9809_s1 + $0x6a0] sm:$0xf]  ;;  %v6398_v27 = vld [vmem:[%s9809_s1 + $0x794] sm:$0xf0] }
  0x67   : > { %3431 = vmatpush.bf16.msra.mxu1 %v4807_v22  ;;  %v5231_v22 = vor.u32 %v6408_v13, %v5230_v12  ;;  %v6400_v12 = vld [vmem:[%s9809_s1 + $0x7a4] sm:$0xf0]  ;;  %v4990_v28 = vld [vmem:[%s9809_s1 + $0x600] sm:$0xf]  ;;  %v6426_v47 = vld [vmem:[%s9809_s1 + $0x874] sm:$0xf0] }
  0x68   : > { %3444 = vmatpush.bf16.msra.mxu2 %v4871_v23  ;;  %v6374_v23 = vld [vmem:[%s9809_s1 + $0x6d4] sm:$0xf0]  ;;  %v5199_v24 = vor.u32 %v6400_v12, %v5198_v7  ;;  %v5366_v49 = vld [vmem:[%s9809_s1 + $0x8f0] sm:$0xf]  ;;  %vm4100_vm1 = vsmask.f32 2304 }
  0x69   : > { %3457 = vmatpush.bf16.msra.mxu3 %v4935_v33  ;;  %v5095_v30 = vor.u32 %v6374_v23, %v5094_v20  ;;  %v6356_v33 = vld [vmem:[%s9809_s1 + $0x644] sm:$0xf0]  ;;  %v6366_v20 = vld [vmem:[%s9809_s1 + $0x694] sm:$0xf0]  ;;  %v5430_v53 = vld [vmem:[%s9809_s1 + $0x970] sm:$0xf] }
  0x6a   : > { %3419 = vmatpush.bf16.msra.mxu0 %v4735_v41  ;;  %v6404_v41 = vld [vmem:[%s9809_s1 + $0x7c4] sm:$0xf0]  ;;  %v6382_v23 = vld [vmem:[%s9809_s1 + $0x714] sm:$0xf0]  ;;  %vm4103_vm3 = vsmask.f32 6400  ;;  %vm4101_vm4 = vmand %vm4099_vm0, %vm4100_vm1 }
  0x6b   : > { %3432 = vmatpush.bf16.msra.mxu1 %v4799_v44  ;;  %v5023_v44 = vor.u32 %v6356_v33, %v5022_v32  ;;  %v5215_v52 = vor.u32 %v6404_v41, %v5214_v40  ;;  %v5118_v33 = vld [vmem:[%s9809_s1 + $0x700] sm:$0xf]  ;;  %v6396_v40 = vld [vmem:[%s9809_s1 + $0x784] sm:$0xf0]  ;;  %v320_v41 = vshll.u32 %v7031_v42, 16  ;;  %vm4104_vm5 = vmand %vm4102_vm2, %vm4103_vm3 }
  0x6c   : > { %3445 = vmatpush.bf16.msra.mxu2 %v4863_v45  ;;  %v5087_v45 = vor.u32 %v6372_v37, %v5086_v34  ;;  %v6380_v34 = vld [vmem:[%s9809_s1 + $0x704] sm:$0xf0]  ;;  %vm4105_vm6 = vmor %vm4104_vm5, %vm4101_vm4 }
  0x6d   : > { %3458 = vmatpush.bf16.msra.mxu3 %v4927_v46  ;;  %3420 = vmatmul.bf16.vlgmr.msra.gmra.mxu0 %v259_v58  ;;  %v5151_v46 = vor.u32 %v6388_v39, %v5150_v38  ;;  %v5182_v39 = vld [vmem:[%s9809_s1 + $0x780] sm:$0xf] }
  0x6e   : > { %3464 = vmatpush.bf16.msrb.mxu0 %v5047_v57  ;;  %3433 = vmatmul.bf16.vlgmr.msra.gmra.mxu1 %v7368_v11  ;;  %v6402_v57 = vld [vmem:[%s9809_s1 + $0x7b4] sm:$0xf0]  ;;  %v5183_v4 = vor.u32 %v6396_v40, %v5182_v39  ;;  %v5414_v39 = vld [vmem:[%s9809_s1 + $0x950] sm:$0xf] }
  0x6f   : > { %3477 = vmatpush.bf16.msrb.mxu1 %v5111_v61  ;;  %3446 = vmatmul.bf16.vlgmr.msra.gmra.mxu2 %v7366_v8  ;;  %v5143_v61 = vor.u32 %v6386_v55, %v5142_v54  ;;  %v5207_v2 = vor.u32 %v6402_v57, %v5206_v56  ;;  %v7546_v54 = vld [vmem:[%s7007_s25 + $0xc] sm:$0x77]  ;;  %v5119_v56 = vor.u32 %v6380_v34, %v5118_v33  ;;  %v6458_v57 = vld [vmem:[%s9809_s1 + $0x974] sm:$0xf0] }
  0x70   : > { %3490 = vmatpush.bf16.msrb.mxu2 %v5175_v63  ;;  %3459 = vmatmul.bf16.vlgmr.msra.gmra.mxu3 %v7376_v14  ;;  %v5006_v63 = vld [vmem:[%s9809_s1 + $0x620] sm:$0xf]  ;;  %v329_v7 = vunpack.c.l.b16 %v7546_v54  ;;  %v5286_v33 = vld [vmem:[%s9809_s1 + $0x850] sm:$0xf]  ;;  %v6422_v34 = vld [vmem:[%s9809_s1 + $0x854] sm:$0xf0] }
  0x71   : > { %3503 = vmatpush.bf16.msrb.mxu3 %v5239_v3  ;;  %v6368_v3 = vld [vmem:[%s9809_s1 + $0x6a4] sm:$0xf0]  ;;  %v5007_v13 = vor.u32 %v6352_v0, %v5006_v63  ;;  %v6474_v63 = vld [vmem:[%s9809_s1 + $0x9f4] sm:$0xf0]  ;;  %v318_v0 = vshrl.u32 %v7031_v42, 16 }
  0x72   : > { %3465 = vmatpush.bf16.msrb.mxu0 %v5039_v15  ;;  %v4998_v15 = vld [vmem:[%s9809_s1 + $0x610] sm:$0xf]  ;;  %v5071_v18 = vor.u32 %v6368_v3, %v5070_v1  ;;  %v322_v1 = vrot.slane %v320_v41, 1  ;;  %v6454_v40 = vld [vmem:[%s9809_s1 + $0x954] sm:$0xf0] }
  0x73   : > { %3478 = vmatpush.bf16.msrb.mxu1 %v5103_v16  ;;  %v6350_v16 = vld [vmem:[%s9809_s1 + $0x614] sm:$0xf0]  ;;  %v5478_v41 = vld [vmem:[%s9809_s1 + $0x9d0] sm:$0xf] }
  0x74   : > { %3491 = vmatpush.bf16.msrb.mxu2 %v5167_v17  ;;  %v5062_v17 = vld [vmem:[%s9809_s1 + $0x690] sm:$0xf]  ;;  %v4999_v32 = vor.u32 %v6350_v16, %v4998_v15  ;;  %v5294_v15 = vld [vmem:[%s9809_s1 + $0x860] sm:$0xf]  ;;  %v6424_v16 = vld [vmem:[%s9809_s1 + $0x864] sm:$0xf0] }
  0x75   : > { %3504 = vmatpush.bf16.msrb.mxu3 %v5231_v22  ;;  %v5126_v22 = vld [vmem:[%s9809_s1 + $0x710] sm:$0xf]  ;;  %v5063_v37 = vor.u32 %v6366_v20, %v5062_v17  ;;  %v5358_v17 = vld [vmem:[%s9809_s1 + $0x8e0] sm:$0xf]  ;;  %v6440_v20 = vld [vmem:[%s9809_s1 + $0x8e4] sm:$0xf0] }
  0x76   : > { %3466 = vmatpush.bf16.msrb.mxu0 %v5031_v29  ;;  %v6348_v29 = vld [vmem:[%s9809_s1 + $0x604] sm:$0xf0]  ;;  %v5127_v38 = vor.u32 %v6382_v23, %v5126_v22  ;;  %v5422_v22 = vld [vmem:[%s9809_s1 + $0x960] sm:$0xf] }
  0x77   : > { %3479 = vmatpush.bf16.msrb.mxu1 %v5095_v30  ;;  %v5054_v30 = vld [vmem:[%s9809_s1 + $0x680] sm:$0xf]  ;;  %v4991_v51 = vor.u32 %v6348_v29, %v4990_v28  ;;  %v6456_v23 = vld [vmem:[%s9809_s1 + $0x964] sm:$0xf0]  ;;  %v7591_v29 = vpack.c.b16 %v329_v7, %v329_v7  ;;  %v5398_v7 = vld [vmem:[%s9809_s1 + $0x930] sm:$0xf] }
  0x78   : > { %3492 = vmatpush.bf16.msrb.mxu2 %v5159_v31  ;;  %v6364_v31 = vld [vmem:[%s9809_s1 + $0x684] sm:$0xf0] }
  0x79   : > { %3505 = vmatpush.bf16.msrb.mxu3 %v5223_v36  ;;  %v306_v36 = vshll.u32 %v7033_v43, 16  ;;  %v5055_v55 = vor.u32 %v6364_v31, %v5054_v30  ;;  %v6472_v28 = vld [vmem:[%s9809_s1 + $0x9e4] sm:$0xf0]  ;;  %v5295_v30 = vor.u32 %v6424_v16, %v5294_v15  ;;  %v5359_v31 = vor.u32 %v6440_v20, %v5358_v17  ;;  %v6466_v15 = vld [vmem:[%s9809_s1 + $0x9b4] sm:$0xf0] }
  0x7a   : > { %3467 = vmatpush.bf16.msrb.mxu0 %v5023_v44  ;;  %v313_v44 = vshll.u32 %v7041_v48, 16  ;;  %v5262_v20 = vld [vmem:[%s9809_s1 + $0x820] sm:$0xf] }
  0x7b   : > { %3480 = vmatpush.bf16.msrb.mxu1 %v5087_v45  ;;  %v5191_v45 = vor.u32 %v6398_v27, %v5190_v25  ;;  %v5486_v27 = vld [vmem:[%s9809_s1 + $0x9e0] sm:$0xf] }
  0x7c   : > { %3493 = vmatpush.bf16.msrb.mxu2 %v5151_v46  ;;  %v5302_v46 = vld [vmem:[%s9809_s1 + $0x870] sm:$0xf]  ;;  %v315_v3 = vrot.slane %v313_v44, 1  ;;  %v6470_v44 = vld [vmem:[%s9809_s1 + $0x9d4] sm:$0xf0] }
  0x7d   : > { %3506 = vmatpush.bf16.msrb.mxu3 %v5215_v52  ;;  %v6442_v52 = vld [vmem:[%s9809_s1 + $0x8f4] sm:$0xf0]  ;;  %v5303_v5 = vor.u32 %v6426_v47, %v5302_v46  ;;  %v5415_v47 = vor.u32 %v6454_v40, %v5414_v39  ;;  %v5318_v40 = vld [vmem:[%s9809_s1 + $0x890] sm:$0xf] }
  0x7e   : > { %3468 = vmatpush.bf16.msrb.mxu0 %v5015_v59  ;;  %v5494_v59 = vld [vmem:[%s9809_s1 + $0x9f0] sm:$0xf]  ;;  %v5367_v12 = vor.u32 %v6442_v52, %v5366_v49  ;;  %v5278_v49 = vld [vmem:[%s9809_s1 + $0x840] sm:$0xf]  ;;  %v6414_v39 = vld [vmem:[%s9809_s1 + $0x814] sm:$0xf0] }
  0x7f   : > { %3481 = vmatpush.bf16.msrb.mxu1 %v5079_v60  ;;  %v304_v60 = vshrl.u32 %v7033_v43, 16  ;;  %v5342_v52 = vld [vmem:[%s9809_s1 + $0x8c0] sm:$0xf] }
  0x80   : > { %3494 = vmatpush.bf16.msrb.mxu2 %v5143_v61  ;;  %v308_v61 = vrot.slane %v306_v36, 1  ;;  %v5350_v36 = vld [vmem:[%s9809_s1 + $0x8d0] sm:$0xf] }
  0x81   : > { %3507 = vmatpush.bf16.msrb.mxu3 %v5207_v2  ;;  %v311_v2 = vshrl.u32 %v7041_v48, 16 }
  0x82   : > { %3469 = vmatpush.bf16.msrb.mxu0 %v5007_v13  ;;  %v5431_v13 = vor.u32 %v6458_v57, %v5430_v53  ;;  %v5479_v53 = vor.u32 %v6470_v44, %v5478_v41  ;;  %v6452_v57 = vld [vmem:[%s9809_s1 + $0x944] sm:$0xf0]  ;;  %v6430_v41 = vld [vmem:[%s9809_s1 + $0x894] sm:$0xf0] }
  0x83   : > { %3482 = vmatpush.bf16.msrb.mxu1 %v5071_v18  ;;  %v5495_v18 = vor.u32 %v6474_v63, %v5494_v59  ;;  %v7583_v25 = vor.u32 %v315_v3, %v311_v2  ;;  %v5470_v59 = vld [vmem:[%s9809_s1 + $0x9c0] sm:$0xf]  ;;  %v6418_v2 = vld [vmem:[%s9809_s1 + $0x834] sm:$0xf0]  ;;  %v5334_v3 = vld [vmem:[%s9809_s1 + $0x8b0] sm:$0xf] }
  0x84   : > { %3495 = vmatpush.bf16.msrb.mxu2 %v5135_v19  ;;  %v7570_v19 = vor.u32 %v308_v61, %v304_v60  ;;  %v6468_v60 = vld [vmem:[%s9809_s1 + $0x9c4] sm:$0xf0] }
  0x85   : > { %3508 = vmatpush.bf16.msrb.mxu3 %v5199_v24  ;;  %v7581_v24 = vor.u32 %v322_v1, %v318_v0  ;;  %v5270_v1 = vld [vmem:[%s9809_s1 + $0x830] sm:$0xf] }
  0x86   : > { %3470 = vmatpush.bf16.msrb.mxu0 %v4999_v32  ;;  %v5423_v32 = vor.u32 %v6456_v23, %v5422_v22  ;;  %v5271_v16 = vor.u32 %v6418_v2, %v5270_v1  ;;  %v6416_v22 = vld [vmem:[%s9809_s1 + $0x824] sm:$0xf0]  ;;  %v5326_v23 = vld [vmem:[%s9809_s1 + $0x8a0] sm:$0xf]  ;;  %v342_v1 = vshll.u32 %v7121_v26, 16 }
  0x87   : > { %3483 = vmatpush.bf16.msrb.mxu1 %v5063_v37  ;;  %v5487_v37 = vor.u32 %v6472_v28, %v5486_v27  ;;  %v6432_v28 = vld [vmem:[%s9809_s1 + $0x8a4] sm:$0xf0] }
  0x88   : > { %3496 = vmatpush.bf16.msrb.mxu2 %v5127_v38  ;;  %v6438_v38 = vld [vmem:[%s9809_s1 + $0x8d4] sm:$0xf0] }
  0x89   : > { %3509 = vmatpush.bf16.msrb.mxu3 %v5191_v45  ;;  %v5287_v45 = vor.u32 %v6422_v34, %v5286_v33  ;;  %v5351_v46 = vor.u32 %v6438_v38, %v5350_v36  ;;  %v6464_v33 = vld [vmem:[%s9809_s1 + $0x9a4] sm:$0xf0]  ;;  %v5263_v34 = vor.u32 %v6416_v22, %v5262_v20  ;;  %v5254_v36 = vld [vmem:[%s9809_s1 + $0x810] sm:$0xf]  ;;  %v6522_v22 = vld [vmem:[%s9809_s1 + $0xb74] sm:$0xf0] }
  0x8a   : > { %3471 = vmatpush.bf16.msrb.mxu0 %v4991_v51  ;;  %v6420_v51 = vld [vmem:[%s9809_s1 + $0x844] sm:$0xf0]  ;;  %v5686_v20 = vld [vmem:[%s9809_s1 + $0xb70] sm:$0xf] }
  0x8b   : > { %3484 = vmatpush.bf16.msrb.mxu1 %v5055_v55  ;;  %v6436_v55 = vld [vmem:[%s9809_s1 + $0x8c4] sm:$0xf0]  ;;  %v5279_v61 = vor.u32 %v6420_v51, %v5278_v49  ;;  %v6462_v49 = vld [vmem:[%s9809_s1 + $0x994] sm:$0xf0]  ;;  %v5246_v51 = vld [vmem:[%s9809_s1 + $0x800] sm:$0xf] }
  0x8c   : > { %3497 = vmatpush.bf16.msrb.mxu2 %v5119_v56  ;;  %v5406_v56 = vld [vmem:[%s9809_s1 + $0x940] sm:$0xf]  ;;  %v5343_v63 = vor.u32 %v6436_v55, %v5342_v52  ;;  %v6412_v52 = vld [vmem:[%s9809_s1 + $0x804] sm:$0xf0] }
  0x8d   : > { %3510 = vmatpush.bf16.msrb.mxu3 %v5183_v4  ;;  %3472 = vmatmul.bf16.vlgmr.msrb.gmra.mxu0 %v7570_v19  ;;  %v5407_v0 = vor.u32 %v6452_v57, %v5406_v56  ;;  %v5471_v4 = vor.u32 %v6468_v60, %v5470_v59  ;;  %v5310_v55 = vld [vmem:[%s9809_s1 + $0x880] sm:$0xf]  ;;  %v6428_v56 = vld [vmem:[%s9809_s1 + $0x884] sm:$0xf0]  ;;  %v5319_v59 = vor.u32 %v6430_v41, %v5318_v40 }
  0x8e   : > { %3516 = vmatpush.bf16.msra.mxu0 %v5303_v5  ;;  %3485 = vmatmul.bf16.vlgmr.msrb.gmra.mxu1 %v7583_v25  ;;  %v6434_v5 = vld [vmem:[%s9809_s1 + $0x8b4] sm:$0xf0]  ;;  %v5374_v57 = vld [vmem:[%s9809_s1 + $0x900] sm:$0xf]  ;;  %v6488_v41 = vld [vmem:[%s9809_s1 + $0xa64] sm:$0xf0] }
  0x8f   : > { %3529 = vmatpush.bf16.msra.mxu1 %v5367_v12  ;;  %3498 = vmatmul.bf16.vlgmr.msrb.gmra.mxu2 %v7581_v24  ;;  %v6450_v12 = vld [vmem:[%s9809_s1 + $0x934] sm:$0xf0]  ;;  %v5335_v17 = vor.u32 %v6434_v5, %v5334_v3  ;;  %v6460_v3 = vld [vmem:[%s9809_s1 + $0x984] sm:$0xf0]  ;;  %v347_v5 = vshrl.u32 %v7184_v9, 16 }
  0x90   : > { %3542 = vmatpush.bf16.msra.mxu2 %v5431_v13  ;;  %3511 = vmatmul.bf16.vlgmr.msrb.gmra.mxu3 %v7591_v29  ;;  %v5462_v13 = vld [vmem:[%s9809_s1 + $0x9b0] sm:$0xf]  ;;  %v5550_v40 = vld [vmem:[%s9809_s1 + $0xa60] sm:$0xf] }
  0x91   : > { %3555 = vmatpush.bf16.msra.mxu3 %v5495_v18  ;;  %v5399_v18 = vor.u32 %v6450_v12, %v5398_v7  ;;  %v5463_v27 = vor.u32 %v6466_v15, %v5462_v13  ;;  %v350_v7 = vshll.u32 %v7184_v9, 16  ;;  %v5558_v12 = vld [vmem:[%s9809_s1 + $0xa70] sm:$0xf]  ;;  %v6490_v13 = vld [vmem:[%s9809_s1 + $0xa74] sm:$0xf0] }
  0x92   : > { %3517 = vmatpush.bf16.msra.mxu0 %v5295_v30  ;;  %v5390_v30 = vld [vmem:[%s9809_s1 + $0x920] sm:$0xf]  ;;  %v5622_v15 = vld [vmem:[%s9809_s1 + $0xaf0] sm:$0xf]  ;;  %v6323_v9 = vld [vmem:[%s9809_s1 + $0x544] sm:$0xf] }
  0x93   : > { %3530 = vmatpush.bf16.msra.mxu1 %v5359_v31  ;;  %v6448_v31 = vld [vmem:[%s9809_s1 + $0x924] sm:$0xf0] }
  0x94   : > { %3543 = vmatpush.bf16.msra.mxu2 %v5423_v32  ;;  %v5454_v32 = vld [vmem:[%s9809_s1 + $0x9a0] sm:$0xf]  ;;  %v5391_v38 = vor.u32 %v6448_v31, %v5390_v30  ;;  %v6538_v30 = vld [vmem:[%s9809_s1 + $0xbf4] sm:$0xf0] }
  0x95   : > { %3556 = vmatpush.bf16.msra.mxu3 %v5487_v37  ;;  %v5327_v37 = vor.u32 %v6432_v28, %v5326_v23  ;;  %v5455_v44 = vor.u32 %v6464_v33, %v5454_v32  ;;  %v330_v23 = vunpack.c.h.b16 %v7546_v54  ;;  %v5750_v28 = vld [vmem:[%s9809_s1 + $0xbf0] sm:$0xf]  ;;  %v344_v32 = vrot.slane %v342_v1, 4 }
  0x96   : > { %3518 = vmatpush.bf16.msra.mxu0 %v5287_v45  ;;  %v5382_v45 = vld [vmem:[%s9809_s1 + $0x910] sm:$0xf] }
  0x97   : > { %3531 = vmatpush.bf16.msra.mxu1 %v5351_v46  ;;  %v6446_v46 = vld [vmem:[%s9809_s1 + $0x914] sm:$0xf0]  ;;  %v5606_v1 = vld [vmem:[%s9809_s1 + $0xad0] sm:$0xf] }
  0x98   : > { %3544 = vmatpush.bf16.msra.mxu2 %v5415_v47  ;;  %v5446_v47 = vld [vmem:[%s9809_s1 + $0x990] sm:$0xf]  ;;  %v5383_v60 = vor.u32 %v6446_v46, %v5382_v45  ;;  %v5751_v45 = vor.u32 %v6538_v30, %v5750_v28  ;;  %v7780_v46 = vpack.c.b16 %v330_v23, %v330_v23  ;;  %v6500_v23 = vld [vmem:[%s9809_s1 + $0xac4] sm:$0xf0]  ;;  %v5726_v30 = vld [vmem:[%s9809_s1 + $0xbc0] sm:$0xf] }
  0x99   : > { %3557 = vmatpush.bf16.msra.mxu3 %v5479_v53  ;;  %v5255_v53 = vor.u32 %v6414_v39, %v5254_v36  ;;  %v5447_v2 = vor.u32 %v6462_v49, %v5446_v47  ;;  %v5559_v36 = vor.u32 %v6490_v13, %v5558_v12  ;;  %v5687_v39 = vor.u32 %v6522_v22, %v5686_v20  ;;  %v6504_v47 = vld [vmem:[%s9809_s1 + $0xae4] sm:$0xf0]  ;;  %v5678_v49 = vld [vmem:[%s9809_s1 + $0xb60] sm:$0xf]  ;;  %v6534_v12 = vld [vmem:[%s9809_s1 + $0xbd4] sm:$0xf0] }
  0x9a   : > { %3519 = vmatpush.bf16.msra.mxu0 %v5279_v61  ;;  %v6444_v61 = vld [vmem:[%s9809_s1 + $0x904] sm:$0xf0]  ;;  %v5598_v20 = vld [vmem:[%s9809_s1 + $0xac0] sm:$0xf] }
  0x9b   : > { %3532 = vmatpush.bf16.msra.mxu1 %v5343_v63  ;;  %v5438_v63 = vld [vmem:[%s9809_s1 + $0x980] sm:$0xf]  ;;  %v6516_v28 = vld [vmem:[%s9809_s1 + $0xb44] sm:$0xf0] }
  0x9c   : > { %3545 = vmatpush.bf16.msra.mxu2 %v5407_v0  ;;  %v339_v0 = vshrl.u32 %v7121_v26, 16  ;;  %v6373_v26 = vld [vmem:[%s9809_s1 + $0x6d4] sm:$0xf] }
  0x9d   : > { %3558 = vmatpush.bf16.msra.mxu3 %v5471_v4  ;;  %v186_v4 = vld [vmem:[%s7007_s25 + $0x14] sm:$0x7] }
  0x9e   : > { %3520 = vmatpush.bf16.msra.mxu0 %v5271_v16  ;;  %v5247_v16 = vor.u32 %v6412_v52, %v5246_v51  ;;  %v341_v31 = vrot.slane %v339_v0, 3  ;;  %v331_v33 = vunpack.c.l.b16 %v186_v4  ;;  %v6520_v51 = vld [vmem:[%s9809_s1 + $0xb64] sm:$0xf0]  ;;  %v6486_v0 = vld [vmem:[%s9809_s1 + $0xa54] sm:$0xf0] }
  0x9f   : > { %3533 = vmatpush.bf16.msra.mxu1 %v5335_v17  ;;  %v5311_v17 = vor.u32 %v6428_v56, %v5310_v55  ;;  %v5742_v55 = vld [vmem:[%s9809_s1 + $0xbe0] sm:$0xf]  ;;  %v6536_v56 = vld [vmem:[%s9809_s1 + $0xbe4] sm:$0xf0]  ;;  %v5670_v4 = vld [vmem:[%s9809_s1 + $0xb50] sm:$0xf] }
  0xa0   : > { %3546 = vmatpush.bf16.msra.mxu2 %v5399_v18  ;;  %v6506_v18 = vld [vmem:[%s9809_s1 + $0xaf4] sm:$0xf0]  ;;  %v7791_v52 = vor.u32 %v344_v32, %v341_v31  ;;  %v6532_v31 = vld [vmem:[%s9809_s1 + $0xbc4] sm:$0xf0] }
  0xa1   : > { %3559 = vmatpush.bf16.msra.mxu3 %v5463_v27  ;;  %v5375_v27 = vor.u32 %v6444_v61, %v5374_v57  ;;  %v5623_v54 = vor.u32 %v6506_v18, %v5622_v15  ;;  %v5679_v61 = vor.u32 %v6520_v51, %v5678_v49  ;;  %v6484_v18 = vld [vmem:[%s9809_s1 + $0xa44] sm:$0xf0] }
  0xa2   : > { %3521 = vmatpush.bf16.msra.mxu0 %v5263_v34  ;;  %v5439_v34 = vor.u32 %v6460_v3, %v5438_v63  ;;  %v5542_v63 = vld [vmem:[%s9809_s1 + $0xa50] sm:$0xf]  ;;  %v6502_v3 = vld [vmem:[%s9809_s1 + $0xad4] sm:$0xf0] }
  0xa3   : > { %3534 = vmatpush.bf16.msra.mxu1 %v5327_v37  ;;  %v349_v37 = vrot.slane %v347_v5, 3  ;;  %v6518_v5 = vld [vmem:[%s9809_s1 + $0xb54] sm:$0xf0]  ;;  %v5543_v13 = vor.u32 %v6486_v0, %v5542_v63  ;;  %v5607_v15 = vor.u32 %v6502_v3, %v5606_v1  ;;  %v5646_v63 = vld [vmem:[%s9809_s1 + $0xb20] sm:$0xf] }
  0xa4   : > { %3547 = vmatpush.bf16.msra.mxu2 %v5391_v38  ;;  %v352_v38 = vrot.slane %v350_v7, 4  ;;  %v5734_v7 = vld [vmem:[%s9809_s1 + $0xbd0] sm:$0xf]  ;;  %v6512_v0 = vld [vmem:[%s9809_s1 + $0xb24] sm:$0xf0] }
  0xa5   : > { %3560 = vmatpush.bf16.msra.mxu3 %v5455_v44  ;;  %v5614_v44 = vld [vmem:[%s9809_s1 + $0xae0] sm:$0xf]  ;;  %v5735_v22 = vor.u32 %v6534_v12, %v5734_v7  ;;  %v5510_v3 = vld [vmem:[%s9809_s1 + $0xa10] sm:$0xf]  ;;  %v6494_v12 = vld [vmem:[%s9809_s1 + $0xa94] sm:$0xf0] }
  0xa6   : > { %3522 = vmatpush.bf16.msra.mxu0 %v5255_v53  ;;  %v7793_v53 = vpack.c.b16 %v331_v33, %v331_v33  ;;  %v7801_v57 = vor.u32 %v352_v38, %v349_v37  ;;  %v5599_v33 = vor.u32 %v6500_v23, %v5598_v20  ;;  %v6482_v37 = vld [vmem:[%s9809_s1 + $0xa34] sm:$0xf0]  ;;  %v5590_v38 = vld [vmem:[%s9809_s1 + $0xab0] sm:$0xf]  ;;  %v5710_v1 = vld [vmem:[%s9809_s1 + $0xba0] sm:$0xf] }
  0xa7   : > { %3535 = vmatpush.bf16.msra.mxu1 %v5319_v59  ;;  %v5551_v59 = vor.u32 %v6488_v41, %v5550_v40  ;;  %v5654_v40 = vld [vmem:[%s9809_s1 + $0xb30] sm:$0xf]  ;;  %v6514_v41 = vld [vmem:[%s9809_s1 + $0xb34] sm:$0xf0] }
  0xa8   : > { %3548 = vmatpush.bf16.msra.mxu2 %v5383_v60  ;;  %v5615_v60 = vor.u32 %v6504_v47, %v5614_v44  ;;  %v5718_v44 = vld [vmem:[%s9809_s1 + $0xbb0] sm:$0xf]  ;;  %v5655_v51 = vor.u32 %v6514_v41, %v5654_v40  ;;  %v6526_v23 = vld [vmem:[%s9809_s1 + $0xb94] sm:$0xf0]  ;;  %v5694_v40 = vld [vmem:[%s9809_s1 + $0xb80] sm:$0xf] }
  0xa9   : > { %3561 = vmatpush.bf16.msra.mxu3 %v5447_v2  ;;  %v5743_v2 = vor.u32 %v6536_v56, %v5742_v55  ;;  %v5518_v55 = vld [vmem:[%s9809_s1 + $0xa20] sm:$0xf]  ;;  %v6480_v56 = vld [vmem:[%s9809_s1 + $0xa24] sm:$0xf0]  ;;  %v5574_v7 = vld [vmem:[%s9809_s1 + $0xa90] sm:$0xf] }
  0xaa   : > { %3523 = vmatpush.bf16.msra.mxu0 %v5247_v16  ;;  %v5671_v16 = vor.u32 %v6518_v5, %v5670_v4  ;;  %v5519_v4 = vor.u32 %v6480_v56, %v5518_v55  ;;  %v6478_v5 = vld [vmem:[%s9809_s1 + $0xa14] sm:$0xf0]  ;;  %v6524_v41 = vld [vmem:[%s9809_s1 + $0xb84] sm:$0xf0] }
  0xab   : > { %3536 = vmatpush.bf16.msra.mxu1 %v5311_v17  ;;  %v5534_v17 = vld [vmem:[%s9809_s1 + $0xa40] sm:$0xf]  ;;  %v4212_v55 = vld [vmem:[%s7007_s25 + $0x24] sm:$0x30]  ;;  %v4210_v56 = vld [vmem:[%s7007_s25 + $0x18] sm:$0x8] }
  0xac   : > { %3549 = vmatpush.bf16.msra.mxu2 %v5375_v27  ;;  %v5662_v27 = vld [vmem:[%s9809_s1 + $0xb40] sm:$0xf]  ;;  %v5535_v32 = vor.u32 %v6484_v18, %v5534_v17  ;;  %v6510_v17 = vld [vmem:[%s9809_s1 + $0xb14] sm:$0xf0] }
  0xad   : > { %3562 = vmatpush.bf16.msra.mxu3 %v5439_v34  ;;  %3524 = vmatmul.bf16.vlgmr.msra.gmra.mxu0 %v7780_v46  ;;  %v5663_v34 = vor.u32 %v6516_v28, %v5662_v27  ;;  %v902_v18 = vld [vmem:[%s9810_s2] sm:$0x3]  ;;  %v6476_v28 = vld [vmem:[%s9809_s1 + $0xa04] sm:$0xf0] }
  0xae   : > { %3568 = vmatpush.bf16.msrb.mxu0 %v5559_v36  ;;  %3537 = vmatmul.bf16.vlgmr.msra.gmra.mxu1 %v7793_v53  ;;  %v5526_v36 = vld [vmem:[%s9809_s1 + $0xa30] sm:$0xf]  ;;  %v5502_v27 = vld [vmem:[%s9809_s1 + $0xa00] sm:$0xf] }
  0xaf   : > { %3581 = vmatpush.bf16.msrb.mxu1 %v5623_v54  ;;  %3550 = vmatmul.bf16.vlgmr.msra.gmra.mxu2 %v7791_v52  ;;  %v5727_v54 = vor.u32 %v6532_v31, %v5726_v30  ;;  %v5527_v47 = vor.u32 %v6482_v37, %v5526_v36  ;;  %v5566_v30 = vld [vmem:[%s9809_s1 + $0xa80] sm:$0xf]  ;;  %v6492_v31 = vld [vmem:[%s9809_s1 + $0xa84] sm:$0xf0]  ;;  %v355_v36 = vshrl.u32 %v7324_v35, 16  ;;  %v358_v37 = vshll.u32 %v7324_v35, 16 }
  0xb0   : > { %3594 = vmatpush.bf16.msrb.mxu2 %v5687_v39  ;;  %3563 = vmatmul.bf16.vlgmr.msra.gmra.mxu3 %v7801_v57  ;;  %v6498_v39 = vld [vmem:[%s9809_s1 + $0xab4] sm:$0xf0] }
  0xb1   : > { %3607 = vmatpush.bf16.msrb.mxu3 %v5751_v45  ;;  %v6530_v45 = vld [vmem:[%s9809_s1 + $0xbb4] sm:$0xf0]  ;;  %v5591_v49 = vor.u32 %v6498_v39, %v5590_v38  ;;  %v904_v38 = vperm.slane %v902_v18, 0 }
  0xb2   : > { %3569 = vmatpush.bf16.msrb.mxu0 %v5551_v59  ;;  %v5582_v59 = vld [vmem:[%s9809_s1 + $0xaa0] sm:$0xf] }
  0xb3   : > { %3582 = vmatpush.bf16.msrb.mxu1 %v5615_v60  ;;  %v5719_v60 = vor.u32 %v6530_v45, %v5718_v44  ;;  %v5814_v44 = vld [vmem:[%s9809_s1 + $0xc70] sm:$0xf]  ;;  %v6554_v45 = vld [vmem:[%s9809_s1 + $0xc74] sm:$0xf0] }
  0xb4   : > { %3595 = vmatpush.bf16.msrb.mxu2 %v5679_v61  ;;  %v6496_v61 = vld [vmem:[%s9809_s1 + $0xaa4] sm:$0xf0] }
  0xb5   : > { %3608 = vmatpush.bf16.msrb.mxu3 %v5743_v2  ;;  %v6528_v2 = vld [vmem:[%s9809_s1 + $0xba4] sm:$0xf0] }
  0xb6   : > { %3570 = vmatpush.bf16.msrb.mxu0 %v5543_v13  ;;  %v5583_v13 = vor.u32 %v6496_v61, %v5582_v59  ;;  %v5711_v20 = vor.u32 %v6528_v2, %v5710_v1  ;;  %v6153_v59 = vld [vmem:[%s7007_s25 + $0x20] sm:$0x30]  ;;  %v6570_v61 = vld [vmem:[%s9809_s1 + $0xcf4] sm:$0xf0]  ;;  %v6154_v1 = vld [vmem:[%s7007_s25 + $0x28] sm:$0x30]  ;;  %v5567_v2 = vor.u32 %v6492_v31, %v5566_v30 }
  0xb7   : > { %3583 = vmatpush.bf16.msrb.mxu1 %v5607_v15  ;;  %v5647_v15 = vor.u32 %v6512_v0, %v5646_v63  ;;  %v3317_v63 = vpop.f32.mrf.mxu0  ;;  %v4218_v0 = vld [vmem:[%s7007_s25 + $0x20] sm:$0x8] }
  0xb8   : > { %3596 = vmatpush.bf16.msrb.mxu2 %v5671_v16  ;;  %v5638_v16 = vld [vmem:[%s9809_s1 + $0xb10] sm:$0xf] }
  0xb9   : > { %3609 = vmatpush.bf16.msrb.mxu3 %v5735_v22  ;;  %v5702_v22 = vld [vmem:[%s9809_s1 + $0xb90] sm:$0xf]  ;;  %v5639_v39 = vor.u32 %v6510_v17, %v5638_v16  ;;  %v6602_v17 = vld [vmem:[%s9809_s1 + $0xdf4] sm:$0xf0] }
  0xba   : > { %3571 = vmatpush.bf16.msrb.mxu0 %v5535_v32  ;;  %v5511_v32 = vor.u32 %v6478_v5, %v5510_v3  ;;  %v5942_v3 = vld [vmem:[%s9809_s1 + $0xd70] sm:$0xf]  ;;  %v357_v5 = vrot.slane %v355_v36, 3  ;;  %v3343_v36 = vpop.f32.mrf.mxu2 }
  0xbb   : > { %3584 = vmatpush.bf16.msrb.mxu1 %v5599_v33  ;;  %v5630_v33 = vld [vmem:[%s9809_s1 + $0xb00] sm:$0xf]  ;;  %v6006_v16 = vld [vmem:[%s9809_s1 + $0xdf0] sm:$0xf] }
  0xbc   : > { %3597 = vmatpush.bf16.msrb.mxu2 %v5663_v34  ;;  %v6508_v34 = vld [vmem:[%s9809_s1 + $0xb04] sm:$0xf0] }
  0xbd   : > { %3610 = vmatpush.bf16.msrb.mxu3 %v5727_v54  ;;  %v5575_v54 = vor.u32 %v6494_v12, %v5574_v7  ;;  %v360_v7 = vrot.slane %v358_v37, 4  ;;  %v3318_v12 = vadd.f32 %v3317_v63, %v904_v38  ;;  %v6007_v37 = vor.u32 %v6602_v17, %v6006_v16  ;;  %v5862_v63 = vld [vmem:[%s9809_s1 + $0xcd0] sm:$0xf] }
  0xbe   : > { %3572 = vmatpush.bf16.msrb.mxu0 %v5527_v47  ;;  %v6152_v47 = vld [vmem:[%s7007_s25 + $0x1c] sm:$0x8] }
  0xbf   : > { %3585 = vmatpush.bf16.msrb.mxu1 %v5591_v49  ;;  %v5703_v49 = vor.u32 %v6526_v23, %v5702_v22  ;;  %v4215_v18 = vor.u32 %v6152_v47, %v4212_v55  ;;  %v5695_v22 = vor.u32 %v6524_v41, %v5694_v40  ;;  %v5815_v23 = vor.u32 %v6554_v45, %v5814_v44  ;;  %v6584_v40 = vld [vmem:[%s9809_s1 + $0xd64] sm:$0xf0]  ;;  %v5998_v47 = vld [vmem:[%s9809_s1 + $0xde0] sm:$0xf] }
  0xc0   : > { %3598 = vmatpush.bf16.msrb.mxu2 %v5655_v51  ;;  %v5878_v51 = vld [vmem:[%s9809_s1 + $0xcf0] sm:$0xf]  ;;  %v7995_v38 = vor.u32 %v360_v7, %v357_v5 }
  0xc1   : > { %3611 = vmatpush.bf16.msrb.mxu3 %v5719_v60  ;;  %v5503_v60 = vor.u32 %v6476_v28, %v5502_v27  ;;  %v4219_v27 = vor.u32 %v6154_v1, %v4218_v0  ;;  %v5879_v30 = vor.u32 %v6570_v61, %v5878_v51  ;;  %v8006_v44 = vrot.slane %v4215_v18, 3  ;;  %v6550_v61 = vld [vmem:[%s9809_s1 + $0xc54] sm:$0xf0]  ;;  %v3319_v0 = vpop.f32.mrf.mxu0  ;;  %v5990_v7 = vld [vmem:[%s9809_s1 + $0xdd0] sm:$0xf] }
  0xc2   : > { %3573 = vmatpush.bf16.msrb.mxu0 %v5519_v4  ;;  %v6586_v4 = vld [vmem:[%s9809_s1 + $0xd74] sm:$0xf0] }
  0xc3   : > { %3586 = vmatpush.bf16.msrb.mxu1 %v5583_v13  ;;  %v3330_v13 = vpop.f32.mrf.mxu1  ;;  %v5943_v31 = vor.u32 %v6586_v4, %v5942_v3  ;;  %v8016_v51 = vrot.slane %v4219_v27, 3  ;;  %v5926_v3 = vld [vmem:[%s9809_s1 + $0xd50] sm:$0xf]  ;;  %v6582_v4 = vld [vmem:[%s9809_s1 + $0xd54] sm:$0xf0]  ;;  %v3345_v27 = vpop.f32.mrf.mxu2 }
  0xc4   : > { %3599 = vmatpush.bf16.msrb.mxu2 %v5647_v15  ;;  %v5631_v15 = vor.u32 %v6508_v34, %v5630_v33  ;;  %v3331_v28 = vadd.f32 %v3330_v13, %v3318_v12  ;;  %v6552_v33 = vld [vmem:[%s9809_s1 + $0xc64] sm:$0xf0]  ;;  %v5870_v34 = vld [vmem:[%s9809_s1 + $0xce0] sm:$0xf]  ;;  %v6598_v12 = vld [vmem:[%s9809_s1 + $0xdd4] sm:$0xf0]  ;;  %v5927_v17 = vor.u32 %v6582_v4, %v5926_v3 }
  0xc5   : > { %3612 = vmatpush.bf16.msrb.mxu3 %v5711_v20  ;;  %v4211_v20 = vor.u32 %v6153_v59, %v4210_v56 }
  0xc6   : > { %3574 = vmatpush.bf16.msrb.mxu0 %v5511_v32  ;;  %v5806_v32 = vld [vmem:[%s9809_s1 + $0xc60] sm:$0xf]  ;;  %v3344_v41 = vadd.f32 %v3343_v36, %v3331_v28  ;;  %v5991_v28 = vor.u32 %v6598_v12, %v5990_v7  ;;  %v6544_v7 = vld [vmem:[%s9809_s1 + $0xc24] sm:$0xf0] }
  0xc7   : > { %3587 = vmatpush.bf16.msrb.mxu1 %v5575_v54  ;;  %v6568_v54 = vld [vmem:[%s9809_s1 + $0xce4] sm:$0xf0]  ;;  %v8008_v45 = vrot.slane %v4211_v20, 3  ;;  %v5807_v55 = vor.u32 %v6552_v33, %v5806_v32  ;;  %v5790_v20 = vld [vmem:[%s9809_s1 + $0xc40] sm:$0xf] }
  0xc8   : > { %3600 = vmatpush.bf16.msrb.mxu2 %v5639_v39  ;;  %v5934_v39 = vld [vmem:[%s9809_s1 + $0xd60] sm:$0xf]  ;;  %v5871_v56 = vor.u32 %v6568_v54, %v5870_v34  ;;  %v6580_v32 = vld [vmem:[%s9809_s1 + $0xd44] sm:$0xf0] }
  0xc9   : > { %3613 = vmatpush.bf16.msrb.mxu3 %v5703_v49  ;;  %v6600_v49 = vld [vmem:[%s9809_s1 + $0xde4] sm:$0xf0]  ;;  %v5935_v59 = vor.u32 %v6584_v40, %v5934_v39  ;;  %v5982_v33 = vld [vmem:[%s9809_s1 + $0xdc0] sm:$0xf]  ;;  %v5782_v39 = vld [vmem:[%s9809_s1 + $0xc30] sm:$0xf] }
  0xca   : > { %3575 = vmatpush.bf16.msrb.mxu0 %v5503_v60  ;;  %v5798_v60 = vld [vmem:[%s9809_s1 + $0xc50] sm:$0xf]  ;;  %v5999_v1 = vor.u32 %v6600_v49, %v5998_v47  ;;  %v6596_v34 = vld [vmem:[%s9809_s1 + $0xdc4] sm:$0xf0]  ;;  %v6546_v40 = vld [vmem:[%s9809_s1 + $0xc34] sm:$0xf0] }
  0xcb   : > { %3588 = vmatpush.bf16.msrb.mxu1 %v5567_v2  ;;  %v6566_v2 = vld [vmem:[%s9809_s1 + $0xcd4] sm:$0xf0]  ;;  %v3332_v5 = vpop.f32.mrf.mxu1  ;;  %v5799_v13 = vor.u32 %v6550_v61, %v5798_v60  ;;  %v5983_v47 = vor.u32 %v6596_v34, %v5982_v33  ;;  %v3369_v61 = vpop.f32.mrf.mxu0  ;;  %v5838_v12 = vld [vmem:[%s9809_s1 + $0xca0] sm:$0xf]  ;;  %v5830_v34 = vld [vmem:[%s9809_s1 + $0xc90] sm:$0xf] }
  0xcc   : > { %3601 = vmatpush.bf16.msrb.mxu2 %v5631_v15  ;;  %v3356_v15 = vpop.f32.mrf.mxu3  ;;  %v5863_v16 = vor.u32 %v6566_v2, %v5862_v63  ;;  %v6562_v49 = vld [vmem:[%s9809_s1 + $0xcb4] sm:$0xf0]  ;;  %v5783_v63 = vor.u32 %v6546_v40, %v5782_v39  ;;  %v5774_v5 = vld [vmem:[%s9809_s1 + $0xc20] sm:$0xf]  ;;  %v5894_v39 = vld [vmem:[%s9809_s1 + $0xd10] sm:$0xf] }
  0xcd   : > { %3614 = vmatpush.bf16.msrb.mxu3 %v5695_v22  ;;  %3576 = vmatmul.bf16.vlgmr.msrb.gmra.mxu0 %v7995_v38  ;;  %v3357_v18 = vadd.f32 %v3356_v15, %v3344_v41  ;;  %v6548_v22 = vld [vmem:[%s9809_s1 + $0xc44] sm:$0xf0]  ;;  %v5846_v41 = vld [vmem:[%s9809_s1 + $0xcb0] sm:$0xf]  ;;  %v6594_v60 = vld [vmem:[%s9809_s1 + $0xdb4] sm:$0xf0]  ;;  %v5775_v27 = vor.u32 %v6544_v7, %v5774_v5 }
  0xce   : > { %3620 = vmatpush.bf16.msra.mxu0 %v5815_v23  ;;  %3589 = vmatmul.bf16.vlgmr.msrb.gmra.mxu1 %v8008_v45  ;;  %v5854_v23 = vld [vmem:[%s9809_s1 + $0xcc0] sm:$0xf]  ;;  %v5791_v36 = vor.u32 %v6548_v22, %v5790_v20  ;;  %v5847_v3 = vor.u32 %v6562_v49, %v5846_v41  ;;  %v6574_v40 = vld [vmem:[%s9809_s1 + $0xd14] sm:$0xf0]  ;;  %v192_v41 = vld [vmem:[%s7007_s25 + $0x8] sm:$0xe] }
  0xcf   : > { %3633 = vmatpush.bf16.msra.mxu1 %v5879_v30  ;;  %3602 = vmatmul.bf16.vlgmr.msrb.gmra.mxu2 %v8006_v44  ;;  %v6564_v30 = vld [vmem:[%s9809_s1 + $0xcc4] sm:$0xf0]  ;;  %v5966_v22 = vld [vmem:[%s9809_s1 + $0xda0] sm:$0xf]  ;;  %v6590_v49 = vld [vmem:[%s9809_s1 + $0xd94] sm:$0xf0]  ;;  %v388_v7 = vunpack.c.l.b16 %v192_v41 }
  0xd0   : > { %3646 = vmatpush.bf16.msra.mxu2 %v5943_v31  ;;  %3615 = vmatmul.bf16.vlgmr.msrb.gmra.mxu3 %v8016_v51  ;;  %v5918_v31 = vld [vmem:[%s9809_s1 + $0xd40] sm:$0xf]  ;;  %v6572_v5 = vld [vmem:[%s9809_s1 + $0xd04] sm:$0xf0] }
  0xd1   : > { %3659 = vmatpush.bf16.msra.mxu3 %v6007_v37  ;;  %v5855_v37 = vor.u32 %v6564_v30, %v5854_v23  ;;  %v5919_v54 = vor.u32 %v6580_v32, %v5918_v31  ;;  %v6592_v23 = vld [vmem:[%s9809_s1 + $0xda4] sm:$0xf0]  ;;  %v5766_v30 = vld [vmem:[%s9809_s1 + $0xc10] sm:$0xf]  ;;  %v6542_v31 = vld [vmem:[%s9809_s1 + $0xc14] sm:$0xf0] }
  0xd2   : > { %3621 = vmatpush.bf16.msra.mxu0 %v5807_v55  ;;  %v5910_v55 = vld [vmem:[%s9809_s1 + $0xd30] sm:$0xf] }
  0xd3   : > { %3634 = vmatpush.bf16.msra.mxu1 %v5871_v56  ;;  %v6578_v56 = vld [vmem:[%s9809_s1 + $0xd34] sm:$0xf0]  ;;  %v3382_v2 = vpop.f32.mrf.mxu1 }
  0xd4   : > { %3647 = vmatpush.bf16.msra.mxu2 %v5935_v59  ;;  %v5974_v59 = vld [vmem:[%s9809_s1 + $0xdb0] sm:$0xf]  ;;  %v3358_v0 = vpop.f32.mrf.mxu3  ;;  %v5911_v4 = vor.u32 %v6578_v56, %v5910_v55  ;;  %v3371_v55 = vpop.f32.mrf.mxu0  ;;  %v5767_v56 = vor.u32 %v6542_v31, %v5766_v30 }
  0xd5   : > { %3660 = vmatpush.bf16.msra.mxu3 %v5999_v1  ;;  %v3370_v1 = vadd.f32 %v3369_v61, %v3357_v18  ;;  %v5975_v15 = vor.u32 %v6594_v60, %v5974_v59  ;;  %v6576_v18 = vld [vmem:[%s9809_s1 + $0xd24] sm:$0xf0]  ;;  %v5758_v59 = vld [vmem:[%s9809_s1 + $0xc00] sm:$0xf]  ;;  %v6134_v30 = vld [vmem:[%s9809_s1 + $0xef0] sm:$0xf] }
  0xd6   : > { %3622 = vmatpush.bf16.msra.mxu0 %v5799_v13  ;;  %v3395_v13 = vpop.f32.mrf.mxu2  ;;  %v6540_v60 = vld [vmem:[%s9809_s1 + $0xc04] sm:$0xf0]  ;;  %v5822_v61 = vld [vmem:[%s9809_s1 + $0xc80] sm:$0xf]  ;;  %v399_v55 = vshrl.u32 %v7591_v29, 16 }
  0xd7   : > { %3635 = vmatpush.bf16.msra.mxu1 %v5863_v16  ;;  %v6560_v16 = vld [vmem:[%s9809_s1 + $0xca4] sm:$0xf0]  ;;  %v3383_v20 = vadd.f32 %v3382_v2, %v3370_v1  ;;  %v5895_v2 = vor.u32 %v6574_v40, %v5894_v39  ;;  %v5759_v31 = vor.u32 %v6540_v60, %v5758_v59  ;;  %v4344_v39 = vld [vmem:[%s9809_s1 + $0xf8] sm:$0xf0]  ;;  %v8197_v40 = vpack.c.b16 %v388_v7, %v388_v7  ;;  %v6062_v59 = vld [vmem:[%s9809_s1 + $0xe60] sm:$0xf] }
  0xd8   : > { %3648 = vmatpush.bf16.msra.mxu2 %v5927_v17  ;;  %v5902_v17 = vld [vmem:[%s9809_s1 + $0xd20] sm:$0xf]  ;;  %v5839_v32 = vor.u32 %v6560_v16, %v5838_v12 }
  0xd9   : > { %3661 = vmatpush.bf16.msra.mxu3 %v5991_v28  ;;  %v3396_v28 = vadd.f32 %v3395_v13, %v3383_v20  ;;  %v5903_v33 = vor.u32 %v6576_v18, %v5902_v17  ;;  %v5950_v17 = vld [vmem:[%s9809_s1 + $0xd80] sm:$0xf]  ;;  %v6588_v18 = vld [vmem:[%s9809_s1 + $0xd84] sm:$0xf0]  ;;  %v401_v20 = vshll.u32 %v7591_v29, 16  ;;  %v394_v7 = vrot.slane %v8197_v40, 1 }
  0xda   : > { %3623 = vmatpush.bf16.msra.mxu0 %v5791_v36  ;;  %v6558_v36 = vld [vmem:[%s9809_s1 + $0xc94] sm:$0xf0] }
  0xdb   : > { %3636 = vmatpush.bf16.msra.mxu1 %v5855_v37  ;;  %v191_v37 = vld [vmem:[%s7007_s25] sm:$0xee]  ;;  %v3384_v0 = vpop.f32.mrf.mxu1  ;;  %v5831_v1 = vor.u32 %v6558_v36, %v5830_v34  ;;  %v4280_v34 = vld [vmem:[%s9809_s1 + $0x78] sm:$0xf0] }
  0xdc   : > { %3649 = vmatpush.bf16.msra.mxu2 %v5919_v54  ;;  %v5967_v54 = vor.u32 %v6592_v23, %v5966_v22  ;;  %v387_v12 = vunpack.c.h.b16 %v191_v37  ;;  %v3408_v16 = vpop.f32.mrf.mxu3  ;;  %v6070_v23 = vld [vmem:[%s9809_s1 + $0xe70] sm:$0xf]  ;;  %v6126_v0 = vld [vmem:[%s9809_s1 + $0xee0] sm:$0xf] }
  0xdd   : > { %3662 = vmatpush.bf16.msra.mxu3 %v5983_v47  ;;  %v5958_v47 = vld [vmem:[%s9809_s1 + $0xd90] sm:$0xf]  ;;  %v8169_v22 = vadd.f32 %v3408_v16, %v3396_v28  ;;  %v6634_v28 = vld [vmem:[%s9809_s1 + $0xef4] sm:$0xf0] }
  0xde   : > { %3624 = vmatpush.bf16.msra.mxu0 %v5783_v63  ;;  %v386_v63 = vunpack.c.l.b16 %v191_v37  ;;  %v3397_v13 = vpop.f32.mrf.mxu2  ;;  %v8199_v41 = vpack.c.b16 %v387_v12, %v387_v12  ;;  %v6135_v60 = vor.u32 %v6634_v28, %v6134_v30  ;;  %v6614_v30 = vld [vmem:[%s9809_s1 + $0xe54] sm:$0xf0] }
  0xdf   : > { %3637 = vmatpush.bf16.msra.mxu1 %v5847_v3  ;;  %v6556_v3 = vld [vmem:[%s9809_s1 + $0xc84] sm:$0xf0]  ;;  %v6183_v13 = vld [vmem:[%s9809_s1 + $0xe4] sm:$0xf]  ;;  %v6630_v28 = vld [vmem:[%s9809_s1 + $0xed4] sm:$0xf0] }
  0xe0   : > { %3650 = vmatpush.bf16.msra.mxu2 %v5911_v4  ;;  %v5886_v4 = vld [vmem:[%s9809_s1 + $0xd00] sm:$0xf]  ;;  %v8189_v36 = vpack.c.b16 %v386_v63, %v386_v63  ;;  %v6616_v63 = vld [vmem:[%s9809_s1 + $0xe64] sm:$0xf0]  ;;  %v393_v12 = vrot.slane %v8199_v41, 1 }
  0xe1   : > { %3663 = vmatpush.bf16.msra.mxu3 %v5975_v15  ;;  %v5959_v15 = vor.u32 %v6590_v49, %v5958_v47  ;;  %v5887_v37 = vor.u32 %v6572_v5, %v5886_v4  ;;  %v5951_v47 = vor.u32 %v6588_v18, %v5950_v17  ;;  %v6167_v4 = vld [vmem:[%s9809_s1 + $0x64] sm:$0xf]  ;;  %v4272_v5 = vld [vmem:[%s9809_s1 + $0x68] sm:$0xf0]  ;;  %v6063_v17 = vor.u32 %v6616_v63, %v6062_v59  ;;  %v6110_v59 = vld [vmem:[%s9809_s1 + $0xec0] sm:$0xf] }
  0xe2   : > { %3625 = vmatpush.bf16.msra.mxu0 %v5775_v27  ;;  %v6618_v27 = vld [vmem:[%s9809_s1 + $0xe74] sm:$0xf0]  ;;  %v6163_v63 = vld [vmem:[%s9809_s1 + $0x44] sm:$0xf] }
  0xe3   : > { %3638 = vmatpush.bf16.msra.mxu1 %v5839_v32  ;;  %v5823_v32 = vor.u32 %v6556_v3, %v5822_v61  ;;  %v6071_v49 = vor.u32 %v6618_v27, %v6070_v23  ;;  %v392_v3 = vrot.slane %v8189_v36, 1  ;;  %v4275_v23 = vor.u32 %v6167_v4, %v4272_v5  ;;  %v6054_v27 = vld [vmem:[%s9809_s1 + $0xe50] sm:$0xf]  ;;  %v4320_v4 = vld [vmem:[%s9809_s1 + $0xc8] sm:$0xf0] }
  0xe4   : > { %3651 = vmatpush.bf16.msra.mxu2 %v5903_v33  ;;  %v6169_v33 = vld [vmem:[%s9809_s1 + $0x74] sm:$0xf]  ;;  %v3410_v18 = vpop.f32.mrf.mxu3 }
  0xe5   : > { %3664 = vmatpush.bf16.msra.mxu3 %v5967_v54  ;;  %v6185_v54 = vld [vmem:[%s9809_s1 + $0xf4] sm:$0xf]  ;;  %v4283_v61 = vor.u32 %v6169_v33, %v4280_v34  ;;  %v4264_v34 = vld [vmem:[%s9809_s1 + $0x58] sm:$0xf0] }
  0xe6   : > { %3626 = vmatpush.bf16.msra.mxu0 %v5767_v56  ;;  %v403_v56 = vrot.slane %v401_v20, 1  ;;  %v6165_v33 = vld [vmem:[%s9809_s1 + $0x54] sm:$0xf] }
  0xe7   : > { %3639 = vmatpush.bf16.msra.mxu1 %v5831_v1  ;;  %v6632_v1 = vld [vmem:[%s9809_s1 + $0xee4] sm:$0xf0] }
  0xe8   : > { %3652 = vmatpush.bf16.msra.mxu2 %v5895_v2  ;;  %v4347_v2 = vor.u32 %v6185_v54, %v4344_v39  ;;  %v8229_v16 = vor.u32 %v403_v56, %v399_v55  ;;  %v6127_v20 = vor.u32 %v6632_v1, %v6126_v0  ;;  %v4328_v54 = vld [vmem:[%s9809_s1 + $0xd8] sm:$0xf0]  ;;  %v6055_v39 = vor.u32 %v6614_v30, %v6054_v27  ;;  %v6046_v55 = vld [vmem:[%s9809_s1 + $0xe40] sm:$0xf]  ;;  %v6612_v56 = vld [vmem:[%s9809_s1 + $0xe44] sm:$0xf0] }
  0xe9   : > { %3665 = vmatpush.bf16.msra.mxu3 %v5959_v15  ;;  %v4336_v15 = vld [vmem:[%s9809_s1 + $0xe8] sm:$0xf0]  ;;  %v6102_v27 = vld [vmem:[%s9809_s1 + $0xeb0] sm:$0xf] }
  0xea   : > { %3627 = vmatpush.bf16.msra.mxu0 %v5759_v31  ;;  %v6118_v31 = vld [vmem:[%s9809_s1 + $0xed0] sm:$0xf]  ;;  %v4256_v0 = vld [vmem:[%s9809_s1 + $0x48] sm:$0xf0]  ;;  %v3421_v1 = vpop.f32.mrf.mxu0 }
  0xeb   : > { %3640 = vmatpush.bf16.msra.mxu1 %v5823_v32  ;;  %v4339_v32 = vor.u32 %v6183_v13, %v4336_v15  ;;  %v3422_v5 = vadd.f32 %v3421_v1, %v8169_v22  ;;  %v6047_v13 = vor.u32 %v6612_v56, %v6046_v55  ;;  %v3434_v15 = vpop.f32.mrf.mxu1  ;;  %v4259_v18 = vor.u32 %v6163_v63, %v4256_v0  ;;  %v6094_v55 = vld [vmem:[%s9809_s1 + $0xea0] sm:$0xf]  ;;  %v4240_v63 = vld [vmem:[%s9809_s1 + $0x28] sm:$0xf0] }
  0xec   : > { %3653 = vmatpush.bf16.msra.mxu2 %v5887_v37  ;;  %v6181_v37 = vld [vmem:[%s9809_s1 + $0xd4] sm:$0xf] }
  0xed   : > { %3666 = vmatpush.bf16.msra.mxu3 %v5951_v47  ;;  %3628 = vmatmul.bf16.vlgmr.msra.gmra.mxu0 %v392_v3  ;;  %v6119_v47 = vor.u32 %v6630_v28, %v6118_v31  ;;  %v3435_v30 = vadd.f32 %v3434_v15, %v3422_v5  ;;  %v6626_v31 = vld [vmem:[%s9809_s1 + $0xeb4] sm:$0xf0]  ;;  %v4248_v28 = vld [vmem:[%s9809_s1 + $0x38] sm:$0xf0]  ;;  %v6022_v15 = vld [vmem:[%s9809_s1 + $0xe10] sm:$0xf] }
  0xee   : > { %3672 = vmatpush.bf16.msrb.mxu0 %v6071_v49  ;;  %3641 = vmatmul.bf16.vlgmr.msra.gmra.mxu1 %v393_v12  ;;  %v4267_v49 = vor.u32 %v6165_v33, %v4264_v34  ;;  %v6177_v33 = vld [vmem:[%s9809_s1 + $0xb4] sm:$0xf]  ;;  %v4312_v34 = vld [vmem:[%s9809_s1 + $0xb8] sm:$0xf0] }
  0xef   : > { %3685 = vmatpush.bf16.msrb.mxu1 %v6135_v60  ;;  %3654 = vmatmul.bf16.vlgmr.msra.gmra.mxu2 %v394_v7  ;;  %v4331_v60 = vor.u32 %v6181_v37, %v4328_v54  ;;  %v6103_v54 = vor.u32 %v6626_v31, %v6102_v27  ;;  %v4315_v56 = vor.u32 %v6177_v33, %v4312_v34  ;;  %v6606_v27 = vld [vmem:[%s9809_s1 + $0xe14] sm:$0xf0]  ;;  %v6173_v33 = vld [vmem:[%s9809_s1 + $0x94] sm:$0xf]  ;;  %v4296_v34 = vld [vmem:[%s9809_s1 + $0x98] sm:$0xf0] }
  0xf0   : > { %3698 = vmatpush.bf16.msrb.mxu2 %v4283_v61  ;;  %3667 = vmatmul.bf16.vlgmr.msra.gmra.mxu3 %v8229_v16  ;;  %v6628_v61 = vld [vmem:[%s9809_s1 + $0xec4] sm:$0xf0] }
  0xf1   : > { %3711 = vmatpush.bf16.msrb.mxu3 %v4347_v2  ;;  %v6179_v2 = vld [vmem:[%s9809_s1 + $0xc4] sm:$0xf] }
  0xf2   : > { %3673 = vmatpush.bf16.msrb.mxu0 %v6063_v17  ;;  %v6111_v17 = vor.u32 %v6628_v61, %v6110_v59  ;;  %v4323_v22 = vor.u32 %v6179_v2, %v4320_v4  ;;  %v3447_v59 = vpop.f32.mrf.mxu2  ;;  %v6159_v61 = vld [vmem:[%s9809_s1 + $0x24] sm:$0xf]  ;;  %v4304_v4 = vld [vmem:[%s9809_s1 + $0xa8] sm:$0xf0]  ;;  %v3423_v5 = vpop.f32.mrf.mxu0 }
  0xf3   : > { %3686 = vmatpush.bf16.msrb.mxu1 %v6127_v20  ;;  %v6038_v20 = vld [vmem:[%s9809_s1 + $0xe30] sm:$0xf]  ;;  %v3448_v0 = vadd.f32 %v3447_v59, %v3435_v30  ;;  %v3460_v1 = vpop.f32.mrf.mxu3  ;;  %v6175_v2 = vld [vmem:[%s9809_s1 + $0xa4] sm:$0xf]  ;;  %v6622_v30 = vld [vmem:[%s9809_s1 + $0xe94] sm:$0xf0] }
  0xf4   : > { %3699 = vmatpush.bf16.msrb.mxu2 %v4275_v23  ;;  %v6610_v23 = vld [vmem:[%s9809_s1 + $0xe34] sm:$0xf0]  ;;  %v4307_v31 = vor.u32 %v6175_v2, %v4304_v4  ;;  %v4288_v2 = vld [vmem:[%s9809_s1 + $0x88] sm:$0xf0]  ;;  %v6201_v4 = vld [vmem:[%s9809_s1 + $0x174] sm:$0xf] }
  0xf5   : > { %3712 = vmatpush.bf16.msrb.mxu3 %v4339_v32  ;;  %v6161_v32 = vld [vmem:[%s9809_s1 + $0x34] sm:$0xf]  ;;  %v6039_v37 = vor.u32 %v6610_v23, %v6038_v20  ;;  %v4243_v23 = vor.u32 %v6159_v61, %v4240_v63  ;;  %v4224_v61 = vld [vmem:[%s9809_s1 + $0x8] sm:$0xf0]  ;;  %v415_v63 = vshll.u32 %v7793_v53, 16 }
  0xf6   : > { %3674 = vmatpush.bf16.msrb.mxu0 %v6055_v39  ;;  %v4251_v39 = vor.u32 %v6161_v32, %v4248_v28  ;;  %v6157_v32 = vld [vmem:[%s9809_s1 + $0x14] sm:$0xf]  ;;  %v4232_v28 = vld [vmem:[%s9809_s1 + $0x18] sm:$0xf0] }
  0xf7   : > { %3687 = vmatpush.bf16.msrb.mxu1 %v6119_v47  ;;  %v6030_v47 = vld [vmem:[%s9809_s1 + $0xe20] sm:$0xf]  ;;  %v4235_v59 = vor.u32 %v6157_v32, %v4232_v28 }
  0xf8   : > { %3700 = vmatpush.bf16.msrb.mxu2 %v4267_v49  ;;  %v6608_v49 = vld [vmem:[%s9809_s1 + $0xe24] sm:$0xf0] }
  0xf9   : > { %3713 = vmatpush.bf16.msrb.mxu3 %v4331_v60  ;;  %v6624_v60 = vld [vmem:[%s9809_s1 + $0xea4] sm:$0xf0] }
  0xfa   : > { %3675 = vmatpush.bf16.msrb.mxu0 %v6047_v13  ;;  %v6031_v13 = vor.u32 %v6608_v49, %v6030_v47  ;;  %v6095_v20 = vor.u32 %v6624_v60, %v6094_v55  ;;  %v6078_v47 = vld [vmem:[%s9809_s1 + $0xe80] sm:$0xf]  ;;  %v6620_v49 = vld [vmem:[%s9809_s1 + $0xe84] sm:$0xf0]  ;;  %v408_v55 = vshll.u32 %v7780_v46, 16  ;;  %v3449_v5 = vpop.f32.mrf.mxu2 }
  0xfb   : > { %3688 = vmatpush.bf16.msrb.mxu1 %v6111_v17  ;;  %v3436_v17 = vpop.f32.mrf.mxu1  ;;  %v6155_v60 = vld [vmem:[%s9809_s1 + $0x4] sm:$0xf]  ;;  %v6079_v32 = vor.u32 %v6620_v49, %v6078_v47  ;;  %v4400_v49 = vld [vmem:[%s9809_s1 + $0x168] sm:$0xf0] }
  0xfc   : > { %3701 = vmatpush.bf16.msrb.mxu2 %v4259_v18  ;;  %v8338_v18 = vadd.f32 %v3460_v1, %v3448_v0  ;;  %v4299_v0 = vor.u32 %v6173_v33, %v4296_v34  ;;  %v6171_v1 = vld [vmem:[%s9809_s1 + $0x84] sm:$0xf]  ;;  %v4472_v17 = vld [vmem:[%s9809_s1 + $0x1f8] sm:$0xf0]  ;;  %v4227_v28 = vor.u32 %v6155_v60, %v4224_v61  ;;  %v6249_v33 = vld [vmem:[%s9809_s1 + $0x2f4] sm:$0xf] }
  0xfd   : > { %3714 = vmatpush.bf16.msrb.mxu3 %v4323_v22  ;;  %v6086_v22 = vld [vmem:[%s9809_s1 + $0xe90] sm:$0xf]  ;;  %v4600_v34 = vld [vmem:[%s9809_s1 + $0x2f8] sm:$0xf0]  ;;  %v6199_v47 = vld [vmem:[%s9809_s1 + $0x164] sm:$0xf] }
  0xfe   : > { %3676 = vmatpush.bf16.msrb.mxu0 %v6039_v37  ;;  %v6014_v37 = vld [vmem:[%s9809_s1 + $0xe00] sm:$0xf]  ;;  %v4464_v61 = vld [vmem:[%s9809_s1 + $0x1e8] sm:$0xf0] }
  0xff   : > { %3689 = vmatpush.bf16.msrb.mxu1 %v6103_v54  ;;  %v6604_v54 = vld [vmem:[%s9809_s1 + $0xe04] sm:$0xf0] }
 0x100   : > { %3702 = vmatpush.bf16.msrb.mxu2 %v4251_v39  ;;  %v6023_v39 = vor.u32 %v6606_v27, %v6022_v15  ;;  %v6217_v15 = vld [vmem:[%s9809_s1 + $0x1f4] sm:$0xf] }
 0x101   : > { %3715 = vmatpush.bf16.msrb.mxu3 %v4315_v56  ;;  %v6087_v56 = vor.u32 %v6622_v30, %v6086_v22  ;;  %v6233_v27 = vld [vmem:[%s9809_s1 + $0x274] sm:$0xf]  ;;  %v4536_v22 = vld [vmem:[%s9809_s1 + $0x278] sm:$0xf0]  ;;  %v406_v30 = vshrl.u32 %v7780_v46, 16 }
 0x102   : > { %3677 = vmatpush.bf16.msrb.mxu0 %v6031_v13  ;;  %v4408_v13 = vld [vmem:[%s9809_s1 + $0x178] sm:$0xf0] }
 0x103   : > { %3690 = vmatpush.bf16.msrb.mxu1 %v6095_v20  ;;  %v3462_v20 = vpop.f32.mrf.mxu3  ;;  %v4411_v5 = vor.u32 %v6201_v4, %v4408_v13  ;;  %v4592_v4 = vld [vmem:[%s9809_s1 + $0x2e8] sm:$0xf0]  ;;  %v4403_v13 = vor.u32 %v6199_v47, %v4400_v49  ;;  %v6227_v47 = vld [vmem:[%s9809_s1 + $0x244] sm:$0xf] }
 0x104   : > { %3703 = vmatpush.bf16.msrb.mxu2 %v4243_v23  ;;  %v6015_v23 = vor.u32 %v6604_v54, %v6014_v37  ;;  %v413_v37 = vshrl.u32 %v7793_v53, 16  ;;  %v417_v54 = vrot.slane %v415_v63, 1  ;;  %v4475_v20 = vor.u32 %v6217_v15, %v4472_v17  ;;  %v6231_v63 = vld [vmem:[%s9809_s1 + $0x264] sm:$0xf]  ;;  %v4512_v49 = vld [vmem:[%s9809_s1 + $0x248] sm:$0xf0] }
 0x105   : > { %3716 = vmatpush.bf16.msrb.mxu3 %v4307_v31  ;;  %v410_v31 = vrot.slane %v408_v55, 1  ;;  %v4539_v55 = vor.u32 %v6233_v27, %v4536_v22  ;;  %v4392_v27 = vld [vmem:[%s9809_s1 + $0x158] sm:$0xf0]  ;;  %v6213_v22 = vld [vmem:[%s9809_s1 + $0x1d4] sm:$0xf] }
 0x106   : > { %3678 = vmatpush.bf16.msrb.mxu0 %v6023_v39  ;;  %v4291_v39 = vor.u32 %v6171_v1, %v4288_v2  ;;  %v8433_v1 = vor.u32 %v417_v54, %v413_v37  ;;  %v6247_v2 = vld [vmem:[%s9809_s1 + $0x2e4] sm:$0xf] }
 0x107   : > { %3691 = vmatpush.bf16.msrb.mxu1 %v6087_v56  ;;  %v6215_v56 = vld [vmem:[%s9809_s1 + $0x1e4] sm:$0xf]  ;;  %v8422_v60 = vor.u32 %v410_v31, %v406_v30  ;;  %v4595_v30 = vor.u32 %v6247_v2, %v4592_v4  ;;  %v4456_v31 = vld [vmem:[%s9809_s1 + $0x1d8] sm:$0xf0] }
 0x108   : > { %3704 = vmatpush.bf16.msrb.mxu2 %v4235_v59  ;;  %v4603_v59 = vor.u32 %v6249_v33, %v4600_v34  ;;  %v4467_v15 = vor.u32 %v6215_v56, %v4464_v61  ;;  %v6245_v33 = vld [vmem:[%s9809_s1 + $0x2d4] sm:$0xf]  ;;  %v4584_v34 = vld [vmem:[%s9809_s1 + $0x2d8] sm:$0xf0]  ;;  %v4459_v54 = vor.u32 %v6213_v22, %v4456_v31  ;;  %v4576_v61 = vld [vmem:[%s9809_s1 + $0x2c8] sm:$0xf0] }
 0x109   : > { %3717 = vmatpush.bf16.msrb.mxu3 %v4299_v0  ;;  %v4528_v0 = vld [vmem:[%s9809_s1 + $0x268] sm:$0xf0]  ;;  %v4440_v22 = vld [vmem:[%s9809_s1 + $0x1b8] sm:$0xf0] }
 0x10a   : > { %3679 = vmatpush.bf16.msrb.mxu0 %v6015_v23  ;;  %v4531_v17 = vor.u32 %v6231_v63, %v4528_v0  ;;  %v6197_v23 = vld [vmem:[%s9809_s1 + $0x154] sm:$0xf]  ;;  %v3473_v56 = vpop.f32.mrf.mxu0  ;;  %v4504_v31 = vld [vmem:[%s9809_s1 + $0x238] sm:$0xf0] }
 0x10b   : > { %3692 = vmatpush.bf16.msrb.mxu1 %v6079_v32  ;;  %v6229_v32 = vld [vmem:[%s9809_s1 + $0x254] sm:$0xf]  ;;  %v4395_v37 = vor.u32 %v6197_v23, %v4392_v27  ;;  %v3474_v63 = vadd.f32 %v3473_v56, %v8338_v18  ;;  %v3486_v2 = vpop.f32.mrf.mxu1 }
 0x10c   : > { %3705 = vmatpush.bf16.msrb.mxu2 %v4227_v28  ;;  %v4520_v28 = vld [vmem:[%s9809_s1 + $0x258] sm:$0xf0]  ;;  %v6209_v23 = vld [vmem:[%s9809_s1 + $0x1b4] sm:$0xf] }
 0x10d   : > { %3718 = vmatpush.bf16.msrb.mxu3 %v4291_v39  ;;  %3680 = vmatmul.bf16.vlgmr.msrb.gmra.mxu0 %v8422_v60  ;;  %v4523_v39 = vor.u32 %v6229_v32, %v4520_v28  ;;  %v3487_v27 = vadd.f32 %v3486_v2, %v3474_v63  ;;  %v6241_v32 = vld [vmem:[%s9809_s1 + $0x2b4] sm:$0xf]  ;;  %v4568_v28 = vld [vmem:[%s9809_s1 + $0x2b8] sm:$0xf0] }
 0x10e   : > { %3724 = vmatpush.bf16.msra.mxu0 %v4411_v5  ;;  %3693 = vmatmul.bf16.vlgmr.msrb.gmra.mxu1 %v8433_v1  ;;  %v6195_v5 = vld [vmem:[%s9809_s1 + $0x144] sm:$0xf] }
 0x10f   : > { %3737 = vmatpush.bf16.msra.mxu1 %v4475_v20  ;;  %3706 = vmatmul.bf16.vlgmr.msrb.gmra.mxu2 %v7033_v43  ;;  %v4384_v20 = vld [vmem:[%s9809_s1 + $0x148] sm:$0xf0]  ;;  %v6211_v43 = vld [vmem:[%s9809_s1 + $0x1c4] sm:$0xf] }
 0x110   : > { %3750 = vmatpush.bf16.msra.mxu2 %v4539_v55  ;;  %3719 = vmatmul.bf16.vlgmr.msrb.gmra.mxu3 %v7041_v48  ;;  %v4587_v55 = vor.u32 %v6245_v33, %v4584_v34  ;;  %v4448_v48 = vld [vmem:[%s9809_s1 + $0x1c8] sm:$0xf0]  ;;  %v4387_v0 = vor.u32 %v6195_v5, %v4384_v20  ;;  %v4443_v34 = vor.u32 %v6209_v23, %v4440_v22  ;;  %v6207_v5 = vld [vmem:[%s9809_s1 + $0x1a4] sm:$0xf]  ;;  %v4360_v23 = vld [vmem:[%s9809_s1 + $0x118] sm:$0xf0] }
 0x111   : > { %3763 = vmatpush.bf16.msra.mxu3 %v4603_v59  ;;  %v6243_v59 = vld [vmem:[%s9809_s1 + $0x2c4] sm:$0xf]  ;;  %v4451_v4 = vor.u32 %v6211_v43, %v4448_v48  ;;  %v4571_v20 = vor.u32 %v6241_v32, %v4568_v28  ;;  %v4424_v22 = vld [vmem:[%s9809_s1 + $0x198] sm:$0xf0]  ;;  %v6237_v32 = vld [vmem:[%s9809_s1 + $0x294] sm:$0xf] }
 0x112   : > { %3725 = vmatpush.bf16.msra.mxu0 %v4403_v13  ;;  %v4515_v13 = vor.u32 %v6227_v47, %v4512_v49  ;;  %v4579_v18 = vor.u32 %v6243_v59, %v4576_v61  ;;  %v3499_v43 = vpop.f32.mrf.mxu2  ;;  %v6223_v48 = vld [vmem:[%s9809_s1 + $0x224] sm:$0xf]  ;;  %v4496_v47 = vld [vmem:[%s9809_s1 + $0x228] sm:$0xf0]  ;;  %v3475_v63 = vpop.f32.mrf.mxu0  ;;  %v4552_v28 = vld [vmem:[%s9809_s1 + $0x298] sm:$0xf0] }
 0x113   : > { %3738 = vmatpush.bf16.msra.mxu1 %v4467_v15  ;;  %v6193_v15 = vld [vmem:[%s9809_s1 + $0x134] sm:$0xf]  ;;  %v3500_v49 = vadd.f32 %v3499_v43, %v3487_v27  ;;  %v3512_v56 = vpop.f32.mrf.mxu3  ;;  %v6239_v59 = vld [vmem:[%s9809_s1 + $0x2a4] sm:$0xf]  ;;  %v4560_v61 = vld [vmem:[%s9809_s1 + $0x2a8] sm:$0xf0]  ;;  %v3488_v2 = vpop.f32.mrf.mxu1 }
 0x114   : > { %3751 = vmatpush.bf16.msra.mxu2 %v4531_v17  ;;  %v4376_v17 = vld [vmem:[%s9809_s1 + $0x138] sm:$0xf0]  ;;  %v4563_v27 = vor.u32 %v6239_v59, %v4560_v61  ;;  %v6219_v43 = vld [vmem:[%s9809_s1 + $0x204] sm:$0xf]  ;;  %v6265_v59 = vld [vmem:[%s9809_s1 + $0x374] sm:$0xf] }
 0x115   : > { %3764 = vmatpush.bf16.msra.mxu3 %v4595_v30  ;;  %v6225_v30 = vld [vmem:[%s9809_s1 + $0x234] sm:$0xf]  ;;  %v4379_v33 = vor.u32 %v6193_v15, %v4376_v17  ;;  %v4499_v15 = vor.u32 %v6223_v48, %v4496_v47  ;;  %v4480_v48 = vld [vmem:[%s9809_s1 + $0x208] sm:$0xf0]  ;;  %v6235_v47 = vld [vmem:[%s9809_s1 + $0x284] sm:$0xf] }
 0x116   : > { %3726 = vmatpush.bf16.msra.mxu0 %v4395_v37  ;;  %v4507_v37 = vor.u32 %v6225_v30, %v4504_v31  ;;  %v6189_v17 = vld [vmem:[%s9809_s1 + $0x114] sm:$0xf]  ;;  %v4488_v31 = vld [vmem:[%s9809_s1 + $0x218] sm:$0xf0] }
 0x117   : > { %3739 = vmatpush.bf16.msra.mxu1 %v4459_v54  ;;  %v6191_v54 = vld [vmem:[%s9809_s1 + $0x124] sm:$0xf]  ;;  %v6221_v30 = vld [vmem:[%s9809_s1 + $0x214] sm:$0xf]  ;;  %v4664_v61 = vld [vmem:[%s9809_s1 + $0x378] sm:$0xf0] }
 0x118   : > { %3752 = vmatpush.bf16.msra.mxu2 %v4523_v39  ;;  %v4368_v39 = vld [vmem:[%s9809_s1 + $0x128] sm:$0xf0]  ;;  %v6281_v63 = vld [vmem:[%s9809_s1 + $0x3f4] sm:$0xf] }
 0x119   : > { %3765 = vmatpush.bf16.msra.mxu3 %v4587_v55  ;;  %v4432_v55 = vld [vmem:[%s9809_s1 + $0x1a8] sm:$0xf0] }
 0x11a   : > { %3727 = vmatpush.bf16.msra.mxu0 %v4387_v0  ;;  %v4371_v0 = vor.u32 %v6191_v54, %v4368_v39  ;;  %v4491_v39 = vor.u32 %v6221_v30, %v4488_v31  ;;  %v4667_v31 = vor.u32 %v6265_v59, %v4664_v61  ;;  %v4648_v59 = vld [vmem:[%s9809_s1 + $0x358] sm:$0xf0]  ;;  %v6277_v61 = vld [vmem:[%s9809_s1 + $0x3d4] sm:$0xf] }
 0x11b   : > { %3740 = vmatpush.bf16.msra.mxu1 %v4451_v4  ;;  %v8542_v4 = vadd.f32 %v3512_v56, %v3500_v49  ;;  %v4544_v49 = vld [vmem:[%s9809_s1 + $0x288] sm:$0xf0]  ;;  %v3501_v56 = vpop.f32.mrf.mxu2 }
 0x11c   : > { %3753 = vmatpush.bf16.msra.mxu2 %v4515_v13  ;;  %v4435_v13 = vor.u32 %v6207_v5, %v4432_v55  ;;  %v6203_v5 = vld [vmem:[%s9809_s1 + $0x184] sm:$0xf]  ;;  %v4555_v55 = vor.u32 %v6237_v32, %v4552_v28  ;;  %v4547_v30 = vor.u32 %v6235_v47, %v4544_v49  ;;  %v6261_v56 = vld [vmem:[%s9809_s1 + $0x354] sm:$0xf] }
 0x11d   : > { %3766 = vmatpush.bf16.msra.mxu3 %v4579_v18  ;;  %v6205_v18 = vld [vmem:[%s9809_s1 + $0x194] sm:$0xf] }
 0x11e   : > { %3728 = vmatpush.bf16.msra.mxu0 %v4379_v33  ;;  %v4363_v33 = vor.u32 %v6189_v17, %v4360_v23  ;;  %v4427_v54 = vor.u32 %v6205_v18, %v4424_v22  ;;  %v4792_v17 = vld [vmem:[%s9809_s1 + $0x478] sm:$0xf0]  ;;  %v4483_v18 = vor.u32 %v6219_v43, %v4480_v48  ;;  %v6311_v43 = vld [vmem:[%s9809_s1 + $0x4e4] sm:$0xf] }
 0x11f   : > { %3741 = vmatpush.bf16.msra.mxu1 %v4443_v34  ;;  %v6187_v34 = vld [vmem:[%s9809_s1 + $0x104] sm:$0xf]  ;;  %v4856_v22 = vld [vmem:[%s9809_s1 + $0x4f8] sm:$0xf0] }
 0x120   : > { %3754 = vmatpush.bf16.msra.mxu2 %v4507_v37  ;;  %v4352_v37 = vld [vmem:[%s9809_s1 + $0x108] sm:$0xf0] }
 0x121   : > { %3767 = vmatpush.bf16.msra.mxu3 %v4571_v20  ;;  %v4416_v20 = vld [vmem:[%s9809_s1 + $0x188] sm:$0xf0]  ;;  %v4355_v2 = vor.u32 %v6187_v34, %v4352_v37  ;;  %v6279_v37 = vld [vmem:[%s9809_s1 + $0x3e4] sm:$0xf] }
 0x122   : > { %3729 = vmatpush.bf16.msra.mxu0 %v4371_v0  ;;  %v3514_v0 = vpop.f32.mrf.mxu3  ;;  %v4419_v23 = vor.u32 %v6203_v5, %v4416_v20  ;;  %v4656_v34 = vld [vmem:[%s9809_s1 + $0x368] sm:$0xf0]  ;;  %v6295_v5 = vld [vmem:[%s9809_s1 + $0x464] sm:$0xf] }
 0x123   : > { %3742 = vmatpush.bf16.msra.mxu1 %v4435_v13  ;;  %v4728_v13 = vld [vmem:[%s9809_s1 + $0x3f8] sm:$0xf0]  ;;  %v4784_v20 = vld [vmem:[%s9809_s1 + $0x468] sm:$0xf0] }
 0x124   : > { %3755 = vmatpush.bf16.msra.mxu2 %v4499_v15  ;;  %v6297_v15 = vld [vmem:[%s9809_s1 + $0x474] sm:$0xf]  ;;  %v4731_v32 = vor.u32 %v6281_v63, %v4728_v13  ;;  %v4787_v49 = vor.u32 %v6295_v5, %v4784_v20  ;;  %v4712_v0 = vld [vmem:[%s9809_s1 + $0x3d8] sm:$0xf0] }
 0x125   : > { %3768 = vmatpush.bf16.msra.mxu3 %v4563_v27  ;;  %v6313_v27 = vld [vmem:[%s9809_s1 + $0x4f4] sm:$0xf]  ;;  %v4795_v28 = vor.u32 %v6297_v15, %v4792_v17  ;;  %v4776_v13 = vld [vmem:[%s9809_s1 + $0x458] sm:$0xf0]  ;;  %v4651_v17 = vor.u32 %v6261_v56, %v4648_v59 }
 0x126   : > { %3730 = vmatpush.bf16.msra.mxu0 %v4363_v33  ;;  %v6263_v33 = vld [vmem:[%s9809_s1 + $0x364] sm:$0xf]  ;;  %v6309_v15 = vld [vmem:[%s9809_s1 + $0x4d4] sm:$0xf]  ;;  %v4760_v56 = vld [vmem:[%s9809_s1 + $0x438] sm:$0xf0] }
 0x127   : > { %3743 = vmatpush.bf16.msra.mxu1 %v4427_v54  ;;  %v4859_v54 = vor.u32 %v6313_v27, %v4856_v22  ;;  %v4659_v48 = vor.u32 %v6263_v33, %v4656_v34  ;;  %v6259_v27 = vld [vmem:[%s9809_s1 + $0x344] sm:$0xf]  ;;  %v4640_v22 = vld [vmem:[%s9809_s1 + $0x348] sm:$0xf0]  ;;  %v6257_v20 = vld [vmem:[%s9809_s1 + $0x334] sm:$0xf] }
 0x128   : > { %3756 = vmatpush.bf16.msra.mxu2 %v4491_v39  ;;  %v4720_v39 = vld [vmem:[%s9809_s1 + $0x3e8] sm:$0xf0]  ;;  %v6305_v59 = vld [vmem:[%s9809_s1 + $0x4b4] sm:$0xf] }
 0x129   : > { %3769 = vmatpush.bf16.msra.mxu3 %v4555_v55  ;;  %v4848_v55 = vld [vmem:[%s9809_s1 + $0x4e8] sm:$0xf0]  ;;  %v4723_v47 = vor.u32 %v6279_v37, %v4720_v39  ;;  %v4643_v37 = vor.u32 %v6259_v27, %v4640_v22  ;;  %v6287_v27 = vld [vmem:[%s9809_s1 + $0x424] sm:$0xf] }
 0x12a   : > { %3731 = vmatpush.bf16.msra.mxu0 %v4355_v2  ;;  %v4851_v63 = vor.u32 %v6311_v43, %v4848_v55  ;;  %v6293_v2 = vld [vmem:[%s9809_s1 + $0x454] sm:$0xf]  ;;  %v4832_v33 = vld [vmem:[%s9809_s1 + $0x4c8] sm:$0xf0]  ;;  %v4632_v43 = vld [vmem:[%s9809_s1 + $0x338] sm:$0xf0] }
 0x12b   : > { %3744 = vmatpush.bf16.msra.mxu1 %v4419_v23  ;;  %v4715_v23 = vor.u32 %v6277_v61, %v4712_v0  ;;  %v6273_v55 = vld [vmem:[%s9809_s1 + $0x3b4] sm:$0xf]  ;;  %v4824_v61 = vld [vmem:[%s9809_s1 + $0x4b8] sm:$0xf0]  ;;  %v4752_v22 = vld [vmem:[%s9809_s1 + $0x428] sm:$0xf0] }
 0x12c   : > { %3757 = vmatpush.bf16.msra.mxu2 %v4483_v18  ;;  %v4779_v18 = vor.u32 %v6293_v2, %v4776_v13  ;;  %v6255_v13 = vld [vmem:[%s9809_s1 + $0x324] sm:$0xf] }
 0x12d   : > { %3770 = vmatpush.bf16.msra.mxu3 %v4547_v30  ;;  %3732 = vmatmul.bf16.vlgmr.msra.gmra.mxu0 %v7031_v42  ;;  %v6275_v42 = vld [vmem:[%s9809_s1 + $0x3c4] sm:$0xf] }
 0x12e   : > { %3776 = vmatpush.bf16.msrb.mxu0 %v4667_v31  ;;  %3745 = vmatmul.bf16.vlgmr.msra.gmra.mxu1 %v7066_v62  ;;  %v4704_v62 = vld [vmem:[%s9809_s1 + $0x3c8] sm:$0xf0]  ;;  %v6291_v30 = vld [vmem:[%s9809_s1 + $0x444] sm:$0xf] }
 0x12f   : > { %3789 = vmatpush.bf16.msrb.mxu1 %v4731_v32  ;;  %3758 = vmatmul.bf16.vlgmr.msra.gmra.mxu2 %v7176_v6  ;;  %v4840_v6 = vld [vmem:[%s9809_s1 + $0x4d8] sm:$0xf0]  ;;  %v4768_v31 = vld [vmem:[%s9809_s1 + $0x448] sm:$0xf0]  ;;  %v3525_v32 = vpop.f32.mrf.mxu0  ;;  %v4707_v39 = vor.u32 %v6275_v42, %v4704_v62  ;;  %v6303_v62 = vld [vmem:[%s9809_s1 + $0x4a4] sm:$0xf] }
 0x130   : > { %3802 = vmatpush.bf16.msrb.mxu2 %v4795_v28  ;;  %3771 = vmatmul.bf16.vlgmr.msra.gmra.mxu3 %v7186_v10  ;;  %v4843_v10 = vor.u32 %v6309_v15, %v4840_v6  ;;  %v6307_v28 = vld [vmem:[%s9809_s1 + $0x4c4] sm:$0xf]  ;;  %v3526_v34 = vadd.f32 %v3525_v32, %v8542_v4  ;;  %v4771_v5 = vor.u32 %v6291_v30, %v4768_v31  ;;  %v4624_v15 = vld [vmem:[%s9809_s1 + $0x328] sm:$0xf0] }
 0x131   : > { %3815 = vmatpush.bf16.msrb.mxu3 %v4859_v54  ;;  %v3538_v54 = vpop.f32.mrf.mxu1  ;;  %v4835_v4 = vor.u32 %v6307_v28, %v4832_v33  ;;  %v6271_v6 = vld [vmem:[%s9809_s1 + $0x3a4] sm:$0xf]  ;;  %v4816_v30 = vld [vmem:[%s9809_s1 + $0x4a8] sm:$0xf0]  ;;  %v4627_v32 = vor.u32 %v6255_v13, %v4624_v15 }
 0x132   : > { %3777 = vmatpush.bf16.msrb.mxu0 %v4659_v48  ;;  %v3539_v48 = vadd.f32 %v3538_v54, %v3526_v34  ;;  %v6253_v54 = vld [vmem:[%s9809_s1 + $0x314] sm:$0xf]  ;;  %v6283_v13 = vld [vmem:[%s9809_s1 + $0x404] sm:$0xf] }
 0x133   : > { %3790 = vmatpush.bf16.msrb.mxu1 %v4723_v47  ;;  %v4696_v47 = vld [vmem:[%s9809_s1 + $0x3b8] sm:$0xf0] }
 0x134   : > { %3803 = vmatpush.bf16.msrb.mxu2 %v4787_v49  ;;  %v6289_v49 = vld [vmem:[%s9809_s1 + $0x434] sm:$0xf]  ;;  %v4699_v0 = vor.u32 %v6273_v55, %v4696_v47  ;;  %v4808_v47 = vld [vmem:[%s9809_s1 + $0x498] sm:$0xf0] }
 0x135   : > { %3816 = vmatpush.bf16.msrb.mxu3 %v4851_v63  ;;  %v4635_v63 = vor.u32 %v6257_v20, %v4632_v43  ;;  %v4763_v2 = vor.u32 %v6289_v49, %v4760_v56  ;;  %v4819_v20 = vor.u32 %v6303_v62, %v4816_v30  ;;  %v4680_v43 = vld [vmem:[%s9809_s1 + $0x398] sm:$0xf0]  ;;  %v6285_v55 = vld [vmem:[%s9809_s1 + $0x414] sm:$0xf]  ;;  %v6251_v56 = vld [vmem:[%s9809_s1 + $0x304] sm:$0xf] }
 0x136   : > { %3778 = vmatpush.bf16.msrb.mxu0 %v4651_v17  ;;  %v4827_v17 = vor.u32 %v6305_v59, %v4824_v61  ;;  %v4608_v59 = vld [vmem:[%s9809_s1 + $0x308] sm:$0xf0]  ;;  %v4984_v30 = vld [vmem:[%s9809_s1 + $0x5f8] sm:$0xf0] }
 0x137   : > { %3791 = vmatpush.bf16.msrb.mxu1 %v4715_v23  ;;  %v3551_v23 = vpop.f32.mrf.mxu2  ;;  %v3527_v31 = vpop.f32.mrf.mxu0  ;;  %v4611_v62 = vor.u32 %v6251_v56, %v4608_v59  ;;  %v6359_v56 = vld [vmem:[%s9809_s1 + $0x664] sm:$0xf]  ;;  %v5040_v59 = vld [vmem:[%s9809_s1 + $0x668] sm:$0xf0] }
 0x138   : > { %3804 = vmatpush.bf16.msrb.mxu2 %v4779_v18  ;;  %v4688_v18 = vld [vmem:[%s9809_s1 + $0x3a8] sm:$0xf0]  ;;  %v3552_v42 = vadd.f32 %v3551_v23, %v3539_v48  ;;  %v6301_v48 = vld [vmem:[%s9809_s1 + $0x494] sm:$0xf] }
 0x139   : > { %3817 = vmatpush.bf16.msrb.mxu3 %v4843_v10  ;;  %v3564_v10 = vpop.f32.mrf.mxu3  ;;  %v3540_v28 = vpop.f32.mrf.mxu1  ;;  %v4691_v34 = vor.u32 %v6271_v6, %v4688_v18  ;;  %v4811_v15 = vor.u32 %v6301_v48, %v4808_v47  ;;  %v4736_v6 = vld [vmem:[%s9809_s1 + $0x408] sm:$0xf0]  ;;  %v6361_v31 = vld [vmem:[%s9809_s1 + $0x674] sm:$0xf]  ;;  %v6343_v48 = vld [vmem:[%s9809_s1 + $0x5e4] sm:$0xf] }
 0x13a   : > { %3779 = vmatpush.bf16.msrb.mxu0 %v4643_v37  ;;  %v8741_v33 = vadd.f32 %v3564_v10, %v3552_v42  ;;  %v4755_v37 = vor.u32 %v6287_v27, %v4752_v22  ;;  %v4800_v23 = vld [vmem:[%s9809_s1 + $0x488] sm:$0xf0]  ;;  %v6329_v27 = vld [vmem:[%s9809_s1 + $0x574] sm:$0xf]  ;;  %v4920_v22 = vld [vmem:[%s9809_s1 + $0x578] sm:$0xf0] }
 0x13b   : > { %3792 = vmatpush.bf16.msrb.mxu1 %v4707_v39  ;;  %v4616_v39 = vld [vmem:[%s9809_s1 + $0x318] sm:$0xf0]  ;;  %v6345_v42 = vld [vmem:[%s9809_s1 + $0x5f4] sm:$0xf] }
 0x13c   : > { %3805 = vmatpush.bf16.msrb.mxu2 %v4771_v5  ;;  %v6269_v5 = vld [vmem:[%s9809_s1 + $0x394] sm:$0xf]  ;;  %v4619_v49 = vor.u32 %v6253_v54, %v4616_v39  ;;  %v5112_v54 = vld [vmem:[%s9809_s1 + $0x6f8] sm:$0xf0] }
 0x13d   : > { %3818 = vmatpush.bf16.msrb.mxu3 %v4835_v4  ;;  %v4744_v4 = vld [vmem:[%s9809_s1 + $0x418] sm:$0xf0]  ;;  %v4683_v61 = vor.u32 %v6269_v5, %v4680_v43  ;;  %v4923_v5 = vor.u32 %v6329_v27, %v4920_v22  ;;  %v6357_v27 = vld [vmem:[%s9809_s1 + $0x654] sm:$0xf] }
 0x13e   : > { %3780 = vmatpush.bf16.msrb.mxu0 %v4635_v63  ;;  %v4747_v63 = vor.u32 %v6285_v55, %v4744_v4  ;;  %v6327_v55 = vld [vmem:[%s9809_s1 + $0x564] sm:$0xf]  ;;  %v4912_v4 = vld [vmem:[%s9809_s1 + $0x568] sm:$0xf0]  ;;  %v5032_v22 = vld [vmem:[%s9809_s1 + $0x658] sm:$0xf0] }
 0x13f   : > { %3793 = vmatpush.bf16.msrb.mxu1 %v4699_v0  ;;  %v6267_v0 = vld [vmem:[%s9809_s1 + $0x384] sm:$0xf]  ;;  %v3553_v18 = vpop.f32.mrf.mxu2  ;;  %v5035_v35 = vor.u32 %v6357_v27, %v5032_v22  ;;  %v5008_v22 = vld [vmem:[%s9809_s1 + $0x628] sm:$0xf0] }
 0x140   : > { %3806 = vmatpush.bf16.msrb.mxu2 %v4763_v2  ;;  %v4672_v2 = vld [vmem:[%s9809_s1 + $0x388] sm:$0xf0]  ;;  %v4968_v18 = vld [vmem:[%s9809_s1 + $0x5d8] sm:$0xf0]  ;;  %v6351_v27 = vld [vmem:[%s9809_s1 + $0x624] sm:$0xf] }
 0x141   : > { %3819 = vmatpush.bf16.msrb.mxu3 %v4827_v17  ;;  %v6299_v17 = vld [vmem:[%s9809_s1 + $0x484] sm:$0xf]  ;;  %v3566_v10 = vpop.f32.mrf.mxu3  ;;  %v4675_v28 = vor.u32 %v6267_v0, %v4672_v2  ;;  %v4915_v0 = vor.u32 %v6327_v55, %v4912_v4  ;;  %v4888_v55 = vld [vmem:[%s9809_s1 + $0x538] sm:$0xf0]  ;;  %v6337_v4 = vld [vmem:[%s9809_s1 + $0x5b4] sm:$0xf] }
 0x142   : > { %3781 = vmatpush.bf16.msrb.mxu0 %v4627_v32  ;;  %v5048_v32 = vld [vmem:[%s9809_s1 + $0x678] sm:$0xf0]  ;;  %v4803_v39 = vor.u32 %v6299_v17, %v4800_v23  ;;  %v6341_v17 = vld [vmem:[%s9809_s1 + $0x5d4] sm:$0xf] }
 0x143   : > { %3794 = vmatpush.bf16.msrb.mxu1 %v4691_v34  ;;  %v4739_v34 = vor.u32 %v6283_v13, %v4736_v6  ;;  %v5051_v43 = vor.u32 %v6361_v31, %v5048_v32  ;;  %v5043_v13 = vor.u32 %v6359_v56, %v5040_v59  ;;  %v4904_v6 = vld [vmem:[%s9809_s1 + $0x558] sm:$0xf0]  ;;  %v4971_v10 = vor.u32 %v6341_v17, %v4968_v18  ;;  %v5024_v31 = vld [vmem:[%s9809_s1 + $0x648] sm:$0xf0]  ;;  %v6369_v59 = vld [vmem:[%s9809_s1 + $0x6b4] sm:$0xf] }
 0x144   : > { %3807 = vmatpush.bf16.msrb.mxu2 %v4755_v37  ;;  %v6377_v37 = vld [vmem:[%s9809_s1 + $0x6f4] sm:$0xf]  ;;  %v5016_v56 = vld [vmem:[%s9809_s1 + $0x638] sm:$0xf0]  ;;  %v4944_v18 = vld [vmem:[%s9809_s1 + $0x5a8] sm:$0xf0] }
 0x145   : > { %3820 = vmatpush.bf16.msrb.mxu3 %v4819_v20  ;;  %v4987_v20 = vor.u32 %v6345_v42, %v4984_v30  ;;  %v5115_v47 = vor.u32 %v6377_v37, %v5112_v54  ;;  %v6355_v30 = vld [vmem:[%s9809_s1 + $0x644] sm:$0xf] }
 0x146   : > { %3782 = vmatpush.bf16.msrb.mxu0 %v4619_v49  ;;  %v4976_v49 = vld [vmem:[%s9809_s1 + $0x5e8] sm:$0xf0] }
 0x147   : > { %3795 = vmatpush.bf16.msrb.mxu1 %v4683_v61  ;;  %v6375_v61 = vld [vmem:[%s9809_s1 + $0x6e4] sm:$0xf]  ;;  %v4979_v2 = vor.u32 %v6343_v48, %v4976_v49  ;;  %v6353_v49 = vld [vmem:[%s9809_s1 + $0x634] sm:$0xf] }
 0x148   : > { %3808 = vmatpush.bf16.msrb.mxu2 %v4747_v63  ;;  %v5104_v63 = vld [vmem:[%s9809_s1 + $0x6e8] sm:$0xf0] }
 0x149   : > { %3821 = vmatpush.bf16.msrb.mxu3 %v4811_v15  ;;  %v6325_v15 = vld [vmem:[%s9809_s1 + $0x554] sm:$0xf]  ;;  %v5107_v23 = vor.u32 %v6375_v61, %v5104_v63  ;;  %v5080_v61 = vld [vmem:[%s9809_s1 + $0x6b8] sm:$0xf0] }
 0x14a   : > { %3783 = vmatpush.bf16.msrb.mxu0 %v4611_v62  ;;  %v4907_v42 = vor.u32 %v6325_v15, %v4904_v6  ;;  %v4960_v62 = vld [vmem:[%s9809_s1 + $0x5c8] sm:$0xf0]  ;;  %v3577_v32 = vpop.f32.mrf.mxu0  ;;  %v6335_v6 = vld [vmem:[%s9809_s1 + $0x5a4] sm:$0xf]  ;;  %v5083_v17 = vor.u32 %v6369_v59, %v5080_v61 }
 0x14b   : > { %3796 = vmatpush.bf16.msrb.mxu1 %v4675_v28  ;;  %v6371_v28 = vld [vmem:[%s9809_s1 + $0x6c4] sm:$0xf]  ;;  %v3578_v37 = vadd.f32 %v3577_v32, %v8741_v33  ;;  %v4880_v15 = vld [vmem:[%s9809_s1 + $0x528] sm:$0xf0]  ;;  %v6333_v32 = vld [vmem:[%s9809_s1 + $0x594] sm:$0xf] }
 0x14c   : > { %3809 = vmatpush.bf16.msrb.mxu2 %v4739_v34  ;;  %v5088_v34 = vld [vmem:[%s9809_s1 + $0x6c8] sm:$0xf0]  ;;  %v6363_v61 = vld [vmem:[%s9809_s1 + $0x684] sm:$0xf] }
 0x14d   : > { %3822 = vmatpush.bf16.msrb.mxu3 %v4803_v39  ;;  %3784 = vmatmul.bf16.vlgmr.msrb.gmra.mxu0 %v257_v50  ;;  %v5096_v50 = vld [vmem:[%s9809_s1 + $0x6d8] sm:$0xf0]  ;;  %v3590_v39 = vpop.f32.mrf.mxu1  ;;  %v5091_v33 = vor.u32 %v6371_v28, %v5088_v34  ;;  %v4992_v59 = vld [vmem:[%s9809_s1 + $0x608] sm:$0xf0] }
 0x14e   : > { %3828 = vmatpush.bf16.msra.mxu0 %v4923_v5  ;;  %3797 = vmatmul.bf16.vlgmr.msrb.gmra.mxu1 %v258_v21  ;;  %v4896_v21 = vld [vmem:[%s9809_s1 + $0x548] sm:$0xf0]  ;;  %v3591_v48 = vadd.f32 %v3590_v39, %v3578_v37  ;;  %v4936_v34 = vld [vmem:[%s9809_s1 + $0x598] sm:$0xf0]  ;;  %v6349_v37 = vld [vmem:[%s9809_s1 + $0x614] sm:$0xf] }
 0x14f   : > { %3841 = vmatpush.bf16.msra.mxu1 %v4987_v20  ;;  %3810 = vmatmul.bf16.vlgmr.msrb.gmra.mxu2 %v259_v58  ;;  %v6339_v58 = vld [vmem:[%s9809_s1 + $0x5c4] sm:$0xf]  ;;  %v4899_v54 = vor.u32 %v6323_v9, %v4896_v21  ;;  %v5027_v20 = vor.u32 %v6355_v30, %v5024_v31  ;;  %v6317_v30 = vld [vmem:[%s9809_s1 + $0x514] sm:$0xf]  ;;  %v4872_v31 = vld [vmem:[%s9809_s1 + $0x518] sm:$0xf0] }
 0x150   : > { %3854 = vmatpush.bf16.msra.mxu2 %v5051_v43  ;;  %3823 = vmatmul.bf16.vlgmr.msrb.gmra.mxu3 %v7368_v11  ;;  %v5099_v11 = vor.u32 %v6373_v26, %v5096_v50  ;;  %v4963_v5 = vor.u32 %v6339_v58, %v4960_v62  ;;  %v6321_v43 = vld [vmem:[%s9809_s1 + $0x534] sm:$0xf]  ;;  %v5011_v62 = vor.u32 %v6351_v27, %v5008_v22  ;;  %v5304_v27 = vld [vmem:[%s9809_s1 + $0x878] sm:$0xf0] }
 0x151   : > { %3867 = vmatpush.bf16.msra.mxu3 %v5115_v47  ;;  %v4952_v47 = vld [vmem:[%s9809_s1 + $0x5b8] sm:$0xf0]  ;;  %v4891_v63 = vor.u32 %v6321_v43, %v4888_v55  ;;  %v6365_v39 = vld [vmem:[%s9809_s1 + $0x694] sm:$0xf]  ;;  %v6315_v43 = vld [vmem:[%s9809_s1 + $0x504] sm:$0xf] }
 0x152   : > { %3829 = vmatpush.bf16.msra.mxu0 %v4915_v0  ;;  %v4955_v0 = vor.u32 %v6337_v4, %v4952_v47  ;;  %v4864_v55 = vld [vmem:[%s9809_s1 + $0x508] sm:$0xf0]  ;;  %v4939_v4 = vor.u32 %v6333_v32, %v4936_v34 }
 0x153   : > { %3842 = vmatpush.bf16.msra.mxu1 %v4979_v2  ;;  %v5019_v2 = vor.u32 %v6353_v49, %v5016_v56  ;;  %v3616_v50 = vpop.f32.mrf.mxu3  ;;  %v4928_v47 = vld [vmem:[%s9809_s1 + $0x588] sm:$0xf0]  ;;  %v6347_v49 = vld [vmem:[%s9809_s1 + $0x604] sm:$0xf] }
 0x154   : > { %3855 = vmatpush.bf16.msra.mxu2 %v5043_v13  ;;  %v6319_v13 = vld [vmem:[%s9809_s1 + $0x524] sm:$0xf]  ;;  %v5232_v32 = vld [vmem:[%s9809_s1 + $0x7e8] sm:$0xf0] }
 0x155   : > { %3868 = vmatpush.bf16.msra.mxu3 %v5107_v23  ;;  %v3603_v23 = vpop.f32.mrf.mxu2  ;;  %v4883_v9 = vor.u32 %v6319_v13, %v4880_v15  ;;  %v3592_v21 = vpop.f32.mrf.mxu1  ;;  %v5176_v13 = vld [vmem:[%s9809_s1 + $0x778] sm:$0xf0]  ;;  %v6409_v15 = vld [vmem:[%s9809_s1 + $0x7f4] sm:$0xf]  ;;  %v5296_v34 = vld [vmem:[%s9809_s1 + $0x868] sm:$0xf0] }
 0x156   : > { %3830 = vmatpush.bf16.msra.mxu0 %v4907_v42  ;;  %v3604_v26 = vadd.f32 %v3603_v23, %v3591_v48  ;;  %v6367_v42 = vld [vmem:[%s9809_s1 + $0x6a4] sm:$0xf]  ;;  %v5240_v23 = vld [vmem:[%s9809_s1 + $0x7f8] sm:$0xf0] }
 0x157   : > { %3843 = vmatpush.bf16.msra.mxu1 %v4971_v10  ;;  %v5072_v10 = vld [vmem:[%s9809_s1 + $0x6a8] sm:$0xf0]  ;;  %v6331_v48 = vld [vmem:[%s9809_s1 + $0x584] sm:$0xf] }
 0x158   : > { %3856 = vmatpush.bf16.msra.mxu2 %v5035_v35  ;;  %v3579_v35 = vpop.f32.mrf.mxu0  ;;  %v8943_v58 = vadd.f32 %v3616_v50, %v3604_v26  ;;  %v5075_v28 = vor.u32 %v6367_v42, %v5072_v10  ;;  %v4931_v22 = vor.u32 %v6331_v48, %v4928_v47  ;;  %v4995_v26 = vor.u32 %v6347_v49, %v4992_v59  ;;  %v6441_v50 = vld [vmem:[%s9809_s1 + $0x8f4] sm:$0xf]  ;;  %v5368_v42 = vld [vmem:[%s9809_s1 + $0x8f8] sm:$0xf0] }
 0x159   : > { %3869 = vmatpush.bf16.msra.mxu3 %v5099_v11  ;;  %v4947_v11 = vor.u32 %v6335_v6, %v4944_v18  ;;  %v6425_v18 = vld [vmem:[%s9809_s1 + $0x874] sm:$0xf]  ;;  %v5224_v48 = vld [vmem:[%s9809_s1 + $0x7d8] sm:$0xf0] }
 0x15a   : > { %3831 = vmatpush.bf16.msra.mxu0 %v4899_v54  ;;  %v5000_v54 = vld [vmem:[%s9809_s1 + $0x618] sm:$0xf0]  ;;  %v5307_v21 = vor.u32 %v6425_v18, %v5304_v27  ;;  %v6421_v47 = vld [vmem:[%s9809_s1 + $0x854] sm:$0xf] }
 0x15b   : > { %3844 = vmatpush.bf16.msra.mxu1 %v4963_v5  ;;  %v5064_v5 = vld [vmem:[%s9809_s1 + $0x698] sm:$0xf0]  ;;  %v3618_v6 = vpop.f32.mrf.mxu3 }
 0x15c   : > { %3857 = vmatpush.bf16.msra.mxu2 %v5027_v20  ;;  %v4875_v20 = vor.u32 %v6317_v30, %v4872_v31  ;;  %v5067_v56 = vor.u32 %v6365_v39, %v5064_v5  ;;  %v6407_v30 = vld [vmem:[%s9809_s1 + $0x7e4] sm:$0xf]  ;;  %v5371_v31 = vor.u32 %v6441_v50, %v5368_v42  ;;  %v5288_v49 = vld [vmem:[%s9809_s1 + $0x858] sm:$0xf0]  ;;  %v6385_v42 = vld [vmem:[%s9809_s1 + $0x734] sm:$0xf] }
 0x15d   : > { %3870 = vmatpush.bf16.msra.mxu3 %v5091_v33  ;;  %v5003_v33 = vor.u32 %v6349_v37, %v5000_v54  ;;  %v6439_v37 = vld [vmem:[%s9809_s1 + $0x8e4] sm:$0xf]  ;;  %v5360_v54 = vld [vmem:[%s9809_s1 + $0x8e8] sm:$0xf0]  ;;  %v5235_v5 = vor.u32 %v6407_v30, %v5232_v32  ;;  %v6433_v30 = vld [vmem:[%s9809_s1 + $0x8b4] sm:$0xf] }
 0x15e   : > { %3832 = vmatpush.bf16.msra.mxu0 %v4891_v63  ;;  %v5056_v63 = vld [vmem:[%s9809_s1 + $0x688] sm:$0xf0] }
 0x15f   : > { %3845 = vmatpush.bf16.msra.mxu1 %v4955_v0  ;;  %v3605_v0 = vpop.f32.mrf.mxu2  ;;  %v5059_v10 = vor.u32 %v6363_v61, %v5056_v63  ;;  %v5291_v63 = vor.u32 %v6421_v47, %v5288_v49  ;;  %v6431_v47 = vld [vmem:[%s9809_s1 + $0x8a4] sm:$0xf]  ;;  %v5328_v49 = vld [vmem:[%s9809_s1 + $0x8a8] sm:$0xf0] }
 0x160   : > { %3858 = vmatpush.bf16.msra.mxu2 %v5019_v2  ;;  %v6393_v2 = vld [vmem:[%s9809_s1 + $0x774] sm:$0xf]  ;;  %v6403_v0 = vld [vmem:[%s9809_s1 + $0x7c4] sm:$0xf] }
 0x161   : > { %3871 = vmatpush.bf16.msra.mxu3 %v5083_v17  ;;  %v4867_v17 = vor.u32 %v6315_v43, %v4864_v55  ;;  %v5179_v35 = vor.u32 %v6393_v2, %v5176_v13  ;;  %v6389_v43 = vld [vmem:[%s9809_s1 + $0x754] sm:$0xf]  ;;  %v5160_v55 = vld [vmem:[%s9809_s1 + $0x758] sm:$0xf0]  ;;  %v5216_v2 = vld [vmem:[%s9809_s1 + $0x7c8] sm:$0xf0] }
 0x162   : > { %3833 = vmatpush.bf16.msra.mxu0 %v4883_v9  ;;  %v5243_v9 = vor.u32 %v6409_v15, %v5240_v23  ;;  %v5163_v59 = vor.u32 %v6389_v43, %v5160_v55  ;;  %v6419_v13 = vld [vmem:[%s9809_s1 + $0x844] sm:$0xf]  ;;  %v5280_v15 = vld [vmem:[%s9809_s1 + $0x848] sm:$0xf0] }
 0x163   : > { %3846 = vmatpush.bf16.msra.mxu1 %v4947_v11  ;;  %v6391_v11 = vld [vmem:[%s9809_s1 + $0x764] sm:$0xf]  ;;  %v5344_v23 = vld [vmem:[%s9809_s1 + $0x8c8] sm:$0xf0]  ;;  %v5283_v50 = vor.u32 %v6419_v13, %v5280_v15  ;;  %v5192_v13 = vld [vmem:[%s9809_s1 + $0x798] sm:$0xf0] }
 0x164   : > { %3859 = vmatpush.bf16.msra.mxu2 %v5011_v62  ;;  %v5168_v62 = vld [vmem:[%s9809_s1 + $0x768] sm:$0xf0]  ;;  %v6415_v55 = vld [vmem:[%s9809_s1 + $0x824] sm:$0xf]  ;;  %v6413_v15 = vld [vmem:[%s9809_s1 + $0x814] sm:$0xf] }
 0x165   : > { %3872 = vmatpush.bf16.msra.mxu3 %v5075_v28  ;;  %v6423_v28 = vld [vmem:[%s9809_s1 + $0x864] sm:$0xf]  ;;  %v5171_v39 = vor.u32 %v6391_v11, %v5168_v62  ;;  %v6417_v11 = vld [vmem:[%s9809_s1 + $0x834] sm:$0xf]  ;;  %v5272_v62 = vld [vmem:[%s9809_s1 + $0x838] sm:$0xf0] }
 0x166   : > { %3834 = vmatpush.bf16.msra.mxu0 %v4875_v20  ;;  %v5299_v20 = vor.u32 %v6423_v28, %v5296_v34  ;;  %v5275_v34 = vor.u32 %v6417_v11, %v5272_v62  ;;  %v5200_v43 = vld [vmem:[%s9809_s1 + $0x7a8] sm:$0xf0] }
 0x167   : > { %3847 = vmatpush.bf16.msra.mxu1 %v4939_v4  ;;  %v6405_v4 = vld [vmem:[%s9809_s1 + $0x7d4] sm:$0xf]  ;;  %v5312_v11 = vld [vmem:[%s9809_s1 + $0x888] sm:$0xf0] }
 0x168   : > { %3860 = vmatpush.bf16.msra.mxu2 %v5003_v33  ;;  %v5363_v33 = vor.u32 %v6439_v37, %v5360_v54  ;;  %v5227_v61 = vor.u32 %v6405_v4, %v5224_v48  ;;  %v6383_v37 = vld [vmem:[%s9809_s1 + $0x724] sm:$0xf]  ;;  %v5136_v54 = vld [vmem:[%s9809_s1 + $0x728] sm:$0xf0] }
 0x169   : > { %3873 = vmatpush.bf16.msra.mxu3 %v5067_v56  ;;  %v5352_v56 = vld [vmem:[%s9809_s1 + $0x8d8] sm:$0xf0]  ;;  %v5264_v4 = vld [vmem:[%s9809_s1 + $0x828] sm:$0xf0] }
 0x16a   : > { %3835 = vmatpush.bf16.msra.mxu0 %v4867_v17  ;;  %v3629_v6 = vpop.f32.mrf.mxu0  ;;  %v6435_v17 = vld [vmem:[%s9809_s1 + $0x8c4] sm:$0xf] }
 0x16b   : > { %3848 = vmatpush.bf16.msra.mxu1 %v4931_v22  ;;  %v3630_v18 = vadd.f32 %v3629_v6, %v8943_v58  ;;  %v3642_v22 = vpop.f32.mrf.mxu1  ;;  %v5347_v58 = vor.u32 %v6435_v17, %v5344_v23  ;;  %v5256_v6 = vld [vmem:[%s9809_s1 + $0x818] sm:$0xf0]  ;;  %v6429_v17 = vld [vmem:[%s9809_s1 + $0x894] sm:$0xf] }
 0x16c   : > { %3861 = vmatpush.bf16.msra.mxu2 %v4995_v26  ;;  %v5219_v26 = vor.u32 %v6403_v0, %v5216_v2  ;;  %v5128_v0 = vld [vmem:[%s9809_s1 + $0x718] sm:$0xf0]  ;;  %v5331_v2 = vor.u32 %v6431_v47, %v5328_v49  ;;  %v6455_v49 = vld [vmem:[%s9809_s1 + $0x964] sm:$0xf] }
 0x16d   : > { %3874 = vmatpush.bf16.msra.mxu3 %v5059_v10  ;;  %3836 = vmatmul.bf16.vlgmr.msra.gmra.mxu0 %v7366_v8  ;;  %v6437_v8 = vld [vmem:[%s9809_s1 + $0x8d4] sm:$0xf]  ;;  %v5144_v10 = vld [vmem:[%s9809_s1 + $0x738] sm:$0xf0] }
 0x16e   : > { %3880 = vmatpush.bf16.msrb.mxu0 %v5179_v35  ;;  %3849 = vmatmul.bf16.vlgmr.msra.gmra.mxu1 %v7376_v14  ;;  %v6387_v14 = vld [vmem:[%s9809_s1 + $0x744] sm:$0xf]  ;;  %v6401_v35 = vld [vmem:[%s9809_s1 + $0x7b4] sm:$0xf]  ;;  %v5147_v32 = vor.u32 %v6385_v42, %v5144_v10  ;;  %v5320_v23 = vld [vmem:[%s9809_s1 + $0x898] sm:$0xf0] }
 0x16f   : > { %3893 = vmatpush.bf16.msrb.mxu1 %v5243_v9  ;;  %3862 = vmatmul.bf16.vlgmr.msra.gmra.mxu2 %v7570_v19  ;;  %v5152_v19 = vld [vmem:[%s9809_s1 + $0x748] sm:$0xf0]  ;;  %v3643_v9 = vadd.f32 %v3642_v22, %v3630_v18  ;;  %v6395_v42 = vld [vmem:[%s9809_s1 + $0x784] sm:$0xf] }
 0x170   : > { %3906 = vmatpush.bf16.msrb.mxu2 %v5307_v21  ;;  %3875 = vmatmul.bf16.vlgmr.msra.gmra.mxu3 %v7583_v25  ;;  %v5355_v25 = vor.u32 %v6437_v8, %v5352_v56  ;;  %v5155_v27 = vor.u32 %v6387_v14, %v5152_v19  ;;  %v5208_v21 = vld [vmem:[%s9809_s1 + $0x7b8] sm:$0xf0]  ;;  %v5139_v56 = vor.u32 %v6383_v37, %v5136_v54  ;;  %v6381_v19 = vld [vmem:[%s9809_s1 + $0x714] sm:$0xf]  ;;  %v5120_v22 = vld [vmem:[%s9809_s1 + $0x708] sm:$0xf0] }
 0x171   : > { %3919 = vmatpush.bf16.msrb.mxu3 %v5371_v31  ;;  %v5336_v31 = vld [vmem:[%s9809_s1 + $0x8b8] sm:$0xf0]  ;;  %v5211_v28 = vor.u32 %v6401_v35, %v5208_v21  ;;  %v5267_v14 = vor.u32 %v6415_v55, %v5264_v4  ;;  %v5131_v18 = vor.u32 %v6381_v19, %v5128_v0  ;;  %v5184_v10 = vld [vmem:[%s9809_s1 + $0x788] sm:$0xf0]  ;;  %v6411_v35 = vld [vmem:[%s9809_s1 + $0x804] sm:$0xf] }
 0x172   : > { %3881 = vmatpush.bf16.msrb.mxu0 %v5171_v39  ;;  %v6399_v39 = vld [vmem:[%s9809_s1 + $0x7a4] sm:$0xf]  ;;  %v3631_v8 = vpop.f32.mrf.mxu0  ;;  %v5496_v37 = vld [vmem:[%s9809_s1 + $0x9f8] sm:$0xf0]  ;;  %v6489_v54 = vld [vmem:[%s9809_s1 + $0xa74] sm:$0xf] }
 0x173   : > { %3894 = vmatpush.bf16.msrb.mxu1 %v5235_v5  ;;  %v5339_v5 = vor.u32 %v6433_v30, %v5336_v31  ;;  %v3668_v48 = vpop.f32.mrf.mxu3  ;;  %v6427_v21 = vld [vmem:[%s9809_s1 + $0x884] sm:$0xf]  ;;  %v6457_v30 = vld [vmem:[%s9809_s1 + $0x974] sm:$0xf]  ;;  %v5432_v31 = vld [vmem:[%s9809_s1 + $0x978] sm:$0xf0] }
 0x174   : > { %3907 = vmatpush.bf16.msrb.mxu2 %v5299_v20  ;;  %v3655_v20 = vpop.f32.mrf.mxu2  ;;  %v5624_v55 = vld [vmem:[%s9809_s1 + $0xaf8] sm:$0xf0]  ;;  %v5315_v4 = vor.u32 %v6427_v21, %v5312_v11  ;;  %v5424_v8 = vld [vmem:[%s9809_s1 + $0x968] sm:$0xf0]  ;;  %v6503_v0 = vld [vmem:[%s9809_s1 + $0xae4] sm:$0xf] }
 0x175   : > { %3920 = vmatpush.bf16.msrb.mxu3 %v5363_v33  ;;  %v3656_v33 = vadd.f32 %v3655_v20, %v3643_v9  ;;  %v5248_v9 = vld [vmem:[%s9809_s1 + $0x808] sm:$0xf0]  ;;  %v6483_v21 = vld [vmem:[%s9809_s1 + $0xa44] sm:$0xf] }
 0x176   : > { %3882 = vmatpush.bf16.msrb.mxu0 %v5163_v59  ;;  %v3644_v59 = vpop.f32.mrf.mxu1  ;;  %v5251_v20 = vor.u32 %v6411_v35, %v5248_v9  ;;  %v5552_v19 = vld [vmem:[%s9809_s1 + $0xa68] sm:$0xf0] }
 0x177   : > { %3895 = vmatpush.bf16.msrb.mxu1 %v5227_v61  ;;  %v9142_v61 = vadd.f32 %v3668_v48, %v3656_v33  ;;  %v5435_v33 = vor.u32 %v6457_v30, %v5432_v31  ;;  %v5472_v9 = vld [vmem:[%s9809_s1 + $0x9c8] sm:$0xf0]  ;;  %v6499_v30 = vld [vmem:[%s9809_s1 + $0xac4] sm:$0xf] }
 0x178   : > { %3908 = vmatpush.bf16.msrb.mxu2 %v5291_v63  ;;  %v5203_v63 = vor.u32 %v6399_v39, %v5200_v43  ;;  %v5560_v39 = vld [vmem:[%s9809_s1 + $0xa78] sm:$0xf0]  ;;  %v6505_v43 = vld [vmem:[%s9809_s1 + $0xaf4] sm:$0xf]  ;;  %v5536_v11 = vld [vmem:[%s9809_s1 + $0xa48] sm:$0xf0] }
 0x179   : > { %3921 = vmatpush.bf16.msrb.mxu3 %v5355_v25  ;;  %v6397_v25 = vld [vmem:[%s9809_s1 + $0x794] sm:$0xf]  ;;  %v5563_v47 = vor.u32 %v6489_v54, %v5560_v39  ;;  %v5627_v59 = vor.u32 %v6505_v43, %v5624_v55  ;;  %v5600_v31 = vld [vmem:[%s9809_s1 + $0xac8] sm:$0xf0]  ;;  %v5539_v54 = vor.u32 %v6483_v21, %v5536_v11  ;;  %v5464_v55 = vld [vmem:[%s9809_s1 + $0x9b8] sm:$0xf0] }
 0x17a   : > { %3883 = vmatpush.bf16.msrb.mxu0 %v5155_v27  ;;  %v6379_v27 = vld [vmem:[%s9809_s1 + $0x704] sm:$0xf]  ;;  %v6449_v39 = vld [vmem:[%s9809_s1 + $0x934] sm:$0xf]  ;;  %v5512_v21 = vld [vmem:[%s9809_s1 + $0xa18] sm:$0xf0] }
 0x17b   : > { %3896 = vmatpush.bf16.msrb.mxu1 %v5219_v26  ;;  %v5195_v26 = vor.u32 %v6397_v25, %v5192_v13  ;;  %v5616_v25 = vld [vmem:[%s9809_s1 + $0xae8] sm:$0xf0]  ;;  %v6493_v11 = vld [vmem:[%s9809_s1 + $0xa94] sm:$0xf] }
 0x17c   : > { %3909 = vmatpush.bf16.msrb.mxu2 %v5283_v50  ;;  %v5259_v50 = vor.u32 %v6413_v15, %v5256_v6  ;;  %v3657_v62 = vpop.f32.mrf.mxu2  ;;  %v6453_v6 = vld [vmem:[%s9809_s1 + $0x954] sm:$0xf] }
 0x17d   : > { %3922 = vmatpush.bf16.msrb.mxu3 %v5347_v58  ;;  %v5323_v58 = vor.u32 %v6429_v17, %v5320_v23  ;;  %v5416_v17 = vld [vmem:[%s9809_s1 + $0x958] sm:$0xf0]  ;;  %v6469_v23 = vld [vmem:[%s9809_s1 + $0x9d4] sm:$0xf] }
 0x17e   : > { %3884 = vmatpush.bf16.msrb.mxu0 %v5147_v32  ;;  %v6473_v32 = vld [vmem:[%s9809_s1 + $0x9f4] sm:$0xf] }
 0x17f   : > { %3897 = vmatpush.bf16.msrb.mxu1 %v5211_v28  ;;  %v3670_v28 = vpop.f32.mrf.mxu3  ;;  %v5499_v48 = vor.u32 %v6473_v32, %v5496_v37 }
 0x180   : > { %3910 = vmatpush.bf16.msrb.mxu2 %v5275_v34  ;;  %v5123_v34 = vor.u32 %v6379_v27, %v5120_v22  ;;  %v5480_v27 = vld [vmem:[%s9809_s1 + $0x9d8] sm:$0xf0]  ;;  %v6485_v22 = vld [vmem:[%s9809_s1 + $0xa54] sm:$0xf] }
 0x181   : > { %3923 = vmatpush.bf16.msrb.mxu3 %v5339_v5  ;;  %v5187_v5 = vor.u32 %v6395_v42, %v5184_v10  ;;  %v5419_v42 = vor.u32 %v6453_v6, %v5416_v17  ;;  %v5483_v10 = vor.u32 %v6469_v23, %v5480_v27  ;;  %v6495_v17 = vld [vmem:[%s9809_s1 + $0xaa4] sm:$0xf]  ;;  %v5584_v23 = vld [vmem:[%s9809_s1 + $0xaa8] sm:$0xf0] }
 0x182   : > { %3885 = vmatpush.bf16.msrb.mxu0 %v5139_v56  ;;  %v6471_v56 = vld [vmem:[%s9809_s1 + $0x9e4] sm:$0xf] }
 0x183   : > { %3898 = vmatpush.bf16.msrb.mxu1 %v5203_v63  ;;  %v5488_v63 = vld [vmem:[%s9809_s1 + $0x9e8] sm:$0xf0] }
 0x184   : > { %3911 = vmatpush.bf16.msrb.mxu2 %v5267_v14  ;;  %v6487_v14 = vld [vmem:[%s9809_s1 + $0xa64] sm:$0xf]  ;;  %v5491_v13 = vor.u32 %v6471_v56, %v5488_v63 }
 0x185   : > { %3924 = vmatpush.bf16.msrb.mxu3 %v5331_v2  ;;  %v5427_v2 = vor.u32 %v6455_v49, %v5424_v8  ;;  %v5555_v15 = vor.u32 %v6487_v14, %v5552_v19  ;;  %v6648_v49 = vld [vmem:[%s9810_s2] sm:$0x3]  ;;  %v6447_v14 = vld [vmem:[%s9809_s1 + $0x924] sm:$0xf]  ;;  %v5392_v19 = vld [vmem:[%s9809_s1 + $0x928] sm:$0xf0] }
 0x186   : > { %3886 = vmatpush.bf16.msrb.mxu0 %v5131_v18  ;;  %v5619_v18 = vor.u32 %v6503_v0, %v5616_v25  ;;  %v905_v8 = vperm.slane %v6648_v49, 1  ;;  %v6463_v0 = vld [vmem:[%s9809_s1 + $0x9a4] sm:$0xf] }
 0x187   : > { %3899 = vmatpush.bf16.msrb.mxu1 %v5195_v26  ;;  %v5544_v26 = vld [vmem:[%s9809_s1 + $0xa58] sm:$0xf0] }
 0x188   : > { %3912 = vmatpush.bf16.msrb.mxu2 %v5259_v50  ;;  %v5608_v50 = vld [vmem:[%s9809_s1 + $0xad8] sm:$0xf0]  ;;  %v5547_v35 = vor.u32 %v6485_v22, %v5544_v26  ;;  %v5395_v26 = vor.u32 %v6447_v14, %v5392_v19 }
 0x189   : > { %3925 = vmatpush.bf16.msrb.mxu3 %v5323_v58  ;;  %v6467_v58 = vld [vmem:[%s9809_s1 + $0x9c4] sm:$0xf] }
 0x18a   : > { %3887 = vmatpush.bf16.msrb.mxu0 %v5123_v34  ;;  %v3681_v62 = vpop.f32.mrf.mxu0  ;;  %v5475_v37 = vor.u32 %v6467_v58, %v5472_v9  ;;  %v5587_v58 = vor.u32 %v6495_v17, %v5584_v23  ;;  %v6477_v9 = vld [vmem:[%s9809_s1 + $0xa14] sm:$0xf]  ;;  %v6519_v17 = vld [vmem:[%s9809_s1 + $0xb64] sm:$0xf]  ;;  %v5680_v23 = vld [vmem:[%s9809_s1 + $0xb68] sm:$0xf0] }
 0x18b   : > { %3900 = vmatpush.bf16.msrb.mxu1 %v5187_v5  ;;  %v3682_v32 = vadd.f32 %v3681_v62, %v9142_v61  ;;  %v3694_v34 = vpop.f32.mrf.mxu1  ;;  %v5400_v5 = vld [vmem:[%s9809_s1 + $0x938] sm:$0xf0]  ;;  %v5603_v61 = vor.u32 %v6499_v30, %v5600_v31  ;;  %v6443_v31 = vld [vmem:[%s9809_s1 + $0x904] sm:$0xf] }
 0x18c   : > { %3913 = vmatpush.bf16.msrb.mxu2 %v5251_v20  ;;  %v6465_v20 = vld [vmem:[%s9809_s1 + $0x9b4] sm:$0xf]  ;;  %v5403_v56 = vor.u32 %v6449_v39, %v5400_v5  ;;  %v5576_v62 = vld [vmem:[%s9809_s1 + $0xa98] sm:$0xf0]  ;;  %v6475_v39 = vld [vmem:[%s9809_s1 + $0xa04] sm:$0xf] }
 0x18d   : > { %3926 = vmatpush.bf16.msrb.mxu3 %v5315_v4  ;;  %3888 = vmatmul.bf16.vlgmr.msrb.gmra.mxu0 %v7581_v24  ;;  %v6501_v24 = vld [vmem:[%s9809_s1 + $0xad4] sm:$0xf]  ;;  %v9302_v43 = vadd.f32 %v3694_v34, %v3682_v32  ;;  %v5376_v32 = vld [vmem:[%s9809_s1 + $0x908] sm:$0xf0]  ;;  %v5515_v34 = vor.u32 %v6477_v9, %v5512_v21  ;;  %v5579_v5 = vor.u32 %v6493_v11, %v5576_v62  ;;  %v5736_v11 = vld [vmem:[%s9809_s1 + $0xbd8] sm:$0xf0] }
 0x18e   : > { %3932 = vmatpush.bf16.msra.mxu0 %v5435_v33  ;;  %3901 = vmatmul.bf16.vlgmr.msrb.gmra.mxu1 %v7591_v29  ;;  %v6451_v29 = vld [vmem:[%s9809_s1 + $0x944] sm:$0xf]  ;;  %v6481_v4 = vld [vmem:[%s9809_s1 + $0xa34] sm:$0xf]  ;;  %v5528_v33 = vld [vmem:[%s9809_s1 + $0xa38] sm:$0xf0] }
 0x18f   : > { %3945 = vmatpush.bf16.msra.mxu1 %v5499_v48  ;;  %3914 = vmatmul.bf16.vlgmr.msrb.gmra.mxu2 %v7780_v46  ;;  %v5408_v46 = vld [vmem:[%s9809_s1 + $0x948] sm:$0xf0]  ;;  %v6497_v48 = vld [vmem:[%s9809_s1 + $0xab4] sm:$0xf]  ;;  %v5531_v63 = vor.u32 %v6481_v4, %v5528_v33 }
 0x190   : > { %3958 = vmatpush.bf16.msra.mxu2 %v5563_v47  ;;  %3927 = vmatmul.bf16.vlgmr.msrb.gmra.mxu3 %v7793_v53  ;;  %v5611_v53 = vor.u32 %v6501_v24, %v5608_v50  ;;  %v5411_v28 = vor.u32 %v6451_v29, %v5408_v46  ;;  %v5592_v47 = vld [vmem:[%s9809_s1 + $0xab8] sm:$0xf0]  ;;  %v6461_v29 = vld [vmem:[%s9809_s1 + $0x994] sm:$0xf] }
 0x191   : > { %3971 = vmatpush.bf16.msra.mxu3 %v5627_v59  ;;  %v5467_v59 = vor.u32 %v6465_v20, %v5464_v55  ;;  %v5595_v25 = vor.u32 %v6497_v48, %v5592_v47  ;;  %v5504_v20 = vld [vmem:[%s9809_s1 + $0xa08] sm:$0xf0]  ;;  %v6521_v33 = vld [vmem:[%s9809_s1 + $0xb74] sm:$0xf]  ;;  %v5688_v48 = vld [vmem:[%s9809_s1 + $0xb78] sm:$0xf0] }
 0x192   : > { %3933 = vmatpush.bf16.msra.mxu0 %v5427_v2  ;;  %v5456_v2 = vld [vmem:[%s9809_s1 + $0x9a8] sm:$0xf0]  ;;  %v3707_v6 = vpop.f32.mrf.mxu2  ;;  %v3683_v22 = vpop.f32.mrf.mxu0  ;;  %v6537_v47 = vld [vmem:[%s9809_s1 + $0xbf4] sm:$0xf]  ;;  %v5507_v19 = vor.u32 %v6475_v39, %v5504_v20  ;;  %v6547_v39 = vld [vmem:[%s9809_s1 + $0xc44] sm:$0xf] }
 0x193   : > { %3946 = vmatpush.bf16.msra.mxu1 %v5491_v13  ;;  %v6479_v13 = vld [vmem:[%s9809_s1 + $0xa24] sm:$0xf]  ;;  %v3720_v27 = vpop.f32.mrf.mxu3  ;;  %v3696_v24 = vpop.f32.mrf.mxu1  ;;  %v5459_v50 = vor.u32 %v6463_v0, %v5456_v2  ;;  %v5568_v55 = vld [vmem:[%s9809_s1 + $0xa88] sm:$0xf0]  ;;  %v6569_v0 = vld [vmem:[%s9809_s1 + $0xcf4] sm:$0xf] }
 0x194   : > { %3959 = vmatpush.bf16.msra.mxu2 %v5555_v15  ;;  %v5520_v15 = vld [vmem:[%s9809_s1 + $0xa28] sm:$0xf0]  ;;  %v6533_v9 = vld [vmem:[%s9809_s1 + $0xbd4] sm:$0xf]  ;;  %v6563_v20 = vld [vmem:[%s9809_s1 + $0xcc4] sm:$0xf] }
 0x195   : > { %3972 = vmatpush.bf16.msra.mxu3 %v5619_v18  ;;  %v3708_v18 = vadd.f32 %v3707_v6, %v905_v8  ;;  %v5379_v8 = vor.u32 %v6443_v31, %v5376_v32  ;;  %v5744_v22 = vld [vmem:[%s9809_s1 + $0xbe8] sm:$0xf0]  ;;  %v6549_v62 = vld [vmem:[%s9809_s1 + $0xc54] sm:$0xf]  ;;  %v5864_v31 = vld [vmem:[%s9809_s1 + $0xcd8] sm:$0xf0] }
 0x196   : > { %3934 = vmatpush.bf16.msra.mxu0 %v5419_v42  ;;  %v5523_v42 = vor.u32 %v6479_v13, %v5520_v15  ;;  %v5691_v13 = vor.u32 %v6521_v33, %v5688_v48  ;;  %v5808_v24 = vld [vmem:[%s9809_s1 + $0xc68] sm:$0xf0] }
 0x197   : > { %3947 = vmatpush.bf16.msra.mxu1 %v5483_v10  ;;  %v6445_v10 = vld [vmem:[%s9809_s1 + $0x914] sm:$0xf]  ;;  %v9355_v46 = vadd.f32 %v3720_v27, %v3708_v18  ;;  %v6535_v18 = vld [vmem:[%s9809_s1 + $0xbe4] sm:$0xf] }
 0x198   : > { %3960 = vmatpush.bf16.msra.mxu2 %v5547_v35  ;;  %v5384_v35 = vld [vmem:[%s9809_s1 + $0x918] sm:$0xf0] }
 0x199   : > { %3973 = vmatpush.bf16.msra.mxu3 %v5611_v53  ;;  %v5448_v53 = vld [vmem:[%s9809_s1 + $0x998] sm:$0xf0]  ;;  %v5387_v30 = vor.u32 %v6445_v10, %v5384_v35  ;;  %v5683_v10 = vor.u32 %v6519_v17, %v5680_v23  ;;  %v5747_v35 = vor.u32 %v6535_v18, %v5744_v22  ;;  %v6511_v17 = vld [vmem:[%s9809_s1 + $0xb24] sm:$0xf]  ;;  %v5648_v23 = vld [vmem:[%s9809_s1 + $0xb28] sm:$0xf0] }
 0x19a   : > { %3935 = vmatpush.bf16.msra.mxu0 %v5411_v28  ;;  %v5451_v28 = vor.u32 %v6461_v29, %v5448_v53  ;;  %v3709_v4 = vpop.f32.mrf.mxu2  ;;  %v5672_v53 = vld [vmem:[%s9809_s1 + $0xb58] sm:$0xf0]  ;;  %v6527_v18 = vld [vmem:[%s9809_s1 + $0xba4] sm:$0xf] }
 0x19b   : > { %3948 = vmatpush.bf16.msra.mxu1 %v5475_v37  ;;  %v6459_v37 = vld [vmem:[%s9809_s1 + $0x984] sm:$0xf]  ;;  %v3722_v49 = vpop.f32.mrf.mxu3 }
 0x19c   : > { %3961 = vmatpush.bf16.msra.mxu2 %v5539_v54  ;;  %v5440_v54 = vld [vmem:[%s9809_s1 + $0x988] sm:$0xf0]  ;;  %v5656_v49 = vld [vmem:[%s9809_s1 + $0xb38] sm:$0xf0] }
 0x19d   : > { %3974 = vmatpush.bf16.msra.mxu3 %v5603_v61  ;;  %v6491_v61 = vld [vmem:[%s9809_s1 + $0xa84] sm:$0xf]  ;;  %v5443_v14 = vor.u32 %v6459_v37, %v5440_v54  ;;  %v5728_v54 = vld [vmem:[%s9809_s1 + $0xbc8] sm:$0xf0] }
 0x19e   : > { %3936 = vmatpush.bf16.msra.mxu0 %v5403_v56  ;;  %v5752_v56 = vld [vmem:[%s9809_s1 + $0xbf8] sm:$0xf0]  ;;  %v5571_v2 = vor.u32 %v6491_v61, %v5568_v55  ;;  %v6531_v37 = vld [vmem:[%s9809_s1 + $0xbc4] sm:$0xf]  ;;  %v5856_v61 = vld [vmem:[%s9809_s1 + $0xcc8] sm:$0xf0] }
 0x19f   : > { %3949 = vmatpush.bf16.msra.mxu1 %v5467_v59  ;;  %v6553_v59 = vld [vmem:[%s9809_s1 + $0xc74] sm:$0xf]  ;;  %v5755_v15 = vor.u32 %v6537_v47, %v5752_v56  ;;  %v5731_v33 = vor.u32 %v6531_v37, %v5728_v54  ;;  %v5832_v37 = vld [vmem:[%s9809_s1 + $0xc98] sm:$0xf0]  ;;  %v6507_v54 = vld [vmem:[%s9809_s1 + $0xb04] sm:$0xf] }
 0x1a0   : > { %3962 = vmatpush.bf16.msra.mxu2 %v5531_v63  ;;  %v5816_v63 = vld [vmem:[%s9809_s1 + $0xc78] sm:$0xf0]  ;;  %v6513_v47 = vld [vmem:[%s9809_s1 + $0xb34] sm:$0xf] }
 0x1a1   : > { %3975 = vmatpush.bf16.msra.mxu3 %v5595_v25  ;;  %v5880_v25 = vld [vmem:[%s9809_s1 + $0xcf8] sm:$0xf0]  ;;  %v5819_v6 = vor.u32 %v6553_v59, %v5816_v63  ;;  %v5859_v63 = vor.u32 %v6563_v20, %v5856_v61  ;;  %v6523_v61 = vld [vmem:[%s9809_s1 + $0xb84] sm:$0xf] }
 0x1a2   : > { %3937 = vmatpush.bf16.msra.mxu0 %v5395_v26  ;;  %v5883_v27 = vor.u32 %v6569_v0, %v5880_v25  ;;  %v6551_v26 = vld [vmem:[%s9809_s1 + $0xc64] sm:$0xf]  ;;  %v5784_v0 = vld [vmem:[%s9809_s1 + $0xc38] sm:$0xf0]  ;;  %v6561_v25 = vld [vmem:[%s9809_s1 + $0xcb4] sm:$0xf] }
 0x1a3   : > { %3950 = vmatpush.bf16.msra.mxu1 %v5459_v50  ;;  %v6567_v50 = vld [vmem:[%s9809_s1 + $0xce4] sm:$0xf]  ;;  %v5811_v29 = vor.u32 %v6551_v26, %v5808_v24  ;;  %v5712_v26 = vld [vmem:[%s9809_s1 + $0xba8] sm:$0xf0] }
 0x1a4   : > { %3963 = vmatpush.bf16.msra.mxu2 %v5523_v42  ;;  %v5872_v42 = vld [vmem:[%s9809_s1 + $0xce8] sm:$0xf0]  ;;  %v6543_v24 = vld [vmem:[%s9809_s1 + $0xc24] sm:$0xf] }
 0x1a5   : > { %3976 = vmatpush.bf16.msra.mxu3 %v5587_v58  ;;  %v6517_v58 = vld [vmem:[%s9809_s1 + $0xb54] sm:$0xf]  ;;  %v5875_v21 = vor.u32 %v6567_v50, %v5872_v42  ;;  %v5776_v50 = vld [vmem:[%s9809_s1 + $0xc28] sm:$0xf0] }
 0x1a6   : > { %3938 = vmatpush.bf16.msra.mxu0 %v5387_v30  ;;  %v5800_v30 = vld [vmem:[%s9809_s1 + $0xc58] sm:$0xf0]  ;;  %v5675_v32 = vor.u32 %v6517_v58, %v5672_v53  ;;  %v5651_v58 = vor.u32 %v6511_v17, %v5648_v23 }
 0x1a7   : > { %3951 = vmatpush.bf16.msra.mxu1 %v5451_v28  ;;  %v5739_v28 = vor.u32 %v6533_v9, %v5736_v11  ;;  %v5779_v11 = vor.u32 %v6543_v24, %v5776_v50  ;;  %v6599_v24 = vld [vmem:[%s9809_s1 + $0xde4] sm:$0xf] }
 0x1a8   : > { %3964 = vmatpush.bf16.msra.mxu2 %v5515_v34  ;;  %v5803_v34 = vor.u32 %v6549_v62, %v5800_v30  ;;  %v6509_v62 = vld [vmem:[%s9809_s1 + $0xb14] sm:$0xf]  ;;  %v5640_v30 = vld [vmem:[%s9809_s1 + $0xb18] sm:$0xf0] }
 0x1a9   : > { %3977 = vmatpush.bf16.msra.mxu3 %v5579_v5  ;;  %v5792_v5 = vld [vmem:[%s9809_s1 + $0xc48] sm:$0xf0] }
 0x1aa   : > { %3939 = vmatpush.bf16.msra.mxu0 %v5379_v8  ;;  %v3733_v4 = vpop.f32.mrf.mxu0  ;;  %v5795_v48 = vor.u32 %v6547_v39, %v5792_v5  ;;  %v6529_v8 = vld [vmem:[%s9809_s1 + $0xbb4] sm:$0xf]  ;;  %v5632_v39 = vld [vmem:[%s9809_s1 + $0xb08] sm:$0xf0] }
 0x1ab   : > { %3952 = vmatpush.bf16.msra.mxu1 %v5443_v14  ;;  %v3734_v56 = vadd.f32 %v3733_v4, %v9355_v46  ;;  %v3746_v59 = vpop.f32.mrf.mxu1  ;;  %v5720_v14 = vld [vmem:[%s9809_s1 + $0xbb8] sm:$0xf0]  ;;  %v6539_v4 = vld [vmem:[%s9809_s1 + $0xc04] sm:$0xf] }
 0x1ac   : > { %3965 = vmatpush.bf16.msra.mxu2 %v5507_v19  ;;  %v6545_v19 = vld [vmem:[%s9809_s1 + $0xc34] sm:$0xf]  ;;  %v5848_v46 = vld [vmem:[%s9809_s1 + $0xcb8] sm:$0xf0] }
 0x1ad   : > { %3978 = vmatpush.bf16.msra.mxu3 %v5571_v2  ;;  %3940 = vmatmul.bf16.vlgmr.msra.gmra.mxu0 %v7791_v52  ;;  %v6565_v52 = vld [vmem:[%s9809_s1 + $0xcd4] sm:$0xf]  ;;  %v3747_v2 = vadd.f32 %v3746_v59, %v3734_v56  ;;  %v5851_v22 = vor.u32 %v6561_v25, %v5848_v46  ;;  %v6072_v46 = vld [vmem:[%s9809_s1 + $0xe78] sm:$0xf0] }
 0x1ae   : > { %3984 = vmatpush.bf16.msrb.mxu0 %v5691_v13  ;;  %3953 = vmatmul.bf16.vlgmr.msra.gmra.mxu1 %v7801_v57  ;;  %v6515_v57 = vld [vmem:[%s9809_s1 + $0xb44] sm:$0xf]  ;;  %v5659_v13 = vor.u32 %v6513_v47, %v5656_v49  ;;  %v5760_v47 = vld [vmem:[%s9809_s1 + $0xc08] sm:$0xf0]  ;;  %v6585_v59 = vld [vmem:[%s9809_s1 + $0xd74] sm:$0xf] }
 0x1af   : > { %3997 = vmatpush.bf16.msrb.mxu1 %v5755_v15  ;;  %3966 = vmatmul.bf16.vlgmr.msra.gmra.mxu2 %v7995_v38  ;;  %v5664_v38 = vld [vmem:[%s9809_s1 + $0xb48] sm:$0xf0]  ;;  %v5723_v15 = vor.u32 %v6529_v8, %v5720_v14  ;;  %v6555_v49 = vld [vmem:[%s9809_s1 + $0xc84] sm:$0xf]  ;;  %v6601_v14 = vld [vmem:[%s9809_s1 + $0xdf4] sm:$0xf] }
 0x1b0   : > { %4010 = vmatpush.bf16.msrb.mxu2 %v5819_v6  ;;  %3979 = vmatmul.bf16.vlgmr.msra.gmra.mxu3 %v8008_v45  ;;  %v5867_v45 = vor.u32 %v6565_v52, %v5864_v31  ;;  %v5667_v55 = vor.u32 %v6515_v57, %v5664_v38  ;;  %v5787_v6 = vor.u32 %v6545_v19, %v5784_v0  ;;  %v6525_v52 = vld [vmem:[%s9809_s1 + $0xb94] sm:$0xf]  ;;  %v5768_v57 = vld [vmem:[%s9809_s1 + $0xc18] sm:$0xf0]  ;;  %v5824_v8 = vld [vmem:[%s9809_s1 + $0xc88] sm:$0xf0] }
 0x1b1   : > { %4023 = vmatpush.bf16.msrb.mxu3 %v5883_v27  ;;  %v6557_v38 = vld [vmem:[%s9809_s1 + $0xc94] sm:$0xf]  ;;  %v5635_v19 = vor.u32 %v6507_v54, %v5632_v39  ;;  %v6008_v0 = vld [vmem:[%s9809_s1 + $0xdf8] sm:$0xf0]  ;;  %v5827_v17 = vor.u32 %v6555_v49, %v5824_v8  ;;  %v6611_v54 = vld [vmem:[%s9809_s1 + $0xe44] sm:$0xf] }
 0x1b2   : > { %3985 = vmatpush.bf16.msrb.mxu0 %v5683_v10  ;;  %v3759_v27 = vpop.f32.mrf.mxu2  ;;  %v3735_v9 = vpop.f32.mrf.mxu0  ;;  %v6617_v25 = vld [vmem:[%s9809_s1 + $0xe74] sm:$0xf]  ;;  %v6048_v39 = vld [vmem:[%s9809_s1 + $0xe48] sm:$0xf0]  ;;  %v5912_v8 = vld [vmem:[%s9809_s1 + $0xd38] sm:$0xf0] }
 0x1b3   : > { %3998 = vmatpush.bf16.msrb.mxu1 %v5747_v35  ;;  %v3760_v42 = vadd.f32 %v3759_v27, %v3747_v2  ;;  %v3772_v10 = vpop.f32.mrf.mxu3  ;;  %v6559_v35 = vld [vmem:[%s9809_s1 + $0xca4] sm:$0xf]  ;;  %v3748_v31 = vpop.f32.mrf.mxu1  ;;  %v6075_v27 = vor.u32 %v6617_v25, %v6072_v46  ;;  %v6577_v49 = vld [vmem:[%s9809_s1 + $0xd34] sm:$0xf]  ;;  %v6104_v25 = vld [vmem:[%s9809_s1 + $0xeb8] sm:$0xf0] }
 0x1b4   : > { %4011 = vmatpush.bf16.msrb.mxu2 %v5811_v29  ;;  %v5840_v29 = vld [vmem:[%s9809_s1 + $0xca8] sm:$0xf0]  ;;  %v5915_v46 = vor.u32 %v6577_v49, %v5912_v8 }
 0x1b5   : > { %4024 = vmatpush.bf16.msrb.mxu3 %v5875_v21  ;;  %v9545_v53 = vadd.f32 %v3772_v10, %v3760_v42  ;;  %v5715_v21 = vor.u32 %v6527_v18, %v5712_v26  ;;  %v6011_v18 = vor.u32 %v6601_v14, %v6008_v0  ;;  %v5936_v26 = vld [vmem:[%s9809_s1 + $0xd68] sm:$0xf0]  ;;  %v6615_v10 = vld [vmem:[%s9809_s1 + $0xe64] sm:$0xf]  ;;  %v6609_v14 = vld [vmem:[%s9809_s1 + $0xe34] sm:$0xf] }
 0x1b6   : > { %3986 = vmatpush.bf16.msrb.mxu0 %v5675_v32  ;;  %v5843_v32 = vor.u32 %v6559_v35, %v5840_v29  ;;  %v6000_v42 = vld [vmem:[%s9809_s1 + $0xde8] sm:$0xf0]  ;;  %v6631_v29 = vld [vmem:[%s9809_s1 + $0xee4] sm:$0xf]  ;;  %v6625_v0 = vld [vmem:[%s9809_s1 + $0xeb4] sm:$0xf] }
 0x1b7   : > { %3999 = vmatpush.bf16.msrb.mxu1 %v5739_v28  ;;  %v5704_v28 = vld [vmem:[%s9809_s1 + $0xb98] sm:$0xf0]  ;;  %v6064_v35 = vld [vmem:[%s9809_s1 + $0xe68] sm:$0xf0] }
 0x1b8   : > { %4012 = vmatpush.bf16.msrb.mxu2 %v5803_v34  ;;  %v6541_v34 = vld [vmem:[%s9809_s1 + $0xc14] sm:$0xf]  ;;  %v5707_v5 = vor.u32 %v6525_v52, %v5704_v28 }
 0x1b9   : > { %4025 = vmatpush.bf16.msrb.mxu3 %v5867_v45  ;;  %v5643_v45 = vor.u32 %v6509_v62, %v5640_v30  ;;  %v5771_v20 = vor.u32 %v6541_v34, %v5768_v57  ;;  %v6581_v62 = vld [vmem:[%s9809_s1 + $0xd54] sm:$0xf]  ;;  %v5928_v30 = vld [vmem:[%s9809_s1 + $0xd58] sm:$0xf0] }
 0x1ba   : > { %3987 = vmatpush.bf16.msrb.mxu0 %v5667_v55  ;;  %v5696_v55 = vld [vmem:[%s9809_s1 + $0xb88] sm:$0xf0]  ;;  %v6597_v52 = vld [vmem:[%s9809_s1 + $0xdd4] sm:$0xf]  ;;  %v6056_v34 = vld [vmem:[%s9809_s1 + $0xe58] sm:$0xf0] }
 0x1bb   : > { %4000 = vmatpush.bf16.msrb.mxu1 %v5731_v33  ;;  %v3761_v33 = vpop.f32.mrf.mxu2  ;;  %v3774_v56 = vpop.f32.mrf.mxu3  ;;  %v5699_v2 = vor.u32 %v6523_v61, %v5696_v55  ;;  %v6613_v28 = vld [vmem:[%s9809_s1 + $0xe54] sm:$0xf]  ;;  %v6120_v57 = vld [vmem:[%s9809_s1 + $0xed8] sm:$0xf0]  ;;  %v6112_v61 = vld [vmem:[%s9809_s1 + $0xec8] sm:$0xf0] }
 0x1bc   : > { %4013 = vmatpush.bf16.msrb.mxu2 %v5795_v48  ;;  %v5835_v48 = vor.u32 %v6557_v38, %v5832_v37  ;;  %v5931_v38 = vor.u32 %v6581_v62, %v5928_v30  ;;  %v6059_v36 = vor.u32 %v6613_v28, %v6056_v34  ;;  %v6593_v56 = vld [vmem:[%s9809_s1 + $0xdb4] sm:$0xf]  ;;  %v5896_v30 = vld [vmem:[%s9809_s1 + $0xd18] sm:$0xf0] }
 0x1bd   : > { %4026 = vmatpush.bf16.msrb.mxu3 %v5859_v63  ;;  %v5944_v63 = vld [vmem:[%s9809_s1 + $0xd78] sm:$0xf0]  ;;  %v6573_v62 = vld [vmem:[%s9809_s1 + $0xd14] sm:$0xf] }
 0x1be   : > { %3988 = vmatpush.bf16.msrb.mxu0 %v5659_v13  ;;  %v5763_v13 = vor.u32 %v6539_v4, %v5760_v47  ;;  %v5947_v23 = vor.u32 %v6585_v59, %v5944_v63  ;;  %v6051_v47 = vor.u32 %v6611_v54, %v6048_v39  ;;  %v5976_v63 = vld [vmem:[%s9809_s1 + $0xdb8] sm:$0xf0]  ;;  %v6605_v28 = vld [vmem:[%s9809_s1 + $0xe14] sm:$0xf]  ;;  %v6603_v54 = vld [vmem:[%s9809_s1 + $0xe04] sm:$0xf] }
 0x1bf   : > { %4001 = vmatpush.bf16.msrb.mxu1 %v5723_v15  ;;  %v6633_v15 = vld [vmem:[%s9809_s1 + $0xef4] sm:$0xf]  ;;  %v6024_v34 = vld [vmem:[%s9809_s1 + $0xe18] sm:$0xf0]  ;;  %v6016_v39 = vld [vmem:[%s9809_s1 + $0xe08] sm:$0xf0] }
 0x1c0   : > { %4014 = vmatpush.bf16.msrb.mxu2 %v5787_v6  ;;  %v6136_v6 = vld [vmem:[%s9809_s1 + $0xef8] sm:$0xf0] }
 0x1c1   : > { %4027 = vmatpush.bf16.msrb.mxu3 %v5851_v22  ;;  %v6583_v22 = vld [vmem:[%s9809_s1 + $0xd64] sm:$0xf]  ;;  %v6139_v50 = vor.u32 %v6633_v15, %v6136_v6  ;;  %v5904_v6 = vld [vmem:[%s9809_s1 + $0xd28] sm:$0xf0] }
 0x1c2   : > { %3989 = vmatpush.bf16.msrb.mxu0 %v5651_v58  ;;  %v6128_v58 = vld [vmem:[%s9809_s1 + $0xee8] sm:$0xf0]  ;;  %v5939_v9 = vor.u32 %v6583_v22, %v5936_v26  ;;  %v6575_v15 = vld [vmem:[%s9809_s1 + $0xd24] sm:$0xf] }
 0x1c3   : > { %4002 = vmatpush.bf16.msrb.mxu1 %v5715_v21  ;;  %v6003_v21 = vor.u32 %v6599_v24, %v6000_v42  ;;  %v6131_v31 = vor.u32 %v6631_v29, %v6128_v58  ;;  %v6607_v22 = vld [vmem:[%s9809_s1 + $0xe24] sm:$0xf]  ;;  %v6032_v26 = vld [vmem:[%s9809_s1 + $0xe28] sm:$0xf0]  ;;  %v5907_v29 = vor.u32 %v6575_v15, %v5904_v6 }
 0x1c4   : > { %4015 = vmatpush.bf16.msrb.mxu2 %v5779_v11  ;;  %v6067_v11 = vor.u32 %v6615_v10, %v6064_v35  ;;  %v6623_v42 = vld [vmem:[%s9809_s1 + $0xea4] sm:$0xf]  ;;  %v6096_v10 = vld [vmem:[%s9809_s1 + $0xea8] sm:$0xf0] }
 0x1c5   : > { %4028 = vmatpush.bf16.msrb.mxu3 %v5843_v32  ;;  %v5992_v32 = vld [vmem:[%s9809_s1 + $0xdd8] sm:$0xf0] }
 0x1c6   : > { %3990 = vmatpush.bf16.msrb.mxu0 %v5643_v45  ;;  %v5995_v37 = vor.u32 %v6597_v52, %v5992_v32  ;;  %v6595_v45 = vld [vmem:[%s9809_s1 + $0xdc4] sm:$0xf]  ;;  %v6589_v52 = vld [vmem:[%s9809_s1 + $0xd94] sm:$0xf]  ;;  %v5960_v32 = vld [vmem:[%s9809_s1 + $0xd98] sm:$0xf0] }
 0x1c7   : > { %4003 = vmatpush.bf16.msrb.mxu1 %v5707_v5 }
 0x1c8   : > { %4016 = vmatpush.bf16.msrb.mxu2 %v5771_v20  ;;  %v6627_v20 = vld [vmem:[%s9809_s1 + $0xec4] sm:$0xf] }
 0x1c9   : > { %4029 = vmatpush.bf16.msrb.mxu3 %v5835_v48 }
 0x1ca   : > { %3991 = vmatpush.bf16.msrb.mxu0 %v5635_v19  ;;  %v3785_v5 = vpop.f32.mrf.mxu0  ;;  %v6040_v19 = vld [vmem:[%s9809_s1 + $0xe38] sm:$0xf0] }
 0x1cb   : > { %4004 = vmatpush.bf16.msrb.mxu1 %v5699_v2  ;;  %v3786_v55 = vadd.f32 %v3785_v5, %v9545_v53  ;;  %v3798_v33 = vpop.f32.mrf.mxu1  ;;  %v6115_v53 = vor.u32 %v6627_v20, %v6112_v61  ;;  %v5979_v2 = vor.u32 %v6593_v56, %v5976_v63  ;;  %v6619_v20 = vld [vmem:[%s9809_s1 + $0xe84] sm:$0xf]  ;;  %v6080_v61 = vld [vmem:[%s9809_s1 + $0xe88] sm:$0xf0] }
 0x1cc   : > { %4017 = vmatpush.bf16.msrb.mxu2 %v5763_v13  ;;  %v6043_v13 = vor.u32 %v6609_v14, %v6040_v19 }
 0x1cd   : > { %4030 = vmatpush.bf16.msrb.mxu3 %v5827_v17  ;;  %3992 = vmatmul.bf16.vlgmr.msrb.gmra.mxu0 %v8006_v44  ;;  %v6629_v44 = vld [vmem:[%s9809_s1 + $0xed4] sm:$0xf]  ;;  %v3799_v59 = vadd.f32 %v3798_v33, %v3786_v55  ;;  %v6591_v17 = vld [vmem:[%s9809_s1 + $0xda4] sm:$0xf] }
 0x1ce   : > { %4036 = vmatpush.bf16.msra.mxu0 %v5947_v23  ;;  %4005 = vmatmul.bf16.vlgmr.msrb.gmra.mxu1 %v8016_v51  ;;  %v6579_v51 = vld [vmem:[%s9809_s1 + $0xd44] sm:$0xf]  ;;  %v6123_v41 = vor.u32 %v6629_v44, %v6120_v57  ;;  %v6107_v23 = vor.u32 %v6625_v0, %v6104_v25  ;;  %v6621_v44 = vld [vmem:[%s9809_s1 + $0xe94] sm:$0xf]  ;;  %v6088_v57 = vld [vmem:[%s9809_s1 + $0xe98] sm:$0xf0] }
 0x1cf   : > { %4049 = vmatpush.bf16.msra.mxu1 %v6011_v18  ;;  %4018 = vmatmul.bf16.vlgmr.msrb.gmra.mxu2 %v392_v3  ;;  %v5920_v3 = vld [vmem:[%s9809_s1 + $0xd48] sm:$0xf0] }
 0x1d0   : > { %4062 = vmatpush.bf16.msra.mxu2 %v6075_v27  ;;  %4031 = vmatmul.bf16.vlgmr.msrb.gmra.mxu3 %v393_v12  ;;  %v5984_v12 = vld [vmem:[%s9809_s1 + $0xdc8] sm:$0xf0]  ;;  %v5923_v4 = vor.u32 %v6579_v51, %v5920_v3  ;;  %v6571_v51 = vld [vmem:[%s9809_s1 + $0xd04] sm:$0xf] }
 0x1d1   : > { %4075 = vmatpush.bf16.msra.mxu3 %v6139_v50  ;;  %v5987_v48 = vor.u32 %v6595_v45, %v5984_v12  ;;  %v5968_v27 = vld [vmem:[%s9809_s1 + $0xda8] sm:$0xf0]  ;;  %v6587_v45 = vld [vmem:[%s9809_s1 + $0xd84] sm:$0xf] }
 0x1d2   : > { %4037 = vmatpush.bf16.msra.mxu0 %v5939_v9  ;;  %v3811_v18 = vpop.f32.mrf.mxu2  ;;  %v3787_v35 = vpop.f32.mrf.mxu0  ;;  %v5888_v3 = vld [vmem:[%s9809_s1 + $0xd08] sm:$0xf0] }
 0x1d3   : > { %4050 = vmatpush.bf16.msra.mxu1 %v6003_v21  ;;  %v3812_v24 = vadd.f32 %v3811_v18, %v3799_v59  ;;  %v3824_v50 = vpop.f32.mrf.mxu3  ;;  %v3800_v58 = vpop.f32.mrf.mxu1  ;;  %v5971_v21 = vor.u32 %v6591_v17, %v5968_v27  ;;  %v5952_v12 = vld [vmem:[%s9809_s1 + $0xd88] sm:$0xf0] }
 0x1d4   : > { %4063 = vmatpush.bf16.msra.mxu2 %v6067_v11  ;;  %v6035_v11 = vor.u32 %v6607_v22, %v6032_v26  ;;  %v5955_v33 = vor.u32 %v6587_v45, %v5952_v12 }
 0x1d5   : > { %4076 = vmatpush.bf16.msra.mxu3 %v6131_v31  ;;  %v3825_v9 = vadd.f32 %v3824_v50, %v3812_v24  ;;  %v6099_v31 = vor.u32 %v6623_v42, %v6096_v10 }
 0x1d6   : > { %4038 = vmatpush.bf16.msra.mxu0 %v5931_v38  ;;  %v5899_v38 = vor.u32 %v6573_v62, %v5896_v30 }
 0x1d7   : > { %4051 = vmatpush.bf16.msra.mxu1 %v5995_v37  ;;  %v5963_v37 = vor.u32 %v6589_v52, %v5960_v32 }
 0x1d8   : > { %4064 = vmatpush.bf16.msra.mxu2 %v6059_v36  ;;  %v6027_v36 = vor.u32 %v6605_v28, %v6024_v34 }
 0x1d9   : > { %4077 = vmatpush.bf16.msra.mxu3 %v6123_v41  ;;  %v6091_v41 = vor.u32 %v6621_v44, %v6088_v57 }
 0x1da   : > { %4039 = vmatpush.bf16.msra.mxu0 %v5923_v4  ;;  %v3813_v5 = vpop.f32.mrf.mxu2  ;;  %v5891_v4 = vor.u32 %v6571_v51, %v5888_v3 }
 0x1db   : > { %4052 = vmatpush.bf16.msra.mxu1 %v5987_v48  ;;  %v3826_v55 = vpop.f32.mrf.mxu3  ;;  %v6019_v48 = vor.u32 %v6603_v54, %v6016_v39 }
 0x1dc   : > { %4065 = vmatpush.bf16.msra.mxu2 %v6051_v47  ;;  %v6083_v47 = vor.u32 %v6619_v20, %v6080_v61 }
 0x1dd   : > { %4078 = vmatpush.bf16.msra.mxu3 %v6115_v53 }
 0x1de   : > { %4040 = vmatpush.bf16.msra.mxu0 %v5915_v46 }
 0x1df   : > { %4053 = vmatpush.bf16.msra.mxu1 %v5979_v2 }
 0x1e0   : > { %4066 = vmatpush.bf16.msra.mxu2 %v6043_v13 }
 0x1e1   : > { %4079 = vmatpush.bf16.msra.mxu3 %v6107_v23 }
 0x1e2   : > { %4041 = vmatpush.bf16.msra.mxu0 %v5907_v29 }
 0x1e3   : > { %4054 = vmatpush.bf16.msra.mxu1 %v5971_v21 }
 0x1e4   : > { %4067 = vmatpush.bf16.msra.mxu2 %v6035_v11 }
 0x1e5   : > { %4080 = vmatpush.bf16.msra.mxu3 %v6099_v31 }
 0x1e6   : > { %4042 = vmatpush.bf16.msra.mxu0 %v5899_v38 }
 0x1e7   : > { %4055 = vmatpush.bf16.msra.mxu1 %v5963_v37 }
 0x1e8   : > { %4068 = vmatpush.bf16.msra.mxu2 %v6027_v36 }
 0x1e9   : > { %4081 = vmatpush.bf16.msra.mxu3 %v6091_v41  ;;  %v4088_v41 = vmul.f32 0.5, %v9302_v43 }
 0x1ea   : > { %4043 = vmatpush.bf16.msra.mxu0 %v5891_v4  ;;  %v3837_v49 = vpop.f32.mrf.mxu0 }
 0x1eb   : > { %4056 = vmatpush.bf16.msra.mxu1 %v5955_v33  ;;  %v3838_v8 = vadd.f32 %v3837_v49, %v3825_v9  ;;  %v3850_v56 = vpop.f32.mrf.mxu1  ;;  %6644 = vtanh.f32 %v4088_v41 }
 0x1ec   : > { %4069 = vmatpush.bf16.msra.mxu2 %v6019_v48 }
 0x1ed   : > { %4082 = vmatpush.bf16.msra.mxu3 %v6083_v47  ;;  %4044 = vmatmul.bf16.vlgmr.msra.gmra.mxu0 %v394_v7  ;;  %v3851_v53 = vadd.f32 %v3850_v56, %v3838_v8 }
 0x1ee   : > { %4057 = vmatmul.bf16.vlgmr.msra.gmra.mxu1 %v8229_v16 }
 0x1ef   : > { %4070 = vmatmul.bf16.vlgmr.msra.gmra.mxu2 %v8422_v60 }
 0x1f0   : > { %4083 = vmatmul.bf16.vlgmr.msra.gmra.mxu3 %v8433_v1 }
 0x1f1   : > { %v6645_v33 = vpop.eup %6644 }
 0x1f2   : > { %v3863_v59 = vpop.f32.mrf.mxu2  ;;  %v3839_v19 = vpop.f32.mrf.mxu0  ;;  %v4092_v49 = vadd.f32 1.0, %v6645_v33 }
 0x1f3   : > { %v3864_v63 = vadd.f32 %v3863_v59, %v3851_v53  ;;  %v3876_v14 = vpop.f32.mrf.mxu3  ;;  %v3852_v0 = vpop.f32.mrf.mxu1  ;;  %v4106_v19 = vld [vmem:[%s170_s22] sm:$0x77] }
 0x1f4   : > { %v4094_v56 = vmul.f32 0.5, %v4092_v49 }
 0x1f5   : > { %v3877_v25 = vadd.f32 %v3876_v14, %v3864_v63 }
 0x1f6   : > { %v4096_v63 = vmul.f32 %v4094_v56, %v9302_v43 }
 0x1fa   : > { %v3865_v46 = vpop.f32.mrf.mxu2 }
 0x1fb   : > { %v3878_v2 = vpop.f32.mrf.mxu3 }
 0x20a   : > { %v3889_v40 = vpop.f32.mrf.mxu0 }
 0x20b   : > { %v3890_v7 = vadd.f32 %v3889_v40, %v3877_v25  ;;  %v3902_v13 = vpop.f32.mrf.mxu1 }
 0x20d   : > { %v3903_v16 = vadd.f32 %v3902_v13, %v3890_v7 }
 0x212   : > { %v3915_v15 = vpop.f32.mrf.mxu2  ;;  %v3891_v1 = vpop.f32.mrf.mxu0 }
 0x213   : > { %v3916_v60 = vadd.f32 %v3915_v15, %v3903_v16  ;;  %v3928_v6 = vpop.f32.mrf.mxu3  ;;  %v3904_v17 = vpop.f32.mrf.mxu1 }
 0x215   : > { %v3929_v23 = vadd.f32 %v3928_v6, %v3916_v60 }
 0x21a   : > { %v3917_v18 = vpop.f32.mrf.mxu2 }
 0x21b   : > { %v3930_v27 = vpop.f32.mrf.mxu3 }
 0x22a   : > { %v3941_v22 = vpop.f32.mrf.mxu0 }
 0x22b   : > { %v3954_v26 = vpop.f32.mrf.mxu1  ;;  %v3942_v21 = vadd.f32 %v3941_v22, %v3929_v23 }
 0x22d   : > { %v3955_v31 = vadd.f32 %v3954_v26, %v3942_v21 }
 0x232   : > { %v3967_v24 = vpop.f32.mrf.mxu2  ;;  %v3943_v42 = vpop.f32.mrf.mxu0 }
 0x233   : > { %v3980_v50 = vpop.f32.mrf.mxu3  ;;  %v3956_v10 = vpop.f32.mrf.mxu1  ;;  %v3968_v32 = vadd.f32 %v3967_v24, %v3955_v31 }
 0x235   : > { %v3981_v44 = vadd.f32 %v3980_v50, %v3968_v32 }
 0x23a   : > { %v3969_v35 = vpop.f32.mrf.mxu2 }
 0x23b   : > { %v3982_v29 = vpop.f32.mrf.mxu3 }
 0x24a   : > { %v3993_v58 = vpop.f32.mrf.mxu0 }
 0x24b   : > { %v4006_v9 = vpop.f32.mrf.mxu1  ;;  %v3994_v57 = vadd.f32 %v3993_v58, %v3981_v44 }
 0x24d   : > { %v4007_v38 = vadd.f32 %v4006_v9, %v3994_v57 }
 0x252   : > { %v4019_v11 = vpop.f32.mrf.mxu2  ;;  %v3995_v30 = vpop.f32.mrf.mxu0 }
 0x253   : > { %v4032_v62 = vpop.f32.mrf.mxu3  ;;  %v4008_v52 = vpop.f32.mrf.mxu1  ;;  %v4020_v37 = vadd.f32 %v4019_v11, %v4007_v38 }
 0x255   : > { %v4033_v36 = vadd.f32 %v4032_v62, %v4020_v37 }
 0x25a   : > { %v4021_v28 = vpop.f32.mrf.mxu2 }
 0x25b   : > { %v4034_v34 = vpop.f32.mrf.mxu3 }
 0x26a   : > { %v4045_v51 = vpop.f32.mrf.mxu0 }
 0x26b   : > { %v4058_v3 = vpop.f32.mrf.mxu1  ;;  %v4046_v45 = vadd.f32 %v4045_v51, %v4033_v36 }
 0x26d   : > { %v4059_v12 = vadd.f32 %v4058_v3, %v4046_v45 }
 0x272   : > { %v4071_v54 = vpop.f32.mrf.mxu2  ;;  %v4047_v20 = vpop.f32.mrf.mxu0 }
 0x273   : > { %v4072_v39 = vadd.f32 %v4071_v54, %v4059_v12  ;;  %v4084_v5 = vpop.f32.mrf.mxu3  ;;  %v4060_v61 = vpop.f32.mrf.mxu1 }
 0x275   : > { %v4085_v55 = vadd.f32 %v4084_v5, %v4072_v39 }
 0x277   : > { %v4089_v4 = vmul.f32 0.5, %v4085_v55 }
 0x279   : > { %6646 = vtanh.f32 %v4089_v4 }
 0x27a   : > { %v4073_v48 = vpop.f32.mrf.mxu2 }
 0x27b   : > { %v4086_v47 = vpop.f32.mrf.mxu3 }
 0x27f   : > { %v6647_v8 = vpop.eup %6646 }
 0x280   : > { %v4093_v53 = vadd.f32 1.0, %v6647_v8 }
 0x282   : > { %v4095_v59 = vmul.f32 0.5, %v4093_v53 }
 0x284   : > { %v4097_v14 = vmul.f32 %v4095_v59, %v4085_v55 }
 0x286   : > { %v4098_v0 = vpack.c.bf16 %v4097_v14, %v4096_v63 }
 0x288   : > { %v4107_v25 = vsel %vm4105_vm6, %v4098_v0, %v4106_v19 }
 0x289   : > { %4108 = vst [vmem:[%s170_s22] sm:$0x77] %v4107_v25 }
 0x28a PF: > { %s13_s12 = sadd.s32 1, %s6655_s12  }
 0x28b   : > { %p10_p4 = scmp.ge.s32.totalorder %s13_s12, 4  }
 0x28d   :  { %12 = sbr.rel (!%p10_p4) target bundleno = 1 (0x1), region = 62 }

</bundles_post_ra>
